<compile_context>
chip_gen: v6e
topology: v6e:2x2x1
jax: 0.10.0
libtpu: 0.0.40
codegen_flags: <defaults>
</compile_context>

<pallas_src>
import math
import functools

import jax
import jax.numpy as jnp
from jax import lax
from jax.experimental import pallas as pl
from jax.experimental.pallas import tpu as pltpu

DIM_IN = 1024
DIM_OUT = 512
EPS = 1e-12  # F.normalize default eps


def _fuse_kernel(x_ref, w_ref, b_ref, o_ref, *, normalize_input):
    # x_ref: (tm, 1024)  w_ref: (1024, 512)  b_ref: (1, 512)  o_ref: (tm, 512)
    x = x_ref[...]  # keep input dtype for the MXU operands (bf16-friendly)

    # Plain non-transposed contraction: weight was pre-transposed in the wrapper,
    # so no in-kernel relayout competes with the MXU push for the vex slots.
    y = jnp.dot(x, w_ref[...], preferred_element_type=jnp.float32)  # (tm, 512) f32

    if normalize_input:
        # (x / max(||x||, eps)) @ W == (x @ W) * rsqrt(max(||x||^2, eps^2));
        # scale the small (tm, 512) result instead of a (tm, 1024) copy of x.
        xf = x.astype(jnp.float32)
        sumsq = jnp.sum(xf * xf, axis=-1, keepdims=True)      # (tm, 1), f32
        inv = lax.rsqrt(jnp.maximum(sumsq, EPS * EPS))        # EUP rsqrt
        y = y * inv

    y = y + b_ref[...].astype(jnp.float32)                    # (tm,512)+(1,512)
    o_ref[...] = y.astype(o_ref.dtype)


def _round_up8(v):
    return ((v + 7) // 8) * 8


def _pick_tile_m(M, requested):
    # Tile must be a multiple of 8 sublanes. Cap at round_up8(ceil(M/2)) so the
    # "parallel" grid axis always has >= 2 steps -> both v7x TensorCores are used.
    # Ragged final blocks are fine: every op is row-wise, pad rows are masked on store.
    half = _round_up8((M + 1) // 2)
    return max(8, min(requested, half))


def grid_feature_fuse_extractor(x, weight, bias, *, normalize_input=True,
                                tile_m=512, min_pallas_rows=512,
                                apply_output_scramble=True):
    """x: (B, N, 1024) with N = size*size and size == 7 (module requirement).

    weight: (512, 1024) PyTorch Linear weight, bias: (512,).
    Returns grid_feature: (B, 49, 512), bit-layout-matching the PyTorch module.
    """
    B, N, C = x.shape
    size = int(math.sqrt(N))
    assert size * size == N and size == 7, "module's 7*j slicing requires size == 7"
    assert C == DIM_IN
    assert weight.shape == (DIM_OUT, DIM_IN)

    # Flatten (B, 49) -> M rows (contiguous, free reshape).
    M = B * N
    x2 = x.reshape(M, C)
    # One-time weight transpose in the wrapper (constant-foldable under jit);
    # kernel then does a plain (tm,1024)@(1024,512) matmul.
    wT = jnp.transpose(weight)                    # (1024, 512)
    b2d = bias.reshape(1, DIM_OUT)

    if M <= min_pallas_rows:
        # Small-batch fallback: a single-grid-step Pallas call would be dominated by
        # fixed launch/DMA-setup overhead; XLA's fused matmul is faster here.
        xf = x2.astype(jnp.float32)
        if normalize_input:
            sumsq = jnp.sum(xf * xf, axis=-1, keepdims=True)
            xf = xf * lax.rsqrt(jnp.maximum(sumsq, EPS * EPS))
        y = (jnp.dot(xf, wT.astype(jnp.float32))
             + b2d.astype(jnp.float32)).astype(x.dtype)
    else:
        tm = _pick_tile_m(M, tile_m)
        grid_m = pl.cdiv(M, tm)                   # always >= 2 on this path
        kernel = functools.partial(_fuse_kernel, normalize_input=normalize_input)
        y = pl.pallas_call(
            kernel,
            out_shape=jax.ShapeDtypeStruct((M, DIM_OUT), x.dtype),
            grid=(grid_m,),
            in_specs=[
                pl.BlockSpec((tm, DIM_IN), lambda m: (m, 0)),
                pl.BlockSpec((DIM_IN, DIM_OUT), lambda m: (0, 0)),  # weight, constant
                pl.BlockSpec((1, DIM_OUT), lambda m: (0, 0)),       # bias, constant
            ],
            out_specs=pl.BlockSpec((tm, DIM_OUT), lambda m: (m, 0)),  # lane-dense
            compiler_params=pltpu.CompilerParams(
                dimension_semantics=("parallel",),
                # 512-row f32 tiles need ~9-13 MiB double-buffered; raise above the
                # v5e 16 MiB scoped default, still well under physical VMEM everywhere.
                vmem_limit_bytes=32 * 1024 * 1024),
        )(x2, wT, b2d)

    y = y.reshape(B, N, DIM_OUT)
    if not apply_output_scramble:
        # TODO(synk): downstream consumers should take this (B, token, channel) layout
        # directly; the scramble below is an extra HBM<->HBM shuffle that roughly
        # doubles output traffic and only exists to reproduce the module's
        # permute(0,3,1,2)+reshape channel/token interleaving.
        return y
    # Faithful reproduction of the PyTorch module's trailing layout scramble.
    grid_feature = jnp.transpose(y, (0, 2, 1)).reshape(B, N, DIM_OUT)
    return grid_feature


def _reference(x, weight, bias, normalize_input=True):
    B, N, _ = x.shape
    xf = x.astype(jnp.float32)
    if normalize_input:
        norm = jnp.sqrt(jnp.sum(xf * xf, axis=-1, keepdims=True))
        xf = xf / jnp.maximum(norm, EPS)
    y = jnp.dot(xf, weight.T.astype(jnp.float32),
                precision=lax.Precision.HIGHEST) + bias.astype(jnp.float32)
    y = y.astype(x.dtype)
    return jnp.transpose(y, (0, 2, 1)).reshape(B, N, DIM_OUT)


if __name__ == "__main__":
    key = jax.random.PRNGKey(0)
    kx, kw, kb = jax.random.split(key, 3)

    B, size = 16, 7                     # module hardcodes chunks of 7 -> size must be 7
    N = size * size                     # 49 tokens; M = 784 rows -> Pallas path
    x = jax.random.normal(kx, (B, N, DIM_IN), dtype=jnp.float32)

    # Deterministic synthetic Linear(1024, 512) parameters (PyTorch shapes).
    bound = 1.0 / math.sqrt(DIM_IN)
    weight = jax.random.uniform(kw, (DIM_OUT, DIM_IN), jnp.float32, -bound, bound)
    bias = jax.random.uniform(kb, (DIM_OUT,), jnp.float32, -bound, bound)

    out = grid_feature_fuse_extractor(x, weight, bias, normalize_input=True)
    out = jax.block_until_ready(out)

    ref = _reference(x, weight, bias, normalize_input=True)
    assert out.shape == (B, N, DIM_OUT)
    assert jnp.allclose(out, ref, atol=1e-4, rtol=1e-4), \
        float(jnp.max(jnp.abs(out - ref)))

    print("KERNEL_OK")
</pallas_src>

<mosaic_0001>
module attributes {stable_mosaic.version = 11 : i64} {
  func.func @_fuse_kernel(%arg0: i32, %arg1: memref<392x1024xf32, #tpu.memory_space<vmem>>, %arg2: memref<1024x512xf32, #tpu.memory_space<vmem>>, %arg3: memref<1x512xf32, #tpu.memory_space<vmem>>, %arg4: memref<392x512xf32, #tpu.memory_space<vmem>>) attributes {dimension_semantics = [#tpu.dimension_semantics<parallel>], iteration_bounds = array<i64: 2>, scalar_prefetch = 0 : i64, scratch_operands = 0 : i64, tpu.core_type = #tpu.core_type<tc>, window_params = [{transform_indices = @transform_0, window_bounds = array<i64: 392, 1024>}, {pipeline_mode = #tpu.pipeline_mode<synchronous>, transform_indices = @transform_1, window_bounds = array<i64: 1024, 512>}, {pipeline_mode = #tpu.pipeline_mode<synchronous>, transform_indices = @transform_2, window_bounds = array<i64: 1, 512>}, {transform_indices = @transform_3, window_bounds = array<i64: 392, 512>}]} {
    %c0 = arith.constant 0 : index
    %c0_0 = arith.constant 0 : index
    %0 = vector.load %arg1[%c0, %c0_0] : memref<392x1024xf32, #tpu.memory_space<vmem>>, vector<392x1024xf32>
    %c0_1 = arith.constant 0 : index
    %c0_2 = arith.constant 0 : index
    %1 = vector.load %arg2[%c0_1, %c0_2] : memref<1024x512xf32, #tpu.memory_space<vmem>>, vector<1024x512xf32>
    %cst = arith.constant dense<0.000000e+00> : vector<392x512xf32>
    %2 = tpu.matmul %0, %1, %cst {dimension_numbers = #tpu.dot_dimension_numbers<[1], [0], [0], [1], [0, 0, 1, 1], [], []>} : vector<392x1024xf32>, vector<1024x512xf32>, vector<392x512xf32> -> vector<392x512xf32>
    %3 = arith.mulf %0, %0 : vector<392x1024xf32>
    %cst_3 = arith.constant dense<0.000000e+00> : vector<392xf32>
    %4 = vector.multi_reduction <add>, %3, %cst_3 [1] : vector<392x1024xf32> to vector<392xf32>
    %5 = vector.shape_cast %4 : vector<392xf32> to vector<392x1xf32>
    %cst_4 = arith.constant 1.000000e-24 : f32
    %6 = vector.broadcast %cst_4 : f32 to vector<392x1xf32>
    %7 = arith.maximumf %5, %6 : vector<392x1xf32>
    %8 = math.rsqrt %7 : vector<392x1xf32>
    %9 = vector.broadcast %8 : vector<392x1xf32> to vector<392x512xf32>
    %10 = arith.mulf %2, %9 : vector<392x512xf32>
    %c0_5 = arith.constant 0 : index
    %c0_6 = arith.constant 0 : index
    %11 = vector.load %arg3[%c0_5, %c0_6] : memref<1x512xf32, #tpu.memory_space<vmem>>, vector<1x512xf32>
    %12 = vector.broadcast %11 : vector<1x512xf32> to vector<392x512xf32>
    %13 = arith.addf %10, %12 : vector<392x512xf32>
    %c0_7 = arith.constant 0 : index
    %c0_8 = arith.constant 0 : index
    %14 = vector.load %arg4[%c0_7, %c0_8] : memref<392x512xf32, #tpu.memory_space<vmem>>, vector<392x512xf32>
    tpu.vector_store %arg4[%c0_7, %c0_8], %13 {strides = array<i32>} : memref<392x512xf32, #tpu.memory_space<vmem>>, vector<392x512xf32>,
    return
  }
  func.func @transform_0(%arg0: i32) -> (i32, i32) {
    %c0_i32 = arith.constant 0 : i32
    %c0_i32_0 = arith.constant 0 : i32
    return %arg0, %c0_i32 : i32, i32
  }
  func.func @transform_1(%arg0: i32) -> (i32, i32) {
    %c0_i32 = arith.constant 0 : i32
    %c0_i32_0 = arith.constant 0 : i32
    %c0_i32_1 = arith.constant 0 : i32
    return %c0_i32, %c0_i32_0 : i32, i32
  }
  func.func @transform_2(%arg0: i32) -> (i32, i32) {
    %c0_i32 = arith.constant 0 : i32
    %c0_i32_0 = arith.constant 0 : i32
    %c0_i32_1 = arith.constant 0 : i32
    return %c0_i32, %c0_i32_0 : i32, i32
  }
  func.func @transform_3(%arg0: i32) -> (i32, i32) {
    %c0_i32 = arith.constant 0 : i32
    %c0_i32_0 = arith.constant 0 : i32
    return %arg0, %c0_i32 : i32, i32
  }
}

</mosaic_0001>

<bundles_post_ra>
// kernel: tpu_custom_call.1
= control target key start
LH: loop header
LB: loop body
LE: loop exit
PB: predicated region body
PF: predicated region fallthrough
CT: control target
= control target key end

     0   :  { %8 = vsyncpa [#allocation3], 0  ;;  %s10499_s0 = inlined_call_operand.hbm [shape: f32[784,1024], index: 0, kind: input, shape index: {}]   ;;  %s10500_s1 = inlined_call_operand.hbm [shape: f32[1024,512], index: 1, kind: input, shape index: {}]   ;;  %s10501_s2 = inlined_call_operand.hbm [shape: f32[1,512], index: 2, kind: input, shape index: {}]   ;;  %s10502_s3 = inlined_call_operand.hbm [shape: f32[784,512], index: 3, kind: output, shape index: {}]  }
   0x1   :  { %10 = vsyncpa [#allocation3 + $0x1], 0 }
   0x2   :  { %11 = vsyncpa [#allocation6], 0 }
   0x3   :  { %12 = vsyncpa [#allocation4], 0 }
   0x4   :  { %14 = vsyncpa [#allocation4 + $0x1], 0  ;;  %s6599_s12 = smov 0   ;;  %s6601_s13 = smov 0  }
   0x5   :  { %s6603_s14 = smov 0   ;;  %s6605_s15 = smov 0  }
   0x6 LB: > { %s6620_s16 = sadd.s32 4294967295, %s6567_s15   ;;  %s5643_s17 = sadd.s32 4294967294, %s6567_s15   ;;  %s6567_s15 = sphi %s6605_s15, %s11090_s15   ;;  %s6563_s14 = sphi %s6603_s14, %s11089_s14   ;;  %s6559_s13 = sphi %s6601_s13, %s11088_s13   ;;  %s6555_s12 = sphi %s6599_s12, %s11087_s12  }
   0x7   : > { %p40_p0 = scmp.ne.s32.totalorder %s6559_s13, %s6555_s12  ;;  %p10503_p1 = scmp.eq.s32.totalorder %s6620_s16, 0 }
   0x8   : > { %p112_p3 = scmp.eq.s32.totalorder %s5643_s17, 1  ;;  %p5644_p5 = scmp.ge.s32.totalorder %s6567_s15, 1 }
   0x9   : > { %p6629_p4 = por %p10503_p1, %p40_p0  ;;  %p119_p7 = scmp.lt.s32.totalorder %s6567_s15, 3 }
   0xa   : > { %p6634_p6 = por %p112_p3, %p40_p0  ;;  %s6569_s21 = smov [#allocation5]  }
   0xb   : > { %s10625_s18 = scalar_select %p6629_p4, 1, 0 }
   0xc   : > { %s10626_s19 = scalar_select %p6634_p6, 1, 0 }
   0xd   : > { %p6639_p8 = pnand %p5644_p5, %p119_p7  ;;  %s131_s22 = sshll.u32 %s6569_s21, 4  ;;  %s132_s22 = int_to_ptr.vmem [resolvable:$true] %s131_s22 }
   0xe   : > { %s6570_s24 = smov [#allocation7]   ;;  %s6430_s26 = scalar_lea.vmem %s132_s22, 65536 }
   0xf   : > { %s10627_s20 = scalar_select %p6639_p8, 1, 0 }
  0x10   : > { %p5678_p9 = pneg %p6639_p8  ;;  %s145_s25 = sshll.u32 %s6570_s24, 4  ;;  %s146_s25 = int_to_ptr.vmem [resolvable:$true] %s145_s25 }
  0x11   : > { %p6431_p13 = scmp.ne.s32.totalorder %s132_s22, %s6430_s26  ;;  %p6438_p5 = scmp.lt.s32.totalorder %s132_s22, %s132_s22 }
  0x12   : > { %p6648_p11 = pnand %p5678_p9, %p10503_p1  ;;  %p6439_p7 = scmp.lt.s32.totalorder %s6430_s26, %s6430_s26 }
  0x14   : > { %p6421_p12 = pneg %p6648_p11  ;;  %p6440_p10 = por %p6439_p7, %p6438_p5 }
  0x16   : > { %p6433_p0 = pnand %p6431_p13, %p6421_p12 }
  0x18   : > { %p6434_p3 = pneg %p6433_p0 }
  0x1a   : > { %p6441_p9 = pnand %p6440_p10, %p6434_p3 }
  0x1c   : > { %6444 = shalt.err (!%p6441_p9)
}
  0x1d   : > { %s6571_s27 = smov 512   ;;  %s6572_s28 = smov 32  }
  0x1e   : > { %5681 = dma.hbm_to_vmem [thread:$0]  (!%p6648_p11), %s10500_s1, 65536, %s132_s22, [#allocation6], %s6571_s27, %s6571_s27, %s6572_s28  }
  0x1f   : > { %s6456_s4 = scalar_lea.vmem %s146_s25, 64  ;;  %p6464_p2 = scmp.lt.s32.totalorder %s146_s25, %s146_s25 }
  0x20   : > { %p6457_p1 = scmp.ne.s32.totalorder %s146_s25, %s6456_s4  ;;  %p6465_p6 = scmp.lt.s32.totalorder %s6456_s4, %s6456_s4 }
  0x22   : > { %p6459_p13 = pnand %p6457_p1, %p6421_p12  ;;  %p6466_p5 = por %p6465_p6, %p6464_p2 }
  0x24   : > { %p6460_p0 = pneg %p6459_p13 }
  0x26   : > { %p6467_p10 = pnand %p6466_p5, %p6460_p0 }
  0x28   : > { %6470 = shalt.err (!%p6467_p10)
}
  0x29   : > { %5684 = dma.hbm_to_vmem [thread:$0]  (!%p6648_p11), %s10501_s2, 64, %s146_s25, [#allocation6]  }
  0x2a   : > { %s6671_s7 = sadd.s32 1, %s6567_s15   ;;  %s27_s8 = sadd.s32 1, %s6563_s14 }
  0x2b   : > { %s24_s9 = ssub.s32 %s6567_s15, %s6671_s7  ;;  %p34_p1 = scmp.ne.s32.totalorder %s6563_s14, %s6559_s13 }
  0x2c   : > { %p25_p2 = scmp.eq.s32.totalorder %s24_s9, 0  ;;  %p35_p6 = scmp.eq.s32.totalorder %s6567_s15, 0 }
  0x2d   : > { %p10629_p12 = scmp.eq.s32.totalorder %s6620_s16, 1  ;;  %p5695_p7 = scmp.lt.s32.totalorder %s6567_s15, 2 }
  0x2e   : > { %s6687_s11 = scalar_select %p25_p2, %s6563_s14, %s27_s8  }
  0x2f   : > { %p6681_p3 = por %p10629_p12, %p34_p1  ;;  %p36_p9 = por %p35_p6, %p34_p1 }
  0x30   : > { %s156_s17 = sand.u32 1, %s6563_s14   ;;  %s5661_s22 = smul.u32 50176, %s6567_s15 }
  0x31   : > { %s10630_s10 = scalar_select %p6681_p3, 1, 0 }
  0x32   : > { %s5663_s21 = smul.u32 3136, %s156_s17  ;;  %p6691_p11 = pnand %p5695_p7, %p36_p9 }
  0x33   : > { %s6698_s26 = scalar_lea.hbm %s10499_s0, %s5661_s22  ;;  %s6702_s29 = scalar_lea.sflag [#allocation3], %s156_s17 }
  0x34   : > { %s160_s27 = scalar_lea.vmem [#allocation2], %s5663_s21  ;;  %s6471_s30 = scalar_lea.hbm %s6698_s26, 50176 }
  0x35   : > { %s168_s28 = sshll.u32 %s160_s27, 4  ;;  %p6472_p13 = scmp.ne.s32.totalorder %s6698_s26, %s6471_s30  ;;  %s6700_s28 = int_to_ptr.vmem [resolvable:$true] %s168_s28 }
  0x36   : > { %p6473_p0 = pneg %p6691_p11  ;;  %s6476_s6 = scalar_lea.hbm %s10499_s0, 100352 }
  0x37   : > { %p6477_p1 = scmp.lt.s32.totalorder %s6698_s26, %s10499_s0  ;;  %p6478_p2 = scmp.lt.s32.totalorder %s6476_s6, %s6471_s30 }
  0x38   : > { %p6474_p5 = pnand %p6473_p0, %p6472_p13 }
  0x39   : > { %p6479_p6 = por %p6478_p2, %p6477_p1 }
  0x3a   : > { %p6475_p10 = pneg %p6474_p5 }
  0x3c   : > { %p6480_p12 = pnand %p6479_p6, %p6475_p10 }
  0x3e   : > { %6483 = shalt.err (!%p6480_p12)
}
  0x3f   : > { %s6484_s17 = scalar_lea.vmem %s6700_s28, 50176  ;;  %s6573_s21 = smov [#allocation2]  }
  0x40   : > { %p6485_p7 = scmp.ne.s32.totalorder %s6700_s28, %s6484_s17  ;;  %s6489_s22 = sshll.u32 %s6573_s21, 4  ;;  %s6490_s22 = int_to_ptr.vmem [resolvable:$false] %s6489_s22 }
  0x41   : > { %s6491_s24 = scalar_lea.vmem %s6490_s22, 100352  ;;  %p6492_p5 = scmp.lt.s32.totalorder %s6700_s28, %s6490_s22 }
  0x42   : > { %p6487_p9 = pnand %p6485_p7, %p6473_p0  ;;  %p6493_p3 = scmp.lt.s32.totalorder %s6491_s24, %s6484_s17 }
  0x44   : > { %p6488_p13 = pneg %p6487_p9  ;;  %p6494_p4 = por %p6493_p3, %p6492_p5 }
  0x46   : > { %p6495_p8 = pnand %p6494_p4, %p6488_p13 }
  0x48   : > { %6498 = shalt.err (!%p6495_p8)
}
  0x49   : > { %s6574_s25 = smov 1024   ;;  %s6575_s27 = smov 64  }
  0x4a   : > { %5688 = dma.hbm_to_vmem [thread:$0]  (!%p6691_p11), %s6698_s26, 50176, %s6700_s28, %s6702_s29, %s6574_s25, %s6574_s25, %s6575_s27  }
  0x4b   : > { %p10632_p0 = scmp.ne.s32.totalorder %s10627_s20, 0 }
  0x4d   : > { %180 = sbr.rel (%p10632_p0) target bundleno = 1173 (0x495), region = 32 }
  0x52   : > { %s6726_s30 = sand.u32 1, %s6559_s13   ;;  %p10633_p4 = scmp.ne.s32.totalorder %s10625_s18, 0 }
  0x53   : > { %s5664_s4 = smul.u32 3136, %s6726_s30  ;;  %s183_s5 = scalar_lea.sflag [#allocation3], %s6726_s30 }
  0x55   : > { %s6730_s6 = scalar_lea.vmem [#allocation2], %s5664_s4 }
  0x56   : > { %6542 = dma.done.wait (%p10633_p4), %s183_s5, 50176  }
  0x57   : > { %6544 = vsyncadd (%p10633_p4), %s183_s5, 4294917120  ;;  %p10634_p8 = scmp.eq.s32.totalorder %s6620_s16, 0 }
  0x59   : > { %6546 = dma.done.wait (%p10634_p8), [#allocation6], 65600   ;;  %p10635_p3 = pmov %p10634_p8 }
  0x5a   : > { %v672_v0 = vld [vmem:[#allocation5 + $0x1e8] sm:$0xff]  ;;  %v671_v2 = vld [vmem:[#allocation5 + $0x1e0] sm:$0xff]  ;;  %s5665_s18 = smul.u32 1568, %s6726_s30  ;;  %p11084_p10 = scmp.ne.s32.totalorder %s10630_s10, 0 }
  0x5b   : > { %6548 = vsyncadd (%p10635_p3), [#allocation6], 4294901696  ;;  %v800_v1 = vld [vmem:[#allocation5 + $0x5e8] sm:$0xff]  ;;  %1123 = vmatprep.subr.mxu0 %v672_v0  ;;  %v799_v3 = vld [vmem:[#allocation5 + $0x5e0] sm:$0xff]  ;;  %s5662_s23 = smul.u32 25088, %s6620_s16  ;;  %s5537_s16 = scalar_lea.sflag [#allocation4], %s6726_s30 }
  0x5c   : > { %1482 = vmatprep.subr.mxu1 %v800_v1  ;;  %v668_v4 = vld [vmem:[#allocation5 + $0x1c8] sm:$0xff]  ;;  %1124 = vmatpush1.msra.mxu0 %v671_v2  ;;  %v667_v6 = vld [vmem:[#allocation5 + $0x1c0] sm:$0xff]  ;;  %s8990_s20 = scalar_lea.vmem [#allocation8], %s5665_s18  ;;  %s6576_s17 = smov [#allocation8]  }
  0x5d   : > { %v796_v5 = vld [vmem:[#allocation5 + $0x5c8] sm:$0xff]  ;;  %1483 = vmatpush1.msra.mxu1 %v799_v3  ;;  %v795_v7 = vld [vmem:[#allocation5 + $0x5c0] sm:$0xff]  ;;  %1125 = vmatprep.subr.mxu0 %v668_v4  ;;  %s5551_s26 = sshll.u32 %s8990_s20, 4  ;;  %s10451_s8 = scalar_lea.hbm %s10502_s3, %s5662_s23  ;;  %s10453_s26 = int_to_ptr.vmem [resolvable:$true] %s5551_s26 }
  0x5e   : > { %v664_v8 = vld [vmem:[#allocation5 + $0x1a8] sm:$0xff]  ;;  %1484 = vmatprep.subr.mxu1 %v796_v5  ;;  %v663_v10 = vld [vmem:[#allocation5 + $0x1a0] sm:$0xff]  ;;  %1126 = vmatpush1.msra.mxu0 %v667_v6  ;;  %s6499_s9 = scalar_lea.vmem %s10453_s26, 25088  ;;  %s6503_s21 = sshll.u32 %s6576_s17, 4  ;;  %s6504_s21 = int_to_ptr.vmem [resolvable:$false] %s6503_s21 }
  0x5f   : > { %v792_v9 = vld [vmem:[#allocation5 + $0x5a8] sm:$0xff]  ;;  %v791_v11 = vld [vmem:[#allocation5 + $0x5a0] sm:$0xff]  ;;  %1485 = vmatpush1.msra.mxu1 %v795_v7  ;;  %1127 = vmatprep.subr.mxu0 %v664_v8  ;;  %p6500_p11 = scmp.ne.s32.totalorder %s10453_s26, %s6499_s9  ;;  %s6505_s22 = scalar_lea.vmem %s6504_s21, 50176 }
  0x60   : > { %v660_v12 = vld [vmem:[#allocation5 + $0x188] sm:$0xff]  ;;  %1486 = vmatprep.subr.mxu1 %v792_v9  ;;  %v659_v14 = vld [vmem:[#allocation5 + $0x180] sm:$0xff]  ;;  %1128 = vmatpush1.msra.mxu0 %v663_v10  ;;  %p6506_p6 = scmp.lt.s32.totalorder %s10453_s26, %s6504_s21  ;;  %p6507_p12 = scmp.lt.s32.totalorder %s6505_s22, %s6499_s9 }
  0x61   : > { %v788_v13 = vld [vmem:[#allocation5 + $0x588] sm:$0xff]  ;;  %v787_v15 = vld [vmem:[#allocation5 + $0x580] sm:$0xff]  ;;  %1487 = vmatpush1.msra.mxu1 %v791_v11  ;;  %1129 = vmatprep.subr.mxu0 %v660_v12  ;;  %p6501_p1 = pnand %p6500_p11, %p11084_p10 }
  0x62   : > { %v656_v16 = vld [vmem:[#allocation5 + $0x168] sm:$0xff]  ;;  %1488 = vmatprep.subr.mxu1 %v788_v13  ;;  %v655_v18 = vld [vmem:[#allocation5 + $0x160] sm:$0xff]  ;;  %1130 = vmatpush1.msra.mxu0 %v659_v14  ;;  %p6508_p7 = por %p6507_p12, %p6506_p6 }
  0x63   : > { %v784_v17 = vld [vmem:[#allocation5 + $0x568] sm:$0xff]  ;;  %v783_v19 = vld [vmem:[#allocation5 + $0x560] sm:$0xff]  ;;  %1489 = vmatpush1.msra.mxu1 %v787_v15  ;;  %1131 = vmatprep.subr.mxu0 %v656_v16  ;;  %p6502_p2 = pneg %p6501_p1 }
  0x64   : > { %v652_v20 = vld [vmem:[#allocation5 + $0x148] sm:$0xff]  ;;  %1490 = vmatprep.subr.mxu1 %v784_v17  ;;  %v651_v22 = vld [vmem:[#allocation5 + $0x140] sm:$0xff]  ;;  %1132 = vmatpush1.msra.mxu0 %v655_v18 }
  0x65   : > { %v780_v21 = vld [vmem:[#allocation5 + $0x548] sm:$0xff]  ;;  %v779_v23 = vld [vmem:[#allocation5 + $0x540] sm:$0xff]  ;;  %1491 = vmatpush1.msra.mxu1 %v783_v19  ;;  %1133 = vmatprep.subr.mxu0 %v652_v20  ;;  %p6509_p9 = pnand %p6508_p7, %p6502_p2 }
  0x66   : > { %v648_v24 = vld [vmem:[#allocation5 + $0x128] sm:$0xff]  ;;  %1492 = vmatprep.subr.mxu1 %v780_v21  ;;  %v647_v26 = vld [vmem:[#allocation5 + $0x120] sm:$0xff]  ;;  %1134 = vmatpush1.msra.mxu0 %v651_v22 }
  0x67   : > { %v776_v25 = vld [vmem:[#allocation5 + $0x528] sm:$0xff]  ;;  %v775_v27 = vld [vmem:[#allocation5 + $0x520] sm:$0xff]  ;;  %1493 = vmatpush1.msra.mxu1 %v779_v23  ;;  %1135 = vmatprep.subr.mxu0 %v648_v24 }
  0x68   : > { %v644_v28 = vld [vmem:[#allocation5 + $0x108] sm:$0xff]  ;;  %1494 = vmatprep.subr.mxu1 %v776_v25  ;;  %v643_v30 = vld [vmem:[#allocation5 + $0x100] sm:$0xff]  ;;  %1136 = vmatpush1.msra.mxu0 %v647_v26 }
  0x69   : > { %v772_v29 = vld [vmem:[#allocation5 + $0x508] sm:$0xff]  ;;  %v771_v31 = vld [vmem:[#allocation5 + $0x500] sm:$0xff]  ;;  %1495 = vmatpush1.msra.mxu1 %v775_v27  ;;  %1137 = vmatprep.subr.mxu0 %v644_v28 }
  0x6a   : > { %v640_v32 = vld [vmem:[#allocation5 + $0xe8] sm:$0xff]  ;;  %1496 = vmatprep.subr.mxu1 %v772_v29  ;;  %v639_v34 = vld [vmem:[#allocation5 + $0xe0] sm:$0xff]  ;;  %1138 = vmatpush1.msra.mxu0 %v643_v30 }
  0x6b   : > { %v768_v33 = vld [vmem:[#allocation5 + $0x4e8] sm:$0xff]  ;;  %v767_v35 = vld [vmem:[#allocation5 + $0x4e0] sm:$0xff]  ;;  %1497 = vmatpush1.msra.mxu1 %v771_v31  ;;  %1139 = vmatprep.subr.mxu0 %v640_v32 }
  0x6c   : > { %v636_v36 = vld [vmem:[#allocation5 + $0xc8] sm:$0xff]  ;;  %1498 = vmatprep.subr.mxu1 %v768_v33  ;;  %v635_v38 = vld [vmem:[#allocation5 + $0xc0] sm:$0xff]  ;;  %1140 = vmatpush1.msra.mxu0 %v639_v34 }
  0x6d   : > { %v764_v37 = vld [vmem:[#allocation5 + $0x4c8] sm:$0xff]  ;;  %v763_v39 = vld [vmem:[#allocation5 + $0x4c0] sm:$0xff]  ;;  %1499 = vmatpush1.msra.mxu1 %v767_v35  ;;  %1141 = vmatprep.subr.mxu0 %v636_v36 }
  0x6e   : > { %v632_v40 = vld [vmem:[#allocation5 + $0xa8] sm:$0xff]  ;;  %1500 = vmatprep.subr.mxu1 %v764_v37  ;;  %v631_v42 = vld [vmem:[#allocation5 + $0xa0] sm:$0xff]  ;;  %1142 = vmatpush1.msra.mxu0 %v635_v38 }
  0x6f   : > { %v760_v41 = vld [vmem:[#allocation5 + $0x4a8] sm:$0xff]  ;;  %v759_v43 = vld [vmem:[#allocation5 + $0x4a0] sm:$0xff]  ;;  %1501 = vmatpush1.msra.mxu1 %v763_v39  ;;  %1143 = vmatprep.subr.mxu0 %v632_v40 }
  0x70   : > { %v628_v44 = vld [vmem:[#allocation5 + $0x88] sm:$0xff]  ;;  %1502 = vmatprep.subr.mxu1 %v760_v41  ;;  %v627_v46 = vld [vmem:[#allocation5 + $0x80] sm:$0xff]  ;;  %1144 = vmatpush1.msra.mxu0 %v631_v42 }
  0x71   : > { %v756_v45 = vld [vmem:[#allocation5 + $0x488] sm:$0xff]  ;;  %v755_v47 = vld [vmem:[#allocation5 + $0x480] sm:$0xff]  ;;  %1503 = vmatpush1.msra.mxu1 %v759_v43  ;;  %1145 = vmatprep.subr.mxu0 %v628_v44 }
  0x72   : > { %v624_v48 = vld [vmem:[#allocation5 + $0x68] sm:$0xff]  ;;  %1504 = vmatprep.subr.mxu1 %v756_v45  ;;  %v623_v50 = vld [vmem:[#allocation5 + $0x60] sm:$0xff]  ;;  %1146 = vmatpush1.msra.mxu0 %v627_v46 }
  0x73   : > { %v752_v49 = vld [vmem:[#allocation5 + $0x468] sm:$0xff]  ;;  %v751_v51 = vld [vmem:[#allocation5 + $0x460] sm:$0xff]  ;;  %1505 = vmatpush1.msra.mxu1 %v755_v47  ;;  %1147 = vmatprep.subr.mxu0 %v624_v48 }
  0x74   : > { %v620_v52 = vld [vmem:[#allocation5 + $0x48] sm:$0xff]  ;;  %1506 = vmatprep.subr.mxu1 %v752_v49  ;;  %v619_v54 = vld [vmem:[#allocation5 + $0x40] sm:$0xff]  ;;  %1148 = vmatpush1.msra.mxu0 %v623_v50 }
  0x75   : > { %v748_v53 = vld [vmem:[#allocation5 + $0x448] sm:$0xff]  ;;  %v747_v55 = vld [vmem:[#allocation5 + $0x440] sm:$0xff]  ;;  %1507 = vmatpush1.msra.mxu1 %v751_v51  ;;  %1149 = vmatprep.subr.mxu0 %v620_v52 }
  0x76   : > { %v616_v56 = vld [vmem:[#allocation5 + $0x28] sm:$0xff]  ;;  %1508 = vmatprep.subr.mxu1 %v748_v53  ;;  %v615_v58 = vld [vmem:[#allocation5 + $0x20] sm:$0xff]  ;;  %1150 = vmatpush1.msra.mxu0 %v619_v54 }
  0x77   : > { %v744_v57 = vld [vmem:[#allocation5 + $0x428] sm:$0xff]  ;;  %v743_v59 = vld [vmem:[#allocation5 + $0x420] sm:$0xff]  ;;  %1509 = vmatpush1.msra.mxu1 %v747_v55  ;;  %1151 = vmatprep.subr.mxu0 %v616_v56 }
  0x78   : > { %v612_v60 = vld [vmem:[#allocation5 + $0x8] sm:$0xff]  ;;  %1510 = vmatprep.subr.mxu1 %v744_v57  ;;  %v611_v62 = vld [vmem:[#allocation5] sm:$0xff]  ;;  %1152 = vmatpush1.msra.mxu0 %v615_v58 }
  0x79   : > { %v740_v61 = vld [vmem:[#allocation5 + $0x408] sm:$0xff]  ;;  %v739_v63 = vld [vmem:[#allocation5 + $0x400] sm:$0xff]  ;;  %1511 = vmatpush1.msra.mxu1 %v743_v59  ;;  %1153 = vmatprep.subr.mxu0 %v612_v60 }
  0x7a   : > { %v736_v0 = vld [vmem:[#allocation5 + $0x3e8] sm:$0xff]  ;;  %1512 = vmatprep.subr.mxu1 %v740_v61  ;;  %v735_v2 = vld [vmem:[#allocation5 + $0x3e0] sm:$0xff]  ;;  %1154 = vmatpush1.msra.mxu0 %v611_v62 }
  0x7b   : > { %v864_v1 = vld [vmem:[#allocation5 + $0x7e8] sm:$0xff]  ;;  %v863_v3 = vld [vmem:[#allocation5 + $0x7e0] sm:$0xff]  ;;  %1513 = vmatpush1.msra.mxu1 %v739_v63  ;;  %1155 = vmatprep.subr.mxu0 %v736_v0 }
  0x7c   : > { %v732_v4 = vld [vmem:[#allocation5 + $0x3c8] sm:$0xff]  ;;  %1514 = vmatprep.subr.mxu1 %v864_v1  ;;  %v731_v6 = vld [vmem:[#allocation5 + $0x3c0] sm:$0xff]  ;;  %1156 = vmatpush2.msra.mxu0 %v735_v2  ;;  %v6744_v1 = vld [vmem:[%s6730_s6 + $0x18] sm:$0xff] }
  0x7d   : > { %v860_v5 = vld [vmem:[#allocation5 + $0x7c8] sm:$0xff]  ;;  %v859_v7 = vld [vmem:[#allocation5 + $0x7c0] sm:$0xff]  ;;  %1515 = vmatpush2.msra.mxu1 %v863_v3  ;;  %1157 = vmatprep.subr.mxu0 %v732_v4  ;;  %v6750_v3 = vld [vmem:[%s6730_s6 + $0x10] sm:$0xff] }
  0x7e   : > { %v728_v8 = vld [vmem:[#allocation5 + $0x3a8] sm:$0xff]  ;;  %1516 = vmatprep.subr.mxu1 %v860_v5  ;;  %v727_v10 = vld [vmem:[#allocation5 + $0x3a0] sm:$0xff]  ;;  %1158 = vmatpush2.msra.mxu0 %v731_v6 }
  0x7f   : > { %v856_v9 = vld [vmem:[#allocation5 + $0x7a8] sm:$0xff]  ;;  %v855_v11 = vld [vmem:[#allocation5 + $0x7a0] sm:$0xff]  ;;  %1517 = vmatpush2.msra.mxu1 %v859_v7  ;;  %1159 = vmatprep.subr.mxu0 %v728_v8  ;;  %v6760_v8 = vld [vmem:[%s6730_s6 + $0x58] sm:$0xff] }
  0x80   : > { %v724_v12 = vld [vmem:[#allocation5 + $0x388] sm:$0xff]  ;;  %1518 = vmatprep.subr.mxu1 %v856_v9  ;;  %v723_v14 = vld [vmem:[#allocation5 + $0x380] sm:$0xff]  ;;  %1160 = vmatpush2.msra.mxu0 %v727_v10 }
  0x81   : > { %v852_v13 = vld [vmem:[#allocation5 + $0x788] sm:$0xff]  ;;  %v851_v15 = vld [vmem:[#allocation5 + $0x780] sm:$0xff]  ;;  %1519 = vmatpush2.msra.mxu1 %v855_v11  ;;  %1161 = vmatprep.subr.mxu0 %v724_v12  ;;  %v6766_v11 = vld [vmem:[%s6730_s6 + $0x50] sm:$0xff] }
  0x82   : > { %v720_v16 = vld [vmem:[#allocation5 + $0x368] sm:$0xff]  ;;  %1520 = vmatprep.subr.mxu1 %v852_v13  ;;  %v719_v18 = vld [vmem:[#allocation5 + $0x360] sm:$0xff]  ;;  %1162 = vmatpush2.msra.mxu0 %v723_v14  ;;  %v6773_v13 = vld [vmem:[%s6730_s6 + $0x98] sm:$0xff] }
  0x83   : > { %v848_v17 = vld [vmem:[#allocation5 + $0x768] sm:$0xff]  ;;  %v847_v19 = vld [vmem:[#allocation5 + $0x760] sm:$0xff]  ;;  %1521 = vmatpush2.msra.mxu1 %v851_v15  ;;  %1163 = vmatprep.subr.mxu0 %v720_v16 }
  0x84   : > { %v716_v20 = vld [vmem:[#allocation5 + $0x348] sm:$0xff]  ;;  %1522 = vmatprep.subr.mxu1 %v848_v17  ;;  %v715_v22 = vld [vmem:[#allocation5 + $0x340] sm:$0xff]  ;;  %1164 = vmatpush2.msra.mxu0 %v719_v18 }
  0x85   : > { %v844_v21 = vld [vmem:[#allocation5 + $0x748] sm:$0xff]  ;;  %v843_v23 = vld [vmem:[#allocation5 + $0x740] sm:$0xff]  ;;  %1523 = vmatpush2.msra.mxu1 %v847_v19  ;;  %1165 = vmatprep.subr.mxu0 %v716_v20  ;;  %v6784_v19 = vld [vmem:[%s6730_s6 + $0x90] sm:$0xff] }
  0x86   : > { %v712_v24 = vld [vmem:[#allocation5 + $0x328] sm:$0xff]  ;;  %1524 = vmatprep.subr.mxu1 %v844_v21  ;;  %v711_v26 = vld [vmem:[#allocation5 + $0x320] sm:$0xff]  ;;  %1166 = vmatpush2.msra.mxu0 %v715_v22  ;;  %v6790_v21 = vld [vmem:[%s6730_s6 + $0xd8] sm:$0xff] }
  0x87   : > { %v840_v25 = vld [vmem:[#allocation5 + $0x728] sm:$0xff]  ;;  %v839_v27 = vld [vmem:[#allocation5 + $0x720] sm:$0xff]  ;;  %1525 = vmatpush2.msra.mxu1 %v843_v23  ;;  %1167 = vmatprep.subr.mxu0 %v712_v24 }
  0x88   : > { %v708_v28 = vld [vmem:[#allocation5 + $0x308] sm:$0xff]  ;;  %1526 = vmatprep.subr.mxu1 %v840_v25  ;;  %v707_v30 = vld [vmem:[#allocation5 + $0x300] sm:$0xff]  ;;  %1168 = vmatpush2.msra.mxu0 %v711_v26 }
  0x89   : > { %v836_v29 = vld [vmem:[#allocation5 + $0x708] sm:$0xff]  ;;  %v835_v31 = vld [vmem:[#allocation5 + $0x700] sm:$0xff]  ;;  %1527 = vmatpush2.msra.mxu1 %v839_v27  ;;  %1169 = vmatprep.subr.mxu0 %v708_v28  ;;  %v6800_v27 = vld [vmem:[%s6730_s6 + $0xd0] sm:$0xff] }
  0x8a   : > { %v704_v32 = vld [vmem:[#allocation5 + $0x2e8] sm:$0xff]  ;;  %1528 = vmatprep.subr.mxu1 %v836_v29  ;;  %v703_v34 = vld [vmem:[#allocation5 + $0x2e0] sm:$0xff]  ;;  %1170 = vmatpush2.msra.mxu0 %v707_v30  ;;  %v6806_v29 = vld [vmem:[%s6730_s6 + $0x118] sm:$0xff] }
  0x8b   : > { %v832_v33 = vld [vmem:[#allocation5 + $0x6e8] sm:$0xff]  ;;  %v831_v35 = vld [vmem:[#allocation5 + $0x6e0] sm:$0xff]  ;;  %1529 = vmatpush2.msra.mxu1 %v835_v31  ;;  %1171 = vmatprep.subr.mxu0 %v704_v32 }
  0x8c   : > { %v700_v36 = vld [vmem:[#allocation5 + $0x2c8] sm:$0xff]  ;;  %1530 = vmatprep.subr.mxu1 %v832_v33  ;;  %v699_v38 = vld [vmem:[#allocation5 + $0x2c0] sm:$0xff]  ;;  %1172 = vmatpush2.msra.mxu0 %v703_v34 }
  0x8d   : > { %v828_v37 = vld [vmem:[#allocation5 + $0x6c8] sm:$0xff]  ;;  %v827_v39 = vld [vmem:[#allocation5 + $0x6c0] sm:$0xff]  ;;  %1531 = vmatpush2.msra.mxu1 %v831_v35  ;;  %1173 = vmatprep.subr.mxu0 %v700_v36  ;;  %v6816_v35 = vld [vmem:[%s6730_s6 + $0x110] sm:$0xff] }
  0x8e   : > { %v696_v40 = vld [vmem:[#allocation5 + $0x2a8] sm:$0xff]  ;;  %1532 = vmatprep.subr.mxu1 %v828_v37  ;;  %v695_v42 = vld [vmem:[#allocation5 + $0x2a0] sm:$0xff]  ;;  %1174 = vmatpush2.msra.mxu0 %v699_v38  ;;  %v6822_v37 = vld [vmem:[%s6730_s6 + $0x158] sm:$0xff] }
  0x8f   : > { %v824_v41 = vld [vmem:[#allocation5 + $0x6a8] sm:$0xff]  ;;  %v823_v43 = vld [vmem:[#allocation5 + $0x6a0] sm:$0xff]  ;;  %1533 = vmatpush2.msra.mxu1 %v827_v39  ;;  %1175 = vmatprep.subr.mxu0 %v696_v40 }
  0x90   : > { %v692_v44 = vld [vmem:[#allocation5 + $0x288] sm:$0xff]  ;;  %1534 = vmatprep.subr.mxu1 %v824_v41  ;;  %v691_v46 = vld [vmem:[#allocation5 + $0x280] sm:$0xff]  ;;  %1176 = vmatpush2.msra.mxu0 %v695_v42 }
  0x91   : > { %v820_v45 = vld [vmem:[#allocation5 + $0x688] sm:$0xff]  ;;  %v819_v47 = vld [vmem:[#allocation5 + $0x680] sm:$0xff]  ;;  %1535 = vmatpush2.msra.mxu1 %v823_v43  ;;  %1177 = vmatprep.subr.mxu0 %v692_v44  ;;  %v6832_v43 = vld [vmem:[%s6730_s6 + $0x150] sm:$0xff] }
  0x92   : > { %v688_v48 = vld [vmem:[#allocation5 + $0x268] sm:$0xff]  ;;  %1536 = vmatprep.subr.mxu1 %v820_v45  ;;  %v687_v50 = vld [vmem:[#allocation5 + $0x260] sm:$0xff]  ;;  %1178 = vmatpush2.msra.mxu0 %v691_v46  ;;  %v6838_v45 = vld [vmem:[%s6730_s6 + $0x198] sm:$0xff] }
  0x93   : > { %v816_v49 = vld [vmem:[#allocation5 + $0x668] sm:$0xff]  ;;  %v815_v51 = vld [vmem:[#allocation5 + $0x660] sm:$0xff]  ;;  %1537 = vmatpush2.msra.mxu1 %v819_v47  ;;  %1179 = vmatprep.subr.mxu0 %v688_v48 }
  0x94   : > { %v684_v52 = vld [vmem:[#allocation5 + $0x248] sm:$0xff]  ;;  %1538 = vmatprep.subr.mxu1 %v816_v49  ;;  %v683_v54 = vld [vmem:[#allocation5 + $0x240] sm:$0xff]  ;;  %1180 = vmatpush2.msra.mxu0 %v687_v50 }
  0x95   : > { %v812_v53 = vld [vmem:[#allocation5 + $0x648] sm:$0xff]  ;;  %v811_v55 = vld [vmem:[#allocation5 + $0x640] sm:$0xff]  ;;  %1539 = vmatpush2.msra.mxu1 %v815_v51  ;;  %1181 = vmatprep.subr.mxu0 %v684_v52  ;;  %v6848_v51 = vld [vmem:[%s6730_s6 + $0x190] sm:$0xff] }
  0x96   : > { %v680_v56 = vld [vmem:[#allocation5 + $0x228] sm:$0xff]  ;;  %1540 = vmatprep.subr.mxu1 %v812_v53  ;;  %v679_v58 = vld [vmem:[#allocation5 + $0x220] sm:$0xff]  ;;  %1182 = vmatpush2.msra.mxu0 %v683_v54  ;;  %v6854_v53 = vld [vmem:[%s6730_s6 + $0x1d8] sm:$0xff] }
  0x97   : > { %v808_v57 = vld [vmem:[#allocation5 + $0x628] sm:$0xff]  ;;  %v807_v59 = vld [vmem:[#allocation5 + $0x620] sm:$0xff]  ;;  %1541 = vmatpush2.msra.mxu1 %v811_v55  ;;  %1183 = vmatprep.subr.mxu0 %v680_v56 }
  0x98   : > { %v676_v60 = vld [vmem:[#allocation5 + $0x208] sm:$0xff]  ;;  %1542 = vmatprep.subr.mxu1 %v808_v57  ;;  %v675_v62 = vld [vmem:[#allocation5 + $0x200] sm:$0xff]  ;;  %1184 = vmatpush2.msra.mxu0 %v679_v58 }
  0x99   : > { %v804_v61 = vld [vmem:[#allocation5 + $0x608] sm:$0xff]  ;;  %1543 = vmatpush2.msra.mxu1 %v807_v59  ;;  %v803_v0 = vld [vmem:[#allocation5 + $0x600] sm:$0xff]  ;;  %1185 = vmatprep.subr.mxu0 %v676_v60  ;;  %v6864_v59 = vld [vmem:[%s6730_s6 + $0x1d0] sm:$0xff] }
  0x9a   : > { %v6741_v63 = vld [vmem:[%s6730_s6 + $0x8] sm:$0xff]  ;;  %1544 = vmatprep.subr.mxu1 %v804_v61  ;;  %v6747_v2 = vld [vmem:[%s6730_s6] sm:$0xff]  ;;  %1186 = vmatpush2.msra.mxu0 %v675_v62  ;;  %v6870_v61 = vld [vmem:[%s6730_s6 + $0x218] sm:$0xff] }
  0x9b   : > { %1187 = vmatprep.mubr.f32.mxu0 %v6741_v63  ;;  %v928_v4 = vld [vmem:[#allocation5 + $0x9e8] sm:$0xff]  ;;  %1545 = vmatpush2.msra.mxu1 %v803_v0  ;;  %v927_v6 = vld [vmem:[#allocation5 + $0x9e0] sm:$0xff] }
  0x9c   : > { %v1056_v5 = vld [vmem:[#allocation5 + $0xde8] sm:$0xff]  ;;  %1546 = vmatprep.mubr.f32.mxu1 %v6744_v1  ;;  %1188 = vmatmul.mubr.f32.vlgmr.msra.gmra.mxu0 %v6747_v2  ;;  %v1055_v9 = vld [vmem:[#allocation5 + $0xde0] sm:$0xff] }
  0x9d   : > { %v6755_v7 = vld [vmem:[%s6730_s6 + $0x48] sm:$0xff]  ;;  %1547 = vmatmul.mubr.f32.vlgmr.msra.gmra.mxu1 %v6750_v3  ;;  %1841 = vmatprep.subr.mxu0 %v928_v4  ;;  %v6763_v10 = vld [vmem:[%s6730_s6 + $0x40] sm:$0xff] }
  0x9e   : > { %2200 = vmatprep.subr.mxu1 %v1056_v5  ;;  %1842 = vmatpush1.msra.mxu0 %v927_v6  ;;  %v6770_v12 = vld [vmem:[%s6730_s6 + $0x88] sm:$0xff]  ;;  %v923_v16 = vld [vmem:[#allocation5 + $0x9c0] sm:$0xff] }
  0x9f   : > { %1193 = vmatprep.mubr.f32.mxu0 %v6755_v7  ;;  %1552 = vmatprep.mubr.f32.mxu1 %v6760_v8  ;;  %v924_v14 = vld [vmem:[#allocation5 + $0x9c8] sm:$0xff]  ;;  %v1051_v17 = vld [vmem:[#allocation5 + $0xdc0] sm:$0xff] }
  0xa0   : > { %2201 = vmatpush1.msra.mxu1 %v1055_v9  ;;  %v1052_v15 = vld [vmem:[#allocation5 + $0xdc8] sm:$0xff]  ;;  %1194 = vmatmul.mubr.f32.gmra.mxu0 %v6763_v10  ;;  %v6781_v18 = vld [vmem:[%s6730_s6 + $0x80] sm:$0xff]  ;;  %v6880_v9 = vld [vmem:[%s6730_s6 + $0x210] sm:$0xff] }
  0xa1   : > { %1553 = vmatmul.mubr.f32.gmra.mxu1 %v6766_v11  ;;  %1199 = vmatprep.mubr.f32.mxu0 %v6770_v12  ;;  %v6787_v20 = vld [vmem:[%s6730_s6 + $0xc8] sm:$0xff]  ;;  %v919_v24 = vld [vmem:[#allocation5 + $0x9a0] sm:$0xff] }
  0xa2   : > { %1558 = vmatprep.mubr.f32.mxu1 %v6773_v13  ;;  %1843 = vmatprep.subr.mxu0 %v924_v14  ;;  %v920_v22 = vld [vmem:[#allocation5 + $0x9a8] sm:$0xff]  ;;  %v1047_v25 = vld [vmem:[#allocation5 + $0xda0] sm:$0xff] }
  0xa3   : > { %2202 = vmatprep.subr.mxu1 %v1052_v15  ;;  %1844 = vmatpush1.msra.mxu0 %v923_v16  ;;  %v1048_v23 = vld [vmem:[#allocation5 + $0xda8] sm:$0xff]  ;;  %v6797_v26 = vld [vmem:[%s6730_s6 + $0xc0] sm:$0xff]  ;;  %v6886_v15 = vld [vmem:[%s6730_s6 + $0x258] sm:$0xff] }
  0xa4   : > { %2203 = vmatpush1.msra.mxu1 %v1051_v17  ;;  %1200 = vmatmul.mubr.f32.gmra.mxu0 %v6781_v18  ;;  %v6803_v28 = vld [vmem:[%s6730_s6 + $0x108] sm:$0xff]  ;;  %v915_v32 = vld [vmem:[#allocation5 + $0x980] sm:$0xff] }
  0xa5   : > { %1559 = vmatmul.mubr.f32.gmra.mxu1 %v6784_v19  ;;  %1205 = vmatprep.mubr.f32.mxu0 %v6787_v20  ;;  %v916_v30 = vld [vmem:[#allocation5 + $0x988] sm:$0xff]  ;;  %v1043_v33 = vld [vmem:[#allocation5 + $0xd80] sm:$0xff] }
  0xa6   : > { %1564 = vmatprep.mubr.f32.mxu1 %v6790_v21  ;;  %1845 = vmatprep.subr.mxu0 %v920_v22  ;;  %v1044_v31 = vld [vmem:[#allocation5 + $0xd88] sm:$0xff]  ;;  %v6813_v34 = vld [vmem:[%s6730_s6 + $0x100] sm:$0xff] }
  0xa7   : > { %2204 = vmatprep.subr.mxu1 %v1048_v23  ;;  %1846 = vmatpush1.msra.mxu0 %v919_v24  ;;  %v6819_v36 = vld [vmem:[%s6730_s6 + $0x148] sm:$0xff]  ;;  %v911_v40 = vld [vmem:[#allocation5 + $0x960] sm:$0xff] }
  0xa8   : > { %2205 = vmatpush1.msra.mxu1 %v1047_v25  ;;  %1206 = vmatmul.mubr.f32.gmra.mxu0 %v6797_v26  ;;  %v912_v38 = vld [vmem:[#allocation5 + $0x968] sm:$0xff]  ;;  %v1039_v41 = vld [vmem:[#allocation5 + $0xd60] sm:$0xff]  ;;  %v6896_v25 = vld [vmem:[%s6730_s6 + $0x250] sm:$0xff] }
  0xa9   : > { %1565 = vmatmul.mubr.f32.gmra.mxu1 %v6800_v27  ;;  %1211 = vmatprep.mubr.f32.mxu0 %v6803_v28  ;;  %v1040_v39 = vld [vmem:[#allocation5 + $0xd68] sm:$0xff]  ;;  %v6829_v42 = vld [vmem:[%s6730_s6 + $0x140] sm:$0xff] }
  0xaa   : > { %1570 = vmatprep.mubr.f32.mxu1 %v6806_v29  ;;  %1847 = vmatprep.subr.mxu0 %v916_v30  ;;  %v6835_v44 = vld [vmem:[%s6730_s6 + $0x188] sm:$0xff]  ;;  %v907_v48 = vld [vmem:[#allocation5 + $0x940] sm:$0xff] }
  0xab   : > { %2206 = vmatprep.subr.mxu1 %v1044_v31  ;;  %1848 = vmatpush1.msra.mxu0 %v915_v32  ;;  %v908_v46 = vld [vmem:[#allocation5 + $0x948] sm:$0xff]  ;;  %v1035_v49 = vld [vmem:[#allocation5 + $0xd40] sm:$0xff]  ;;  %v6902_v31 = vld [vmem:[%s6730_s6 + $0x298] sm:$0xff] }
  0xac   : > { %2207 = vmatpush1.msra.mxu1 %v1043_v33  ;;  %1212 = vmatmul.mubr.f32.gmra.mxu0 %v6813_v34  ;;  %v1036_v47 = vld [vmem:[#allocation5 + $0xd48] sm:$0xff]  ;;  %v6845_v50 = vld [vmem:[%s6730_s6 + $0x180] sm:$0xff] }
  0xad   : > { %1571 = vmatmul.mubr.f32.gmra.mxu1 %v6816_v35  ;;  %1217 = vmatprep.mubr.f32.mxu0 %v6819_v36  ;;  %v6851_v52 = vld [vmem:[%s6730_s6 + $0x1c8] sm:$0xff]  ;;  %v903_v56 = vld [vmem:[#allocation5 + $0x920] sm:$0xff] }
  0xae   : > { %1576 = vmatprep.mubr.f32.mxu1 %v6822_v37  ;;  %1849 = vmatprep.subr.mxu0 %v912_v38  ;;  %v904_v54 = vld [vmem:[#allocation5 + $0x928] sm:$0xff]  ;;  %v1031_v57 = vld [vmem:[#allocation5 + $0xd20] sm:$0xff] }
  0xaf   : > { %2208 = vmatprep.subr.mxu1 %v1040_v39  ;;  %1850 = vmatpush1.msra.mxu0 %v911_v40  ;;  %v1032_v55 = vld [vmem:[#allocation5 + $0xd28] sm:$0xff]  ;;  %v6861_v58 = vld [vmem:[%s6730_s6 + $0x1c0] sm:$0xff] }
  0xb0   : > { %2209 = vmatpush1.msra.mxu1 %v1039_v41  ;;  %1218 = vmatmul.mubr.f32.gmra.mxu0 %v6829_v42  ;;  %v6867_v60 = vld [vmem:[%s6730_s6 + $0x208] sm:$0xff]  ;;  %v899_v4 = vld [vmem:[#allocation5 + $0x900] sm:$0xff]  ;;  %v6912_v41 = vld [vmem:[%s6730_s6 + $0x290] sm:$0xff] }
  0xb1   : > { %1577 = vmatmul.mubr.f32.gmra.mxu1 %v6832_v43  ;;  %1223 = vmatprep.mubr.f32.mxu0 %v6835_v44  ;;  %v900_v62 = vld [vmem:[#allocation5 + $0x908] sm:$0xff]  ;;  %v1027_v5 = vld [vmem:[#allocation5 + $0xd00] sm:$0xff] }
  0xb2   : > { %1582 = vmatprep.mubr.f32.mxu1 %v6838_v45  ;;  %1851 = vmatprep.subr.mxu0 %v908_v46  ;;  %v1028_v0 = vld [vmem:[#allocation5 + $0xd08] sm:$0xff]  ;;  %v6877_v6 = vld [vmem:[%s6730_s6 + $0x200] sm:$0xff] }
  0xb3   : > { %2210 = vmatprep.subr.mxu1 %v1036_v47  ;;  %1852 = vmatpush1.msra.mxu0 %v907_v48  ;;  %v6883_v14 = vld [vmem:[%s6730_s6 + $0x248] sm:$0xff]  ;;  %v895_v22 = vld [vmem:[#allocation5 + $0x8e0] sm:$0xff]  ;;  %v6918_v47 = vld [vmem:[%s6730_s6 + $0x2d8] sm:$0xff] }
  0xb4   : > { %2211 = vmatpush1.msra.mxu1 %v1035_v49  ;;  %1224 = vmatmul.mubr.f32.gmra.mxu0 %v6845_v50  ;;  %v896_v16 = vld [vmem:[#allocation5 + $0x8e8] sm:$0xff]  ;;  %v1023_v23 = vld [vmem:[#allocation5 + $0xce0] sm:$0xff] }
  0xb5   : > { %1583 = vmatmul.mubr.f32.gmra.mxu1 %v6848_v51  ;;  %1229 = vmatprep.mubr.f32.mxu0 %v6851_v52  ;;  %v1024_v17 = vld [vmem:[#allocation5 + $0xce8] sm:$0xff]  ;;  %v6893_v24 = vld [vmem:[%s6730_s6 + $0x240] sm:$0xff] }
  0xb6   : > { %1588 = vmatprep.mubr.f32.mxu1 %v6854_v53  ;;  %1853 = vmatprep.subr.mxu0 %v904_v54  ;;  %v6899_v30 = vld [vmem:[%s6730_s6 + $0x288] sm:$0xff]  ;;  %v891_v38 = vld [vmem:[#allocation5 + $0x8c0] sm:$0xff] }
  0xb7   : > { %2212 = vmatprep.subr.mxu1 %v1032_v55  ;;  %1854 = vmatpush1.msra.mxu0 %v903_v56  ;;  %v892_v32 = vld [vmem:[#allocation5 + $0x8c8] sm:$0xff]  ;;  %v1019_v39 = vld [vmem:[#allocation5 + $0xcc0] sm:$0xff] }
  0xb8   : > { %2213 = vmatpush1.msra.mxu1 %v1031_v57  ;;  %1230 = vmatmul.mubr.f32.gmra.mxu0 %v6861_v58  ;;  %v1020_v33 = vld [vmem:[#allocation5 + $0xcc8] sm:$0xff]  ;;  %v6909_v40 = vld [vmem:[%s6730_s6 + $0x280] sm:$0xff]  ;;  %v6928_v57 = vld [vmem:[%s6730_s6 + $0x2d0] sm:$0xff] }
  0xb9   : > { %1589 = vmatmul.mubr.f32.gmra.mxu1 %v6864_v59  ;;  %1235 = vmatprep.mubr.f32.mxu0 %v6867_v60  ;;  %v6915_v46 = vld [vmem:[%s6730_s6 + $0x2c8] sm:$0xff]  ;;  %v887_v54 = vld [vmem:[#allocation5 + $0x8a0] sm:$0xff] }
  0xba   : > { %1594 = vmatprep.mubr.f32.mxu1 %v6870_v61  ;;  %1855 = vmatprep.subr.mxu0 %v900_v62  ;;  %v888_v48 = vld [vmem:[#allocation5 + $0x8a8] sm:$0xff]  ;;  %v1015_v55 = vld [vmem:[#allocation5 + $0xca0] sm:$0xff] }
  0xbb   : > { %2214 = vmatprep.subr.mxu1 %v1028_v0  ;;  %1856 = vmatpush1.msra.mxu0 %v899_v4  ;;  %v1016_v49 = vld [vmem:[#allocation5 + $0xca8] sm:$0xff]  ;;  %v6925_v56 = vld [vmem:[%s6730_s6 + $0x2c0] sm:$0xff]  ;;  %v6934_v0 = vld [vmem:[%s6730_s6 + $0x318] sm:$0xff] }
  0xbc   : > { %2215 = vmatpush1.msra.mxu1 %v1027_v5  ;;  %1236 = vmatmul.mubr.f32.gmra.mxu0 %v6877_v6  ;;  %v6931_v62 = vld [vmem:[%s6730_s6 + $0x308] sm:$0xff]  ;;  %10637 = vst [vmem:[#allocation13_spill] sm:$0xff] %v6934_v0 }
  0xbd   : > { %1595 = vmatmul.mubr.f32.gmra.mxu1 %v6880_v9  ;;  %1241 = vmatprep.mubr.f32.mxu0 %v6883_v14  ;;  %10636 = vst [vmem:[#allocation12_spill] sm:$0xff] %v6931_v62  ;;  %v884_v4 = vld [vmem:[#allocation5 + $0x888] sm:$0xff] }
  0xbe   : > { %1600 = vmatprep.mubr.f32.mxu1 %v6886_v15  ;;  %1857 = vmatprep.subr.mxu0 %v896_v16  ;;  %v1012_v5 = vld [vmem:[#allocation5 + $0xc88] sm:$0xff]  ;;  %v883_v16 = vld [vmem:[#allocation5 + $0x880] sm:$0xff] }
  0xbf   : > { %2216 = vmatprep.subr.mxu1 %v1024_v17  ;;  %1858 = vmatpush1.msra.mxu0 %v895_v22  ;;  %v1011_v17 = vld [vmem:[#allocation5 + $0xc80] sm:$0xff] }
  0xc0   : > { %2217 = vmatpush1.msra.mxu1 %v1023_v23  ;;  %1242 = vmatmul.mubr.f32.gmra.mxu0 %v6893_v24  ;;  %v6941_v22 = vld [vmem:[%s6730_s6 + $0x300] sm:$0xff]  ;;  %v6944_v23 = vld [vmem:[%s6730_s6 + $0x310] sm:$0xff] }
  0xc1   : > { %1601 = vmatmul.mubr.f32.gmra.mxu1 %v6896_v25  ;;  %1247 = vmatprep.mubr.f32.mxu0 %v6899_v30  ;;  %10638 = vst [vmem:[#allocation14_spill] sm:$0xff] %v6941_v22  ;;  %10639 = vst [vmem:[#allocation15_spill] sm:$0xff] %v6944_v23 }
  0xc2   : > { %1606 = vmatprep.mubr.f32.mxu1 %v6902_v31  ;;  %1859 = vmatprep.subr.mxu0 %v892_v32  ;;  %v6947_v32 = vld [vmem:[%s6730_s6 + $0x348] sm:$0xff] }
  0xc3   : > { %2218 = vmatprep.subr.mxu1 %v1020_v33  ;;  %1860 = vmatpush1.msra.mxu0 %v891_v38  ;;  %10640 = vst [vmem:[#allocation16_spill] sm:$0xff] %v6947_v32  ;;  %v6950_v33 = vld [vmem:[%s6730_s6 + $0x358] sm:$0xff]  ;;  %v880_v38 = vld [vmem:[#allocation5 + $0x868] sm:$0xff] }
  0xc4   : > { %2219 = vmatpush1.msra.mxu1 %v1019_v39  ;;  %1248 = vmatmul.mubr.f32.gmra.mxu0 %v6909_v40  ;;  %10641 = vst [vmem:[#allocation17_spill] sm:$0xff] %v6950_v33  ;;  %v1008_v39 = vld [vmem:[#allocation5 + $0xc68] sm:$0xff] }
  0xc5   : > { %1607 = vmatmul.mubr.f32.gmra.mxu1 %v6912_v41  ;;  %1253 = vmatprep.mubr.f32.mxu0 %v6915_v46 }
  0xc6   : > { %1612 = vmatprep.mubr.f32.mxu1 %v6918_v47  ;;  %1861 = vmatprep.subr.mxu0 %v888_v48  ;;  %v879_v48 = vld [vmem:[#allocation5 + $0x860] sm:$0xff] }
  0xc7   : > { %2220 = vmatprep.subr.mxu1 %v1016_v49  ;;  %1862 = vmatpush1.msra.mxu0 %v887_v54  ;;  %v1007_v49 = vld [vmem:[#allocation5 + $0xc60] sm:$0xff] }
  0xc8   : > { %2221 = vmatpush1.msra.mxu1 %v1015_v55  ;;  %1254 = vmatmul.mubr.f32.gmra.mxu0 %v6925_v56  ;;  %v6957_v54 = vld [vmem:[%s6730_s6 + $0x340] sm:$0xff]  ;;  %v6960_v55 = vld [vmem:[%s6730_s6 + $0x350] sm:$0xff] }
  0xc9   : > { %1613 = vmatmul.mubr.f32.gmra.mxu1 %v6928_v57  ;;  %1259 = vmatprep.mubr.f32.mxu0 %v6931_v62  ;;  %10642 = vst [vmem:[#allocation18_spill] sm:$0xff] %v6957_v54  ;;  %10643 = vst [vmem:[#allocation19_spill] sm:$0xff] %v6960_v55  ;;  %v350_v62 = vld [vmem:[%s6730_s6 + $0x418] sm:$0xff] }
  0xca   : > { %1618 = vmatprep.mubr.f32.mxu1 %v6934_v0  ;;  %1863 = vmatprep.subr.mxu0 %v884_v4  ;;  %v6963_v4 = vld [vmem:[%s6730_s6 + $0x388] sm:$0xff] }
  0xcb   : > { %2222 = vmatprep.subr.mxu1 %v1012_v5  ;;  %1864 = vmatpush1.msra.mxu0 %v883_v16  ;;  %10644 = vst [vmem:[#allocation20_spill] sm:$0xff] %v6963_v4  ;;  %v334_v5 = vld [vmem:[%s6730_s6 + $0x398] sm:$0xff]  ;;  %v876_v16 = vld [vmem:[#allocation5 + $0x848] sm:$0xff] }
  0xcc   : > { %2223 = vmatpush1.msra.mxu1 %v1011_v17  ;;  %1260 = vmatmul.mubr.f32.gmra.mxu0 %v6941_v22  ;;  %v1004_v17 = vld [vmem:[#allocation5 + $0xc48] sm:$0xff]  ;;  %v333_v22 = vld [vmem:[%s6730_s6 + $0x390] sm:$0xff] }
  0xcd   : > { %1619 = vmatmul.mubr.f32.gmra.mxu1 %v6944_v23  ;;  %1265 = vmatprep.mubr.f32.mxu0 %v6947_v32  ;;  %v1003_v32 = vld [vmem:[#allocation5 + $0xc40] sm:$0xff]  ;;  %v340_v0 = vld [vmem:[%s6730_s6 + $0x3c8] sm:$0xff] }
  0xce   : > { %1624 = vmatprep.mubr.f32.mxu1 %v6950_v33  ;;  %1865 = vmatprep.subr.mxu0 %v880_v38  ;;  %v875_v33 = vld [vmem:[#allocation5 + $0x840] sm:$0xff]  ;;  %v342_v38 = vld [vmem:[%s6730_s6 + $0x3d8] sm:$0xff] }
  0xcf   : > { %2224 = vmatprep.subr.mxu1 %v1008_v39  ;;  %1866 = vmatpush1.msra.mxu0 %v879_v48  ;;  %v331_v23 = vld [vmem:[%s6730_s6 + $0x380] sm:$0xff]  ;;  %v872_v39 = vld [vmem:[#allocation5 + $0x828] sm:$0xff] }
  0xd0   : > { %2225 = vmatpush1.msra.mxu1 %v1007_v49  ;;  %1266 = vmatmul.mubr.f32.gmra.mxu0 %v6957_v54  ;;  %v1000_v48 = vld [vmem:[#allocation5 + $0xc28] sm:$0xff]  ;;  %v871_v49 = vld [vmem:[#allocation5 + $0x820] sm:$0xff] }
  0xd1   : > { %1625 = vmatmul.mubr.f32.gmra.mxu1 %v6960_v55  ;;  %1271 = vmatprep.mubr.f32.mxu0 %v6963_v4  ;;  %v999_v55 = vld [vmem:[#allocation5 + $0xc20] sm:$0xff]  ;;  %v341_v4 = vld [vmem:[%s6730_s6 + $0x3d0] sm:$0xff]  ;;  %v348_v54 = vld [vmem:[%s6730_s6 + $0x408] sm:$0xff] }
  0xd2   : > { %1630 = vmatprep.mubr.f32.mxu1 %v334_v5  ;;  %1867 = vmatprep.subr.mxu0 %v876_v16  ;;  %v339_v5 = vld [vmem:[%s6730_s6 + $0x3c0] sm:$0xff]  ;;  %v349_v16 = vld [vmem:[%s6730_s6 + $0x410] sm:$0xff] }
  0xd3   : > { %2226 = vmatprep.subr.mxu1 %v1004_v17  ;;  %1868 = vmatpush1.msra.mxu0 %v875_v33  ;;  %v996_v33 = vld [vmem:[#allocation5 + $0xc08] sm:$0xff] }
  0xd4   : > { %2227 = vmatpush1.msra.mxu1 %v1003_v32  ;;  %1272 = vmatmul.mubr.f32.gmra.mxu0 %v331_v23  ;;  %v868_v32 = vld [vmem:[#allocation5 + $0x808] sm:$0xff]  ;;  %v995_v23 = vld [vmem:[#allocation5 + $0xc00] sm:$0xff] }
  0xd5   : > { %1631 = vmatmul.mubr.f32.gmra.mxu1 %v333_v22  ;;  %1277 = vmatprep.mubr.f32.mxu0 %v340_v0  ;;  %v867_v22 = vld [vmem:[#allocation5 + $0x800] sm:$0xff]  ;;  %v356_v17 = vld [vmem:[%s6730_s6 + $0x448] sm:$0xff] }
  0xd6   : > { %1636 = vmatprep.mubr.f32.mxu1 %v342_v38  ;;  %1869 = vmatprep.subr.mxu0 %v872_v39  ;;  %v347_v0 = vld [vmem:[%s6730_s6 + $0x400] sm:$0xff]  ;;  %v358_v38 = vld [vmem:[%s6730_s6 + $0x458] sm:$0xff]  ;;  %v1120_v39 = vld [vmem:[#allocation5 + $0xfe8] sm:$0xff] }
  0xd7   : > { %2228 = vmatprep.subr.mxu1 %v1000_v48  ;;  %1870 = vmatpush1.msra.mxu0 %v871_v49  ;;  %v1119_v48 = vld [vmem:[#allocation5 + $0xfe0] sm:$0xff]  ;;  %v364_v49 = vld [vmem:[%s6730_s6 + $0x488] sm:$0xff] }
  0xd8   : > { %2229 = vmatpush1.msra.mxu1 %v999_v55  ;;  %1278 = vmatmul.mubr.f32.gmra.mxu0 %v339_v5  ;;  %v992_v55 = vld [vmem:[#allocation5 + $0xbe8] sm:$0xff]  ;;  %v366_v5 = vld [vmem:[%s6730_s6 + $0x498] sm:$0xff] }
  0xd9   : > { %1637 = vmatmul.mubr.f32.gmra.mxu1 %v341_v4  ;;  %1283 = vmatprep.mubr.f32.mxu0 %v348_v54  ;;  %v991_v4 = vld [vmem:[#allocation5 + $0xbe0] sm:$0xff]  ;;  %v357_v54 = vld [vmem:[%s6730_s6 + $0x450] sm:$0xff] }
  0xda   : > { %1642 = vmatprep.mubr.f32.mxu1 %v350_v62  ;;  %1871 = vmatprep.subr.mxu0 %v868_v32  ;;  %v355_v62 = vld [vmem:[%s6730_s6 + $0x440] sm:$0xff]  ;;  %v988_v32 = vld [vmem:[#allocation5 + $0xbc8] sm:$0xff] }
  0xdb   : > { %2230 = vmatprep.subr.mxu1 %v996_v33  ;;  %1872 = vmatpush1.msra.mxu0 %v867_v22  ;;  %v1116_v33 = vld [vmem:[#allocation5 + $0xfc8] sm:$0xff]  ;;  %v987_v22 = vld [vmem:[#allocation5 + $0xbc0] sm:$0xff] }
  0xdc   : > { %2231 = vmatpush1.msra.mxu1 %v995_v23  ;;  %1284 = vmatmul.mubr.f32.gmra.mxu0 %v347_v0  ;;  %v1115_v23 = vld [vmem:[#allocation5 + $0xfc0] sm:$0xff] }
  0xdd   : > { %1643 = vmatmul.mubr.f32.gmra.mxu1 %v349_v16  ;;  %1289 = vmatprep.mubr.f32.mxu0 %v356_v17  ;;  %v363_v0 = vld [vmem:[%s6730_s6 + $0x480] sm:$0xff]  ;;  %v365_v16 = vld [vmem:[%s6730_s6 + $0x490] sm:$0xff]  ;;  %v372_v17 = vld [vmem:[%s6730_s6 + $0x4c8] sm:$0xff] }
  0xde   : > { %1648 = vmatprep.mubr.f32.mxu1 %v358_v38  ;;  %1873 = vmatprep.subr.mxu0 %v992_v55  ;;  %v374_v38 = vld [vmem:[%s6730_s6 + $0x4d8] sm:$0xff]  ;;  %v984_v55 = vld [vmem:[#allocation5 + $0xba8] sm:$0xff] }
  0xdf   : > { %2232 = vmatprep.subr.mxu1 %v1120_v39  ;;  %1874 = vmatpush2.msra.mxu0 %v991_v4  ;;  %v1112_v39 = vld [vmem:[#allocation5 + $0xfa8] sm:$0xff]  ;;  %v983_v4 = vld [vmem:[#allocation5 + $0xba0] sm:$0xff] }
  0xe0   : > { %2233 = vmatpush2.msra.mxu1 %v1119_v48  ;;  %1290 = vmatmul.mubr.f32.gmra.mxu0 %v355_v62  ;;  %v1111_v48 = vld [vmem:[#allocation5 + $0xfa0] sm:$0xff] }
  0xe1   : > { %1649 = vmatmul.mubr.f32.gmra.mxu1 %v357_v54  ;;  %1295 = vmatprep.mubr.f32.mxu0 %v364_v49  ;;  %v371_v62 = vld [vmem:[%s6730_s6 + $0x4c0] sm:$0xff]  ;;  %v373_v54 = vld [vmem:[%s6730_s6 + $0x4d0] sm:$0xff]  ;;  %v380_v49 = vld [vmem:[%s6730_s6 + $0x508] sm:$0xff] }
  0xe2   : > { %1654 = vmatprep.mubr.f32.mxu1 %v366_v5  ;;  %1875 = vmatprep.subr.mxu0 %v988_v32  ;;  %v382_v5 = vld [vmem:[%s6730_s6 + $0x518] sm:$0xff]  ;;  %v980_v32 = vld [vmem:[#allocation5 + $0xb88] sm:$0xff] }
  0xe3   : > { %2234 = vmatprep.subr.mxu1 %v1116_v33  ;;  %1876 = vmatpush2.msra.mxu0 %v987_v22  ;;  %v1108_v33 = vld [vmem:[#allocation5 + $0xf88] sm:$0xff]  ;;  %v979_v22 = vld [vmem:[#allocation5 + $0xb80] sm:$0xff] }
  0xe4   : > { %2235 = vmatpush2.msra.mxu1 %v1115_v23  ;;  %1296 = vmatmul.mubr.f32.gmra.mxu0 %v363_v0  ;;  %v1107_v23 = vld [vmem:[#allocation5 + $0xf80] sm:$0xff] }
  0xe5   : > { %1655 = vmatmul.mubr.f32.gmra.mxu1 %v365_v16  ;;  %1301 = vmatprep.mubr.f32.mxu0 %v372_v17  ;;  %v379_v0 = vld [vmem:[%s6730_s6 + $0x500] sm:$0xff]  ;;  %v381_v16 = vld [vmem:[%s6730_s6 + $0x510] sm:$0xff]  ;;  %v388_v17 = vld [vmem:[%s6730_s6 + $0x548] sm:$0xff] }
  0xe6   : > { %1660 = vmatprep.mubr.f32.mxu1 %v374_v38  ;;  %1877 = vmatprep.subr.mxu0 %v984_v55  ;;  %v390_v38 = vld [vmem:[%s6730_s6 + $0x558] sm:$0xff]  ;;  %v976_v55 = vld [vmem:[#allocation5 + $0xb68] sm:$0xff] }
  0xe7   : > { %2236 = vmatprep.subr.mxu1 %v1112_v39  ;;  %1878 = vmatpush2.msra.mxu0 %v983_v4  ;;  %v1104_v39 = vld [vmem:[#allocation5 + $0xf68] sm:$0xff]  ;;  %v975_v4 = vld [vmem:[#allocation5 + $0xb60] sm:$0xff] }
  0xe8   : > { %2237 = vmatpush2.msra.mxu1 %v1111_v48  ;;  %1302 = vmatmul.mubr.f32.gmra.mxu0 %v371_v62  ;;  %v1103_v48 = vld [vmem:[#allocation5 + $0xf60] sm:$0xff]  ;;  %v3996_v62 = vmul.f32 %v6741_v63, %v6741_v63  ;;  %v4012_v63 = vmul.f32 %v6770_v12, %v6770_v12 }
  0xe9   : > { %1661 = vmatmul.mubr.f32.gmra.mxu1 %v373_v54  ;;  %1307 = vmatprep.mubr.f32.mxu0 %v380_v49  ;;  %v3995_v54 = vmul.f32 %v6747_v2, %v6747_v2  ;;  %v387_v49 = vld [vmem:[%s6730_s6 + $0x540] sm:$0xff]  ;;  %v4011_v2 = vmul.f32 %v6781_v18, %v6781_v18  ;;  %v4005_v18 = vmul.f32 %v6766_v11, %v6766_v11  ;;  %v1096_v11 = vld [vmem:[#allocation5 + $0xf28] sm:$0xff] }
  0xea   : > { %1666 = vmatprep.mubr.f32.mxu1 %v382_v5  ;;  %1879 = vmatprep.subr.mxu0 %v980_v32  ;;  %v389_v5 = vld [vmem:[%s6730_s6 + $0x550] sm:$0xff]  ;;  %v4004_v32 = vmul.f32 %v6755_v7, %v6755_v7  ;;  %v1100_v7 = vld [vmem:[#allocation5 + $0xf48] sm:$0xff]  ;;  %v395_v12 = vld [vmem:[%s6730_s6 + $0x580] sm:$0xff] }
  0xeb   : > { %2238 = vmatprep.subr.mxu1 %v1108_v33  ;;  %1880 = vmatpush2.msra.mxu0 %v979_v22  ;;  %v4003_v33 = vmul.f32 %v6763_v10, %v6763_v10  ;;  %v396_v22 = vld [vmem:[%s6730_s6 + $0x588] sm:$0xff]  ;;  %v971_v10 = vld [vmem:[#allocation5 + $0xb40] sm:$0xff] }
  0xec   : > { %2239 = vmatpush2.msra.mxu1 %v1107_v23  ;;  %1308 = vmatmul.mubr.f32.gmra.mxu0 %v379_v0  ;;  %v398_v23 = vld [vmem:[%s6730_s6 + $0x598] sm:$0xff]  ;;  %v972_v0 = vld [vmem:[#allocation5 + $0xb48] sm:$0xff] }
  0xed   : > { %1667 = vmatmul.mubr.f32.gmra.mxu1 %v381_v16  ;;  %1313 = vmatprep.mubr.f32.mxu0 %v388_v17  ;;  %v1099_v16 = vld [vmem:[#allocation5 + $0xf40] sm:$0xff]  ;;  %v4387_v17 = vadd.f32 %v3996_v62, %v3995_v54  ;;  %v4020_v62 = vmul.f32 %v6787_v20, %v6787_v20  ;;  %v968_v54 = vld [vmem:[#allocation5 + $0xb28] sm:$0xff] }
  0xee   : > { %1672 = vmatprep.mubr.f32.mxu1 %v390_v38  ;;  %1881 = vmatprep.subr.mxu0 %v976_v55  ;;  %v3997_v38 = vmul.f32 %v6750_v3, %v6750_v3  ;;  %v397_v55 = vld [vmem:[%s6730_s6 + $0x590] sm:$0xff]  ;;  %v4019_v3 = vmul.f32 %v6797_v26, %v6797_v26  ;;  %v967_v20 = vld [vmem:[#allocation5 + $0xb20] sm:$0xff] }
  0xef   : > { %2240 = vmatprep.subr.mxu1 %v1104_v39  ;;  %1882 = vmatpush2.msra.mxu0 %v975_v4  ;;  %v4396_v39 = vadd.f32 %v4004_v32, %v4003_v33  ;;  %v4013_v4 = vmul.f32 %v6784_v19, %v6784_v19  ;;  %v7029_v19 = vmul.f32 %v6744_v1, %v6744_v1  ;;  %v1095_v26 = vld [vmem:[#allocation5 + $0xf20] sm:$0xff] }
  0xf0   : > { %2241 = vmatpush2.msra.mxu1 %v1103_v48  ;;  %1314 = vmatmul.mubr.f32.gmra.mxu0 %v387_v49  ;;  %v404_v48 = vld [vmem:[%s6730_s6 + $0x5c8] sm:$0xff]  ;;  %v406_v49 = vld [vmem:[%s6730_s6 + $0x5d8] sm:$0xff]  ;;  %v7033_v32 = vmul.f32 %v6760_v8, %v6760_v8  ;;  %v7035_v33 = vadd.f32 %v4387_v17, %v3997_v38  ;;  %v7043_v1 = vmul.f32 %v6790_v21, %v6790_v21  ;;  %v405_v8 = vld [vmem:[%s6730_s6 + $0x5d0] sm:$0xff] }
  0xf1   : > { %1673 = vmatmul.mubr.f32.gmra.mxu1 %v389_v5  ;;  %1319 = vmatprep.mubr.f32.mxu0 %v396_v22  ;;  %v4405_v5 = vadd.f32 %v4012_v63, %v4011_v2  ;;  %v7039_v22 = vmul.f32 %v6773_v13, %v6773_v13  ;;  %v7047_v63 = vadd.f32 %v4396_v39, %v4005_v18  ;;  %v964_v17 = vld [vmem:[#allocation5 + $0xb08] sm:$0xff] }
  0xf2   : > { %1678 = vmatprep.mubr.f32.mxu1 %v398_v23  ;;  %1883 = vmatprep.subr.mxu0 %v972_v0  ;;  %v403_v23 = vld [vmem:[%s6730_s6 + $0x5c0] sm:$0xff]  ;;  %v4028_v2 = vmul.f32 %v6803_v28, %v6803_v28  ;;  %v4027_v0 = vmul.f32 %v6813_v34, %v6813_v34  ;;  %v4414_v21 = vadd.f32 %v4020_v62, %v4019_v3  ;;  %v1092_v38 = vld [vmem:[#allocation5 + $0xf08] sm:$0xff] }
  0xf3   : > { %2242 = vmatprep.subr.mxu1 %v1100_v7  ;;  %1884 = vmatpush2.msra.mxu0 %v971_v10  ;;  %v412_v7 = vld [vmem:[%s6730_s6 + $0x608] sm:$0xff]  ;;  %v414_v10 = vld [vmem:[%s6730_s6 + $0x618] sm:$0xff]  ;;  %v7055_v13 = vadd.f32 %v4405_v5, %v4013_v4  ;;  %v7061_v28 = vmul.f32 %v6806_v29, %v6806_v29  ;;  %v4029_v34 = vmul.f32 %v6816_v35, %v6816_v35  ;;  %v411_v35 = vld [vmem:[%s6730_s6 + $0x600] sm:$0xff] }
  0xf4   : > { %2243 = vmatpush2.msra.mxu1 %v1099_v16  ;;  %1320 = vmatmul.mubr.f32.gmra.mxu0 %v395_v12  ;;  %v4021_v16 = vmul.f32 %v6800_v27, %v6800_v27  ;;  %v4036_v12 = vmul.f32 %v6819_v36, %v6819_v36  ;;  %v963_v27 = vld [vmem:[#allocation5 + $0xb00] sm:$0xff]  ;;  %v7069_v39 = vmul.f32 %v6822_v37, %v6822_v37  ;;  %v413_v4 = vld [vmem:[%s6730_s6 + $0x610] sm:$0xff]  ;;  %v420_v5 = vld [vmem:[%s6730_s6 + $0x648] sm:$0xff] }
  0xf5   : > { %1679 = vmatmul.mubr.f32.gmra.mxu1 %v397_v55  ;;  %1325 = vmatprep.mubr.f32.mxu0 %v404_v48  ;;  %v1091_v55 = vld [vmem:[#allocation5 + $0xf00] sm:$0xff]  ;;  %v4052_v29 = vmul.f32 %v6851_v52, %v6851_v52  ;;  %v4051_v18 = vmul.f32 %v6861_v58, %v6861_v58  ;;  %v4423_v36 = vadd.f32 %v4028_v2, %v4027_v0  ;;  %v422_v37 = vld [vmem:[%s6730_s6 + $0x658] sm:$0xff]  ;;  %v1088_v3 = vld [vmem:[#allocation5 + $0xee8] sm:$0xff] }
  0xf6   : > { %1684 = vmatprep.mubr.f32.mxu1 %v406_v49  ;;  %1885 = vmatprep.subr.mxu0 %v968_v54  ;;  %v4060_v48 = vmul.f32 %v6867_v60, %v6867_v60  ;;  %v4059_v49 = vmul.f32 %v6877_v6, %v6877_v6  ;;  %v7083_v62 = vadd.f32 %v4414_v21, %v4021_v16  ;;  %v960_v60 = vld [vmem:[#allocation5 + $0xae8] sm:$0xff] }
  0xf7   : > { %2244 = vmatprep.subr.mxu1 %v1096_v11  ;;  %1886 = vmatpush2.msra.mxu0 %v967_v20  ;;  %v4035_v52 = vmul.f32 %v6829_v42, %v6829_v42  ;;  %v7089_v58 = vmul.f32 %v6832_v43, %v6832_v43  ;;  %v4044_v6 = vmul.f32 %v6835_v44, %v6835_v44  ;;  %v959_v43 = vld [vmem:[#allocation5 + $0xae0] sm:$0xff]  ;;  %v428_v0 = vld [vmem:[%s6730_s6 + $0x688] sm:$0xff] }
  0xf8   : > { %2245 = vmatpush2.msra.mxu1 %v1095_v26  ;;  %1326 = vmatmul.mubr.f32.gmra.mxu0 %v403_v23  ;;  %v4068_v54 = vmul.f32 %v6883_v14, %v6883_v14  ;;  %v4067_v42 = vmul.f32 %v6893_v24, %v6893_v24  ;;  %v1087_v11 = vld [vmem:[#allocation5 + $0xee0] sm:$0xff]  ;;  %v4043_v20 = vmul.f32 %v6845_v50, %v6845_v50  ;;  %v421_v14 = vld [vmem:[%s6730_s6 + $0x650] sm:$0xff]  ;;  %v956_v21 = vld [vmem:[#allocation5 + $0xac8] sm:$0xff] }
  0xf9   : > { %1685 = vmatmul.mubr.f32.gmra.mxu1 %v405_v8  ;;  %1331 = vmatprep.mubr.f32.mxu0 %v412_v7  ;;  %v4450_v26 = vadd.f32 %v4052_v29, %v4051_v18  ;;  %v4053_v23 = vmul.f32 %v6864_v59, %v6864_v59  ;;  %v419_v44 = vld [vmem:[%s6730_s6 + $0x640] sm:$0xff]  ;;  %v7103_v8 = vadd.f32 %v4423_v36, %v4029_v34  ;;  %v430_v7 = vld [vmem:[%s6730_s6 + $0x698] sm:$0xff]  ;;  %v1084_v16 = vld [vmem:[#allocation5 + $0xec8] sm:$0xff] }
  0xfa   : > { %1690 = vmatprep.mubr.f32.mxu1 %v414_v10  ;;  %1887 = vmatprep.subr.mxu0 %v964_v17  ;;  %v4459_v2 = vadd.f32 %v4060_v48, %v4059_v49  ;;  %v4061_v24 = vmul.f32 %v6880_v9, %v6880_v9  ;;  %v4432_v10 = vadd.f32 %v4036_v12, %v4035_v52  ;;  %v1083_v34 = vld [vmem:[#allocation5 + $0xec0] sm:$0xff]  ;;  %v429_v29 = vld [vmem:[%s6730_s6 + $0x690] sm:$0xff]  ;;  %v1080_v49 = vld [vmem:[#allocation5 + $0xea8] sm:$0xff] }
  0xfb   : > { %2246 = vmatprep.subr.mxu1 %v1092_v38  ;;  %1888 = vmatpush2.msra.mxu0 %v963_v27  ;;  %v4076_v50 = vmul.f32 %v6899_v30, %v6899_v30  ;;  %v4075_v59 = vmul.f32 %v6909_v40, %v6909_v40  ;;  %v4045_v9 = vmul.f32 %v6848_v51, %v6848_v51  ;;  %v955_v30 = vld [vmem:[#allocation5 + $0xac0] sm:$0xff] }
  0xfc   : > { %2247 = vmatpush2.msra.mxu1 %v1091_v55  ;;  %1332 = vmatmul.mubr.f32.gmra.mxu0 %v411_v35  ;;  %v4468_v17 = vadd.f32 %v4068_v54, %v4067_v42  ;;  %v4069_v38 = vmul.f32 %v6896_v25, %v6896_v25  ;;  %v4441_v40 = vadd.f32 %v4044_v6, %v4043_v20  ;;  %v427_v55 = vld [vmem:[%s6730_s6 + $0x680] sm:$0xff]  ;;  %v436_v35 = vld [vmem:[%s6730_s6 + $0x6c8] sm:$0xff]  ;;  %v437_v6 = vld [vmem:[%s6730_s6 + $0x6d0] sm:$0xff] }
  0xfd   : > { %1691 = vmatmul.mubr.f32.gmra.mxu1 %v413_v4  ;;  %1337 = vmatprep.mubr.f32.mxu0 %v420_v5  ;;  %v4054_v12 = vmul.f32 %v6854_v53, %v6854_v53  ;;  %v4451_v27 = vadd.f32 %v4450_v26, %v4053_v23  ;;  %v4062_v51 = vmul.f32 %v6870_v61, %v6870_v61  ;;  %v438_v4 = vld [vmem:[%s6730_s6 + $0x6d8] sm:$0xff]  ;;  %v952_v61 = vld [vmem:[#allocation5 + $0xaa8] sm:$0xff] }
  0xfe   : > { %1696 = vmatprep.mubr.f32.mxu1 %v422_v37  ;;  %1889 = vmatprep.subr.mxu0 %v960_v60  ;;  %v4460_v18 = vadd.f32 %v4459_v2, %v4061_v24  ;;  %v4077_v25 = vmul.f32 %v6912_v41, %v6912_v41  ;;  %v4477_v36 = vadd.f32 %v4076_v50, %v4075_v59  ;;  %v948_v23 = vld [vmem:[#allocation5 + $0xa88] sm:$0xff]  ;;  %v10648_v59 = vld [vmem:[#allocation15_spill] sm:$0xff] }
  0xff   : > { %2248 = vmatprep.subr.mxu1 %v1088_v3  ;;  %1890 = vmatpush2.msra.mxu0 %v959_v43  ;;  %v4084_v53 = vmul.f32 %v6915_v46, %v6915_v46  ;;  %v4083_v48 = vmul.f32 %v6925_v56, %v6925_v56  ;;  %v7133_v41 = vmul.f32 %v6838_v45, %v6838_v45  ;;  %v951_v46 = vld [vmem:[#allocation5 + $0xaa0] sm:$0xff]  ;;  %v444_v43 = vld [vmem:[%s6730_s6 + $0x708] sm:$0xff] }
 0x100   : > { %2249 = vmatpush2.msra.mxu1 %v1087_v11  ;;  %1338 = vmatmul.mubr.f32.gmra.mxu0 %v419_v44  ;;  %v4070_v5 = vmul.f32 %v6886_v15, %v6886_v15  ;;  %v4469_v37 = vadd.f32 %v4468_v17, %v4069_v38  ;;  %v1079_v56 = vld [vmem:[#allocation5 + $0xea0] sm:$0xff]  ;;  %v7138_v52 = vadd.f32 %v4432_v10, %v7089_v58  ;;  %v446_v58 = vld [vmem:[%s6730_s6 + $0x718] sm:$0xff]  ;;  %v10646_v2 = vld [vmem:[#allocation13_spill] sm:$0xff] }
 0x101   : > { %1697 = vmatmul.mubr.f32.gmra.mxu1 %v421_v14  ;;  %1343 = vmatprep.mubr.f32.mxu0 %v428_v0  ;;  %v7140_v60 = vadd.f32 %v4441_v40, %v4045_v9  ;;  %v7142_v3 = vadd.f32 %v4451_v27, %v4054_v12  ;;  %v435_v45 = vld [vmem:[%s6730_s6 + $0x6c0] sm:$0xff]  ;;  %v7146_v54 = vadd.f32 %v4460_v18, %v4062_v51  ;;  %v10647_v10 = vld [vmem:[#allocation14_spill] sm:$0xff]  ;;  %v944_v40 = vld [vmem:[#allocation5 + $0xa68] sm:$0xff] }
 0x102   : > { %1702 = vmatprep.mubr.f32.mxu1 %v430_v7  ;;  %1891 = vmatprep.subr.mxu0 %v956_v21  ;;  %v4078_v15 = vmul.f32 %v6902_v31, %v6902_v31  ;;  %v7152_v42 = vmul.f32 %v6918_v47, %v6918_v47  ;;  %v4478_v11 = vadd.f32 %v4477_v36, %v4077_v25  ;;  %v1076_v31 = vld [vmem:[#allocation5 + $0xe88] sm:$0xff]  ;;  %v1075_v0 = vld [vmem:[#allocation5 + $0xe80] sm:$0xff]  ;;  %v445_v9 = vld [vmem:[%s6730_s6 + $0x710] sm:$0xff] }
 0x103   : > { %2250 = vmatprep.subr.mxu1 %v1084_v16  ;;  %1892 = vmatpush2.msra.mxu0 %v955_v30  ;;  %v4486_v20 = vadd.f32 %v4084_v53, %v4083_v48  ;;  %v4085_v26 = vmul.f32 %v6928_v57, %v6928_v57  ;;  %v7158_v44 = vadd.f32 %v4469_v37, %v4070_v5  ;;  %v10645_v47 = vld [vmem:[#allocation12_spill] sm:$0xff]  ;;  %v10650_v53 = vld [vmem:[#allocation17_spill] sm:$0xff] }
 0x104   : > { %2251 = vmatpush2.msra.mxu1 %v1083_v34  ;;  %1344 = vmatmul.mubr.f32.gmra.mxu0 %v427_v55  ;;  %v4092_v14 = vmul.f32 %v10645_v47, %v10645_v47  ;;  %v7164_v24 = vmul.f32 %v10646_v2, %v10646_v2  ;;  %v947_v57 = vld [vmem:[#allocation5 + $0xa80] sm:$0xff]  ;;  %v4091_v50 = vmul.f32 %v10647_v10, %v10647_v10  ;;  %v452_v30 = vld [vmem:[%s6730_s6 + $0x748] sm:$0xff]  ;;  %v454_v34 = vld [vmem:[%s6730_s6 + $0x758] sm:$0xff] }
 0x105   : > { %1703 = vmatmul.mubr.f32.gmra.mxu1 %v429_v29  ;;  %1349 = vmatprep.mubr.f32.mxu0 %v436_v35  ;;  %v239_v7 = vld [vmem:[%s6730_s6 + $0xa0] sm:$0xff]  ;;  %v7171_v21 = vmul.f32 %v10648_v59, %v10648_v59  ;;  %v4389_v27 = vadd.f32 %v7035_v33, %v7029_v19  ;;  %v4407_v55 = vadd.f32 %v7055_v13, %v7039_v22  ;;  %v1072_v19 = vld [vmem:[#allocation5 + $0xe68] sm:$0xff]  ;;  %v249_v59 = vld [vmem:[%s6730_s6 + $0xf0] sm:$0xff] }
 0x106   : > { %1708 = vmatprep.mubr.f32.mxu1 %v438_v4  ;;  %1893 = vmatprep.subr.mxu0 %v952_v61  ;;  %v443_v16 = vld [vmem:[%s6730_s6 + $0x700] sm:$0xff]  ;;  %v4015_v38 = vmul.f32 %v239_v7, %v239_v7  ;;  %v7182_v29 = vadd.f32 %v4478_v11, %v4078_v15  ;;  %v7184_v51 = vadd.f32 %v4486_v20, %v4085_v26  ;;  %v453_v4 = vld [vmem:[%s6730_s6 + $0x750] sm:$0xff]  ;;  %v460_v13 = vld [vmem:[%s6730_s6 + $0x788] sm:$0xff] }
 0x107   : > { %2252 = vmatprep.subr.mxu1 %v1080_v49  ;;  %1894 = vmatpush2.msra.mxu0 %v951_v46  ;;  %v223_v17 = vld [vmem:[%s6730_s6 + $0x20] sm:$0xff]  ;;  %v7195_v22 = vmul.f32 %v10650_v53, %v10650_v53  ;;  %v224_v61 = vld [vmem:[%s6730_s6 + $0x28] sm:$0xff]  ;;  %v4398_v37 = vadd.f32 %v7047_v63, %v7033_v32  ;;  %v7202_v46 = vadd.f32 %v4092_v14, %v4091_v50  ;;  %v233_v11 = vld [vmem:[%s6730_s6 + $0x70] sm:$0xff] }
 0x108   : > { %2253 = vmatpush2.msra.mxu1 %v1079_v56  ;;  %1350 = vmatmul.mubr.f32.gmra.mxu0 %v435_v45  ;;  %v3999_v12 = vmul.f32 %v223_v17, %v223_v17  ;;  %v10649_v18 = vld [vmem:[#allocation16_spill] sm:$0xff]  ;;  %v462_v56 = vld [vmem:[%s6730_s6 + $0x798] sm:$0xff]  ;;  %v4408_v63 = vadd.f32 %v4407_v55, %v4015_v38  ;;  %v7211_v14 = vmul.f32 %v233_v11, %v233_v11  ;;  %v225_v7 = vld [vmem:[%s6730_s6 + $0x30] sm:$0xff] }
 0x109   : > { %1709 = vmatmul.mubr.f32.gmra.mxu1 %v437_v6  ;;  %1355 = vmatprep.mubr.f32.mxu0 %v444_v43  ;;  %v7188_v25 = vmul.f32 %v10649_v18, %v10649_v18  ;;  %v451_v35 = vld [vmem:[%s6730_s6 + $0x740] sm:$0xff]  ;;  %v232_v49 = vld [vmem:[%s6730_s6 + $0x68] sm:$0xff]  ;;  %v4000_v6 = vmul.f32 %v224_v61, %v224_v61  ;;  %v461_v17 = vld [vmem:[%s6730_s6 + $0x790] sm:$0xff]  ;;  %v4434_v53 = vadd.f32 %v7138_v52, %v7069_v39 }
 0x10a   : > { %1714 = vmatprep.mubr.f32.mxu1 %v446_v58  ;;  %1895 = vmatprep.subr.mxu0 %v948_v23  ;;  %v943_v36 = vld [vmem:[#allocation5 + $0xa60] sm:$0xff]  ;;  %v940_v45 = vld [vmem:[#allocation5 + $0xa48] sm:$0xff]  ;;  %v7205_v15 = vmul.f32 %v232_v49, %v232_v49  ;;  %v4390_v32 = vadd.f32 %v4389_v27, %v3999_v12  ;;  %v7235_v49 = vld [vmem:[%s6730_s6 + $0x38] sm:$0xff]  ;;  %v4443_v39 = vadd.f32 %v7140_v60, %v7133_v41 }
 0x10b   : > { %2254 = vmatprep.subr.mxu1 %v1076_v31  ;;  %1896 = vmatpush2.msra.mxu0 %v947_v57  ;;  %v231_v33 = vld [vmem:[%s6730_s6 + $0x60] sm:$0xff]  ;;  %v240_v43 = vld [vmem:[%s6730_s6 + $0xa8] sm:$0xff]  ;;  %v4416_v57 = vadd.f32 %v7083_v62, %v7043_v1  ;;  %v241_v1 = vld [vmem:[%s6730_s6 + $0xb0] sm:$0xff]  ;;  %v4002_v52 = vmul.f32 %v7235_v49, %v7235_v49 }
 0x10c   : > { %2255 = vmatpush2.msra.mxu1 %v1075_v0  ;;  %1356 = vmatmul.mubr.f32.gmra.mxu0 %v443_v16  ;;  %v1071_v48 = vld [vmem:[#allocation5 + $0xe60] sm:$0xff]  ;;  %v4007_v5 = vmul.f32 %v231_v33, %v231_v33  ;;  %v4016_v20 = vmul.f32 %v240_v43, %v240_v43  ;;  %v1068_v31 = vld [vmem:[#allocation5 + $0xe48] sm:$0xff]  ;;  %v4391_v55 = vadd.f32 %v4390_v32, %v4000_v6  ;;  %v478_v6 = vld [vmem:[%s6730_s6 + $0x818] sm:$0xff] }
 0x10d   : > { %1715 = vmatmul.mubr.f32.gmra.mxu1 %v445_v9  ;;  %1361 = vmatprep.mubr.f32.mxu0 %v452_v30  ;;  %v939_v58 = vld [vmem:[#allocation5 + $0xa40] sm:$0xff]  ;;  %v248_v50 = vld [vmem:[%s6730_s6 + $0xe8] sm:$0xff]  ;;  %v4425_v9 = vadd.f32 %v7103_v8, %v7061_v28  ;;  %v7224_v30 = vmul.f32 %v249_v59, %v249_v59  ;;  %v4017_v28 = vmul.f32 %v241_v1, %v241_v1  ;;  %v242_v43 = vld [vmem:[%s6730_s6 + $0xb8] sm:$0xff] }
 0x10e   : > { %1720 = vmatprep.mubr.f32.mxu1 %v454_v34  ;;  %1897 = vmatprep.subr.mxu0 %v944_v40  ;;  %v247_v26 = vld [vmem:[%s6730_s6 + $0xe0] sm:$0xff]  ;;  %v4399_v10 = vadd.f32 %v4398_v37, %v4007_v5  ;;  %v468_v38 = vld [vmem:[%s6730_s6 + $0x7c8] sm:$0xff]  ;;  %v4024_v62 = vmul.f32 %v248_v50, %v248_v50  ;;  %v4001_v34 = vmul.f32 %v225_v7, %v225_v7  ;;  %v470_v40 = vld [vmem:[%s6730_s6 + $0x7d8] sm:$0xff] }
 0x10f   : > { %2256 = vmatprep.subr.mxu1 %v1072_v19  ;;  %v459_v23 = vld [vmem:[%s6730_s6 + $0x780] sm:$0xff]  ;;  %1898 = vmatpush2.msra.mxu0 %v943_v36  ;;  %v4023_v2 = vmul.f32 %v247_v26, %v247_v26  ;;  %v936_v12 = vld [vmem:[#allocation5 + $0xa28] sm:$0xff]  ;;  %v4409_v8 = vadd.f32 %v4408_v63, %v4016_v20  ;;  %v4018_v63 = vmul.f32 %v242_v43, %v242_v43  ;;  %v7250_v7 = vld [vmem:[%s6730_s6 + $0x78] sm:$0xff] }
 0x110   : > { %2257 = vmatpush2.msra.mxu1 %v1071_v48  ;;  %v1067_v47 = vld [vmem:[#allocation5 + $0xe40] sm:$0xff]  ;;  %1362 = vmatmul.mubr.f32.gmra.mxu0 %v451_v35  ;;  %v469_v35 = vld [vmem:[%s6730_s6 + $0x7d0] sm:$0xff]  ;;  %v256_v19 = vld [vmem:[%s6730_s6 + $0x128] sm:$0xff]  ;;  %v4392_v32 = vadd.f32 %v4391_v55, %v4001_v34  ;;  %v4010_v1 = vmul.f32 %v7250_v7, %v7250_v7 }
 0x111   : > { %v255_v0 = vld [vmem:[%s6730_s6 + $0x120] sm:$0xff]  ;;  %1721 = vmatmul.mubr.f32.gmra.mxu1 %v453_v4  ;;  %1367 = vmatprep.mubr.f32.mxu0 %v460_v13  ;;  %v1064_v4 = vld [vmem:[#allocation5 + $0xe28] sm:$0xff]  ;;  %v4417_v36 = vadd.f32 %v4416_v57, %v4023_v2  ;;  %v4032_v5 = vmul.f32 %v256_v19, %v256_v19  ;;  %v486_v34 = vld [vmem:[%s6730_s6 + $0x858] sm:$0xff] }
 0x112   : > { %v4031_v16 = vmul.f32 %v255_v0, %v255_v0  ;;  %1726 = vmatprep.mubr.f32.mxu1 %v462_v56  ;;  %1899 = vmatprep.subr.mxu0 %v940_v45  ;;  %v263_v27 = vld [vmem:[%s6730_s6 + $0x160] sm:$0xff]  ;;  %v476_v45 = vld [vmem:[%s6730_s6 + $0x808] sm:$0xff]  ;;  %v10651_v19 = vld [vmem:[#allocation18_spill] sm:$0xff] }
 0x113   : > { %2258 = vmatprep.subr.mxu1 %v1068_v31  ;;  %v467_v18 = vld [vmem:[%s6730_s6 + $0x7c0] sm:$0xff]  ;;  %1900 = vmatpush2.msra.mxu0 %v939_v58  ;;  %v4039_v33 = vmul.f32 %v263_v27, %v263_v27  ;;  %v4400_v58 = vadd.f32 %v4399_v10, %v7205_v15  ;;  %v932_v11 = vld [vmem:[#allocation5 + $0xa08] sm:$0xff]  ;;  %v257_v31 = vld [vmem:[%s6730_s6 + $0x130] sm:$0xff]  ;;  %v4418_v15 = vadd.f32 %v4417_v36, %v4024_v62 }
 0x114   : > { %2259 = vmatpush2.msra.mxu1 %v1067_v47  ;;  %v271_v13 = vld [vmem:[%s6730_s6 + $0x1a0] sm:$0xff]  ;;  %1368 = vmatmul.mubr.f32.gmra.mxu0 %v459_v23  ;;  %v4426_v37 = vadd.f32 %v4425_v9, %v4031_v16  ;;  %v1060_v20 = vld [vmem:[#allocation5 + $0xe08] sm:$0xff]  ;;  %v4410_v23 = vadd.f32 %v4409_v8, %v4017_v28  ;;  %v265_v47 = vld [vmem:[%s6730_s6 + $0x170] sm:$0xff]  ;;  %v4033_v10 = vmul.f32 %v257_v31, %v257_v31 }
 0x115   : > { %1727 = vmatmul.mubr.f32.gmra.mxu1 %v461_v17  ;;  %v935_v48 = vld [vmem:[#allocation5 + $0xa20] sm:$0xff]  ;;  %v4047_v56 = vmul.f32 %v271_v13, %v271_v13  ;;  %1373 = vmatprep.mubr.f32.mxu0 %v468_v38  ;;  %v264_v26 = vld [vmem:[%s6730_s6 + $0x168] sm:$0xff]  ;;  %v4435_v60 = vadd.f32 %v4434_v53, %v4039_v33  ;;  %v4041_v50 = vmul.f32 %v265_v47, %v265_v47  ;;  %v477_v9 = vld [vmem:[%s6730_s6 + $0x810] sm:$0xff] }
 0x116   : > { %v1063_v61 = vld [vmem:[#allocation5 + $0xe20] sm:$0xff]  ;;  %1732 = vmatprep.mubr.f32.mxu1 %v470_v40  ;;  %1901 = vmatprep.subr.mxu0 %v936_v12  ;;  %v4040_v41 = vmul.f32 %v264_v26, %v264_v26  ;;  %v272_v2 = vld [vmem:[%s6730_s6 + $0x1a8] sm:$0xff]  ;;  %v4401_v62 = vadd.f32 %v4400_v58, %v7211_v14  ;;  %v674_v40 = vld [vmem:[#allocation5 + $0x1f8] sm:$0xff]  ;;  %v4393_v27 = vadd.f32 %v4392_v32, %v4002_v52 }
 0x117   : > { %2260 = vmatprep.subr.mxu1 %v1064_v4  ;;  %1902 = vmatpush2.msra.mxu0 %v935_v48  ;;  %v931_v57 = vld [vmem:[#allocation5 + $0xa00] sm:$0xff]  ;;  %v4048_v59 = vmul.f32 %v272_v2, %v272_v2  ;;  %v484_v17 = vld [vmem:[%s6730_s6 + $0x848] sm:$0xff]  ;;  %v4444_v38 = vadd.f32 %v4443_v39, %v4047_v56  ;;  %v250_v12 = vld [vmem:[%s6730_s6 + $0xf8] sm:$0xff]  ;;  %v4411_v55 = vadd.f32 %v4410_v23, %v4018_v63 }
 0x118   : > { %2261 = vmatpush2.msra.mxu1 %v1063_v61  ;;  %1374 = vmatmul.mubr.f32.gmra.mxu0 %v467_v18  ;;  %v1059_v0 = vld [vmem:[#allocation5 + $0xe00] sm:$0xff]  ;;  %v4427_v28 = vadd.f32 %v4426_v37, %v4032_v5  ;;  %v802_v8 = vld [vmem:[#allocation5 + $0x5f8] sm:$0xff]  ;;  %v273_v18 = vld [vmem:[%s6730_s6 + $0x1b0] sm:$0xff]  ;;  %v4026_v4 = vmul.f32 %v250_v12, %v250_v12  ;;  %v4419_v14 = vadd.f32 %v4418_v15, %v7224_v30 }
 0x119   : > { %1733 = vmatmul.mubr.f32.gmra.mxu1 %v469_v35  ;;  %1379 = vmatprep.mubr.f32.mxu0 %v476_v45  ;;  %v475_v16 = vld [vmem:[%s6730_s6 + $0x800] sm:$0xff]  ;;  %v4436_v36 = vadd.f32 %v4435_v60, %v4040_v41  ;;  %v7265_v33 = vmul.f32 %v10651_v19, %v10651_v19  ;;  %v4049_v53 = vmul.f32 %v273_v18, %v273_v18  ;;  %v280_v13 = vld [vmem:[%s6730_s6 + $0x1e8] sm:$0xff]  ;;  %v485_v37 = vld [vmem:[%s6730_s6 + $0x850] sm:$0xff] }
 0x11a   : > { %1738 = vmatprep.mubr.f32.mxu1 %v478_v6  ;;  %1903 = vmatprep.subr.mxu0 %v932_v11  ;;  %v279_v35 = vld [vmem:[%s6730_s6 + $0x1e0] sm:$0xff]  ;;  %v258_v56 = vld [vmem:[%s6730_s6 + $0x138] sm:$0xff]  ;;  %v4056_v30 = vmul.f32 %v280_v13, %v280_v13  ;;  %v4402_v6 = vadd.f32 %v4401_v62, %v4010_v1  ;;  %v492_v43 = vld [vmem:[%s6730_s6 + $0x888] sm:$0xff]  ;;  %v4428_v11 = vadd.f32 %v4427_v28, %v4033_v10 }
 0x11b   : > { %2262 = vmatprep.subr.mxu1 %v1060_v20  ;;  %1904 = vmatpush2.msra.mxu0 %v931_v57  ;;  %v4055_v48 = vmul.f32 %v279_v35, %v279_v35  ;;  %v287_v61 = vld [vmem:[%s6730_s6 + $0x220] sm:$0xff]  ;;  %v494_v39 = vld [vmem:[%s6730_s6 + $0x898] sm:$0xff]  ;;  %v4034_v58 = vmul.f32 %v258_v56, %v258_v56  ;;  %v4445_v20 = vadd.f32 %v4444_v38, %v4048_v59  ;;  %v281_v60 = vld [vmem:[%s6730_s6 + $0x1f0] sm:$0xff] }
 0x11c   : > { %2263 = vmatpush2.msra.mxu1 %v1059_v0  ;;  %1380 = vmatmul.mubr.f32.gmra.mxu0 %v475_v16  ;;  %v483_v5 = vld [vmem:[%s6730_s6 + $0x840] sm:$0xff]  ;;  %v4063_v45 = vmul.f32 %v287_v61, %v287_v61  ;;  %v266_v52 = vld [vmem:[%s6730_s6 + $0x178] sm:$0xff]  ;;  %v4420_v26 = vadd.f32 %v4419_v14, %v4026_v4  ;;  %v4437_v63 = vadd.f32 %v4436_v36, %v4041_v50  ;;  %v288_v47 = vld [vmem:[%s6730_s6 + $0x228] sm:$0xff] }
 0x11d   : > { %1739 = vmatmul.mubr.f32.gmra.mxu1 %v477_v9  ;;  %1385 = vmatprep.mubr.f32.mxu0 %v484_v17  ;;  %v4042_v32 = vmul.f32 %v266_v52, %v266_v52  ;;  %v7277_v23 = vadd.f32 %v7184_v51, %v7152_v42  ;;  %v10652_v31 = vld [vmem:[#allocation19_spill] sm:$0xff]  ;;  %v4453_v2 = vadd.f32 %v7142_v3, %v4055_v48  ;;  %v10653_v15 = vld [vmem:[#allocation20_spill] sm:$0xff]  ;;  %v493_v51 = vld [vmem:[%s6730_s6 + $0x890] sm:$0xff] }
 0x11e   : > { %1744 = vmatprep.mubr.f32.mxu1 %v486_v34  ;;  %2559 = vmatprep.subr.mxu0 %v674_v40  ;;  %v7281_v41 = vmul.f32 %v10652_v31, %v10652_v31  ;;  %v7288_v57 = vmul.f32 %v10653_v15, %v10653_v15  ;;  %v491_v42 = vld [vmem:[%s6730_s6 + $0x880] sm:$0xff]  ;;  %v274_v0 = vld [vmem:[%s6730_s6 + $0x1b8] sm:$0xff]  ;;  %v4064_v10 = vmul.f32 %v288_v47, %v288_v47  ;;  %v500_v59 = vld [vmem:[%s6730_s6 + $0x8c8] sm:$0xff] }
 0x11f   : > { %2918 = vmatprep.subr.mxu1 %v802_v8  ;;  %4394 = vadd.xlane.f32.xlu0 %v4393_v27  ;;  %v4057_v50 = vmul.f32 %v281_v60, %v281_v60  ;;  %v502_v16 = vld [vmem:[%s6730_s6 + $0x8d8] sm:$0xff]  ;;  %v4429_v17 = vadd.f32 %v4428_v11, %v4034_v58  ;;  %v4050_v3 = vmul.f32 %v274_v0, %v274_v0  ;;  %v295_v62 = vld [vmem:[%s6730_s6 + $0x260] sm:$0xff]  ;;  %v289_v8 = vld [vmem:[%s6730_s6 + $0x230] sm:$0xff] }
 0x120   : > { %4412 = vadd.xlane.f32.xlu1 %v4411_v55  ;;  %1386 = vmatmul.mubr.f32.gmra.mxu0 %v483_v5  ;;  %v282_v9 = vld [vmem:[%s6730_s6 + $0x1f8] sm:$0xff]  ;;  %v4446_v38 = vadd.f32 %v4445_v20, %v4049_v53  ;;  %v4454_v1 = vadd.f32 %v4453_v2, %v4056_v30  ;;  %v4438_v34 = vadd.f32 %v4437_v63, %v4042_v32  ;;  %v499_v28 = vld [vmem:[%s6730_s6 + $0x8c0] sm:$0xff]  ;;  %v501_v14 = vld [vmem:[%s6730_s6 + $0x8d0] sm:$0xff] }
 0x121   : > { %1745 = vmatmul.mubr.f32.gmra.mxu1 %v485_v37  ;;  %1391 = vmatprep.mubr.f32.mxu0 %v492_v43  ;;  %v4058_v40 = vmul.f32 %v282_v9, %v282_v9  ;;  %v4462_v12 = vadd.f32 %v7146_v54, %v4063_v45  ;;  %v5837_v27 = vld [vmem:[%s6730_s6 + $0x398] sm:$0xff]  ;;  %v4071_v18 = vmul.f32 %v295_v62, %v295_v62  ;;  %v296_v54 = vld [vmem:[%s6730_s6 + $0x268] sm:$0xff]  ;;  %v303_v36 = vld [vmem:[%s6730_s6 + $0x2a0] sm:$0xff] }
 0x122   : > { %1750 = vmatprep.mubr.f32.mxu1 %v494_v39  ;;  %v7299_v55 = vmul.f32 %v5837_v27, %v5837_v27  ;;  %v4455_v35 = vadd.f32 %v4454_v1, %v4057_v50  ;;  %v4496_v4 = vadd.f32 %v7202_v46, %v7171_v21  ;;  %v4065_v19 = vmul.f32 %v289_v8, %v289_v8  ;;  %v5838_v13 = vld [vmem:[%s6730_s6 + $0x380] sm:$0xff]  ;;  %v508_v61 = vld [vmem:[%s6730_s6 + $0x908] sm:$0xff]  ;;  %v510_v5 = vld [vmem:[%s6730_s6 + $0x918] sm:$0xff] }
 0x123   : > { %4403 = vadd.xlane.f32.xlu0 %v4402_v6  ;;  %v4463_v53 = vadd.f32 %v4462_v12, %v4064_v10  ;;  %v4107_v48 = vmul.f32 %v5838_v13, %v5838_v13  ;;  %v290_v37 = vld [vmem:[%s6730_s6 + $0x238] sm:$0xff]  ;;  %v4072_v56 = vmul.f32 %v296_v54, %v296_v54  ;;  %v4079_v30 = vmul.f32 %v303_v36, %v303_v36  ;;  %v5839_v39 = vld [vmem:[%s6730_s6 + $0x390] sm:$0xff]  ;;  %v304_v11 = vld [vmem:[%s6730_s6 + $0x2a8] sm:$0xff] }
 0x124   : > { %4421 = vadd.xlane.f32.xlu1 %v4420_v26  ;;  %1392 = vmatmul.mubr.f32.gmra.mxu0 %v491_v42  ;;  %v4447_v45 = vadd.f32 %v4446_v38, %v4050_v3  ;;  %v4456_v21 = vadd.f32 %v4455_v35, %v4058_v40  ;;  %v4066_v46 = vmul.f32 %v290_v37, %v290_v37  ;;  %v297_v58 = vld [vmem:[%s6730_s6 + $0x270] sm:$0xff]  ;;  %v5840_v26 = vld [vmem:[%s6730_s6 + $0x3c8] sm:$0xff]  ;;  %v507_v63 = vld [vmem:[%s6730_s6 + $0x900] sm:$0xff] }
 0x125   : > { %1751 = vmatmul.mubr.f32.gmra.mxu1 %v493_v51  ;;  %1397 = vmatprep.mubr.f32.mxu0 %v500_v59  ;;  %v4464_v6 = vadd.f32 %v4463_v53, %v4065_v19  ;;  %v4504_v43 = vadd.f32 %v7188_v25, %v7265_v33  ;;  %v4109_v52 = vmul.f32 %v5839_v39, %v5839_v39  ;;  %v509_v31 = vld [vmem:[%s6730_s6 + $0x910] sm:$0xff]  ;;  %v311_v33 = vld [vmem:[%s6730_s6 + $0x2e0] sm:$0xff]  ;;  %v5841_v2 = vld [vmem:[%s6730_s6 + $0x3d8] sm:$0xff] }
 0x126   : > { %1756 = vmatprep.mubr.f32.mxu1 %v502_v16  ;;  %v4471_v20 = vadd.f32 %v7158_v44, %v4071_v18  ;;  %v7319_v32 = vmul.f32 %v5840_v26, %v5840_v26  ;;  %v4080_v25 = vmul.f32 %v304_v11, %v304_v11  ;;  %v4073_v60 = vmul.f32 %v297_v58, %v297_v58  ;;  %v516_v42 = vld [vmem:[%s6730_s6 + $0x948] sm:$0xff]  ;;  %v518_v51 = vld [vmem:[%s6730_s6 + $0x958] sm:$0xff]  ;;  %v305_v3 = vld [vmem:[%s6730_s6 + $0x2b0] sm:$0xff] }
 0x127   : > { %4430 = vadd.xlane.f32.xlu0 %v4429_v17  ;;  %v4513_v47 = vadd.f32 %v7288_v57, %v4107_v48  ;;  %v7326_v15 = vmul.f32 %v5841_v2, %v5841_v2  ;;  %v298_v44 = vld [vmem:[%s6730_s6 + $0x278] sm:$0xff]  ;;  %v4087_v0 = vmul.f32 %v311_v33, %v311_v33  ;;  %v4465_v50 = vadd.f32 %v4464_v6, %v4066_v46  ;;  %v515_v17 = vld [vmem:[%s6730_s6 + $0x940] sm:$0xff]  ;;  %v524_v40 = vld [vmem:[%s6730_s6 + $0x988] sm:$0xff] }
 0x128   : > { %4439 = vadd.xlane.f32.xlu1 %v4438_v34  ;;  %1398 = vmatmul.mubr.f32.gmra.mxu0 %v499_v28  ;;  %v4472_v10 = vadd.f32 %v4471_v20, %v4072_v56  ;;  %v4074_v59 = vmul.f32 %v298_v44, %v298_v44  ;;  %v4480_v57 = vadd.f32 %v7182_v29, %v4079_v30  ;;  %v5842_v1 = vld [vmem:[%s6730_s6 + $0x3c0] sm:$0xff]  ;;  %v517_v34 = vld [vmem:[%s6730_s6 + $0x950] sm:$0xff]  ;;  %v312_v29 = vld [vmem:[%s6730_s6 + $0x2e8] sm:$0xff] }
 0x129   : > { %1757 = vmatmul.mubr.f32.gmra.mxu1 %v501_v14  ;;  %1403 = vmatprep.mubr.f32.mxu0 %v508_v61  ;;  %v4497_v16 = vadd.f32 %v4496_v4, %v7164_v24  ;;  %v4505_v9 = vadd.f32 %v4504_v43, %v7281_v41  ;;  %v4115_v62 = vmul.f32 %v5842_v1, %v5842_v1  ;;  %v5843_v27 = vld [vmem:[%s6730_s6 + $0x3d0] sm:$0xff]  ;;  %v526_v8 = vld [vmem:[%s6730_s6 + $0x998] sm:$0xff]  ;;  %v319_v4 = vld [vmem:[%s6730_s6 + $0x320] sm:$0xff] }
 0x12a   : > { %1762 = vmatprep.mubr.f32.mxu1 %v510_v5  ;;  %v4473_v38 = vadd.f32 %v4472_v10, %v4073_v60  ;;  %v4081_v12 = vmul.f32 %v305_v3, %v305_v3  ;;  %v4481_v24 = vadd.f32 %v4480_v57, %v4080_v25  ;;  %v4514_v41 = vadd.f32 %v4513_v47, %v4109_v52  ;;  %v306_v18 = vld [vmem:[%s6730_s6 + $0x2b8] sm:$0xff]  ;;  %v5844_v48 = vld [vmem:[%s6730_s6 + $0x408] sm:$0xff]  ;;  %v5845_v5 = vld [vmem:[%s6730_s6 + $0x400] sm:$0xff] }
 0x12b   : > { %4448 = vadd.xlane.f32.xlu0 %v4447_v45  ;;  %v4117_v28 = vmul.f32 %v5843_v27, %v5843_v27  ;;  %v4088_v35 = vmul.f32 %v312_v29, %v312_v29  ;;  %v4095_v54 = vmul.f32 %v319_v4, %v319_v4  ;;  %v4082_v36 = vmul.f32 %v306_v18, %v306_v18  ;;  %v313_v56 = vld [vmem:[%s6730_s6 + $0x2f0] sm:$0xff]  ;;  %v320_v30 = vld [vmem:[%s6730_s6 + $0x328] sm:$0xff]  ;;  %v523_v45 = vld [vmem:[%s6730_s6 + $0x980] sm:$0xff] }
 0x12c   : > { %4457 = vadd.xlane.f32.xlu1 %v4456_v21  ;;  %1404 = vmatmul.mubr.f32.gmra.mxu0 %v507_v63  ;;  %v4474_v14 = vadd.f32 %v4473_v38, %v4074_v59  ;;  %v4482_v19 = vadd.f32 %v4481_v24, %v4081_v12  ;;  %v4489_v53 = vadd.f32 %v7277_v23, %v4087_v0  ;;  %v525_v21 = vld [vmem:[%s6730_s6 + $0x990] sm:$0xff]  ;;  %v532_v23 = vld [vmem:[%s6730_s6 + $0x9c8] sm:$0xff]  ;;  %v5846_v39 = vld [vmem:[%s6730_s6 + $0x418] sm:$0xff] }
 0x12d   : > { %1763 = vmatmul.mubr.f32.gmra.mxu1 %v509_v31  ;;  %1409 = vmatprep.mubr.f32.mxu0 %v516_v42  ;;  %v4506_v13 = vadd.f32 %v4505_v9, %v7195_v22  ;;  %v4124_v61 = vmul.f32 %v5844_v48, %v5844_v48  ;;  %v4123_v37 = vmul.f32 %v5845_v5, %v5845_v5  ;;  %v5847_v58 = vld [vmem:[%s6730_s6 + $0x410] sm:$0xff]  ;;  %v534_v20 = vld [vmem:[%s6730_s6 + $0x9d8] sm:$0xff]  ;;  %v327_v63 = vld [vmem:[%s6730_s6 + $0x360] sm:$0xff] }
 0x12e   : > { %1768 = vmatprep.mubr.f32.mxu1 %v518_v51  ;;  %v4096_v46 = vmul.f32 %v320_v30, %v320_v30  ;;  %v4483_v22 = vadd.f32 %v4482_v19, %v4082_v36  ;;  %v4089_v6 = vmul.f32 %v313_v56, %v313_v56  ;;  %v4522_v43 = vadd.f32 %v7319_v32, %v4115_v62  ;;  %v314_v26 = vld [vmem:[%s6730_s6 + $0x2f8] sm:$0xff]  ;;  %v5848_v2 = vld [vmem:[%s6730_s6 + $0x448] sm:$0xff]  ;;  %v7366_v51 = vld [vmem:[%s6730_s6 + $0x9c0] sm:$0xff] }
 0x12f   : > { %4466 = vadd.xlane.f32.xlu0 %v4465_v50  ;;  %v7355_v52 = vmul.f32 %v5846_v39, %v5846_v39  ;;  %v4125_v11 = vmul.f32 %v5847_v58, %v5847_v58  ;;  %v4490_v31 = vadd.f32 %v4489_v53, %v4088_v35  ;;  %v7362_v25 = vadd.f32 %v4514_v41, %v7299_v55  ;;  %v321_v44 = vld [vmem:[%s6730_s6 + $0x330] sm:$0xff]  ;;  %v5849_v0 = vld [vmem:[%s6730_s6 + $0x458] sm:$0xff]  ;;  %v540_v59 = vld [vmem:[%s6730_s6 + $0xa08] sm:$0xff] }
 0x130   : > { %1410 = vmatmul.mubr.f32.gmra.mxu0 %v515_v17  ;;  %4475 = vadd.xlane.f32.xlu1 %v4474_v14  ;;  %v4103_v33 = vmul.f32 %v327_v63, %v327_v63  ;;  %v4090_v32 = vmul.f32 %v314_v26, %v314_v26  ;;  %v4498_v60 = vadd.f32 %v4497_v16, %v4095_v54  ;;  %v533_v50 = vld [vmem:[%s6730_s6 + $0x9d0] sm:$0xff]  ;;  %v328_v57 = vld [vmem:[%s6730_s6 + $0x368] sm:$0xff]  ;;  %v5850_v3 = vld [vmem:[%s6730_s6 + $0x440] sm:$0xff] }
 0x131   : > { %1769 = vmatmul.mubr.f32.gmra.mxu1 %v517_v34  ;;  %1415 = vmatprep.mubr.f32.mxu0 %v524_v40  ;;  %v4531_v47 = vadd.f32 %v4124_v61, %v4123_v37  ;;  %v4132_v42 = vmul.f32 %v5848_v2, %v5848_v2  ;;  %v4491_v55 = vadd.f32 %v4490_v31, %v4089_v6  ;;  %v542_v1 = vld [vmem:[%s6730_s6 + $0xa18] sm:$0xff]  ;;  %v335_v40 = vld [vmem:[%s6730_s6 + $0x3a0] sm:$0xff]  ;;  %v5851_v18 = vld [vmem:[%s6730_s6 + $0x488] sm:$0xff] }
 0x132   : > { %1774 = vmatprep.mubr.f32.mxu1 %v526_v8  ;;  %v7370_v10 = vmul.f32 %v5849_v0, %v5849_v0  ;;  %v4097_v16 = vmul.f32 %v321_v44, %v321_v44  ;;  %v4499_v9 = vadd.f32 %v4498_v60, %v4096_v46  ;;  %v4523_v17 = vadd.f32 %v4522_v43, %v4117_v28  ;;  %v322_v62 = vld [vmem:[%s6730_s6 + $0x338] sm:$0xff]  ;;  %v5852_v28 = vld [vmem:[%s6730_s6 + $0x480] sm:$0xff]  ;;  %v329_v14 = vld [vmem:[%s6730_s6 + $0x370] sm:$0xff] }
 0x133   : > { %4484 = vadd.xlane.f32.xlu0 %v4483_v22  ;;  %v4131_v38 = vmul.f32 %v5850_v3, %v5850_v3  ;;  %v4104_v34 = vmul.f32 %v328_v57, %v328_v57  ;;  %v4492_v29 = vadd.f32 %v4491_v55, %v4090_v32  ;;  %v4111_v12 = vmul.f32 %v335_v40, %v335_v40  ;;  %v336_v54 = vld [vmem:[%s6730_s6 + $0x3a8] sm:$0xff]  ;;  %v7385_v36 = vld [vmem:[%s6730_s6 + $0xa00] sm:$0xff]  ;;  %v541_v19 = vld [vmem:[%s6730_s6 + $0xa10] sm:$0xff] }
 0x134   : > { %1416 = vmatmul.mubr.f32.gmra.mxu0 %v523_v45  ;;  %v4098_v24 = vmul.f32 %v322_v62, %v322_v62  ;;  %v4500_v41 = vadd.f32 %v4499_v9, %v4097_v16  ;;  %v4507_v27 = vadd.f32 %v4506_v13, %v4103_v33  ;;  %v4532_v8 = vadd.f32 %v4531_v47, %v4125_v11  ;;  %v7389_v53 = vld [vmem:[%s6730_s6 + $0xa48] sm:$0xff]  ;;  %v5853_v56 = vld [vmem:[%s6730_s6 + $0x450] sm:$0xff]  ;;  %v550_v45 = vld [vmem:[%s6730_s6 + $0xa58] sm:$0xff] }
 0x135   : > { %1775 = vmatmul.mubr.f32.gmra.mxu1 %v525_v21  ;;  %1421 = vmatprep.mubr.f32.mxu0 %v532_v23  ;;  %v4140_v35 = vmul.f32 %v5851_v18, %v5851_v18  ;;  %v4139_v4 = vmul.f32 %v5852_v28, %v5852_v28  ;;  %v4112_v13 = vmul.f32 %v336_v54, %v336_v54  ;;  %v330_v21 = vld [vmem:[%s6730_s6 + $0x378] sm:$0xff]  ;;  %v343_v23 = vld [vmem:[%s6730_s6 + $0x3e0] sm:$0xff]  ;;  %v5854_v22 = vld [vmem:[%s6730_s6 + $0x490] sm:$0xff] }
 0x136   : > { %1780 = vmatprep.mubr.f32.mxu1 %v534_v20  ;;  %v4501_v48 = vadd.f32 %v4500_v41, %v4098_v24  ;;  %v4105_v61 = vmul.f32 %v329_v14, %v329_v14  ;;  %v4524_v5 = vadd.f32 %v4523_v17, %v7326_v15  ;;  %v4540_v37 = vadd.f32 %v4132_v42, %v4131_v38  ;;  %v5855_v11 = vld [vmem:[%s6730_s6 + $0x4c8] sm:$0xff]  ;;  %v7401_v26 = vld [vmem:[%s6730_s6 + $0xa40] sm:$0xff]  ;;  %v337_v63 = vld [vmem:[%s6730_s6 + $0x3b0] sm:$0xff] }
 0x137   : > { %v4133_v30 = vmul.f32 %v5853_v56, %v5853_v56  ;;  %4493 = vadd.xlane.f32.xlu1 %v4492_v29  ;;  %v4508_v46 = vadd.f32 %v4507_v27, %v4104_v34  ;;  %v4141_v6 = vmul.f32 %v5854_v22, %v5854_v22  ;;  %v4119_v43 = vmul.f32 %v343_v23, %v343_v23  ;;  %v7410_v32 = vld [vmem:[%s6730_s6 + $0xa88] sm:$0xff]  ;;  %v5856_v44 = vld [vmem:[%s6730_s6 + $0x4c0] sm:$0xff]  ;;  %v7415_v0 = vld [vmem:[%s6730_s6 + $0xa98] sm:$0xff] }
 0x138   : > { %1422 = vmatmul.mubr.f32.gmra.mxu0 %v7366_v51  ;;  %4502 = vadd.xlane.f32.xlu0 %v4501_v48  ;;  %v4106_v39 = vmul.f32 %v330_v21, %v330_v21  ;;  %v4516_v15 = vadd.f32 %v7362_v25, %v4111_v12  ;;  %v4549_v58 = vadd.f32 %v4140_v35, %v4139_v4  ;;  %v7407_v25 = vld [vmem:[%s6730_s6 + $0xa50] sm:$0xff]  ;;  %v344_v60 = vld [vmem:[%s6730_s6 + $0x3e8] sm:$0xff]  ;;  %v5857_v38 = vld [vmem:[%s6730_s6 + $0x498] sm:$0xff] }
 0x139   : > { %1781 = vmatmul.mubr.f32.gmra.mxu1 %v533_v50  ;;  %1427 = vmatprep.mubr.f32.mxu0 %v540_v59  ;;  %v4148_v20 = vmul.f32 %v5855_v11, %v5855_v11  ;;  %v4509_v31 = vadd.f32 %v4508_v46, %v4105_v61  ;;  %v4533_v33 = vadd.f32 %v4532_v8, %v7355_v52  ;;  %v338_v50 = vld [vmem:[%s6730_s6 + $0x3b8] sm:$0xff]  ;;  %v351_v59 = vld [vmem:[%s6730_s6 + $0x420] sm:$0xff]  ;;  %v5858_v34 = vld [vmem:[%s6730_s6 + $0x4d0] sm:$0xff] }
 0x13a   : > { %1786 = vmatprep.mubr.f32.mxu1 %v542_v1  ;;  %v4113_v47 = vmul.f32 %v337_v63, %v337_v63  ;;  %v4517_v2 = vadd.f32 %v4516_v15, %v4112_v13  ;;  %v4541_v42 = vadd.f32 %v4540_v37, %v4133_v30  ;;  %v4147_v55 = vmul.f32 %v5856_v44, %v5856_v44  ;;  %v345_v29 = vld [vmem:[%s6730_s6 + $0x3f0] sm:$0xff]  ;;  %v352_v12 = vld [vmem:[%s6730_s6 + $0x428] sm:$0xff]  ;;  %v7428_v24 = vld [vmem:[%s6730_s6 + $0xa80] sm:$0xff] }
 0x13b   : > { %v4120_v52 = vmul.f32 %v344_v60, %v344_v60  ;;  %v4510_v57 = vadd.f32 %v4509_v31, %v4106_v39  ;;  %v4127_v16 = vmul.f32 %v351_v59, %v351_v59  ;;  %v4114_v9 = vmul.f32 %v338_v50, %v338_v50  ;;  %v7431_v41 = vld [vmem:[%s6730_s6 + $0xa90] sm:$0xff]  ;;  %v7434_v27 = vld [vmem:[%s6730_s6 + $0xac8] sm:$0xff]  ;;  %v5860_v54 = vld [vmem:[%s6730_s6 + $0x500] sm:$0xff] }
 0x13c   : > { %1428 = vmatmul.mubr.f32.gmra.mxu0 %v7385_v36  ;;  %v4518_v17 = vadd.f32 %v4517_v2, %v4113_v47  ;;  %v4525_v3 = vadd.f32 %v4524_v5, %v4119_v43  ;;  %v4142_v1 = vmul.f32 %v5857_v38, %v5857_v38  ;;  %v4550_v62 = vadd.f32 %v4549_v58, %v4141_v6  ;;  %v5859_v4 = vld [vmem:[%s6730_s6 + $0x508] sm:$0xff]  ;;  %v7439_v13 = vld [vmem:[%s6730_s6 + $0xad8] sm:$0xff]  ;;  %v359_v61 = vld [vmem:[%s6730_s6 + $0x460] sm:$0xff] }
 0x13d   : > { %1787 = vmatmul.mubr.f32.gmra.mxu1 %v541_v19  ;;  %1433 = vmatprep.mubr.f32.mxu0 %v7389_v53  ;;  %v4149_v40 = vmul.f32 %v5858_v34, %v5858_v34  ;;  %v4128_v8 = vmul.f32 %v352_v12, %v352_v12  ;;  %v4121_v35 = vmul.f32 %v345_v29, %v345_v29  ;;  %v346_v48 = vld [vmem:[%s6730_s6 + $0x3f8] sm:$0xff]  ;;  %v5862_v46 = vld [vmem:[%s6730_s6 + $0x510] sm:$0xff]  ;;  %v7449_v6 = vld [vmem:[%s6730_s6 + $0xac0] sm:$0xff] }
 0x13e   : > { %1792 = vmatprep.mubr.f32.mxu1 %v550_v45  ;;  %v4519_v18 = vadd.f32 %v4518_v17, %v4114_v9  ;;  %v4558_v28 = vadd.f32 %v4148_v20, %v4147_v55  ;;  %v4156_v14 = vmul.f32 %v5859_v4, %v5859_v4  ;;  %v4155_v19 = vmul.f32 %v5860_v54, %v5860_v54  ;;  %v5861_v21 = vld [vmem:[%s6730_s6 + $0x4d8] sm:$0xff]  ;;  %v7455_v15 = vld [vmem:[%s6730_s6 + $0xad0] sm:$0xff]  ;;  %v7458_v58 = vld [vmem:[%s6730_s6 + $0xb08] sm:$0xff] }
 0x13f   : > { %4511 = vadd.xlane.f32.xlu1 %v4510_v57  ;;  %v4526_v5 = vadd.f32 %v4525_v3, %v4120_v52  ;;  %v4542_v37 = vadd.f32 %v4541_v42, %v7370_v10  ;;  %v4135_v56 = vmul.f32 %v359_v61, %v359_v61  ;;  %v4122_v30 = vmul.f32 %v346_v48, %v346_v48  ;;  %v353_v10 = vld [vmem:[%s6730_s6 + $0x430] sm:$0xff]  ;;  %v360_v11 = vld [vmem:[%s6730_s6 + $0x468] sm:$0xff]  ;;  %v7462_v60 = vld [vmem:[%s6730_s6 + $0xb18] sm:$0xff] }
 0x140   : > { %1434 = vmatmul.mubr.f32.gmra.mxu0 %v7401_v26  ;;  %4520 = vadd.xlane.f32.xlu0 %v4519_v18  ;;  %v4534_v45 = vadd.f32 %v4533_v33, %v4127_v16  ;;  %v4150_v23 = vmul.f32 %v5861_v21, %v5861_v21  ;;  %v4157_v22 = vmul.f32 %v5862_v46, %v5862_v46  ;;  %v354_v47 = vld [vmem:[%s6730_s6 + $0x438] sm:$0xff]  ;;  %v367_v42 = vld [vmem:[%s6730_s6 + $0x4a0] sm:$0xff]  ;;  %v361_v57 = vld [vmem:[%s6730_s6 + $0x470] sm:$0xff] }
 0x141   : > { %1793 = vmatmul.mubr.f32.gmra.mxu1 %v7407_v25  ;;  %1439 = vmatprep.mubr.f32.mxu0 %v7410_v32  ;;  %v4527_v43 = vadd.f32 %v4526_v5, %v4121_v35  ;;  %v4551_v39 = vadd.f32 %v4550_v62, %v4142_v1  ;;  %v4129_v20 = vmul.f32 %v353_v10, %v353_v10  ;;  %v368_v16 = vld [vmem:[%s6730_s6 + $0x4a8] sm:$0xff]  ;;  %v7473_v9 = vld [vmem:[%s6730_s6 + $0xb00] sm:$0xff]  ;;  %v7476_v17 = vld [vmem:[%s6730_s6 + $0xb10] sm:$0xff] }
 0x142   : > { %1798 = vmatprep.mubr.f32.mxu1 %v7415_v0  ;;  %v4535_v63 = vadd.f32 %v4534_v45, %v4128_v8  ;;  %v4559_v31 = vadd.f32 %v4558_v28, %v4149_v40  ;;  %v4567_v33 = vadd.f32 %v4156_v14, %v4155_v19  ;;  %v4136_v2 = vmul.f32 %v360_v11, %v360_v11  ;;  %v7479_v3 = vld [vmem:[%s6730_s6 + $0xb48] sm:$0xff]  ;;  %v5863_v34 = vld [vmem:[%s6730_s6 + $0x518] sm:$0xff]  ;;  %v375_v18 = vld [vmem:[%s6730_s6 + $0x4e0] sm:$0xff] }
 0x143   : > { %v4528_v44 = vadd.f32 %v4527_v43, %v4122_v30  ;;  %v4143_v55 = vmul.f32 %v367_v42, %v367_v42  ;;  %v4130_v50 = vmul.f32 %v354_v47, %v354_v47  ;;  %v4543_v59 = vadd.f32 %v4542_v37, %v4135_v56  ;;  %v582_v12 = vld [vmem:[%s6730_s6 + $0xb58] sm:$0xff]  ;;  %v7488_v19 = vld [vmem:[%s6730_s6 + $0xb40] sm:$0xff]  ;;  %v369_v48 = vld [vmem:[%s6730_s6 + $0x4b0] sm:$0xff] }
 0x144   : > { %1440 = vmatmul.mubr.f32.gmra.mxu0 %v7428_v24  ;;  %v4536_v52 = vadd.f32 %v4535_v63, %v4129_v20  ;;  %v4144_v38 = vmul.f32 %v368_v16, %v368_v16  ;;  %v4137_v62 = vmul.f32 %v361_v57, %v361_v57  ;;  %v4158_v40 = vmul.f32 %v5863_v34, %v5863_v34  ;;  %v362_v8 = vld [vmem:[%s6730_s6 + $0x478] sm:$0xff]  ;;  %v7493_v5 = vld [vmem:[%s6730_s6 + $0xb50] sm:$0xff]  ;;  %v7496_v37 = vld [vmem:[%s6730_s6 + $0xb88] sm:$0xff] }
 0x145   : > { %1799 = vmatmul.mubr.f32.gmra.mxu1 %v7431_v41  ;;  %1445 = vmatprep.mubr.f32.mxu0 %v7434_v27  ;;  %v4568_v29 = vadd.f32 %v4567_v33, %v4157_v22  ;;  %v4544_v35 = vadd.f32 %v4543_v59, %v4136_v2  ;;  %v4560_v28 = vadd.f32 %v4559_v31, %v4150_v23  ;;  %v376_v56 = vld [vmem:[%s6730_s6 + $0x4e8] sm:$0xff]  ;;  %v7500_v23 = vld [vmem:[%s6730_s6 + $0xb98] sm:$0xff]  ;;  %v383_v10 = vld [vmem:[%s6730_s6 + $0x520] sm:$0xff] }
 0x146   : > { %1804 = vmatprep.mubr.f32.mxu1 %v7439_v13  ;;  %v4537_v1 = vadd.f32 %v4536_v52, %v4130_v50  ;;  %4529 = vadd.xlane.f32.xlu1 %v4528_v44  ;;  %v4151_v4 = vmul.f32 %v375_v18, %v375_v18  ;;  %v4138_v14 = vmul.f32 %v362_v8, %v362_v8  ;;  %v370_v46 = vld [vmem:[%s6730_s6 + $0x4b8] sm:$0xff]  ;;  %v5864_v31 = vld [vmem:[%s6730_s6 + $0x548] sm:$0xff]  ;;  %v377_v47 = vld [vmem:[%s6730_s6 + $0x4f0] sm:$0xff] }
 0x147   : > { %v4552_v54 = vadd.f32 %v4551_v39, %v4143_v55  ;;  %v4545_v61 = vadd.f32 %v4544_v35, %v4137_v62  ;;  %v4145_v30 = vmul.f32 %v369_v48, %v369_v48  ;;  %v4569_v21 = vadd.f32 %v4568_v29, %v4158_v40  ;;  %v384_v2 = vld [vmem:[%s6730_s6 + $0x528] sm:$0xff]  ;;  %v7512_v42 = vld [vmem:[%s6730_s6 + $0xb80] sm:$0xff]  ;;  %v7515_v44 = vld [vmem:[%s6730_s6 + $0xb90] sm:$0xff] }
 0x148   : > { %1446 = vmatmul.mubr.f32.gmra.mxu0 %v7449_v6  ;;  %4538 = vadd.xlane.f32.xlu0 %v4537_v1  ;;  %v4152_v22 = vmul.f32 %v376_v56, %v376_v56  ;;  %v4159_v39 = vmul.f32 %v383_v10, %v383_v10  ;;  %v4146_v11 = vmul.f32 %v370_v46, %v370_v46  ;;  %v5865_v59 = vld [vmem:[%s6730_s6 + $0x540] sm:$0xff]  ;;  %v5866_v16 = vld [vmem:[%s6730_s6 + $0x588] sm:$0xff]  ;;  %v7524_v40 = vld [vmem:[%s6730_s6 + $0xbd8] sm:$0xff] }
 0x149   : > { %1805 = vmatmul.mubr.f32.gmra.mxu1 %v7455_v15  ;;  %1451 = vmatprep.mubr.f32.mxu0 %v7458_v58  ;;  %v4553_v45 = vadd.f32 %v4552_v54, %v4144_v38  ;;  %v4546_v43 = vadd.f32 %v4545_v61, %v4138_v14  ;;  %v4561_v63 = vadd.f32 %v4560_v28, %v4151_v4  ;;  %v5867_v1 = vld [vmem:[%s6730_s6 + $0x580] sm:$0xff]  ;;  %v7521_v34 = vld [vmem:[%s6730_s6 + $0xbc8] sm:$0xff]  ;;  %v378_v29 = vld [vmem:[%s6730_s6 + $0x4f8] sm:$0xff] }
 0x14a   : > { %1810 = vmatprep.mubr.f32.mxu1 %v7462_v60  ;;  %v4164_v33 = vmul.f32 %v5864_v31, %v5864_v31  ;;  %v4160_v55 = vmul.f32 %v384_v2, %v384_v2  ;;  %v4153_v52 = vmul.f32 %v377_v47, %v377_v47  ;;  %v4163_v57 = vmul.f32 %v5865_v59, %v5865_v59  ;;  %v5868_v35 = vld [vmem:[%s6730_s6 + $0x5c8] sm:$0xff]  ;;  %v5869_v4 = vld [vmem:[%s6730_s6 + $0x5c0] sm:$0xff]  ;;  %v385_v54 = vld [vmem:[%s6730_s6 + $0x530] sm:$0xff] }
 0x14b   : > { %v4554_v20 = vadd.f32 %v4553_v45, %v4145_v30  ;;  %v4172_v38 = vmul.f32 %v5866_v16, %v5866_v16  ;;  %v4171_v62 = vmul.f32 %v5867_v1, %v5867_v1  ;;  %4547 = vadd.xlane.f32.xlu1 %v4546_v43  ;;  %v4154_v8 = vmul.f32 %v378_v29, %v378_v29  ;;  %v5870_v61 = vld [vmem:[%s6730_s6 + $0x550] sm:$0xff]  ;;  %v7536_v30 = vld [vmem:[%s6730_s6 + $0xbc0] sm:$0xff]  ;;  %v5873_v16 = vld [vmem:[%s6730_s6 + $0x558] sm:$0xff] }
 0x14c   : > { %1452 = vmatmul.mubr.f32.gmra.mxu0 %v7473_v9  ;;  %v4570_v18 = vadd.f32 %v4569_v21, %v4159_v39  ;;  %v4180_v28 = vmul.f32 %v5868_v35, %v5868_v35  ;;  %v4179_v14 = vmul.f32 %v5869_v4, %v5869_v4  ;;  %v4165_v56 = vmul.f32 %v5870_v61, %v5870_v61  ;;  %v7539_v45 = vld [vmem:[%s6730_s6 + $0xbd0] sm:$0xff]  ;;  %v5876_v35 = vld [vmem:[%s6730_s6 + $0x600] sm:$0xff]  ;;  %v5877_v4 = vld [vmem:[%s6730_s6 + $0x648] sm:$0xff] }
 0x14d   : > { %1811 = vmatmul.mubr.f32.gmra.mxu1 %v7476_v17  ;;  %1457 = vmatprep.mubr.f32.mxu0 %v7479_v3  ;;  %v4555_v50 = vadd.f32 %v4554_v20, %v4146_v11  ;;  %v4161_v21 = vmul.f32 %v385_v54, %v385_v54  ;;  %v4585_v10 = vadd.f32 %v4172_v38, %v4171_v62  ;;  %v5871_v43 = vld [vmem:[%s6730_s6 + $0x590] sm:$0xff]  ;;  %v7543_v11 = vld [vmem:[%s6730_s6 + $0xc08] sm:$0xff]  ;;  %v7546_v20 = vld [vmem:[%s6730_s6 + $0xc18] sm:$0xff] }
 0x14e   : > { %1816 = vmatprep.mubr.f32.mxu1 %v582_v12  ;;  %v4562_v12 = vadd.f32 %v4561_v63, %v4152_v22  ;;  %v4571_v46 = vadd.f32 %v4570_v18, %v4160_v55  ;;  %v4576_v22 = vadd.f32 %v4164_v33, %v4163_v57  ;;  %v4173_v39 = vmul.f32 %v5871_v43, %v5871_v43  ;;  %v386_v63 = vld [vmem:[%s6730_s6 + $0x538] sm:$0xff]  ;;  %v7555_v33 = vld [vmem:[%s6730_s6 + $0xc00] sm:$0xff]  ;;  %v7558_v59 = vld [vmem:[%s6730_s6 + $0xc10] sm:$0xff] }
 0x14f   : > { %4556 = vadd.xlane.f32.xlu0 %v4555_v50  ;;  %10654 = vst [vmem:[#allocation12_spill] sm:$0xff] %v7546_v20  ;;  %v4162_v47 = vmul.f32 %v386_v63, %v386_v63  ;;  %v4594_v50 = vadd.f32 %v4180_v28, %v4179_v14  ;;  %v4166_v38 = vmul.f32 %v5873_v16, %v5873_v16  ;;  %v5874_v62 = vld [vmem:[%s6730_s6 + $0x598] sm:$0xff]  ;;  %v5878_v54 = vld [vmem:[%s6730_s6 + $0x640] sm:$0xff] }
 0x150   : > { %1458 = vmatmul.mubr.f32.gmra.mxu0 %v7488_v19  ;;  %v4563_v48 = vadd.f32 %v4562_v12, %v4153_v52  ;;  %v4572_v2 = vadd.f32 %v4571_v46, %v4161_v21  ;;  %v5872_v52 = vld [vmem:[%s6730_s6 + $0x5d0] sm:$0xff]  ;;  %v4577_v1 = vadd.f32 %v4576_v22, %v4165_v56  ;;  %v4174_v29 = vmul.f32 %v5874_v62, %v5874_v62  ;;  %v5879_v61 = vld [vmem:[%s6730_s6 + $0x5d8] sm:$0xff] }
 0x151   : > { %1817 = vmatmul.mubr.f32.gmra.mxu1 %v7493_v5  ;;  %1463 = vmatprep.mubr.f32.mxu0 %v7496_v37  ;;  %v4181_v55 = vmul.f32 %v5872_v52, %v5872_v52  ;;  %v4586_v12 = vadd.f32 %v4585_v10, %v4173_v39  ;;  %v4187_v28 = vmul.f32 %v5876_v35, %v5876_v35  ;;  %v5880_v46 = vld [vmem:[%s6730_s6 + $0x618] sm:$0xff]  ;;  %v5881_v39 = vld [vmem:[%s6730_s6 + $0x688] sm:$0xff] }
 0x152   : > { %1822 = vmatprep.mubr.f32.mxu1 %v7500_v23  ;;  %v4564_v31 = vadd.f32 %v4563_v48, %v4154_v8  ;;  %v4573_v57 = vadd.f32 %v4572_v2, %v4162_v47  ;;  %v5875_v8 = vld [vmem:[%s6730_s6 + $0x608] sm:$0xff]  ;;  %v4196_v14 = vmul.f32 %v5877_v4, %v5877_v4  ;;  %v4195_v48 = vmul.f32 %v5878_v54, %v5878_v54  ;;  %v5885_v62 = vld [vmem:[%s6730_s6 + $0x658] sm:$0xff]  ;;  %v673_v54 = vld [vmem:[#allocation5 + $0x1f0] sm:$0xff] }
 0x153   : > { %v4188_v18 = vmul.f32 %v5875_v8, %v5875_v8  ;;  %v4182_v21 = vmul.f32 %v5879_v61, %v5879_v61  ;;  %v4595_v56 = vadd.f32 %v4594_v50, %v4181_v55  ;;  %v7568_v22 = vmul.f32 %v5880_v46, %v5880_v46  ;;  %v5883_v52 = vld [vmem:[%s6730_s6 + $0x28] sm:$0xff] }
 0x154   : > { %1464 = vmatmul.mubr.f32.gmra.mxu0 %v7512_v42  ;;  %4565 = vadd.xlane.f32.xlu1 %v4564_v31  ;;  %v4204_v63 = vmul.f32 %v5881_v39, %v5881_v39  ;;  %v5882_v31 = vld [vmem:[%s6730_s6 + $0x680] sm:$0xff]  ;;  %v7578_v50 = vadd.f32 %v4577_v1, %v4166_v38  ;;  %v7580_v55 = vadd.f32 %v4586_v12, %v4174_v29  ;;  %v801_v1 = vld [vmem:[#allocation5 + $0x5f0] sm:$0xff]  ;;  %v5887_v12 = vld [vmem:[%s6730_s6 + $0x698] sm:$0xff] }
 0x155   : > { %1823 = vmatmul.mubr.f32.gmra.mxu1 %v7515_v44  ;;  %1469 = vmatprep.mubr.f32.mxu0 %v7521_v34  ;;  %v4203_v47 = vmul.f32 %v5882_v31, %v5882_v31  ;;  %v7584_v8 = vmul.f32 %v5885_v62, %v5885_v62  ;;  %v4603_v61 = vadd.f32 %v4188_v18, %v4187_v28  ;;  %v5888_v39 = vld [vmem:[%s6730_s6 + $0x690] sm:$0xff]  ;;  %v5889_v18 = vld [vmem:[%s6730_s6 + $0x20] sm:$0xff] }
 0x156   : > { %1828 = vmatprep.mubr.f32.mxu1 %v7524_v40  ;;  %4574 = vadd.xlane.f32.xlu0 %v4573_v57  ;;  %10656 = vst [vmem:[#allocation14_spill] sm:$0xff] %v7578_v50  ;;  %10657 = vst [vmem:[#allocation15_spill] sm:$0xff] %v7580_v55  ;;  %v5884_v57 = vld [vmem:[%s6730_s6 + $0x610] sm:$0xff]  ;;  %v4612_v46 = vadd.f32 %v4196_v14, %v4195_v48  ;;  %v7589_v29 = vadd.f32 %v4595_v56, %v4182_v21  ;;  %v670_v14 = vld [vmem:[#allocation5 + $0x1d8] sm:$0xff] }
 0x157   : > { %v4189_v16 = vmul.f32 %v5884_v57, %v5884_v57  ;;  %v4205_v31 = vmul.f32 %v5888_v39, %v5888_v39  ;;  %v5890_v28 = vld [vmem:[%s6730_s6 + $0x30] sm:$0xff]  ;;  %v798_v48 = vld [vmem:[#allocation5 + $0x5d8] sm:$0xff]  ;;  %v4621_v62 = vadd.f32 %v4204_v63, %v4203_v47  ;;  %v5891_v21 = vld [vmem:[%s6730_s6 + $0x6c8] sm:$0xff] }
 0x158   : > { %1470 = vmatmul.mubr.f32.gmra.mxu0 %v7536_v30  ;;  %10659 = vst [vmem:[#allocation17_spill] sm:$0xff] %v7589_v29  ;;  %v4212_v56 = vmul.f32 %v5891_v21, %v5891_v21  ;;  %v5894_v39 = vld [vmem:[%s6730_s6 + $0x708] sm:$0xff]  ;;  %v5896_v21 = vld [vmem:[%s6730_s6 + $0x6d8] sm:$0xff]  ;;  %v5904_v55 = vld [vmem:[%s6730_s6 + $0x710] sm:$0xff] }
 0x159   : > { %1829 = vmatmul.mubr.f32.gmra.mxu1 %v7539_v45  ;;  %1475 = vmatprep.mubr.f32.mxu0 %v7543_v11  ;;  %v4604_v63 = vadd.f32 %v4603_v61, %v4189_v16  ;;  %v5899_v61 = vld [vmem:[%s6730_s6 + $0x60] sm:$0xff]  ;;  %v4221_v50 = vmul.f32 %v5904_v55, %v5904_v55  ;;  %v5905_v55 = vld [vmem:[%s6730_s6 + $0x718] sm:$0xff] }
 0x15a   : > { %1834 = vmatprep.mubr.f32.mxu1 %v7546_v20 }
 0x15c   : > { %v1189_v10 = vpop.f32.mrf.mxu0  ;;  %1476 = vmatmul.mubr.f32.gmra.mxu0 %v7555_v33 }
 0x15d   : > { %v1548_v43 = vpop.f32.mrf.mxu1  ;;  %1835 = vmatmul.mubr.f32.gmra.mxu1 %v7558_v59  ;;  %1905 = vmatprep.mubr.f32.mxu0 %v5883_v52 }
 0x15e   : > { %v7574_v2 = vadd.f32 %v1548_v43, %v1189_v10  ;;  %2264 = vmatprep.mubr.f32.mxu1 %v7235_v49  ;;  %v1191_v35 = vpop.f32.mrf.mxu0  ;;  %v5886_v10 = vld [vmem:[%s6730_s6 + $0x650] sm:$0xff]  ;;  %v7592_v43 = vmul.f32 %v5887_v12, %v5887_v12 }
 0x15f   : > { %v1550_v4 = vpop.f32.mrf.mxu1  ;;  %v4197_v49 = vmul.f32 %v5886_v10, %v5886_v10  ;;  %v5893_v10 = vld [vmem:[%s6730_s6 + $0x6c0] sm:$0xff] }
 0x160   : > { %10655 = vst [vmem:[#allocation13_spill] sm:$0xff] %v7574_v2  ;;  %v7587_v38 = vadd.f32 %v1550_v4, %v1191_v35  ;;  %v1195_v52 = vpop.f32.mrf.mxu0  ;;  %1906 = vmatmul.mubr.f32.vlgmr.msra.gmra.mxu0 %v5889_v18  ;;  %v5892_v4 = vld [vmem:[%s6730_s6 + $0x68] sm:$0xff]  ;;  %v4211_v12 = vmul.f32 %v5893_v10, %v5893_v10  ;;  %v5895_v18 = vld [vmem:[%s6730_s6 + $0x700] sm:$0xff] }
 0x161   : > { %v1554_v57 = vpop.f32.mrf.mxu1  ;;  %2265 = vmatmul.mubr.f32.vlgmr.msra.gmra.mxu1 %v5890_v28  ;;  %2560 = vmatpush1.msra.mxu0 %v673_v54  ;;  %v4219_v2 = vmul.f32 %v5895_v18, %v5895_v18  ;;  %v4613_v47 = vadd.f32 %v4612_v46, %v4197_v49  ;;  %v5897_v10 = vld [vmem:[%s6730_s6 + $0x748] sm:$0xff]  ;;  %v5898_v18 = vld [vmem:[%s6730_s6 + $0x740] sm:$0xff]  ;;  %v5900_v46 = vld [vmem:[%s6730_s6 + $0x70] sm:$0xff] }
 0x162   : > { %10658 = vst [vmem:[#allocation16_spill] sm:$0xff] %v7587_v38  ;;  %v7598_v35 = vadd.f32 %v1554_v57, %v1195_v52  ;;  %1911 = vmatprep.mubr.f32.mxu0 %v5892_v4  ;;  %v4220_v38 = vmul.f32 %v5894_v39, %v5894_v39  ;;  %v1197_v28 = vpop.f32.mrf.mxu0  ;;  %2270 = vmatprep.mubr.f32.mxu1 %v7250_v7  ;;  %v669_v52 = vld [vmem:[#allocation5 + $0x1d0] sm:$0xff]  ;;  %v666_v49 = vld [vmem:[#allocation5 + $0x1b8] sm:$0xff] }
 0x163   : > { %v1556_v29 = vpop.f32.mrf.mxu1  ;;  %2919 = vmatpush1.msra.mxu1 %v801_v1  ;;  %2561 = vmatprep.subr.mxu0 %v670_v14  ;;  %v797_v57 = vld [vmem:[#allocation5 + $0x5d0] sm:$0xff]  ;;  %v7608_v4 = vmul.f32 %v5896_v21, %v5896_v21  ;;  %v4228_v39 = vmul.f32 %v5897_v10, %v5897_v10  ;;  %v4227_v7 = vmul.f32 %v5898_v18, %v5898_v18  ;;  %v5903_v10 = vld [vmem:[%s6730_s6 + $0xb8] sm:$0xff] }
 0x164   : > { %10660 = vst [vmem:[#allocation18_spill] sm:$0xff] %v7598_v35  ;;  %v7605_v54 = vadd.f32 %v1556_v29, %v1197_v28  ;;  %2920 = vmatprep.subr.mxu1 %v798_v48  ;;  %v1201_v1 = vpop.f32.mrf.mxu0  ;;  %1912 = vmatmul.mubr.f32.gmra.mxu0 %v5899_v61  ;;  %v794_v29 = vld [vmem:[#allocation5 + $0x5b8] sm:$0xff]  ;;  %v4622_v14 = vadd.f32 %v4621_v62, %v4205_v31  ;;  %v5901_v48 = vld [vmem:[%s6730_s6 + $0x6d0] sm:$0xff] }
 0x165   : > { %v1560_v16 = vpop.f32.mrf.mxu1  ;;  %2271 = vmatmul.mubr.f32.gmra.mxu1 %v5900_v46  ;;  %v4213_v28 = vmul.f32 %v5901_v48, %v5901_v48  ;;  %v4630_v18 = vadd.f32 %v4212_v56, %v4211_v12  ;;  %v4639_v35 = vadd.f32 %v4220_v38, %v4219_v2  ;;  %2562 = vmatpush1.msra.mxu0 %v669_v52  ;;  %v665_v56 = vld [vmem:[#allocation5 + $0x1b0] sm:$0xff]  ;;  %v5909_v46 = vld [vmem:[%s6730_s6 + $0x758] sm:$0xff] }
 0x166   : > { %10661 = vst [vmem:[#allocation19_spill] sm:$0xff] %v7605_v54  ;;  %v7615_v21 = vadd.f32 %v1560_v16, %v1201_v1  ;;  %v5902_v54 = vld [vmem:[%s6730_s6 + $0xa8] sm:$0xff]  ;;  %2276 = vmatprep.mubr.f32.mxu1 %v5903_v10  ;;  %v1203_v61 = vpop.f32.mrf.mxu0  ;;  %2921 = vmatpush1.msra.mxu1 %v797_v57  ;;  %v7621_v31 = vadd.f32 %v4604_v63, %v7568_v22  ;;  %v793_v2 = vld [vmem:[#allocation5 + $0x5b0] sm:$0xff]  ;;  %v5907_v1 = vld [vmem:[%s6730_s6 + $0xa0] sm:$0xff] }
 0x167   : > { %1917 = vmatprep.mubr.f32.mxu0 %v5902_v54  ;;  %v1562_v20 = vpop.f32.mrf.mxu1  ;;  %v7624_v62 = vadd.f32 %v4613_v47, %v7584_v8  ;;  %2563 = vmatprep.subr.mxu0 %v666_v49  ;;  %v4222_v38 = vmul.f32 %v5905_v55, %v5905_v55  ;;  %v4648_v12 = vadd.f32 %v4228_v39, %v4227_v7  ;;  %v5906_v52 = vld [vmem:[%s6730_s6 + $0x750] sm:$0xff]  ;;  %v790_v47 = vld [vmem:[#allocation5 + $0x598] sm:$0xff]  ;;  %v5910_v7 = vld [vmem:[%s6730_s6 + $0xe8] sm:$0xff] }
 0x168   : > { %10662 = vst [vmem:[#allocation20_spill] sm:$0xff] %v7615_v21  ;;  %v7626_v54 = vadd.f32 %v1562_v20, %v1203_v61  ;;  %2922 = vmatprep.subr.mxu1 %v794_v29  ;;  %v4229_v57 = vmul.f32 %v5906_v52, %v5906_v52  ;;  %v1207_v22 = vpop.f32.mrf.mxu0  ;;  %1918 = vmatmul.mubr.f32.gmra.mxu0 %v5907_v1  ;;  %v5908_v8 = vld [vmem:[%s6730_s6 + $0xb0] sm:$0xff]  ;;  %v662_v20 = vld [vmem:[#allocation5 + $0x198] sm:$0xff]  ;;  %v5912_v61 = vld [vmem:[%s6730_s6 + $0x788] sm:$0xff] }
 0x169   : > { %v1566_v63 = vpop.f32.mrf.mxu1  ;;  %2277 = vmatmul.mubr.f32.gmra.mxu1 %v5908_v8  ;;  %v7633_v16 = vadd.f32 %v4622_v14, %v7592_v43  ;;  %v4230_v49 = vmul.f32 %v5909_v46, %v5909_v46  ;;  %1923 = vmatprep.mubr.f32.mxu0 %v5910_v7  ;;  %v5911_v29 = vld [vmem:[%s6730_s6 + $0xf8] sm:$0xff]  ;;  %v4631_v48 = vadd.f32 %v4630_v18, %v4213_v28  ;;  %v661_v28 = vld [vmem:[#allocation5 + $0x190] sm:$0xff]  ;;  %v5915_v18 = vld [vmem:[%s6730_s6 + $0x7c8] sm:$0xff] }
 0x16a   : > { %10663 = vst [vmem:[#allocation21_spill] sm:$0xff] %v7626_v54  ;;  %v7636_v39 = vadd.f32 %v1566_v63, %v1207_v22  ;;  %2282 = vmatprep.mubr.f32.mxu1 %v5911_v29  ;;  %v4640_v10 = vadd.f32 %v4639_v35, %v4221_v50  ;;  %v4236_v55 = vmul.f32 %v5912_v61, %v5912_v61  ;;  %v1209_v52 = vpop.f32.mrf.mxu0  ;;  %v5913_v43 = vld [vmem:[%s6730_s6 + $0x798] sm:$0xff]  ;;  %v5914_v22 = vld [vmem:[%s6730_s6 + $0x780] sm:$0xff]  ;;  %v789_v50 = vld [vmem:[#allocation5 + $0x590] sm:$0xff] }
 0x16b   : > { %10664 = vst [vmem:[#allocation22_spill] sm:$0xff] %v7633_v16  ;;  %v1568_v1 = vpop.f32.mrf.mxu1  ;;  %2564 = vmatpush1.msra.mxu0 %v665_v56  ;;  %2923 = vmatpush1.msra.mxu1 %v793_v2  ;;  %v7642_v14 = vmul.f32 %v5913_v43, %v5913_v43  ;;  %v4235_v63 = vmul.f32 %v5914_v22, %v5914_v22  ;;  %v5916_v56 = vld [vmem:[%s6730_s6 + $0x7c0] sm:$0xff]  ;;  %v5919_v43 = vld [vmem:[%s6730_s6 + $0x808] sm:$0xff] }
 0x16c   : > { %10665 = vst [vmem:[#allocation23_spill] sm:$0xff] %v7636_v39  ;;  %v7645_v8 = vadd.f32 %v1568_v1, %v1209_v52  ;;  %2565 = vmatprep.subr.mxu0 %v662_v20  ;;  %2924 = vmatprep.subr.mxu1 %v790_v47  ;;  %v4649_v35 = vadd.f32 %v4648_v12, %v4229_v57  ;;  %v1213_v7 = vpop.f32.mrf.mxu0  ;;  %v5917_v61 = vld [vmem:[%s6730_s6 + $0xe0] sm:$0xff]  ;;  %v5918_v52 = vld [vmem:[%s6730_s6 + $0xf0] sm:$0xff]  ;;  %v658_v20 = vld [vmem:[#allocation5 + $0x178] sm:$0xff] }
 0x16d   : > { %v4244_v46 = vmul.f32 %v5915_v18, %v5915_v18  ;;  %v4243_v2 = vmul.f32 %v5916_v56, %v5916_v56  ;;  %v1572_v29 = vpop.f32.mrf.mxu1  ;;  %1924 = vmatmul.mubr.f32.gmra.mxu0 %v5917_v61  ;;  %2283 = vmatmul.mubr.f32.gmra.mxu1 %v5918_v52  ;;  %v786_v1 = vld [vmem:[#allocation5 + $0x578] sm:$0xff]  ;;  %v4252_v47 = vmul.f32 %v5919_v43, %v5919_v43  ;;  %v5920_v22 = vld [vmem:[%s6730_s6 + $0x800] sm:$0xff]  ;;  %v5921_v18 = vld [vmem:[%s6730_s6 + $0x128] sm:$0xff] }
 0x16e   : > { %10666 = vst [vmem:[#allocation24_spill] sm:$0xff] %v7645_v8  ;;  %v4251_v12 = vmul.f32 %v5920_v22, %v5920_v22  ;;  %v7653_v57 = vadd.f32 %v1572_v29, %v1213_v7  ;;  %1929 = vmatprep.mubr.f32.mxu0 %v5921_v18  ;;  %v5922_v56 = vld [vmem:[%s6730_s6 + $0x138] sm:$0xff]  ;;  %v7658_v8 = vadd.f32 %v4631_v48, %v7608_v4  ;;  %v5923_v39 = vld [vmem:[%s6730_s6 + $0x790] sm:$0xff]  ;;  %v1215_v54 = vpop.f32.mrf.mxu0 }
 0x16f   : > { %2288 = vmatprep.mubr.f32.mxu1 %v5922_v56  ;;  %v7660_v61 = vadd.f32 %v4640_v10, %v4222_v38  ;;  %v4237_v52 = vmul.f32 %v5923_v39, %v5923_v39  ;;  %v1574_v21 = vpop.f32.mrf.mxu1  ;;  %2566 = vmatpush1.msra.mxu0 %v661_v28  ;;  %v4657_v43 = vadd.f32 %v4236_v55, %v4235_v63  ;;  %v5924_v7 = vld [vmem:[%s6730_s6 + $0x7d8] sm:$0xff]  ;;  %v657_v4 = vld [vmem:[#allocation5 + $0x170] sm:$0xff]  ;;  %v5926_v63 = vld [vmem:[%s6730_s6 + $0x120] sm:$0xff] }
 0x170   : > { %10667 = vst [vmem:[#allocation25_spill] sm:$0xff] %v7653_v57  ;;  %10668 = vst [vmem:[#allocation26_spill] sm:$0xff] %v7658_v8  ;;  %2925 = vmatpush1.msra.mxu1 %v789_v50  ;;  %v7664_v29 = vmul.f32 %v5924_v7, %v5924_v7  ;;  %v7666_v22 = vadd.f32 %v1574_v21, %v1215_v54  ;;  %2567 = vmatprep.subr.mxu0 %v658_v20  ;;  %v785_v38 = vld [vmem:[#allocation5 + $0x570] sm:$0xff]  ;;  %v1219_v50 = vpop.f32.mrf.mxu0  ;;  %v654_v54 = vld [vmem:[#allocation5 + $0x158] sm:$0xff] }
 0x171   : > { %10669 = vst [vmem:[#allocation27_spill] sm:$0xff] %v7660_v61  ;;  %2926 = vmatprep.subr.mxu1 %v786_v1  ;;  %v7668_v48 = vadd.f32 %v4649_v35, %v4230_v49  ;;  %v4666_v39 = vadd.f32 %v4244_v46, %v4243_v2  ;;  %v5925_v10 = vld [vmem:[%s6730_s6 + $0x7d0] sm:$0xff]  ;;  %v1578_v55 = vpop.f32.mrf.mxu1  ;;  %1930 = vmatmul.mubr.f32.gmra.mxu0 %v5926_v63  ;;  %v782_v20 = vld [vmem:[#allocation5 + $0x558] sm:$0xff]  ;;  %v5929_v46 = vld [vmem:[%s6730_s6 + $0x168] sm:$0xff] }
 0x172   : > { %10670 = vst [vmem:[#allocation28_spill] sm:$0xff] %v7666_v22  ;;  %v4245_v28 = vmul.f32 %v5925_v10, %v5925_v10  ;;  %v5927_v21 = vld [vmem:[%s6730_s6 + $0x130] sm:$0xff]  ;;  %v4675_v1 = vadd.f32 %v4252_v47, %v4251_v12  ;;  %v7674_v35 = vadd.f32 %v1578_v55, %v1219_v50  ;;  %1935 = vmatprep.mubr.f32.mxu0 %v5929_v46  ;;  %v5930_v2 = vld [vmem:[%s6730_s6 + $0x178] sm:$0xff]  ;;  %v5932_v10 = vld [vmem:[%s6730_s6 + $0x848] sm:$0xff]  ;;  %v1221_v57 = vpop.f32.mrf.mxu0 }
 0x173   : > { %10671 = vst [vmem:[#allocation29_spill] sm:$0xff] %v7668_v48  ;;  %2289 = vmatmul.mubr.f32.gmra.mxu1 %v5927_v21  ;;  %v5928_v18 = vld [vmem:[%s6730_s6 + $0x810] sm:$0xff]  ;;  %v5931_v56 = vld [vmem:[%s6730_s6 + $0x818] sm:$0xff]  ;;  %v4260_v63 = vmul.f32 %v5932_v10, %v5932_v10  ;;  %v5933_v22 = vld [vmem:[%s6730_s6 + $0x840] sm:$0xff]  ;;  %v1580_v47 = vpop.f32.mrf.mxu1  ;;  %2568 = vmatpush1.msra.mxu0 %v657_v4  ;;  %v4658_v10 = vadd.f32 %v4657_v43, %v4237_v52 }
 0x174   : > { %v4253_v49 = vmul.f32 %v5928_v18, %v5928_v18  ;;  %10672 = vst [vmem:[#allocation30_spill] sm:$0xff] %v7674_v35  ;;  %2294 = vmatprep.mubr.f32.mxu1 %v5930_v2  ;;  %v7679_v7 = vmul.f32 %v5931_v56, %v5931_v56  ;;  %v4259_v21 = vmul.f32 %v5933_v22, %v5933_v22  ;;  %v5934_v12 = vld [vmem:[%s6730_s6 + $0x888] sm:$0xff]  ;;  %v5935_v55 = vld [vmem:[%s6730_s6 + $0x880] sm:$0xff]  ;;  %v653_v2 = vld [vmem:[#allocation5 + $0x150] sm:$0xff] }
 0x175   : > { %2927 = vmatpush1.msra.mxu1 %v785_v38  ;;  %v4268_v50 = vmul.f32 %v5934_v12, %v5934_v12  ;;  %v4267_v18 = vmul.f32 %v5935_v55, %v5935_v55  ;;  %v7685_v46 = vadd.f32 %v1580_v47, %v1221_v57  ;;  %2569 = vmatprep.subr.mxu0 %v654_v54  ;;  %v781_v56 = vld [vmem:[#allocation5 + $0x550] sm:$0xff]  ;;  %v5936_v35 = vld [vmem:[%s6730_s6 + $0x858] sm:$0xff]  ;;  %v1225_v38 = vpop.f32.mrf.mxu0  ;;  %v1584_v48 = vpop.f32.mrf.mxu1  ;;  %v5937_v12 = vld [vmem:[%s6730_s6 + $0x160] sm:$0xff] }
 0x176   : > { %2928 = vmatprep.subr.mxu1 %v782_v20  ;;  %v4667_v22 = vadd.f32 %v4666_v39, %v4245_v28  ;;  %v7688_v4 = vmul.f32 %v5936_v35, %v5936_v35  ;;  %1936 = vmatmul.mubr.f32.gmra.mxu0 %v5937_v12  ;;  %v5938_v57 = vld [vmem:[%s6730_s6 + $0x170] sm:$0xff]  ;;  %v650_v54 = vld [vmem:[#allocation5 + $0x138] sm:$0xff]  ;;  %v4676_v55 = vadd.f32 %v4675_v1, %v4253_v49  ;;  %v5940_v43 = vld [vmem:[%s6730_s6 + $0x1a8] sm:$0xff] }
 0x177   : > { %10673 = vst [vmem:[#allocation31_spill] sm:$0xff] %v7685_v46  ;;  %2295 = vmatmul.mubr.f32.gmra.mxu1 %v5938_v57  ;;  %v778_v47 = vld [vmem:[#allocation5 + $0x538] sm:$0xff]  ;;  %v5939_v20 = vld [vmem:[%s6730_s6 + $0x850] sm:$0xff]  ;;  %v7693_v52 = vadd.f32 %v1584_v48, %v1225_v38  ;;  %1941 = vmatprep.mubr.f32.mxu0 %v5940_v43  ;;  %v4684_v28 = vadd.f32 %v4260_v63, %v4259_v21  ;;  %v5942_v35 = vld [vmem:[%s6730_s6 + $0x8c8] sm:$0xff]  ;;  %v1227_v16 = vpop.f32.mrf.mxu0  ;;  %v1586_v57 = vpop.f32.mrf.mxu1 }
 0x178   : > { %v4261_v46 = vmul.f32 %v5939_v20, %v5939_v20  ;;  %v5941_v39 = vld [vmem:[%s6730_s6 + $0x1b8] sm:$0xff]  ;;  %v4276_v61 = vmul.f32 %v5942_v35, %v5942_v35  ;;  %v5943_v8 = vld [vmem:[%s6730_s6 + $0x8c0] sm:$0xff]  ;;  %2570 = vmatpush1.msra.mxu0 %v653_v2  ;;  %2929 = vmatpush1.msra.mxu1 %v781_v56  ;;  %v4693_v1 = vadd.f32 %v4268_v50, %v4267_v18  ;;  %v5944_v49 = vld [vmem:[%s6730_s6 + $0x890] sm:$0xff] }
 0x179   : > { %10674 = vst [vmem:[#allocation32_spill] sm:$0xff] %v7693_v52  ;;  %2300 = vmatprep.mubr.f32.mxu1 %v5941_v39  ;;  %v4275_v12 = vmul.f32 %v5943_v8, %v5943_v8  ;;  %v4269_v48 = vmul.f32 %v5944_v49, %v5944_v49  ;;  %v7700_v38 = vadd.f32 %v1586_v57, %v1227_v16  ;;  %v649_v20 = vld [vmem:[#allocation5 + $0x130] sm:$0xff]  ;;  %v5945_v2 = vld [vmem:[%s6730_s6 + $0x898] sm:$0xff]  ;;  %v1231_v18 = vpop.f32.mrf.mxu0  ;;  %v1590_v16 = vpop.f32.mrf.mxu1  ;;  %v5946_v56 = vld [vmem:[%s6730_s6 + $0x1a0] sm:$0xff] }
 0x17a   : > { %2571 = vmatprep.subr.mxu0 %v650_v54  ;;  %2930 = vmatprep.subr.mxu1 %v778_v47  ;;  %v777_v63 = vld [vmem:[#allocation5 + $0x530] sm:$0xff]  ;;  %v7703_v21 = vadd.f32 %v4658_v10, %v7642_v14  ;;  %v7706_v8 = vadd.f32 %v4667_v22, %v7664_v29  ;;  %v7709_v50 = vmul.f32 %v5945_v2, %v5945_v2  ;;  %v646_v47 = vld [vmem:[#allocation5 + $0x118] sm:$0xff]  ;;  %v5948_v39 = vld [vmem:[%s6730_s6 + $0x908] sm:$0xff] }
 0x17b   : > { %10675 = vst [vmem:[#allocation33_spill] sm:$0xff] %v7700_v38  ;;  %1942 = vmatmul.mubr.f32.gmra.mxu0 %v5946_v56  ;;  %v5947_v54 = vld [vmem:[%s6730_s6 + $0x1b0] sm:$0xff]  ;;  %v774_v43 = vld [vmem:[#allocation5 + $0x518] sm:$0xff]  ;;  %v4284_v14 = vmul.f32 %v5948_v39, %v5948_v39  ;;  %v5949_v10 = vld [vmem:[%s6730_s6 + $0x900] sm:$0xff]  ;;  %v7715_v29 = vadd.f32 %v1590_v16, %v1231_v18  ;;  %v4685_v49 = vadd.f32 %v4684_v28, %v4261_v46  ;;  %v1592_v52 = vpop.f32.mrf.mxu1 }
 0x17c   : > { %2301 = vmatmul.mubr.f32.gmra.mxu1 %v5947_v54  ;;  %v4283_v35 = vmul.f32 %v5949_v10, %v5949_v10  ;;  %v5950_v22 = vld [vmem:[%s6730_s6 + $0x1e8] sm:$0xff]  ;;  %v5951_v57 = vld [vmem:[%s6730_s6 + $0x1f8] sm:$0xff]  ;;  %v4702_v2 = vadd.f32 %v4276_v61, %v4275_v12  ;;  %v5952_v56 = vld [vmem:[%s6730_s6 + $0x8d0] sm:$0xff]  ;;  %v1233_v54 = vpop.f32.mrf.mxu0  ;;  %2572 = vmatpush1.msra.mxu0 %v649_v20  ;;  %v7721_v39 = vadd.f32 %v4676_v55, %v7679_v7 }
 0x17d   : > { %10676 = vst [vmem:[#allocation34_spill] sm:$0xff] %v7715_v29  ;;  %1947 = vmatprep.mubr.f32.mxu0 %v5950_v22  ;;  %2306 = vmatprep.mubr.f32.mxu1 %v5951_v57  ;;  %v4277_v38 = vmul.f32 %v5952_v56, %v5952_v56  ;;  %v4694_v18 = vadd.f32 %v4693_v1, %v4269_v48  ;;  %v645_v10 = vld [vmem:[#allocation5 + $0x110] sm:$0xff]  ;;  %v5953_v46 = vld [vmem:[%s6730_s6 + $0x8d8] sm:$0xff]  ;;  %v5954_v12 = vld [vmem:[%s6730_s6 + $0x948] sm:$0xff]  ;;  %v1596_v7 = vpop.f32.mrf.mxu1 }
 0x17e   : > { %2931 = vmatpush1.msra.mxu1 %v777_v63  ;;  %v7723_v16 = vadd.f32 %v1592_v52, %v1233_v54  ;;  %2573 = vmatprep.subr.mxu0 %v646_v47  ;;  %v773_v61 = vld [vmem:[#allocation5 + $0x510] sm:$0xff]  ;;  %v4278_v28 = vmul.f32 %v5953_v46, %v5953_v46  ;;  %v4292_v22 = vmul.f32 %v5954_v12, %v5954_v12  ;;  %v5955_v20 = vld [vmem:[%s6730_s6 + $0x940] sm:$0xff]  ;;  %v1237_v57 = vpop.f32.mrf.mxu0  ;;  %v642_v1 = vld [vmem:[#allocation5 + $0xf8] sm:$0xff] }
 0x17f   : > { %2932 = vmatprep.subr.mxu1 %v774_v43  ;;  %v4291_v63 = vmul.f32 %v5955_v20, %v5955_v20  ;;  %v5956_v55 = vld [vmem:[%s6730_s6 + $0x1e0] sm:$0xff]  ;;  %v5957_v52 = vld [vmem:[%s6730_s6 + $0x1f0] sm:$0xff]  ;;  %v770_v48 = vld [vmem:[#allocation5 + $0x4f8] sm:$0xff]  ;;  %v4711_v47 = vadd.f32 %v4284_v14, %v4283_v35  ;;  %v7731_v54 = vadd.f32 %v1596_v7, %v1237_v57  ;;  %v7736_v20 = vadd.f32 %v4685_v49, %v7688_v4  ;;  %v1598_v14 = vpop.f32.mrf.mxu1 }
 0x180   : > { %10677 = vst [vmem:[#allocation35_spill] sm:$0xff] %v7723_v16  ;;  %1948 = vmatmul.mubr.f32.gmra.mxu0 %v5956_v55  ;;  %2307 = vmatmul.mubr.f32.gmra.mxu1 %v5957_v52  ;;  %v5958_v43 = vld [vmem:[%s6730_s6 + $0x910] sm:$0xff]  ;;  %v5959_v46 = vld [vmem:[%s6730_s6 + $0x228] sm:$0xff]  ;;  %v5960_v12 = vld [vmem:[%s6730_s6 + $0x238] sm:$0xff]  ;;  %v4703_v16 = vadd.f32 %v4702_v2, %v4277_v38  ;;  %v1239_v52 = vpop.f32.mrf.mxu0  ;;  %v7742_v35 = vadd.f32 %v4694_v18, %v7709_v50 }
 0x181   : > { %v4285_v56 = vmul.f32 %v5958_v43, %v5958_v43  ;;  %10678 = vst [vmem:[#allocation36_spill] sm:$0xff] %v7731_v54  ;;  %1953 = vmatprep.mubr.f32.mxu0 %v5959_v46  ;;  %2312 = vmatprep.mubr.f32.mxu1 %v5960_v12  ;;  %v5961_v55 = vld [vmem:[%s6730_s6 + $0x918] sm:$0xff]  ;;  %v5962_v57 = vld [vmem:[%s6730_s6 + $0x950] sm:$0xff]  ;;  %v7745_v43 = vadd.f32 %v1598_v14, %v1239_v52  ;;  %v5963_v2 = vld [vmem:[%s6730_s6 + $0x988] sm:$0xff]  ;;  %v1602_v50 = vpop.f32.mrf.mxu1 }
 0x182   : > { %v7739_v29 = vmul.f32 %v5961_v55, %v5961_v55  ;;  %2574 = vmatpush1.msra.mxu0 %v645_v10  ;;  %2933 = vmatpush1.msra.mxu1 %v773_v61  ;;  %10679 = vst [vmem:[#allocation37_spill] sm:$0xff] %v7742_v35  ;;  %v4293_v7 = vmul.f32 %v5962_v57, %v5962_v57  ;;  %v641_v4 = vld [vmem:[#allocation5 + $0xf0] sm:$0xff]  ;;  %v5964_v10 = vld [vmem:[%s6730_s6 + $0x980] sm:$0xff]  ;;  %v1243_v12 = vpop.f32.mrf.mxu0  ;;  %v638_v52 = vld [vmem:[#allocation5 + $0xd8] sm:$0xff] }
 0x183   : > { %10680 = vst [vmem:[#allocation38_spill] sm:$0xff] %v7745_v43  ;;  %2575 = vmatprep.subr.mxu0 %v642_v1  ;;  %2934 = vmatprep.subr.mxu1 %v770_v48  ;;  %v769_v38 = vld [vmem:[#allocation5 + $0x4f0] sm:$0xff]  ;;  %v4720_v49 = vadd.f32 %v4292_v22, %v4291_v63  ;;  %v4300_v46 = vmul.f32 %v5963_v2, %v5963_v2  ;;  %v5965_v18 = vld [vmem:[%s6730_s6 + $0x220] sm:$0xff]  ;;  %v766_v1 = vld [vmem:[#allocation5 + $0x4d8] sm:$0xff] }
 0x184   : > { %v4299_v61 = vmul.f32 %v5964_v10, %v5964_v10  ;;  %1954 = vmatmul.mubr.f32.gmra.mxu0 %v5965_v18  ;;  %v5966_v55 = vld [vmem:[%s6730_s6 + $0x230] sm:$0xff]  ;;  %v4712_v14 = vadd.f32 %v4711_v47, %v4285_v56  ;;  %v5967_v48 = vld [vmem:[%s6730_s6 + $0x958] sm:$0xff]  ;;  %v7752_v22 = vadd.f32 %v1602_v50, %v1243_v12  ;;  %v5968_v63 = vld [vmem:[%s6730_s6 + $0x268] sm:$0xff]  ;;  %v7756_v10 = vadd.f32 %v4703_v16, %v4278_v28  ;;  %v1604_v47 = vpop.f32.mrf.mxu1 }
 0x185   : > { %2313 = vmatmul.mubr.f32.gmra.mxu1 %v5966_v55  ;;  %v4294_v57 = vmul.f32 %v5967_v48, %v5967_v48  ;;  %1959 = vmatprep.mubr.f32.mxu0 %v5968_v63  ;;  %v5969_v2 = vld [vmem:[%s6730_s6 + $0x278] sm:$0xff]  ;;  %v5970_v43 = vld [vmem:[%s6730_s6 + $0x9c8] sm:$0xff]  ;;  %v4307_v18 = vmul.f32 %v7366_v51, %v7366_v51  ;;  %v1245_v55 = vpop.f32.mrf.mxu0  ;;  %v5972_v50 = vld [vmem:[%s6730_s6 + $0x990] sm:$0xff]  ;;  %v4721_v51 = vadd.f32 %v4720_v49, %v4293_v7 }
 0x186   : > { %10681 = vst [vmem:[#allocation39_spill] sm:$0xff] %v7752_v22  ;;  %2318 = vmatprep.mubr.f32.mxu1 %v5969_v2  ;;  %10682 = vst [vmem:[#allocation40_spill] sm:$0xff] %v7756_v10  ;;  %v4308_v54 = vmul.f32 %v5970_v43, %v5970_v43  ;;  %2576 = vmatpush1.msra.mxu0 %v641_v4  ;;  %v5971_v56 = vld [vmem:[%s6730_s6 + $0x998] sm:$0xff]  ;;  %v4301_v48 = vmul.f32 %v5972_v50, %v5972_v50  ;;  %v637_v16 = vld [vmem:[#allocation5 + $0xd0] sm:$0xff] }
 0x187   : > { %2935 = vmatpush1.msra.mxu1 %v769_v38  ;;  %v7762_v12 = vmul.f32 %v5971_v56, %v5971_v56  ;;  %v7765_v63 = vadd.f32 %v1604_v47, %v1245_v55  ;;  %2577 = vmatprep.subr.mxu0 %v638_v52  ;;  %v765_v28 = vld [vmem:[#allocation5 + $0x4d0] sm:$0xff]  ;;  %v4729_v43 = vadd.f32 %v4300_v46, %v4299_v61  ;;  %v5973_v2 = vld [vmem:[%s6730_s6 + $0x9d8] sm:$0xff]  ;;  %v1249_v38 = vpop.f32.mrf.mxu0  ;;  %v1608_v56 = vpop.f32.mrf.mxu1  ;;  %v5974_v22 = vld [vmem:[%s6730_s6 + $0x260] sm:$0xff] }
 0x188   : > { %2936 = vmatprep.subr.mxu1 %v766_v1  ;;  %v7768_v4 = vmul.f32 %v5973_v2, %v5973_v2  ;;  %1960 = vmatmul.mubr.f32.gmra.mxu0 %v5974_v22  ;;  %v5975_v50 = vld [vmem:[%s6730_s6 + $0x270] sm:$0xff]  ;;  %v634_v55 = vld [vmem:[#allocation5 + $0xb8] sm:$0xff]  ;;  %v7773_v47 = vadd.f32 %v4712_v14, %v7739_v29  ;;  %v7776_v49 = vadd.f32 %v1608_v56, %v1249_v38  ;;  %v5977_v46 = vld [vmem:[%s6730_s6 + $0x2a8] sm:$0xff] }
 0x189   : > { %10683 = vst [vmem:[#allocation41_spill] sm:$0xff] %v7765_v63  ;;  %2319 = vmatmul.mubr.f32.gmra.mxu1 %v5975_v50  ;;  %v762_v52 = vld [vmem:[#allocation5 + $0x4b8] sm:$0xff]  ;;  %v5976_v1 = vld [vmem:[%s6730_s6 + $0x9d0] sm:$0xff]  ;;  %1965 = vmatprep.mubr.f32.mxu0 %v5977_v46  ;;  %v4738_v2 = vadd.f32 %v4308_v54, %v4307_v18  ;;  %v5979_v63 = vld [vmem:[%s6730_s6 + $0xa08] sm:$0xff]  ;;  %v4315_v22 = vmul.f32 %v7385_v36, %v7385_v36  ;;  %v1251_v50 = vpop.f32.mrf.mxu0  ;;  %v1610_v35 = vpop.f32.mrf.mxu1 }
 0x18a   : > { %10684 = vst [vmem:[#allocation42_spill] sm:$0xff] %v7773_v47  ;;  %v4309_v7 = vmul.f32 %v5976_v1, %v5976_v1  ;;  %10685 = vst [vmem:[#allocation43_spill] sm:$0xff] %v7776_v49  ;;  %v5978_v61 = vld [vmem:[%s6730_s6 + $0x2b8] sm:$0xff]  ;;  %v4316_v10 = vmul.f32 %v5979_v63, %v5979_v63  ;;  %2578 = vmatpush1.msra.mxu0 %v637_v16  ;;  %2937 = vmatpush1.msra.mxu1 %v765_v28  ;;  %v633_v54 = vld [vmem:[#allocation5 + $0xb0] sm:$0xff] }
 0x18b   : > { %2324 = vmatprep.mubr.f32.mxu1 %v5978_v61  ;;  %v4324_v29 = vmul.f32 %v7389_v53, %v7389_v53  ;;  %v4323_v14 = vmul.f32 %v7401_v26, %v7401_v26  ;;  %v7787_v38 = vadd.f32 %v1610_v35, %v1251_v50  ;;  %2579 = vmatprep.subr.mxu0 %v634_v55  ;;  %v761_v18 = vld [vmem:[#allocation5 + $0x4b0] sm:$0xff]  ;;  %v5980_v16 = vld [vmem:[%s6730_s6 + $0xa18] sm:$0xff]  ;;  %v1255_v56 = vpop.f32.mrf.mxu0  ;;  %v1614_v1 = vpop.f32.mrf.mxu1  ;;  %v5981_v53 = vld [vmem:[%s6730_s6 + $0x2a0] sm:$0xff] }
 0x18c   : > { %2938 = vmatprep.subr.mxu1 %v762_v52  ;;  %v7789_v36 = vadd.f32 %v4721_v51, %v4294_v57  ;;  %v4730_v63 = vadd.f32 %v4729_v43, %v4301_v48  ;;  %v7792_v28 = vmul.f32 %v5980_v16, %v5980_v16  ;;  %1966 = vmatmul.mubr.f32.gmra.mxu0 %v5981_v53  ;;  %v5982_v26 = vld [vmem:[%s6730_s6 + $0x2b0] sm:$0xff]  ;;  %v630_v35 = vld [vmem:[#allocation5 + $0x98] sm:$0xff]  ;;  %v5984_v43 = vld [vmem:[%s6730_s6 + $0x2e8] sm:$0xff] }
 0x18d   : > { %10686 = vst [vmem:[#allocation44_spill] sm:$0xff] %v7787_v38  ;;  %2325 = vmatmul.mubr.f32.gmra.mxu1 %v5982_v26  ;;  %v758_v55 = vld [vmem:[#allocation5 + $0x498] sm:$0xff]  ;;  %v4332_v52 = vmul.f32 %v7410_v32, %v7410_v32  ;;  %v4331_v57 = vmul.f32 %v7428_v24, %v7428_v24  ;;  %v7800_v48 = vadd.f32 %v1614_v1, %v1255_v56  ;;  %v5985_v50 = vld [vmem:[%s6730_s6 + $0xa10] sm:$0xff]  ;;  %v1257_v53 = vpop.f32.mrf.mxu0  ;;  %v1616_v26 = vpop.f32.mrf.mxu1  ;;  %v8177_v47 = vld [vmem:[%s6730_s6 + $0x7e0] sm:$0xff] }
 0x18e   : > { %10687 = vst [vmem:[#allocation45_spill] sm:$0xff] %v7789_v36  ;;  %v5983_v51 = vld [vmem:[%s6730_s6 + $0x2f8] sm:$0xff]  ;;  %1971 = vmatprep.mubr.f32.mxu0 %v5984_v43  ;;  %v4739_v46 = vadd.f32 %v4738_v2, %v4309_v7  ;;  %v4747_v61 = vadd.f32 %v4316_v10, %v4315_v22  ;;  %v4317_v16 = vmul.f32 %v5985_v50, %v5985_v50  ;;  %v629_v1 = vld [vmem:[#allocation5 + $0x90] sm:$0xff]  ;;  %v5990_v50 = vld [vmem:[%s6730_s6 + $0x328] sm:$0xff] }
 0x18f   : > { %10688 = vst [vmem:[#allocation46_spill] sm:$0xff] %v7800_v48  ;;  %2330 = vmatprep.mubr.f32.mxu1 %v5983_v51  ;;  %2580 = vmatpush1.msra.mxu0 %v633_v54  ;;  %v4756_v32 = vadd.f32 %v4324_v29, %v4323_v14  ;;  %v4325_v24 = vmul.f32 %v7407_v25, %v7407_v25  ;;  %v757_v7 = vld [vmem:[#allocation5 + $0x490] sm:$0xff]  ;;  %v5986_v2 = vld [vmem:[%s6730_s6 + $0xa58] sm:$0xff]  ;;  %v1261_v14 = vpop.f32.mrf.mxu0  ;;  %v1620_v25 = vpop.f32.mrf.mxu1  ;;  %v5987_v54 = vld [vmem:[%s6730_s6 + $0x2e0] sm:$0xff] }
 0x190   : > { %2939 = vmatpush1.msra.mxu1 %v761_v18  ;;  %v7807_v56 = vadd.f32 %v1616_v26, %v1257_v53  ;;  %2581 = vmatprep.subr.mxu0 %v630_v35  ;;  %v7810_v10 = vadd.f32 %v4730_v63, %v7762_v12  ;;  %v7813_v22 = vmul.f32 %v5986_v2, %v5986_v2  ;;  %v5988_v18 = vld [vmem:[%s6730_s6 + $0x2f0] sm:$0xff]  ;;  %v626_v35 = vld [vmem:[#allocation5 + $0x78] sm:$0xff] }
 0x191   : > { %2940 = vmatprep.subr.mxu1 %v758_v55  ;;  %v7817_v29 = vmul.f32 %v7415_v0, %v7415_v0  ;;  %1972 = vmatmul.mubr.f32.gmra.mxu0 %v5987_v54  ;;  %v754_v55 = vld [vmem:[#allocation5 + $0x478] sm:$0xff]  ;;  %v4765_v51 = vadd.f32 %v4332_v52, %v4331_v57  ;;  %v4333_v12 = vmul.f32 %v7431_v41, %v7431_v41  ;;  %v1263_v2 = vpop.f32.mrf.mxu0  ;;  %v1622_v52 = vpop.f32.mrf.mxu1 }
 0x192   : > { %10689 = vst [vmem:[#allocation47_spill] sm:$0xff] %v7807_v56  ;;  %10690 = vst [vmem:[#allocation48_spill] sm:$0xff] %v7810_v10  ;;  %2331 = vmatmul.mubr.f32.gmra.mxu1 %v5988_v18  ;;  %v7823_v63 = vadd.f32 %v1620_v25, %v1261_v14  ;;  %v5989_v43 = vld [vmem:[%s6730_s6 + $0x338] sm:$0xff]  ;;  %1977 = vmatprep.mubr.f32.mxu0 %v5990_v50  ;;  %v7828_v0 = vadd.f32 %v4739_v46, %v7768_v4  ;;  %v625_v4 = vld [vmem:[#allocation5 + $0x70] sm:$0xff] }
 0x193   : > { %2336 = vmatprep.mubr.f32.mxu1 %v5989_v43  ;;  %v4340_v53 = vmul.f32 %v7434_v27, %v7434_v27  ;;  %v4339_v26 = vmul.f32 %v7449_v6, %v7449_v6  ;;  %2582 = vmatpush1.msra.mxu0 %v629_v1  ;;  %v7834_v41 = vadd.f32 %v4747_v61, %v4317_v16  ;;  %v753_v27 = vld [vmem:[#allocation5 + $0x470] sm:$0xff]  ;;  %v1267_v16 = vpop.f32.mrf.mxu0  ;;  %v750_v25 = vld [vmem:[#allocation5 + $0x458] sm:$0xff] }
 0x194   : > { %10691 = vst [vmem:[#allocation49_spill] sm:$0xff] %v7823_v63  ;;  %10692 = vst [vmem:[#allocation50_spill] sm:$0xff] %v7828_v0  ;;  %2941 = vmatpush1.msra.mxu1 %v757_v7  ;;  %v7836_v57 = vadd.f32 %v4756_v32, %v4325_v24  ;;  %v7838_v14 = vadd.f32 %v1622_v52, %v1263_v2  ;;  %2583 = vmatprep.subr.mxu0 %v626_v35  ;;  %v1626_v32 = vpop.f32.mrf.mxu1  ;;  %v5991_v24 = vld [vmem:[%s6730_s6 + $0x320] sm:$0xff]  ;;  %v5992_v1 = vld [vmem:[%s6730_s6 + $0x330] sm:$0xff] }
 0x195   : > { %2942 = vmatprep.subr.mxu1 %v754_v55  ;;  %v7842_v6 = vmul.f32 %v7439_v13, %v7439_v13  ;;  %v7846_v46 = vmul.f32 %v7455_v15, %v7455_v15  ;;  %v4348_v61 = vmul.f32 %v7458_v58, %v7458_v58  ;;  %1978 = vmatmul.mubr.f32.gmra.mxu0 %v5991_v24  ;;  %v622_v7 = vld [vmem:[#allocation5 + $0x58] sm:$0xff]  ;;  %v5993_v15 = vld [vmem:[%s6730_s6 + $0x368] sm:$0xff] }
 0x196   : > { %10693 = vst [vmem:[#allocation51_spill] sm:$0xff] %v7838_v14  ;;  %2337 = vmatmul.mubr.f32.gmra.mxu1 %v5992_v1  ;;  %v7852_v54 = vadd.f32 %v4765_v51, %v4333_v12  ;;  %v7856_v13 = vmul.f32 %v7462_v60, %v7462_v60  ;;  %v7858_v18 = vadd.f32 %v1626_v32, %v1267_v16  ;;  %v5994_v35 = vld [vmem:[%s6730_s6 + $0x378] sm:$0xff]  ;;  %v1269_v51 = vpop.f32.mrf.mxu0  ;;  %v1628_v12 = vpop.f32.mrf.mxu1 }
 0x197   : > { %1983 = vmatprep.mubr.f32.mxu0 %v5993_v15  ;;  %2342 = vmatprep.mubr.f32.mxu1 %v5994_v35  ;;  %v7862_v58 = vadd.f32 %v4340_v53, %v4339_v26  ;;  %v4347_v55 = vmul.f32 %v7473_v9, %v7473_v9  ;;  %v4356_v43 = vmul.f32 %v7479_v3, %v7479_v3  ;;  %v621_v26 = vld [vmem:[#allocation5 + $0x50] sm:$0xff]  ;;  %v618_v16 = vld [vmem:[#allocation5 + $0x38] sm:$0xff] }
 0x198   : > { %10694 = vst [vmem:[#allocation52_spill] sm:$0xff] %v7858_v18  ;;  %2584 = vmatpush1.msra.mxu0 %v625_v4  ;;  %2943 = vmatpush1.msra.mxu1 %v753_v27  ;;  %v4355_v60 = vmul.f32 %v7488_v19, %v7488_v19  ;;  %v4364_v50 = vmul.f32 %v7496_v37, %v7496_v37  ;;  %v749_v9 = vld [vmem:[#allocation5 + $0x450] sm:$0xff]  ;;  %v1273_v52 = vpop.f32.mrf.mxu0  ;;  %v1632_v4 = vpop.f32.mrf.mxu1  ;;  %v5995_v37 = vld [vmem:[%s6730_s6 + $0x360] sm:$0xff]  ;;  %v746_v32 = vld [vmem:[#allocation5 + $0x438] sm:$0xff] }
 0x199   : > { %v7872_v53 = vadd.f32 %v1628_v12, %v1269_v51  ;;  %2585 = vmatprep.subr.mxu0 %v622_v7  ;;  %2944 = vmatprep.subr.mxu1 %v750_v25  ;;  %v4363_v3 = vmul.f32 %v7512_v42, %v7512_v42  ;;  %v4372_v2 = vmul.f32 %v7521_v34, %v7521_v34  ;;  %v5996_v27 = vld [vmem:[%s6730_s6 + $0x370] sm:$0xff]  ;;  %v5997_v34 = vld [vmem:[%s6730_s6 + $0x3a8] sm:$0xff]  ;;  %v5998_v7 = vld [vmem:[%s6730_s6 + $0x3b8] sm:$0xff] }
 0x19a   : > { %v4371_v19 = vmul.f32 %v7536_v30, %v7536_v30  ;;  %1984 = vmatmul.mubr.f32.gmra.mxu0 %v5995_v37  ;;  %2343 = vmatmul.mubr.f32.gmra.mxu1 %v5996_v27  ;;  %v4380_v24 = vmul.f32 %v7543_v11, %v7543_v11  ;;  %v4379_v42 = vmul.f32 %v7555_v33, %v7555_v33  ;;  %v1275_v35 = vpop.f32.mrf.mxu0  ;;  %v1634_v51 = vpop.f32.mrf.mxu1  ;;  %v10717_v18 = vld [vmem:[#allocation15_spill] sm:$0xff] }
 0x19b   : > { %10695 = vst [vmem:[#allocation53_spill] sm:$0xff] %v7872_v53  ;;  %v7886_v1 = vadd.f32 %v1632_v4, %v1273_v52  ;;  %1989 = vmatprep.mubr.f32.mxu0 %v5997_v34  ;;  %2348 = vmatprep.mubr.f32.mxu1 %v5998_v7  ;;  %v4783_v30 = vadd.f32 %v4348_v61, %v4347_v55  ;;  %v617_v61 = vld [vmem:[#allocation5 + $0x30] sm:$0xff]  ;;  %v8086_v48 = vld [vmem:[%s6730_s6 + $0x578] sm:$0xff] }
 0x19c   : > { %v4349_v25 = vmul.f32 %v7476_v17, %v7476_v17  ;;  %v4357_v15 = vmul.f32 %v7493_v5, %v7493_v5  ;;  %2586 = vmatpush1.msra.mxu0 %v621_v26  ;;  %2945 = vmatpush1.msra.mxu1 %v749_v9  ;;  %v4792_v11 = vadd.f32 %v4356_v43, %v4355_v60  ;;  %v745_v17 = vld [vmem:[#allocation5 + $0x430] sm:$0xff]  ;;  %v1279_v26 = vpop.f32.mrf.mxu0  ;;  %v1638_v4 = vpop.f32.mrf.mxu1  ;;  %v5999_v43 = vld [vmem:[%s6730_s6 + $0x3a0] sm:$0xff]  ;;  %v742_v9 = vld [vmem:[#allocation5 + $0x418] sm:$0xff] }
 0x19d   : > { %10696 = vst [vmem:[#allocation54_spill] sm:$0xff] %v7886_v1  ;;  %v4365_v33 = vmul.f32 %v7515_v44, %v7515_v44  ;;  %v7896_v12 = vadd.f32 %v1634_v51, %v1275_v35  ;;  %2587 = vmatprep.subr.mxu0 %v618_v16  ;;  %2946 = vmatprep.subr.mxu1 %v746_v32  ;;  %v6000_v60 = vld [vmem:[%s6730_s6 + $0x3b0] sm:$0xff]  ;;  %v614_v44 = vld [vmem:[#allocation5 + $0x18] sm:$0xff] }
 0x19e   : > { %v4801_v55 = vadd.f32 %v4364_v50, %v4363_v3  ;;  %v4810_v5 = vadd.f32 %v4372_v2, %v4371_v19  ;;  %v4373_v52 = vmul.f32 %v7539_v45, %v7539_v45  ;;  %1990 = vmatmul.mubr.f32.gmra.mxu0 %v5999_v43  ;;  %2349 = vmatmul.mubr.f32.gmra.mxu1 %v6000_v60  ;;  %v6001_v50 = vld [vmem:[%s6730_s6 + $0x3f8] sm:$0xff]  ;;  %v6002_v3 = vld [vmem:[%s6730_s6 + $0x3e8] sm:$0xff]  ;;  %v1281_v34 = vpop.f32.mrf.mxu0  ;;  %v1640_v7 = vpop.f32.mrf.mxu1  ;;  %v613_v35 = vld [vmem:[#allocation5 + $0x10] sm:$0xff] }
 0x19f   : > { %10697 = vst [vmem:[#allocation55_spill] sm:$0xff] %v7896_v12  ;;  %v4819_v37 = vadd.f32 %v4380_v24, %v4379_v42  ;;  %v4381_v27 = vmul.f32 %v7558_v59, %v7558_v59  ;;  %v7904_v16 = vadd.f32 %v1638_v4, %v1279_v26  ;;  %2354 = vmatprep.mubr.f32.mxu1 %v6001_v50  ;;  %v6003_v19 = vld [vmem:[%s6730_s6 + $0xb58] sm:$0xff]  ;;  %v6005_v26 = vld [vmem:[%s6730_s6 + $0x3f0] sm:$0xff] }
 0x1a0   : > { %1995 = vmatprep.mubr.f32.mxu0 %v6002_v3  ;;  %v4775_v45 = vadd.f32 %v7862_v58, %v7846_v46  ;;  %v4784_v2 = vadd.f32 %v4783_v30, %v4349_v25  ;;  %v4358_v32 = vmul.f32 %v6003_v19, %v6003_v19  ;;  %2588 = vmatpush1.msra.mxu0 %v617_v61  ;;  %v741_v46 = vld [vmem:[#allocation5 + $0x410] sm:$0xff]  ;;  %v10700_v25 = vld [vmem:[#allocation12_spill] sm:$0xff]  ;;  %v1285_v61 = vpop.f32.mrf.mxu0  ;;  %v866_v4 = vld [vmem:[#allocation5 + $0x7f8] sm:$0xff] }
 0x1a1   : > { %10698 = vst [vmem:[#allocation56_spill] sm:$0xff] %v7904_v16  ;;  %2947 = vmatpush1.msra.mxu1 %v745_v17  ;;  %v4366_v59 = vmul.f32 %v7500_v23, %v7500_v23  ;;  %v4374_v24 = vmul.f32 %v7524_v40, %v7524_v40  ;;  %v7915_v42 = vadd.f32 %v1640_v7, %v1281_v34  ;;  %v1644_v17 = vpop.f32.mrf.mxu1  ;;  %v6004_v23 = vld [vmem:[%s6730_s6 + $0x3e0] sm:$0xff]  ;;  %v738_v40 = vld [vmem:[#allocation5 + $0x3f8] sm:$0xff]  ;;  %v7957_v34 = vld [vmem:[%s6730_s6 + $0x568] sm:$0xff] }
 0x1a2   : > { %2589 = vmatprep.subr.mxu0 %v614_v44  ;;  %2948 = vmatprep.subr.mxu1 %v742_v9  ;;  %v4793_v58 = vadd.f32 %v4792_v11, %v4357_v15  ;;  %v4802_v30 = vadd.f32 %v4801_v55, %v4365_v33  ;;  %v4382_v51 = vmul.f32 %v10700_v25, %v10700_v25  ;;  %v6006_v9 = vld [vmem:[%s6730_s6 + $0x428] sm:$0xff]  ;;  %v6007_v15 = vld [vmem:[%s6730_s6 + $0x438] sm:$0xff]  ;;  %v7926_v11 = vld [vmem:[%s6730_s6 + $0x560] sm:$0xff]  ;;  %v1287_v50 = vpop.f32.mrf.mxu0 }
 0x1a3   : > { %10699 = vst [vmem:[#allocation57_spill] sm:$0xff] %v7915_v42  ;;  %1996 = vmatmul.mubr.f32.gmra.mxu0 %v6004_v23  ;;  %2355 = vmatmul.mubr.f32.gmra.mxu1 %v6005_v26  ;;  %v4811_v43 = vadd.f32 %v4810_v5, %v4373_v52  ;;  %v4820_v60 = vadd.f32 %v4819_v37, %v4381_v27  ;;  %v1646_v3 = vpop.f32.mrf.mxu1  ;;  %v734_v7 = vld [vmem:[#allocation5 + $0x3d8] sm:$0xff]  ;;  %v7974_v25 = vld [vmem:[%s6730_s6 + $0x5e8] sm:$0xff]  ;;  %v7983_v23 = vld [vmem:[%s6730_s6 + $0x5e0] sm:$0xff] }
 0x1a4   : > { %v7921_v44 = vadd.f32 %v1644_v17, %v1285_v61  ;;  %2001 = vmatprep.mubr.f32.mxu0 %v6006_v9  ;;  %2360 = vmatprep.mubr.f32.mxu1 %v6007_v15  ;;  %v7930_v33 = vadd.f32 %v7834_v41, %v7792_v28  ;;  %v7934_v55 = vadd.f32 %v7836_v57, %v7813_v22  ;;  %v737_v22 = vld [vmem:[#allocation5 + $0x3f0] sm:$0xff]  ;;  %v7986_v26 = vld [vmem:[%s6730_s6 + $0x628] sm:$0xff] }
 0x1a5   : > { %v4167_v5 = vmul.f32 %v7926_v11, %v7926_v11  ;;  %2590 = vmatpush1.msra.mxu0 %v613_v35  ;;  %2949 = vmatpush1.msra.mxu1 %v741_v46  ;;  %v7940_v52 = vadd.f32 %v7852_v54, %v7817_v29  ;;  %v7943_v28 = vadd.f32 %v4775_v45, %v7842_v6  ;;  %v865_v57 = vld [vmem:[#allocation5 + $0x7f0] sm:$0xff]  ;;  %v1291_v29 = vpop.f32.mrf.mxu0  ;;  %v1650_v54 = vpop.f32.mrf.mxu1  ;;  %v6008_v6 = vld [vmem:[%s6730_s6 + $0x420] sm:$0xff]  ;;  %v6010_v35 = vld [vmem:[%s6730_s6 + $0x478] sm:$0xff] }
 0x1a6   : > { %10701 = vst [vmem:[#allocation12_spill] sm:$0xff] %v7921_v44  ;;  %10702 = vst [vmem:[#allocation58_spill] sm:$0xff] %v7930_v33  ;;  %v7945_v41 = vadd.f32 %v1646_v3, %v1287_v50  ;;  %2591 = vmatprep.subr.mxu0 %v738_v40  ;;  %2950 = vmatprep.subr.mxu1 %v866_v4  ;;  %v7948_v37 = vadd.f32 %v4784_v2, %v7856_v13  ;;  %v6009_v45 = vld [vmem:[%s6730_s6 + $0x430] sm:$0xff]  ;;  %v862_v13 = vld [vmem:[#allocation5 + $0x7d8] sm:$0xff] }
 0x1a7   : > { %10703 = vst [vmem:[#allocation59_spill] sm:$0xff] %v7934_v55  ;;  %10704 = vst [vmem:[#allocation60_spill] sm:$0xff] %v7940_v52  ;;  %v7950_v27 = vadd.f32 %v4793_v58, %v4358_v32  ;;  %v7952_v19 = vadd.f32 %v4802_v30, %v4366_v59  ;;  %2002 = vmatmul.mubr.f32.gmra.mxu0 %v6008_v6  ;;  %2361 = vmatmul.mubr.f32.gmra.mxu1 %v6009_v45  ;;  %v6011_v46 = vld [vmem:[%s6730_s6 + $0x468] sm:$0xff]  ;;  %v7971_v30 = vld [vmem:[%s6730_s6 + $0x5a0] sm:$0xff]  ;;  %v1293_v61 = vpop.f32.mrf.mxu0  ;;  %v1652_v17 = vpop.f32.mrf.mxu1 }
 0x1a8   : > { %10705 = vst [vmem:[#allocation61_spill] sm:$0xff] %v7943_v28  ;;  %10706 = vst [vmem:[#allocation62_spill] sm:$0xff] %v7945_v41  ;;  %v7959_v2 = vadd.f32 %v4811_v43, %v4374_v24  ;;  %v7961_v32 = vadd.f32 %v4820_v60, %v4382_v51  ;;  %v7963_v59 = vadd.f32 %v1650_v54, %v1291_v29  ;;  %2366 = vmatprep.mubr.f32.mxu1 %v6010_v35  ;;  %v7968_v58 = vld [vmem:[%s6730_s6 + $0x5a8] sm:$0xff]  ;;  %v7989_v40 = vld [vmem:[%s6730_s6 + $0x620] sm:$0xff] }
 0x1a9   : > { %10707 = vst [vmem:[#allocation63_spill] sm:$0xff] %v7948_v37  ;;  %10708 = vst [vmem:[#allocation64_spill] sm:$0xff] %v7950_v27  ;;  %2007 = vmatprep.mubr.f32.mxu0 %v6011_v46  ;;  %v4168_v24 = vmul.f32 %v7957_v34, %v7957_v34  ;;  %v7980_v51 = vmul.f32 %v7968_v58, %v7968_v58  ;;  %2592 = vmatpush2.msra.mxu0 %v737_v22  ;;  %v10713_v4 = vld [vmem:[#allocation14_spill] sm:$0xff]  ;;  %v8001_v50 = vld [vmem:[%s6730_s6 + $0x668] sm:$0xff] }
 0x1aa   : > { %10709 = vst [vmem:[#allocation65_spill] sm:$0xff] %v7952_v19  ;;  %10710 = vst [vmem:[#allocation66_spill] sm:$0xff] %v7959_v2  ;;  %2951 = vmatpush2.msra.mxu1 %v865_v57  ;;  %v4579_v43 = vadd.f32 %v10713_v4, %v4167_v5  ;;  %v7992_v60 = vadd.f32 %v1652_v17, %v1293_v61  ;;  %v4175_v9 = vmul.f32 %v7971_v30, %v7971_v30  ;;  %v733_v3 = vld [vmem:[#allocation5 + $0x3d0] sm:$0xff]  ;;  %v1297_v57 = vpop.f32.mrf.mxu0  ;;  %v1656_v5 = vpop.f32.mrf.mxu1  ;;  %v6012_v29 = vld [vmem:[%s6730_s6 + $0x460] sm:$0xff] }
 0x1ab   : > { %10711 = vst [vmem:[#allocation67_spill] sm:$0xff] %v7961_v32  ;;  %10712 = vst [vmem:[#allocation68_spill] sm:$0xff] %v7963_v59  ;;  %v7998_v15 = vmul.f32 %v7974_v25, %v7974_v25  ;;  %2593 = vmatprep.subr.mxu0 %v734_v7  ;;  %2952 = vmatprep.subr.mxu1 %v862_v13  ;;  %v861_v22 = vld [vmem:[#allocation5 + $0x7d0] sm:$0xff]  ;;  %v4183_v6 = vmul.f32 %v7983_v23, %v7983_v23  ;;  %v8016_v13 = vld [vmem:[%s6730_s6 + $0x660] sm:$0xff] }
 0x1ac   : > { %10714 = vst [vmem:[#allocation14_spill] sm:$0xff] %v7992_v60  ;;  %2008 = vmatmul.mubr.f32.gmra.mxu0 %v6012_v29  ;;  %v6013_v54 = vld [vmem:[%s6730_s6 + $0x470] sm:$0xff]  ;;  %v8009_v45 = vmul.f32 %v7986_v26, %v7986_v26  ;;  %v8013_v7 = vmul.f32 %v7989_v40, %v7989_v40  ;;  %v730_v35 = vld [vmem:[#allocation5 + $0x3b8] sm:$0xff]  ;;  %v8018_v61 = vadd.f32 %v1656_v5, %v1297_v57  ;;  %v6014_v17 = vld [vmem:[%s6730_s6 + $0x4a8] sm:$0xff]  ;;  %v1299_v5 = vpop.f32.mrf.mxu0 }
 0x1ad   : > { %2367 = vmatmul.mubr.f32.gmra.mxu1 %v6013_v54  ;;  %v858_v46 = vld [vmem:[#allocation5 + $0x7b8] sm:$0xff]  ;;  %2013 = vmatprep.mubr.f32.mxu0 %v6014_v17  ;;  %v8023_v29 = vld [vmem:[%s6730_s6 + $0x570] sm:$0xff]  ;;  %v8027_v54 = vmul.f32 %v8001_v50, %v8001_v50  ;;  %v8031_v60 = vmul.f32 %v8016_v13, %v8016_v13  ;;  %v8034_v59 = vld [vmem:[%s6730_s6 + $0x6a8] sm:$0xff]  ;;  %v4580_v16 = vadd.f32 %v4579_v43, %v4168_v24 }
 0x1ae   : > { %10715 = vst [vmem:[#allocation69_spill] sm:$0xff] %v8018_v61  ;;  %v6015_v4 = vld [vmem:[%s6730_s6 + $0x4b8] sm:$0xff]  ;;  %v8037_v57 = vld [vmem:[%s6730_s6 + $0x6a0] sm:$0xff]  ;;  %v1658_v61 = vpop.f32.mrf.mxu1  ;;  %v8041_v17 = vmul.f32 %v8034_v59, %v8034_v59  ;;  %2594 = vmatpush2.msra.mxu0 %v733_v3  ;;  %2953 = vmatpush2.msra.mxu1 %v861_v22  ;;  %v8050_v44 = vld [vmem:[%s6730_s6 + $0x728] sm:$0xff]  ;;  %v4169_v42 = vmul.f32 %v8023_v29, %v8023_v29  ;;  %v1303_v63 = vpop.f32.mrf.mxu0 }
 0x1af   : > { %2372 = vmatprep.mubr.f32.mxu1 %v6015_v4  ;;  %v8044_v4 = vld [vmem:[%s6730_s6 + $0x6e8] sm:$0xff]  ;;  %v8047_v41 = vld [vmem:[%s6730_s6 + $0x6e0] sm:$0xff]  ;;  %v8054_v12 = vadd.f32 %v1658_v61, %v1299_v5  ;;  %v8058_v1 = vmul.f32 %v8037_v57, %v8037_v57  ;;  %2595 = vmatprep.subr.mxu0 %v730_v35  ;;  %v729_v53 = vld [vmem:[#allocation5 + $0x3b0] sm:$0xff]  ;;  %v4588_v14 = vadd.f32 %v10717_v18, %v4175_v9 }
 0x1b0   : > { %v8061_v3 = vld [vmem:[%s6730_s6 + $0x720] sm:$0xff]  ;;  %2954 = vmatprep.subr.mxu1 %v858_v46  ;;  %v857_v22 = vld [vmem:[#allocation5 + $0x7b0] sm:$0xff]  ;;  %v1662_v56 = vpop.f32.mrf.mxu1  ;;  %v8068_v61 = vmul.f32 %v8044_v4, %v8044_v4  ;;  %v8072_v35 = vmul.f32 %v8047_v41, %v8047_v41  ;;  %v8076_v18 = vmul.f32 %v8050_v44, %v8050_v44  ;;  %v8079_v9 = vld [vmem:[%s6730_s6 + $0x768] sm:$0xff]  ;;  %v1305_v32 = vpop.f32.mrf.mxu0  ;;  %2596 = vmatpush2.msra.mxu0 %v729_v53 }
 0x1b1   : > { %10716 = vst [vmem:[#allocation70_spill] sm:$0xff] %v8054_v12  ;;  %v6016_v24 = vld [vmem:[%s6730_s6 + $0x4a0] sm:$0xff]  ;;  %v6017_v43 = vld [vmem:[%s6730_s6 + $0x4b0] sm:$0xff]  ;;  %v726_v46 = vld [vmem:[#allocation5 + $0x398] sm:$0xff]  ;;  %v8090_v38 = vmul.f32 %v8061_v3, %v8061_v3  ;;  %v8094_v49 = vmul.f32 %v8079_v9, %v8079_v9  ;;  %2955 = vmatpush2.msra.mxu1 %v857_v22  ;;  %v4589_v52 = vadd.f32 %v4588_v14, %v7980_v51 }
 0x1b2   : > { %2014 = vmatmul.mubr.f32.gmra.mxu0 %v6016_v24  ;;  %2373 = vmatmul.mubr.f32.gmra.mxu1 %v6017_v43  ;;  %v854_v5 = vld [vmem:[#allocation5 + $0x798] sm:$0xff]  ;;  %v8081_v24 = vadd.f32 %v1662_v56, %v1303_v63  ;;  %v6019_v12 = vld [vmem:[%s6730_s6 + $0x4e8] sm:$0xff]  ;;  %v1664_v2 = vpop.f32.mrf.mxu1  ;;  %v8097_v19 = vld [vmem:[%s6730_s6 + $0x5b0] sm:$0xff]  ;;  %v4170_v63 = vmul.f32 %v8086_v48, %v8086_v48  ;;  %v1309_v55 = vpop.f32.mrf.mxu0  ;;  %v4615_v0 = vadd.f32 %v7624_v62, %v8031_v60 }
 0x1b3   : > { %v6018_v43 = vld [vmem:[%s6730_s6 + $0x4f8] sm:$0xff]  ;;  %2019 = vmatprep.mubr.f32.mxu0 %v6019_v12  ;;  %v8100_v56 = vld [vmem:[%s6730_s6 + $0x760] sm:$0xff]  ;;  %v4581_v12 = vadd.f32 %v4580_v16, %v4169_v42  ;;  %v8105_v27 = vadd.f32 %v1664_v2, %v1305_v32  ;;  %2597 = vmatprep.subr.mxu0 %v726_v46  ;;  %v725_v37 = vld [vmem:[#allocation5 + $0x390] sm:$0xff]  ;;  %v4177_v22 = vmul.f32 %v8097_v19, %v8097_v19 }
 0x1b4   : > { %10718 = vst [vmem:[#allocation15_spill] sm:$0xff] %v8081_v24  ;;  %2378 = vmatprep.mubr.f32.mxu1 %v6018_v43  ;;  %10719 = vst [vmem:[#allocation71_spill] sm:$0xff] %v8100_v56  ;;  %v10720_v43 = vld [vmem:[#allocation17_spill] sm:$0xff]  ;;  %2956 = vmatprep.subr.mxu1 %v854_v5  ;;  %v1668_v16 = vpop.f32.mrf.mxu1  ;;  %v6020_v42 = vld [vmem:[%s6730_s6 + $0x4e0] sm:$0xff]  ;;  %v8117_v32 = vmul.f32 %v8100_v56, %v8100_v56  ;;  %v4606_v5 = vadd.f32 %v7621_v31, %v8013_v7  ;;  %v1311_v10 = vpop.f32.mrf.mxu0 }
 0x1b5   : > { %v4597_v24 = vadd.f32 %v10720_v43, %v4183_v6  ;;  %10721 = vst [vmem:[#allocation17_spill] sm:$0xff] %v8105_v27  ;;  %v8108_v28 = vld [vmem:[%s6730_s6 + $0x7a8] sm:$0xff]  ;;  %v853_v53 = vld [vmem:[#allocation5 + $0x790] sm:$0xff]  ;;  %v8124_v46 = vld [vmem:[%s6730_s6 + $0x7a0] sm:$0xff]  ;;  %v8128_v43 = vadd.f32 %v1668_v16, %v1309_v55  ;;  %2598 = vmatpush2.msra.mxu0 %v725_v37  ;;  %v4582_v55 = vadd.f32 %v4581_v12, %v4170_v63 }
 0x1b6   : > { %10722 = vst [vmem:[#allocation72_spill] sm:$0xff] %v8108_v28  ;;  %2020 = vmatmul.mubr.f32.gmra.mxu0 %v6020_v42  ;;  %v6021_v2 = vld [vmem:[%s6730_s6 + $0x4f0] sm:$0xff]  ;;  %v8121_v6 = vmul.f32 %v8108_v28, %v8108_v28  ;;  %10723 = vst [vmem:[#allocation73_spill] sm:$0xff] %v8124_v46  ;;  %v722_v14 = vld [vmem:[#allocation5 + $0x378] sm:$0xff]  ;;  %v8137_v33 = vmul.f32 %v8124_v46, %v8124_v46  ;;  %v1670_v36 = vpop.f32.mrf.mxu1  ;;  %2957 = vmatpush2.msra.mxu1 %v853_v53  ;;  %v1315_v53 = vpop.f32.mrf.mxu0 }
 0x1b7   : > { %2379 = vmatmul.mubr.f32.gmra.mxu1 %v6021_v2  ;;  %v850_v51 = vld [vmem:[#allocation5 + $0x778] sm:$0xff]  ;;  %10724 = vst [vmem:[#allocation74_spill] sm:$0xff] %v8128_v43  ;;  %v6022_v42 = vld [vmem:[%s6730_s6 + $0x528] sm:$0xff]  ;;  %v8133_v27 = vld [vmem:[%s6730_s6 + $0x5f0] sm:$0xff]  ;;  %v4598_v16 = vadd.f32 %v4597_v24, %v7998_v15  ;;  %2599 = vmatprep.subr.mxu0 %v722_v14  ;;  %v4590_v37 = vadd.f32 %v4589_v52, %v4177_v22 }
 0x1b8   : > { %2025 = vmatprep.mubr.f32.mxu0 %v6022_v42  ;;  %v6023_v2 = vld [vmem:[%s6730_s6 + $0x538] sm:$0xff]  ;;  %v8143_v31 = vld [vmem:[%s6730_s6 + $0x630] sm:$0xff]  ;;  %v4185_v7 = vmul.f32 %v8133_v27, %v8133_v27  ;;  %v8148_v42 = vadd.f32 %v1670_v36, %v1311_v10  ;;  %2958 = vmatprep.subr.mxu1 %v850_v51  ;;  %v1674_v46 = vpop.f32.mrf.mxu1  ;;  %v6024_v63 = vld [vmem:[%s6730_s6 + $0x520] sm:$0xff]  ;;  %v4607_v52 = vadd.f32 %v4606_v5, %v8009_v45 }
 0x1b9   : > { %2384 = vmatprep.mubr.f32.mxu1 %v6023_v2  ;;  %v402_v28 = vld [vmem:[%s6730_s6 + $0x5b8] sm:$0xff]  ;;  %v8151_v2 = vld [vmem:[%s6730_s6 + $0x7e8] sm:$0xff]  ;;  %v721_v62 = vld [vmem:[#allocation5 + $0x370] sm:$0xff]  ;;  %v4193_v24 = vmul.f32 %v8143_v31, %v8143_v31  ;;  %v8165_v22 = vadd.f32 %v1674_v46, %v1315_v53  ;;  %v8185_v53 = vmul.f32 %v8177_v47, %v8177_v47  ;;  %4583 = vadd.xlane.f32.xlu1 %v4582_v55 }
 0x1ba   : > { %10725 = vst [vmem:[#allocation75_spill] sm:$0xff] %v8148_v42  ;;  %10726 = vst [vmem:[#allocation76_spill] sm:$0xff] %v8151_v2  ;;  %v849_v60 = vld [vmem:[#allocation5 + $0x770] sm:$0xff]  ;;  %v4178_v43 = vmul.f32 %v402_v28, %v402_v28  ;;  %2026 = vmatmul.mubr.f32.gmra.mxu0 %v6024_v63  ;;  %v8160_v36 = vmul.f32 %v8151_v2, %v8151_v2  ;;  %v718_v10 = vld [vmem:[#allocation5 + $0x358] sm:$0xff]  ;;  %v4616_v63 = vadd.f32 %v4615_v0, %v8027_v54  ;;  %v1676_v42 = vpop.f32.mrf.mxu1 }
 0x1bb   : > { %v6025_v12 = vld [vmem:[%s6730_s6 + $0x530] sm:$0xff]  ;;  %10727 = vst [vmem:[#allocation77_spill] sm:$0xff] %v8165_v22  ;;  %2031 = vmatprep.mubr.f32.mxu0 %v7957_v34  ;;  %v410_v14 = vld [vmem:[%s6730_s6 + $0x5f8] sm:$0xff]  ;;  %2600 = vmatpush2.msra.mxu0 %v721_v62  ;;  %v8188_v0 = vld [vmem:[%s6730_s6 + $0x828] sm:$0xff] }
 0x1bc   : > { %2385 = vmatmul.mubr.f32.gmra.mxu1 %v6025_v12  ;;  %v8156_v15 = vld [vmem:[%s6730_s6 + $0x670] sm:$0xff]  ;;  %v1317_v12 = vpop.f32.mrf.mxu0  ;;  %v8174_v2 = vld [vmem:[%s6730_s6 + $0x638] sm:$0xff]  ;;  %v4186_v45 = vmul.f32 %v410_v14, %v410_v14  ;;  %2601 = vmatprep.subr.mxu0 %v718_v10  ;;  %v1680_v56 = vpop.f32.mrf.mxu1  ;;  %v8197_v55 = vmul.f32 %v8188_v0, %v8188_v0 }
 0x1bd   : > { %2390 = vmatprep.mubr.f32.mxu1 %v8086_v48  ;;  %v4201_v51 = vmul.f32 %v8156_v15, %v8156_v15  ;;  %2959 = vmatpush2.msra.mxu1 %v849_v60  ;;  %v4599_v48 = vadd.f32 %v4598_v16, %v4185_v7  ;;  %v10728_v34 = vld [vmem:[#allocation22_spill] sm:$0xff]  ;;  %v8181_v5 = vadd.f32 %v1676_v42, %v1317_v12 }
 0x1be   : > { %v4624_v46 = vadd.f32 %v10728_v34, %v8058_v1  ;;  %v717_v54 = vld [vmem:[#allocation5 + $0x350] sm:$0xff]  ;;  %v846_v62 = vld [vmem:[#allocation5 + $0x758] sm:$0xff]  ;;  %v4591_v60 = vadd.f32 %v4590_v37, %v4178_v43  ;;  %v1321_v22 = vpop.f32.mrf.mxu0  ;;  %2032 = vmatmul.mubr.f32.gmra.mxu0 %v7926_v11  ;;  %v4194_v16 = vmul.f32 %v8174_v2, %v8174_v2  ;;  %v4608_v42 = vadd.f32 %v4607_v52, %v4193_v24  ;;  %v1682_v12 = vpop.f32.mrf.mxu1  ;;  %v8210_v34 = vld [vmem:[%s6730_s6 + $0x820] sm:$0xff] }
 0x1bf   : > { %10729 = vst [vmem:[#allocation22_spill] sm:$0xff] %v8181_v5  ;;  %v8193_v1 = vld [vmem:[%s6730_s6 + $0x678] sm:$0xff]  ;;  %v845_v7 = vld [vmem:[#allocation5 + $0x750] sm:$0xff]  ;;  %v8201_v43 = vadd.f32 %v1680_v56, %v1321_v22  ;;  %2037 = vmatprep.mubr.f32.mxu0 %v7968_v58  ;;  %v4617_v37 = vadd.f32 %v4616_v63, %v4201_v51  ;;  %2602 = vmatpush2.msra.mxu0 %v717_v54  ;;  %v8213_v24 = vld [vmem:[%s6730_s6 + $0x868] sm:$0xff] }
 0x1c0   : > { %2391 = vmatmul.mubr.f32.gmra.mxu1 %v8023_v29  ;;  %v8205_v11 = vld [vmem:[%s6730_s6 + $0x6b0] sm:$0xff]  ;;  %v4202_v29 = vmul.f32 %v8193_v1, %v8193_v1  ;;  %v1323_v10 = vpop.f32.mrf.mxu0  ;;  %2960 = vmatprep.subr.mxu1 %v846_v62  ;;  %v4600_v56 = vadd.f32 %v4599_v48, %v4186_v45  ;;  %v4625_v58 = vadd.f32 %v4624_v46, %v8041_v17  ;;  %v8225_v51 = vld [vmem:[%s6730_s6 + $0x860] sm:$0xff]  ;;  %v8228_v63 = vld [vmem:[%s6730_s6 + $0x8a8] sm:$0xff] }
 0x1c1   : > { %10730 = vst [vmem:[#allocation78_spill] sm:$0xff] %v8201_v43  ;;  %2396 = vmatprep.mubr.f32.mxu1 %v402_v28  ;;  %v4209_v28 = vmul.f32 %v8205_v11, %v8205_v11  ;;  %v8218_v52 = vadd.f32 %v1682_v12, %v1323_v10  ;;  %v8222_v22 = vmul.f32 %v8210_v34, %v8210_v34  ;;  %10732 = vst [vmem:[#allocation80_spill] sm:$0xff] %v8225_v51  ;;  %v714_v54 = vld [vmem:[#allocation5 + $0x338] sm:$0xff]  ;;  %v1686_v43 = vpop.f32.mrf.mxu1  ;;  %v8253_v5 = vld [vmem:[%s6730_s6 + $0x6f0] sm:$0xff] }
 0x1c2   : > { %4592 = vadd.xlane.f32.xlu0 %v4591_v60  ;;  %2961 = vmatpush2.msra.mxu1 %v845_v7  ;;  %10733 = vst [vmem:[#allocation81_spill] sm:$0xff] %v8228_v63  ;;  %v10734_v45 = vld [vmem:[#allocation26_spill] sm:$0xff]  ;;  %v1327_v62 = vpop.f32.mrf.mxu0  ;;  %v8236_v17 = vmul.f32 %v8213_v24, %v8213_v24  ;;  %v8240_v46 = vmul.f32 %v8225_v51, %v8225_v51 }
 0x1c3   : > { %10731 = vst [vmem:[#allocation79_spill] sm:$0xff] %v8218_v52  ;;  %v4633_v48 = vadd.f32 %v10734_v45, %v8072_v35  ;;  %2038 = vmatmul.mubr.f32.gmra.mxu0 %v7971_v30  ;;  %v8244_v60 = vmul.f32 %v8228_v63, %v8228_v63  ;;  %v713_v35 = vld [vmem:[#allocation5 + $0x330] sm:$0xff]  ;;  %v842_v7 = vld [vmem:[#allocation5 + $0x738] sm:$0xff]  ;;  %v8246_v10 = vadd.f32 %v1686_v43, %v1327_v62  ;;  %v1688_v52 = vpop.f32.mrf.mxu1  ;;  %v8262_v62 = vld [vmem:[%s6730_s6 + $0x8a0] sm:$0xff] }
 0x1c4   : > { %2397 = vmatmul.mubr.f32.gmra.mxu1 %v8097_v19  ;;  %2043 = vmatprep.mubr.f32.mxu0 %v7974_v25  ;;  %v8250_v19 = vld [vmem:[%s6730_s6 + $0x6b8] sm:$0xff]  ;;  %v4609_v30 = vadd.f32 %v4608_v42, %v4194_v16  ;;  %v4618_v12 = vadd.f32 %v4617_v37, %v4202_v29  ;;  %v1329_v45 = vpop.f32.mrf.mxu0  ;;  %v4626_v51 = vadd.f32 %v4625_v58, %v4209_v28  ;;  %v841_v16 = vld [vmem:[#allocation5 + $0x730] sm:$0xff]  ;;  %v8265_v42 = vld [vmem:[%s6730_s6 + $0x8e8] sm:$0xff] }
 0x1c5   : > { %10735 = vst [vmem:[#allocation26_spill] sm:$0xff] %v8246_v10  ;;  %2402 = vmatprep.mubr.f32.mxu1 %v410_v14  ;;  %4601 = vadd.xlane.f32.xlu1 %v4600_v56  ;;  %v4210_v63 = vmul.f32 %v8250_v19, %v8250_v19  ;;  %v10736_v43 = vld [vmem:[#allocation27_spill] sm:$0xff]  ;;  %v8259_v25 = vadd.f32 %v1688_v52, %v1329_v45  ;;  %v1692_v28 = vpop.f32.mrf.mxu1 }
 0x1c6   : > { %2603 = vmatprep.subr.mxu0 %v714_v54  ;;  %v4642_v14 = vadd.f32 %v10736_v43, %v8090_v38  ;;  %2962 = vmatprep.subr.mxu1 %v842_v7  ;;  %v4217_v29 = vmul.f32 %v8253_v5, %v8253_v5  ;;  %v4634_v37 = vadd.f32 %v4633_v48, %v8068_v61  ;;  %v1333_v56 = vpop.f32.mrf.mxu0  ;;  %v8281_v52 = vld [vmem:[%s6730_s6 + $0x8e0] sm:$0xff]  ;;  %v710_v54 = vld [vmem:[#allocation5 + $0x318] sm:$0xff]  ;;  %v8284_v61 = vld [vmem:[%s6730_s6 + $0x928] sm:$0xff] }
 0x1c7   : > { %10737 = vst [vmem:[#allocation27_spill] sm:$0xff] %v8259_v25  ;;  %2604 = vmatpush2.msra.mxu0 %v713_v35  ;;  %v8274_v38 = vmul.f32 %v8262_v62, %v8262_v62  ;;  %v8278_v58 = vmul.f32 %v8265_v42, %v8265_v42  ;;  %10738 = vst [vmem:[#allocation82_spill] sm:$0xff] %v8284_v61  ;;  %v10739_v48 = vld [vmem:[#allocation29_spill] sm:$0xff]  ;;  %v8288_v35 = vadd.f32 %v1692_v28, %v1333_v56  ;;  %v1694_v25 = vpop.f32.mrf.mxu1  ;;  %v838_v10 = vld [vmem:[#allocation5 + $0x718] sm:$0xff] }
 0x1c8   : > { %2044 = vmatmul.mubr.f32.gmra.mxu0 %v7983_v23  ;;  %2403 = vmatmul.mubr.f32.gmra.mxu1 %v8133_v27  ;;  %v4651_v23 = vadd.f32 %v10739_v48, %v8117_v32  ;;  %v8293_v27 = vld [vmem:[%s6730_s6 + $0x730] sm:$0xff]  ;;  %v8297_v7 = vmul.f32 %v8281_v52, %v8281_v52  ;;  %v8301_v45 = vmul.f32 %v8284_v61, %v8284_v61  ;;  %v1335_v43 = vpop.f32.mrf.mxu0  ;;  %v8304_v32 = vld [vmem:[%s6730_s6 + $0x6f8] sm:$0xff]  ;;  %v8315_v61 = vld [vmem:[%s6730_s6 + $0x920] sm:$0xff] }
 0x1c9   : > { %10740 = vst [vmem:[#allocation29_spill] sm:$0xff] %v8288_v35  ;;  %2049 = vmatprep.mubr.f32.mxu0 %v7986_v26  ;;  %2408 = vmatprep.mubr.f32.mxu1 %v8174_v2  ;;  %v8307_v56 = vld [vmem:[%s6730_s6 + $0x770] sm:$0xff]  ;;  %v4627_v26 = vadd.f32 %v4626_v51, %v4210_v63  ;;  %v4225_v2 = vmul.f32 %v8293_v27, %v8293_v27 }
 0x1ca   : > { %2963 = vmatpush2.msra.mxu1 %v841_v16  ;;  %4610 = vadd.xlane.f32.xlu0 %v4609_v30  ;;  %v4643_v28 = vadd.f32 %v4642_v14, %v8076_v18  ;;  %v8312_v48 = vadd.f32 %v1694_v25, %v1335_v43  ;;  %v709_v35 = vld [vmem:[#allocation5 + $0x310] sm:$0xff]  ;;  %v4218_v16 = vmul.f32 %v8304_v32, %v8304_v32  ;;  %v1339_v63 = vpop.f32.mrf.mxu0  ;;  %v1698_v30 = vpop.f32.mrf.mxu1  ;;  %v8326_v14 = vld [vmem:[%s6730_s6 + $0x968] sm:$0xff] }
 0x1cb   : > { %2605 = vmatprep.subr.mxu0 %v710_v54  ;;  %4619 = vadd.xlane.f32.xlu1 %v4618_v12  ;;  %v4635_v51 = vadd.f32 %v4634_v37, %v4217_v29  ;;  %v8323_v18 = vmul.f32 %v8315_v61, %v8315_v61  ;;  %v837_v12 = vld [vmem:[#allocation5 + $0x710] sm:$0xff]  ;;  %10742 = vst [vmem:[#allocation84_spill] sm:$0xff] %v8326_v14  ;;  %v8343_v37 = vld [vmem:[%s6730_s6 + $0x960] sm:$0xff] }
 0x1cc   : > { %10741 = vst [vmem:[#allocation83_spill] sm:$0xff] %v8312_v48  ;;  %2050 = vmatmul.mubr.f32.gmra.mxu0 %v7989_v40  ;;  %2409 = vmatmul.mubr.f32.gmra.mxu1 %v8143_v31  ;;  %v4233_v25 = vmul.f32 %v8307_v56, %v8307_v56  ;;  %v4652_v54 = vadd.f32 %v4651_v23, %v8094_v49  ;;  %v8336_v40 = vld [vmem:[%s6730_s6 + $0x738] sm:$0xff]  ;;  %10744 = vst [vmem:[#allocation86_spill] sm:$0xff] %v8343_v37  ;;  %v1341_v48 = vpop.f32.mrf.mxu0  ;;  %v1700_v49 = vpop.f32.mrf.mxu1 }
 0x1cd   : > { %v8331_v29 = vadd.f32 %v1698_v30, %v1339_v63  ;;  %2414 = vmatprep.mubr.f32.mxu1 %v8193_v1  ;;  %2055 = vmatprep.mubr.f32.mxu0 %v8001_v50  ;;  %v8340_v31 = vmul.f32 %v8326_v14, %v8326_v14  ;;  %v4660_v43 = vadd.f32 %v7703_v21, %v8137_v33  ;;  %v8352_v50 = vld [vmem:[%s6730_s6 + $0x9a8] sm:$0xff]  ;;  %v706_v21 = vld [vmem:[#allocation5 + $0x2f8] sm:$0xff] }
 0x1ce   : > { %2606 = vmatpush2.msra.mxu0 %v709_v35  ;;  %2964 = vmatprep.subr.mxu1 %v838_v10  ;;  %v8349_v1 = vmul.f32 %v8343_v37, %v8343_v37  ;;  %v4226_v23 = vmul.f32 %v8336_v40, %v8336_v40  ;;  %v4644_v63 = vadd.f32 %v4643_v28, %v4225_v2  ;;  %v834_v33 = vld [vmem:[#allocation5 + $0x6f8] sm:$0xff]  ;;  %v1345_v37 = vpop.f32.mrf.mxu0  ;;  %v1704_v14 = vpop.f32.mrf.mxu1  ;;  %v8368_v2 = vld [vmem:[%s6730_s6 + $0x7b0] sm:$0xff] }
 0x1cf   : > { %10743 = vst [vmem:[#allocation85_spill] sm:$0xff] %v8331_v29  ;;  %v8356_v30 = vadd.f32 %v1700_v49, %v1341_v48  ;;  %v8359_v29 = vld [vmem:[%s6730_s6 + $0x778] sm:$0xff]  ;;  %2965 = vmatpush2.msra.mxu1 %v837_v12  ;;  %4628 = vadd.xlane.f32.xlu0 %v4627_v26  ;;  %v4636_v10 = vadd.f32 %v4635_v51, %v4218_v16  ;;  %v705_v28 = vld [vmem:[#allocation5 + $0x2f0] sm:$0xff] }
 0x1d0   : > { %v8363_v35 = vmul.f32 %v8352_v50, %v8352_v50  ;;  %2056 = vmatmul.mubr.f32.gmra.mxu0 %v8016_v13  ;;  %2415 = vmatmul.mubr.f32.gmra.mxu1 %v8156_v15  ;;  %v833_v48 = vld [vmem:[#allocation5 + $0x6f0] sm:$0xff]  ;;  %v4234_v26 = vmul.f32 %v8359_v29, %v8359_v29  ;;  %v4653_v12 = vadd.f32 %v4652_v54, %v4233_v25  ;;  %v8379_v13 = vld [vmem:[%s6730_s6 + $0x9a0] sm:$0xff]  ;;  %v8382_v15 = vld [vmem:[%s6730_s6 + $0x9e8] sm:$0xff]  ;;  %v1347_v54 = vpop.f32.mrf.mxu0 }
 0x1d1   : > { %10745 = vst [vmem:[#allocation87_spill] sm:$0xff] %v8356_v30  ;;  %v4669_v16 = vadd.f32 %v7706_v8, %v8185_v53  ;;  %v8374_v51 = vadd.f32 %v1704_v14, %v1345_v37  ;;  %2061 = vmatprep.mubr.f32.mxu0 %v8034_v59  ;;  %2420 = vmatprep.mubr.f32.mxu1 %v8250_v19  ;;  %v1706_v30 = vpop.f32.mrf.mxu1  ;;  %v8396_v19 = vld [vmem:[%s6730_s6 + $0x9e0] sm:$0xff]  ;;  %v8401_v37 = vld [vmem:[%s6730_s6 + $0x7f0] sm:$0xff] }
 0x1d2   : > { %v4241_v49 = vmul.f32 %v8368_v2, %v8368_v2  ;;  %v4661_v25 = vadd.f32 %v4660_v43, %v8121_v6  ;;  %2607 = vmatprep.subr.mxu0 %v706_v21  ;;  %2966 = vmatprep.subr.mxu1 %v834_v33  ;;  %v8389_v8 = vmul.f32 %v8379_v13, %v8379_v13  ;;  %v702_v6 = vld [vmem:[#allocation5 + $0x2d8] sm:$0xff]  ;;  %v701_v33 = vld [vmem:[#allocation5 + $0x2d0] sm:$0xff] }
 0x1d3   : > { %10746 = vst [vmem:[#allocation88_spill] sm:$0xff] %v8374_v51  ;;  %v4645_v59 = vadd.f32 %v4644_v63, %v4226_v23  ;;  %v8393_v53 = vmul.f32 %v8382_v15, %v8382_v15  ;;  %v8398_v14 = vadd.f32 %v1706_v30, %v1347_v54  ;;  %2608 = vmatpush2.msra.mxu0 %v705_v28  ;;  %v1351_v63 = vpop.f32.mrf.mxu0  ;;  %v1710_v21 = vpop.f32.mrf.mxu1  ;;  %v8412_v30 = vld [vmem:[%s6730_s6 + $0x7b8] sm:$0xff]  ;;  %v8430_v51 = vld [vmem:[%s6730_s6 + $0x830] sm:$0xff] }
 0x1d4   : > { %2967 = vmatpush2.msra.mxu1 %v833_v48  ;;  %v8405_v43 = vmul.f32 %v8396_v19, %v8396_v19  ;;  %v4678_v23 = vadd.f32 %v7721_v39, %v8222_v22  ;;  %2062 = vmatmul.mubr.f32.gmra.mxu0 %v8037_v57  ;;  %v4654_v28 = vadd.f32 %v4653_v12, %v4234_v26  ;;  %v8422_v39 = vld [vmem:[%s6730_s6 + $0xa28] sm:$0xff]  ;;  %v8425_v57 = vld [vmem:[%s6730_s6 + $0xa20] sm:$0xff] }
 0x1d5   : > { %10747 = vst [vmem:[#allocation89_spill] sm:$0xff] %v8398_v14  ;;  %2421 = vmatmul.mubr.f32.gmra.mxu1 %v8205_v11  ;;  %v4249_v48 = vmul.f32 %v8401_v37, %v8401_v37  ;;  %v4670_v54 = vadd.f32 %v4669_v16, %v8160_v36  ;;  %v8417_v14 = vadd.f32 %v1710_v21, %v1351_v63  ;;  %10749 = vst [vmem:[#allocation91_spill] sm:$0xff] %v8425_v57  ;;  %v1353_v26 = vpop.f32.mrf.mxu0  ;;  %v1712_v12 = vpop.f32.mrf.mxu1 }
 0x1d6   : > { %2426 = vmatprep.mubr.f32.mxu1 %v8304_v32  ;;  %2067 = vmatprep.mubr.f32.mxu0 %v8044_v4  ;;  %v4242_v11 = vmul.f32 %v8412_v30, %v8412_v30  ;;  %v4662_v22 = vadd.f32 %v4661_v25, %v4241_v49  ;;  %v8434_v36 = vmul.f32 %v8422_v39, %v8422_v39  ;;  %v8445_v49 = vld [vmem:[%s6730_s6 + $0x7f8] sm:$0xff] }
 0x1d7   : > { %10748 = vst [vmem:[#allocation90_spill] sm:$0xff] %v8417_v14  ;;  %4637 = vadd.xlane.f32.xlu1 %v4636_v10  ;;  %2609 = vmatprep.subr.mxu0 %v702_v6  ;;  %v8438_v4 = vmul.f32 %v8425_v57, %v8425_v57  ;;  %v4687_v32 = vadd.f32 %v7736_v20, %v8240_v46  ;;  %v830_v10 = vld [vmem:[#allocation5 + $0x6d8] sm:$0xff]  ;;  %v1357_v63 = vpop.f32.mrf.mxu0  ;;  %v1716_v21 = vpop.f32.mrf.mxu1  ;;  %v829_v20 = vld [vmem:[#allocation5 + $0x6d0] sm:$0xff]  ;;  %v8471_v14 = vld [vmem:[%s6730_s6 + $0xa60] sm:$0xff] }
 0x1d8   : > { %v8442_v16 = vadd.f32 %v1712_v12, %v1353_v26  ;;  %4646 = vadd.xlane.f32.xlu0 %v4645_v59  ;;  %2610 = vmatpush2.msra.mxu0 %v701_v33  ;;  %v4257_v25 = vmul.f32 %v8430_v51, %v8430_v51  ;;  %v4679_v6 = vadd.f32 %v4678_v23, %v8197_v55  ;;  %v698_v46 = vld [vmem:[#allocation5 + $0x2b8] sm:$0xff]  ;;  %v8453_v26 = vld [vmem:[%s6730_s6 + $0xa68] sm:$0xff] }
 0x1d9   : > { %2068 = vmatmul.mubr.f32.gmra.mxu0 %v8047_v41  ;;  %2427 = vmatmul.mubr.f32.gmra.mxu1 %v8253_v5  ;;  %v4250_v59 = vmul.f32 %v8445_v49, %v8445_v49  ;;  %v4671_v33 = vadd.f32 %v4670_v54, %v4249_v48  ;;  %v10751_v12 = vld [vmem:[#allocation37_spill] sm:$0xff]  ;;  %v8459_v55 = vadd.f32 %v1716_v21, %v1357_v63  ;;  %v1359_v48 = vpop.f32.mrf.mxu0  ;;  %v1718_v54 = vpop.f32.mrf.mxu1  ;;  %v8474_v57 = vld [vmem:[%s6730_s6 + $0x838] sm:$0xff] }
 0x1da   : > { %10750 = vst [vmem:[#allocation92_spill] sm:$0xff] %v8442_v16  ;;  %v4696_v16 = vadd.f32 %v10751_v12, %v8274_v38  ;;  %2073 = vmatprep.mubr.f32.mxu0 %v8050_v44  ;;  %2432 = vmatprep.mubr.f32.mxu1 %v8336_v40  ;;  %v8464_v41 = vld [vmem:[%s6730_s6 + $0x870] sm:$0xff]  ;;  %v4663_v5 = vadd.f32 %v4662_v22, %v4242_v11  ;;  %10753 = vst [vmem:[#allocation93_spill] sm:$0xff] %v8471_v14 }
 0x1db   : > { %10752 = vst [vmem:[#allocation37_spill] sm:$0xff] %v8459_v55  ;;  %v8468_v23 = vmul.f32 %v8453_v26, %v8453_v26  ;;  %2968 = vmatprep.subr.mxu1 %v830_v10  ;;  %4655 = vadd.xlane.f32.xlu1 %v4654_v28  ;;  %v8478_v44 = vmul.f32 %v8471_v14, %v8471_v14  ;;  %v8486_v22 = vld [vmem:[%s6730_s6 + $0x8b0] sm:$0xff]  ;;  %v826_v10 = vld [vmem:[#allocation5 + $0x6b8] sm:$0xff]  ;;  %v1363_v12 = vpop.f32.mrf.mxu0  ;;  %v1722_v55 = vpop.f32.mrf.mxu1 }
 0x1dc   : > { %v4265_v38 = vmul.f32 %v8464_v41, %v8464_v41  ;;  %v4688_v40 = vadd.f32 %v4687_v32, %v8236_v17  ;;  %v8483_v11 = vadd.f32 %v1718_v54, %v1359_v48  ;;  %2969 = vmatpush2.msra.mxu1 %v829_v20  ;;  %2611 = vmatprep.subr.mxu0 %v698_v46  ;;  %v697_v63 = vld [vmem:[#allocation5 + $0x2b0] sm:$0xff]  ;;  %v8493_v48 = vld [vmem:[%s6730_s6 + $0xaa8] sm:$0xff] }
 0x1dd   : > { %v4258_v28 = vmul.f32 %v8474_v57, %v8474_v57  ;;  %v4680_v21 = vadd.f32 %v4679_v6, %v4257_v25  ;;  %2074 = vmatmul.mubr.f32.gmra.mxu0 %v8061_v3  ;;  %2433 = vmatmul.mubr.f32.gmra.mxu1 %v8293_v27  ;;  %v825_v17 = vld [vmem:[#allocation5 + $0x6b0] sm:$0xff]  ;;  %v4672_v32 = vadd.f32 %v4671_v33, %v4250_v59  ;;  %v8503_v3 = vld [vmem:[%s6730_s6 + $0x878] sm:$0xff]  ;;  %v8510_v25 = vld [vmem:[%s6730_s6 + $0xaa0] sm:$0xff]  ;;  %v1365_v33 = vpop.f32.mrf.mxu0 }
 0x1de   : > { %10754 = vst [vmem:[#allocation94_spill] sm:$0xff] %v8483_v11  ;;  %10755 = vst [vmem:[#allocation95_spill] sm:$0xff] %v8493_v48  ;;  %v4273_v20 = vmul.f32 %v8486_v22, %v8486_v22  ;;  %v4697_v46 = vadd.f32 %v4696_v16, %v8244_v60  ;;  %v8498_v54 = vadd.f32 %v1722_v55, %v1363_v12  ;;  %2438 = vmatprep.mubr.f32.mxu1 %v8359_v29  ;;  %v10758_v6 = vld [vmem:[#allocation40_spill] sm:$0xff]  ;;  %v1724_v60 = vpop.f32.mrf.mxu1 }
 0x1df   : > { %2079 = vmatprep.mubr.f32.mxu0 %v8079_v9  ;;  %v8507_v27 = vmul.f32 %v8493_v48, %v8493_v48  ;;  %10757 = vst [vmem:[#allocation97_spill] sm:$0xff] %v8510_v25  ;;  %v4705_v59 = vadd.f32 %v10758_v6, %v8297_v7  ;;  %2612 = vmatpush2.msra.mxu0 %v697_v63  ;;  %v8519_v9 = vld [vmem:[%s6730_s6 + $0xae8] sm:$0xff]  ;;  %v694_v7 = vld [vmem:[#allocation5 + $0x298] sm:$0xff]  ;;  %v1369_v6 = vpop.f32.mrf.mxu0 }
 0x1e0   : > { %10756 = vst [vmem:[#allocation96_spill] sm:$0xff] %v8498_v54  ;;  %2970 = vmatprep.subr.mxu1 %v826_v10  ;;  %v8516_v29 = vmul.f32 %v8510_v25, %v8510_v25  ;;  %10759 = vst [vmem:[#allocation40_spill] sm:$0xff] %v8519_v9  ;;  %v4266_v16 = vmul.f32 %v8503_v3, %v8503_v3  ;;  %v4689_v55 = vadd.f32 %v4688_v40, %v4265_v38  ;;  %v8526_v54 = vld [vmem:[%s6730_s6 + $0x8b8] sm:$0xff]  ;;  %v1728_v11 = vpop.f32.mrf.mxu1  ;;  %v8535_v38 = vld [vmem:[%s6730_s6 + $0x8f0] sm:$0xff] }
 0x1e1   : > { %v8523_v12 = vadd.f32 %v1724_v60, %v1365_v33  ;;  %2971 = vmatpush2.msra.mxu1 %v825_v17  ;;  %4664 = vadd.xlane.f32.xlu0 %v4663_v5  ;;  %v4681_v63 = vadd.f32 %v4680_v21, %v4258_v28  ;;  %v8530_v10 = vmul.f32 %v8519_v9, %v8519_v9  ;;  %v10761_v25 = vld [vmem:[#allocation71_spill] sm:$0xff]  ;;  %v693_v40 = vld [vmem:[#allocation5 + $0x290] sm:$0xff]  ;;  %v1371_v48 = vpop.f32.mrf.mxu0 }
 0x1e2   : > { %2080 = vmatmul.mubr.f32.gmra.mxu0 %v10761_v25  ;;  %2439 = vmatmul.mubr.f32.gmra.mxu1 %v8307_v56  ;;  %v822_v33 = vld [vmem:[#allocation5 + $0x698] sm:$0xff]  ;;  %v4274_v5 = vmul.f32 %v8526_v54, %v8526_v54  ;;  %v4698_v28 = vadd.f32 %v4697_v46, %v4273_v20  ;;  %v8541_v60 = vadd.f32 %v1728_v11, %v1369_v6  ;;  %v8546_v56 = vld [vmem:[%s6730_s6 + $0xae0] sm:$0xff]  ;;  %v1730_v14 = vpop.f32.mrf.mxu1  ;;  %v8558_v20 = vld [vmem:[%s6730_s6 + $0xb28] sm:$0xff] }
 0x1e3   : > { %10760 = vst [vmem:[#allocation98_spill] sm:$0xff] %v8523_v12  ;;  %v10762_v21 = vld [vmem:[#allocation42_spill] sm:$0xff]  ;;  %v10764_v12 = vld [vmem:[#allocation72_spill] sm:$0xff]  ;;  %2444 = vmatprep.mubr.f32.mxu1 %v8412_v30  ;;  %v4281_v25 = vmul.f32 %v8535_v38, %v8535_v38  ;;  %v4706_v9 = vadd.f32 %v4705_v59, %v8278_v58  ;;  %2613 = vmatprep.subr.mxu0 %v694_v7  ;;  %v10768_v46 = vld [vmem:[#allocation45_spill] sm:$0xff] }
 0x1e4   : > { %v4714_v17 = vadd.f32 %v10762_v21, %v8323_v18  ;;  %10763 = vst [vmem:[#allocation71_spill] sm:$0xff] %v8541_v60  ;;  %2085 = vmatprep.mubr.f32.mxu0 %v10764_v12  ;;  %10765 = vst [vmem:[#allocation42_spill] sm:$0xff] %v8546_v56  ;;  %4673 = vadd.xlane.f32.xlu1 %v4672_v32  ;;  %v8553_v18 = vmul.f32 %v8546_v56, %v8546_v56  ;;  %v8561_v30 = vld [vmem:[%s6730_s6 + $0xb20] sm:$0xff]  ;;  %v8568_v58 = vld [vmem:[%s6730_s6 + $0x930] sm:$0xff]  ;;  %v1734_v7 = vpop.f32.mrf.mxu1 }
 0x1e5   : > { %v8555_v11 = vadd.f32 %v4689_v55, %v4266_v16  ;;  %10766 = vst [vmem:[#allocation72_spill] sm:$0xff] %v8558_v20  ;;  %10767 = vst [vmem:[#allocation99_spill] sm:$0xff] %v8561_v30  ;;  %v4723_v12 = vadd.f32 %v10768_v46, %v8349_v1  ;;  %v8565_v6 = vadd.f32 %v1730_v14, %v1371_v48  ;;  %2614 = vmatpush2.msra.mxu0 %v693_v40  ;;  %v821_v32 = vld [vmem:[#allocation5 + $0x690] sm:$0xff]  ;;  %v1375_v55 = vpop.f32.mrf.mxu0  ;;  %v8581_v14 = vld [vmem:[%s6730_s6 + $0x8f8] sm:$0xff] }
 0x1e6   : > { %2972 = vmatprep.subr.mxu1 %v822_v33  ;;  %v8572_v59 = vmul.f32 %v8558_v20, %v8558_v20  ;;  %v8576_v16 = vmul.f32 %v8561_v30, %v8561_v30  ;;  %v10770_v1 = vld [vmem:[#allocation73_spill] sm:$0xff]  ;;  %2445 = vmatmul.mubr.f32.gmra.mxu1 %v8368_v2  ;;  %v690_v48 = vld [vmem:[#allocation5 + $0x278] sm:$0xff]  ;;  %v8583_v33 = vadd.f32 %v4698_v28, %v4274_v5  ;;  %v1736_v20 = vpop.f32.mrf.mxu1 }
 0x1e7   : > { %10769 = vst [vmem:[#allocation45_spill] sm:$0xff] %v8565_v6  ;;  %2086 = vmatmul.mubr.f32.gmra.mxu0 %v10770_v1  ;;  %v818_v40 = vld [vmem:[#allocation5 + $0x678] sm:$0xff]  ;;  %v4289_v21 = vmul.f32 %v8568_v58, %v8568_v58  ;;  %v4715_v46 = vadd.f32 %v4714_v17, %v8301_v45  ;;  %v8588_v6 = vadd.f32 %v1734_v7, %v1375_v55  ;;  %v10772_v1 = vld [vmem:[#allocation76_spill] sm:$0xff]  ;;  %v8593_v2 = vld [vmem:[%s6730_s6 + $0x970] sm:$0xff]  ;;  %v1377_v30 = vpop.f32.mrf.mxu0 }
 0x1e8   : > { %2450 = vmatprep.mubr.f32.mxu1 %v8445_v49  ;;  %2091 = vmatprep.mubr.f32.mxu0 %v10772_v1  ;;  %v8596_v60 = vld [vmem:[%s6730_s6 + $0xb68] sm:$0xff]  ;;  %v4282_v5 = vmul.f32 %v8581_v14, %v8581_v14  ;;  %v4707_v28 = vadd.f32 %v4706_v9, %v4281_v25  ;;  %v8605_v17 = vld [vmem:[%s6730_s6 + $0xb60] sm:$0xff]  ;;  %v4297_v49 = vmul.f32 %v8593_v2, %v8593_v2  ;;  %v8613_v1 = vld [vmem:[%s6730_s6 + $0x938] sm:$0xff] }
 0x1e9   : > { %10771 = vst [vmem:[#allocation73_spill] sm:$0xff] %v8588_v6  ;;  %10773 = vst [vmem:[#allocation76_spill] sm:$0xff] %v8596_v60  ;;  %2973 = vmatpush2.msra.mxu1 %v821_v32  ;;  %4682 = vadd.xlane.f32.xlu0 %v4681_v63  ;;  %v8602_v45 = vmul.f32 %v8596_v60, %v8596_v60  ;;  %v4724_v55 = vadd.f32 %v4723_v12, %v8340_v31  ;;  %v689_v9 = vld [vmem:[#allocation5 + $0x270] sm:$0xff]  ;;  %v10776_v25 = vld [vmem:[#allocation48_spill] sm:$0xff]  ;;  %v1381_v6 = vpop.f32.mrf.mxu0  ;;  %v1740_v60 = vpop.f32.mrf.mxu1 }
 0x1ea   : > { %10774 = vst [vmem:[#allocation100_spill] sm:$0xff] %v8605_v17  ;;  %v8610_v7 = vadd.f32 %v1736_v20, %v1377_v30  ;;  %2615 = vmatprep.subr.mxu0 %v690_v48  ;;  %2974 = vmatprep.subr.mxu1 %v818_v40  ;;  %v8617_v63 = vmul.f32 %v8605_v17, %v8605_v17  ;;  %v817_v31 = vld [vmem:[#allocation5 + $0x670] sm:$0xff]  ;;  %v686_v20 = vld [vmem:[#allocation5 + $0x258] sm:$0xff]  ;;  %v8624_v30 = vld [vmem:[%s6730_s6 + $0xba8] sm:$0xff] }
 0x1eb   : > { %v4732_v32 = vadd.f32 %v10776_v25, %v8389_v8  ;;  %2092 = vmatmul.mubr.f32.gmra.mxu0 %v8177_v47  ;;  %2451 = vmatmul.mubr.f32.gmra.mxu1 %v8401_v37  ;;  %v4290_v12 = vmul.f32 %v8613_v1, %v8613_v1  ;;  %v4716_v48 = vadd.f32 %v4715_v46, %v4289_v21  ;;  %v10777_v40 = vld [vmem:[#allocation50_spill] sm:$0xff]  ;;  %v8642_v17 = vld [vmem:[%s6730_s6 + $0xba0] sm:$0xff]  ;;  %v1383_v21 = vpop.f32.mrf.mxu0  ;;  %v1742_v46 = vpop.f32.mrf.mxu1 }
 0x1ec   : > { %10775 = vst [vmem:[#allocation101_spill] sm:$0xff] %v8610_v7  ;;  %v4741_v7 = vadd.f32 %v10777_v40, %v8405_v43  ;;  %v8630_v8 = vadd.f32 %v1740_v60, %v1381_v6  ;;  %2097 = vmatprep.mubr.f32.mxu0 %v8188_v0  ;;  %2456 = vmatprep.mubr.f32.mxu1 %v8474_v57  ;;  %v8635_v47 = vld [vmem:[%s6730_s6 + $0x978] sm:$0xff]  ;;  %v8645_v56 = vld [vmem:[%s6730_s6 + $0x9b0] sm:$0xff] }
 0x1ed   : > { %v4708_v37 = vadd.f32 %v4707_v28, %v4282_v5  ;;  %v8639_v25 = vmul.f32 %v8624_v30, %v8624_v30  ;;  %2616 = vmatpush2.msra.mxu0 %v689_v9  ;;  %4691 = vadd.xlane.f32.xlu1 %v8555_v11  ;;  %v8650_v0 = vmul.f32 %v8642_v17, %v8642_v17  ;;  %v8657_v6 = vld [vmem:[%s6730_s6 + $0x9f0] sm:$0xff]  ;;  %v1387_v9 = vpop.f32.mrf.mxu0  ;;  %v1746_v40 = vpop.f32.mrf.mxu1 }
 0x1ee   : > { %10778 = vst [vmem:[#allocation48_spill] sm:$0xff] %v8630_v8  ;;  %v4298_v43 = vmul.f32 %v8635_v47, %v8635_v47  ;;  %v4725_v57 = vadd.f32 %v4724_v55, %v4297_v49  ;;  %v8654_v60 = vadd.f32 %v1742_v46, %v1383_v21  ;;  %2975 = vmatpush2.msra.mxu1 %v817_v31  ;;  %v685_v5 = vld [vmem:[#allocation5 + $0x250] sm:$0xff]  ;;  %v814_v49 = vld [vmem:[#allocation5 + $0x658] sm:$0xff]  ;;  %v8667_v31 = vld [vmem:[%s6730_s6 + $0xbe8] sm:$0xff] }
 0x1ef   : > { %2617 = vmatprep.subr.mxu0 %v686_v20  ;;  %v4305_v11 = vmul.f32 %v8645_v56, %v8645_v56  ;;  %v4733_v28 = vadd.f32 %v4732_v32, %v8363_v35  ;;  %2098 = vmatmul.mubr.f32.gmra.mxu0 %v8210_v34  ;;  %v8664_v55 = vadd.f32 %v4716_v48, %v4290_v12  ;;  %v8681_v35 = vld [vmem:[%s6730_s6 + $0xbe0] sm:$0xff]  ;;  %v1389_v12 = vpop.f32.mrf.mxu0  ;;  %v1748_v48 = vpop.f32.mrf.mxu1 }
 0x1f0   : > { %10779 = vst [vmem:[#allocation50_spill] sm:$0xff] %v8654_v60  ;;  %2457 = vmatmul.mubr.f32.gmra.mxu1 %v8430_v51  ;;  %10780 = vst [vmem:[#allocation102_spill] sm:$0xff] %v8667_v31  ;;  %v4313_v20 = vmul.f32 %v8657_v6, %v8657_v6  ;;  %v4742_v21 = vadd.f32 %v4741_v7, %v8393_v53  ;;  %v8672_v46 = vadd.f32 %v1746_v40, %v1387_v9  ;;  %v10783_v51 = vld [vmem:[#allocation58_spill] sm:$0xff]  ;;  %v10784_v7 = vld [vmem:[#allocation59_spill] sm:$0xff] }
 0x1f1   : > { %2462 = vmatprep.mubr.f32.mxu1 %v8503_v3  ;;  %2103 = vmatprep.mubr.f32.mxu0 %v8213_v24  ;;  %v8678_v34 = vmul.f32 %v8667_v31, %v8667_v31  ;;  %10782 = vst [vmem:[#allocation104_spill] sm:$0xff] %v8681_v35  ;;  %v4750_v32 = vadd.f32 %v10783_v51, %v8438_v4  ;;  %v8686_v60 = vld [vmem:[%s6730_s6 + $0x9b8] sm:$0xff]  ;;  %v813_v40 = vld [vmem:[#allocation5 + $0x650] sm:$0xff]  ;;  %v1393_v8 = vpop.f32.mrf.mxu0 }
 0x1f2   : > { %10781 = vst [vmem:[#allocation103_spill] sm:$0xff] %v8672_v46  ;;  %v8689_v53 = vld [vmem:[%s6730_s6 + $0x9f8] sm:$0xff]  ;;  %4700 = vadd.xlane.f32.xlu0 %v8583_v33  ;;  %2618 = vmatpush2.msra.mxu0 %v685_v5  ;;  %v8694_v24 = vmul.f32 %v8681_v35, %v8681_v35  ;;  %v8696_v3 = vadd.f32 %v4725_v57, %v4298_v43  ;;  %v8703_v46 = vld [vmem:[%s6730_s6 + $0xc28] sm:$0xff]  ;;  %v1752_v43 = vpop.f32.mrf.mxu1 }
 0x1f3   : > { %v4759_v9 = vadd.f32 %v10784_v7, %v8478_v44  ;;  %v8700_v4 = vadd.f32 %v1748_v48, %v1389_v12  ;;  %2976 = vmatprep.subr.mxu1 %v814_v49  ;;  %4709 = vadd.xlane.f32.xlu1 %v4708_v37  ;;  %v682_v51 = vld [vmem:[#allocation5 + $0x238] sm:$0xff]  ;;  %10786 = vst [vmem:[#allocation59_spill] sm:$0xff] %v8703_v46  ;;  %v10787_v57 = vld [vmem:[#allocation80_spill] sm:$0xff]  ;;  %v8710_v44 = vld [vmem:[%s6730_s6 + $0xa30] sm:$0xff]  ;;  %v1395_v35 = vpop.f32.mrf.mxu0 }
 0x1f4   : > { %v4306_v33 = vmul.f32 %v8686_v60, %v8686_v60  ;;  %v4734_v5 = vadd.f32 %v4733_v28, %v4305_v11  ;;  %2104 = vmatmul.mubr.f32.gmra.mxu0 %v10787_v57  ;;  %2463 = vmatmul.mubr.f32.gmra.mxu1 %v8464_v41  ;;  %v681_v49 = vld [vmem:[#allocation5 + $0x230] sm:$0xff]  ;;  %v810_v12 = vld [vmem:[#allocation5 + $0x638] sm:$0xff]  ;;  %v8714_v37 = vmul.f32 %v8703_v46, %v8703_v46  ;;  %v8726_v41 = vld [vmem:[%s6730_s6 + $0xc20] sm:$0xff]  ;;  %v1754_v31 = vpop.f32.mrf.mxu1 }
 0x1f5   : > { %10785 = vst [vmem:[#allocation58_spill] sm:$0xff] %v8700_v4  ;;  %v4314_v48 = vmul.f32 %v8689_v53, %v8689_v53  ;;  %v4743_v7 = vadd.f32 %v4742_v21, %v4313_v20  ;;  %v8718_v4 = vadd.f32 %v1752_v43, %v1393_v8  ;;  %v10789_v11 = vld [vmem:[#allocation81_spill] sm:$0xff]  ;;  %2468 = vmatprep.mubr.f32.mxu1 %v8526_v54  ;;  %v1399_v43 = vpop.f32.mrf.mxu0 }
 0x1f6   : > { %2109 = vmatprep.mubr.f32.mxu0 %v10789_v11  ;;  %v8723_v28 = vld [vmem:[%s6730_s6 + $0xa70] sm:$0xff]  ;;  %v4321_v57 = vmul.f32 %v8710_v44, %v8710_v44  ;;  %v4751_v46 = vadd.f32 %v4750_v32, %v8434_v36  ;;  %2977 = vmatpush2.msra.mxu1 %v813_v40  ;;  %v8733_v8 = vmul.f32 %v8726_v41, %v8726_v41  ;;  %v10790_v40 = vld [vmem:[#allocation60_spill] sm:$0xff]  ;;  %v1758_v11 = vpop.f32.mrf.mxu1 }
 0x1f7   : > { %10788 = vst [vmem:[#allocation80_spill] sm:$0xff] %v8718_v4  ;;  %2619 = vmatprep.subr.mxu0 %v682_v51  ;;  %v4329_v54 = vmul.f32 %v8723_v28, %v8723_v28  ;;  %v4760_v20 = vadd.f32 %v4759_v9, %v8468_v23  ;;  %v8738_v21 = vadd.f32 %v1754_v31, %v1395_v35  ;;  %v809_v36 = vld [vmem:[#allocation5 + $0x630] sm:$0xff]  ;;  %v8745_v4 = vld [vmem:[%s6730_s6 + $0xa38] sm:$0xff] }
 0x1f8   : > { %2620 = vmatpush2.msra.mxu0 %v681_v49  ;;  %2978 = vmatprep.subr.mxu1 %v810_v12  ;;  %v4735_v32 = vadd.f32 %v4734_v5, %v4306_v33  ;;  %v4768_v51 = vadd.f32 %v10790_v40, %v8516_v29  ;;  %v678_v23 = vld [vmem:[#allocation5 + $0x218] sm:$0xff]  ;;  %v8747_v31 = vadd.f32 %v4743_v7, %v4314_v48  ;;  %v10791_v35 = vld [vmem:[#allocation61_spill] sm:$0xff]  ;;  %v1401_v48 = vpop.f32.mrf.mxu0 }
 0x1f9   : > { %2110 = vmatmul.mubr.f32.gmra.mxu0 %v8262_v62  ;;  %2469 = vmatmul.mubr.f32.gmra.mxu1 %v8486_v22  ;;  %v4777_v9 = vadd.f32 %v10791_v35, %v8553_v18  ;;  %v10792_v33 = vld [vmem:[#allocation63_spill] sm:$0xff]  ;;  %v8753_v49 = vadd.f32 %v1758_v11, %v1399_v43  ;;  %v8761_v22 = vld [vmem:[%s6730_s6 + $0xab0] sm:$0xff]  ;;  %v4322_v29 = vmul.f32 %v8745_v4, %v8745_v4  ;;  %v1760_v18 = vpop.f32.mrf.mxu1 }
 0x1fa   : > { %v4786_v5 = vadd.f32 %v10792_v33, %v8576_v16  ;;  %2474 = vmatprep.mubr.f32.mxu1 %v8581_v14  ;;  %2115 = vmatprep.mubr.f32.mxu0 %v8265_v42  ;;  %v8758_v62 = vld [vmem:[%s6730_s6 + $0xa78] sm:$0xff]  ;;  %v4752_v12 = vadd.f32 %v4751_v46, %v4321_v57  ;;  %v8766_v7 = vld [vmem:[%s6730_s6 + $0xaf0] sm:$0xff]  ;;  %v4761_v14 = vadd.f32 %v4760_v20, %v4329_v54  ;;  %v1405_v11 = vpop.f32.mrf.mxu0 }
 0x1fb   : > { %2979 = vmatpush2.msra.mxu1 %v809_v36  ;;  %4718 = vadd.xlane.f32.xlu0 %v8664_v55  ;;  %v4330_v16 = vmul.f32 %v8758_v62, %v8758_v62  ;;  %v4337_v42 = vmul.f32 %v8761_v22, %v8761_v22  ;;  %v8773_v40 = vadd.f32 %v1760_v18, %v1401_v48  ;;  %v8776_v43 = vld [vmem:[%s6730_s6 + $0xb30] sm:$0xff]  ;;  %v806_v57 = vld [vmem:[#allocation5 + $0x618] sm:$0xff]  ;;  %v1764_v54 = vpop.f32.mrf.mxu1 }
 0x1fc   : > { %2621 = vmatprep.subr.mxu0 %v678_v23  ;;  %4727 = vadd.xlane.f32.xlu1 %v8696_v3  ;;  %v677_v46 = vld [vmem:[#allocation5 + $0x210] sm:$0xff]  ;;  %v4769_v36 = vadd.f32 %v4768_v51, %v8507_v27  ;;  %v4345_v55 = vmul.f32 %v8766_v7, %v8766_v7  ;;  %v4778_v23 = vadd.f32 %v4777_v9, %v8530_v10  ;;  %v8793_v33 = vld [vmem:[%s6730_s6 + $0xab8] sm:$0xff]  ;;  %v1407_v18 = vpop.f32.mrf.mxu0 }
 0x1fd   : > { %2116 = vmatmul.mubr.f32.gmra.mxu0 %v8281_v52  ;;  %2475 = vmatmul.mubr.f32.gmra.mxu1 %v8535_v38  ;;  %v805_v20 = vld [vmem:[#allocation5 + $0x610] sm:$0xff]  ;;  %v4353_v3 = vmul.f32 %v8776_v43, %v8776_v43  ;;  %v4787_v35 = vadd.f32 %v4786_v5, %v8572_v59  ;;  %v8788_v27 = vadd.f32 %v1764_v54, %v1405_v11  ;;  %v10794_v38 = vld [vmem:[#allocation64_spill] sm:$0xff]  ;;  %v1766_v10 = vpop.f32.mrf.mxu1  ;;  %v8798_v9 = vld [vmem:[%s6730_s6 + $0xaf8] sm:$0xff] }
 0x1fe   : > { %v10793_v51 = vld [vmem:[#allocation82_spill] sm:$0xff]  ;;  %2480 = vmatprep.mubr.f32.mxu1 %v8613_v1  ;;  %v4753_v52 = vadd.f32 %v4752_v12, %v4322_v29  ;;  %v4795_v48 = vadd.f32 %v10794_v38, %v8617_v63  ;;  %2622 = vmatpush2.msra.mxu0 %v677_v46  ;;  %v4762_v59 = vadd.f32 %v4761_v14, %v4330_v16  ;;  %v10795_v11 = vld [vmem:[#allocation65_spill] sm:$0xff]  ;;  %v1411_v16 = vpop.f32.mrf.mxu0 }
 0x1ff   : > { %2121 = vmatprep.mubr.f32.mxu0 %v10793_v51  ;;  %2980 = vmatprep.subr.mxu1 %v806_v57  ;;  %v4338_v5 = vmul.f32 %v8793_v33, %v8793_v33  ;;  %v4804_v1 = vadd.f32 %v10795_v11, %v8650_v0  ;;  %v8804_v54 = vadd.f32 %v1766_v10, %v1407_v18  ;;  %v8807_v29 = vld [vmem:[%s6730_s6 + $0xb38] sm:$0xff]  ;;  %v1770_v14 = vpop.f32.mrf.mxu1  ;;  %v8814_v0 = vld [vmem:[%s6730_s6 + $0xb70] sm:$0xff] }
 0x200   : > { %2981 = vmatpush2.msra.mxu1 %v805_v20  ;;  %4736 = vadd.xlane.f32.xlu0 %v4735_v32  ;;  %v930_v63 = vld [vmem:[#allocation5 + $0x9f8] sm:$0xff]  ;;  %v4770_v51 = vadd.f32 %v4769_v36, %v4337_v42  ;;  %v4346_v46 = vmul.f32 %v8798_v9, %v8798_v9  ;;  %v4779_v57 = vadd.f32 %v4778_v23, %v4345_v55  ;;  %v10796_v42 = vld [vmem:[#allocation84_spill] sm:$0xff]  ;;  %v8823_v36 = vld [vmem:[%s6730_s6 + $0xbb0] sm:$0xff]  ;;  %v1413_v18 = vpop.f32.mrf.mxu0 }
 0x201   : > { %v1058_v12 = vld [vmem:[#allocation5 + $0xdf8] sm:$0xff]  ;;  %2122 = vmatmul.mubr.f32.gmra.mxu0 %v8315_v61  ;;  %2481 = vmatmul.mubr.f32.gmra.mxu1 %v8568_v58  ;;  %v4354_v20 = vmul.f32 %v8807_v29, %v8807_v29  ;;  %v4788_v32 = vadd.f32 %v4787_v35, %v4353_v3  ;;  %v8818_v38 = vadd.f32 %v1770_v14, %v1411_v16  ;;  %v1772_v55 = vpop.f32.mrf.mxu1 }
 0x202   : > { %2486 = vmatprep.mubr.f32.mxu1 %v8635_v47  ;;  %2127 = vmatprep.mubr.f32.mxu0 %v10796_v42  ;;  %v4361_v61 = vmul.f32 %v8814_v0, %v8814_v0  ;;  %v4796_v58 = vadd.f32 %v4795_v48, %v8602_v45  ;;  %v4369_v23 = vmul.f32 %v8823_v36, %v8823_v36  ;;  %v10797_v47 = vld [vmem:[#allocation66_spill] sm:$0xff]  ;;  %v10798_v48 = vld [vmem:[#allocation67_spill] sm:$0xff] }
 0x203   : > { %3277 = vmatprep.subr.mxu0 %v930_v63  ;;  %3636 = vmatprep.subr.mxu1 %v1058_v12  ;;  %v4805_v3 = vadd.f32 %v4804_v1, %v8639_v25  ;;  %v4813_v35 = vadd.f32 %v10797_v47, %v8694_v24  ;;  %v8833_v10 = vadd.f32 %v1772_v55, %v1413_v18  ;;  %v1417_v63 = vpop.f32.mrf.mxu0  ;;  %v1776_v12 = vpop.f32.mrf.mxu1  ;;  %v10799_v16 = vld [vmem:[#allocation86_spill] sm:$0xff] }
 0x204   : > { %4745 = vadd.xlane.f32.xlu1 %v8747_v31  ;;  %4754 = vadd.xlane.f32.xlu0 %v4753_v52  ;;  %v4771_v45 = vadd.f32 %v4770_v51, %v4338_v5  ;;  %v4822_v11 = vadd.f32 %v10798_v48, %v8733_v8  ;;  %v8841_v25 = vld [vmem:[%s6730_s6 + $0xb78] sm:$0xff]  ;;  %v4780_v24 = vadd.f32 %v4779_v57, %v4346_v46  ;;  %v8851_v8 = vld [vmem:[%s6730_s6 + $0xbf0] sm:$0xff] }
 0x205   : > { %2128 = vmatmul.mubr.f32.gmra.mxu0 %v10799_v16  ;;  %2487 = vmatmul.mubr.f32.gmra.mxu1 %v8593_v2  ;;  %v4789_v1 = vadd.f32 %v4788_v32, %v4354_v20  ;;  %v8843_v14 = vadd.f32 %v1776_v12, %v1417_v63  ;;  %v8848_v31 = vld [vmem:[%s6730_s6 + $0xbb8] sm:$0xff]  ;;  %v4362_v52 = vmul.f32 %v8841_v25, %v8841_v25  ;;  %v1419_v51 = vpop.f32.mrf.mxu0  ;;  %v1778_v2 = vpop.f32.mrf.mxu1  ;;  %v8856_v42 = vld [vmem:[%s6730_s6 + $0xc30] sm:$0xff] }
 0x206   : > { %2133 = vmatprep.mubr.f32.mxu0 %v8352_v50  ;;  %2492 = vmatprep.mubr.f32.mxu1 %v8686_v60  ;;  %v4797_v5 = vadd.f32 %v4796_v58, %v4361_v61  ;;  %v4370_v46 = vmul.f32 %v8848_v31, %v8848_v31  ;;  %v4806_v57 = vadd.f32 %v4805_v3, %v4369_v23  ;;  %v8878_v3 = vld [vmem:[%s6730_s6 + $0xc38] sm:$0xff] }
 0x207   : > { %v4377_v50 = vmul.f32 %v8851_v8, %v8851_v8  ;;  %v4814_v60 = vadd.f32 %v4813_v35, %v8678_v34  ;;  %v8863_v20 = vadd.f32 %v1778_v2, %v1419_v51  ;;  %v4385_v32 = vmul.f32 %v8856_v42, %v8856_v42  ;;  %v1423_v58 = vpop.f32.mrf.mxu0  ;;  %v1782_v18 = vpop.f32.mrf.mxu1  ;;  %v8875_v34 = vld [vmem:[%s6730_s6 + $0xbf8] sm:$0xff] }
 0x208   : > { %4763 = vadd.xlane.f32.xlu1 %v4762_v59  ;;  %4772 = vadd.xlane.f32.xlu0 %v4771_v45  ;;  %v4823_v61 = vadd.f32 %v4822_v11, %v8714_v37  ;;  %v8870_v55 = vadd.f32 %v1782_v18, %v1423_v58  ;;  %v4798_v47 = vadd.f32 %v4797_v5, %v4362_v52  ;;  %v10800_v51 = vld [vmem:[#allocation91_spill] sm:$0xff]  ;;  %v10803_v58 = vld [vmem:[#allocation97_spill] sm:$0xff] }
 0x209   : > { %2134 = vmatmul.mubr.f32.gmra.mxu0 %v8379_v13  ;;  %2493 = vmatmul.mubr.f32.gmra.mxu1 %v8645_v56  ;;  %v1425_v59 = vpop.f32.mrf.mxu0  ;;  %v1784_v23 = vpop.f32.mrf.mxu1  ;;  %v4807_v37 = vadd.f32 %v4806_v57, %v4370_v46  ;;  %v4378_v35 = vmul.f32 %v8875_v34, %v8875_v34  ;;  %v4815_v13 = vadd.f32 %v4814_v60, %v4377_v50  ;;  %v10801_v57 = vld [vmem:[#allocation93_spill] sm:$0xff] }
 0x20a   : > { %2498 = vmatprep.mubr.f32.mxu1 %v8689_v53  ;;  %2139 = vmatprep.mubr.f32.mxu0 %v8382_v15  ;;  %v8882_v45 = vadd.f32 %v1784_v23, %v1425_v59  ;;  %v4386_v56 = vmul.f32 %v8878_v3, %v8878_v3  ;;  %v4824_v15 = vadd.f32 %v4823_v61, %v4385_v32 }
 0x20b   : > { %v1429_v53 = vpop.f32.mrf.mxu0  ;;  %v1788_v48 = vpop.f32.mrf.mxu1 }
 0x20c   : > { %4781 = vadd.xlane.f32.xlu1 %v4780_v24  ;;  %4790 = vadd.xlane.f32.xlu0 %v4789_v1  ;;  %v8888_v11 = vadd.f32 %v1788_v48, %v1429_v53  ;;  %v4816_v24 = vadd.f32 %v4815_v13, %v4378_v35  ;;  %v4825_v1 = vadd.f32 %v4824_v15, %v4386_v56  ;;  %v10805_v13 = vld [vmem:[#allocation42_spill] sm:$0xff] }
 0x20d   : > { %2140 = vmatmul.mubr.f32.gmra.mxu0 %v8396_v19  ;;  %2499 = vmatmul.mubr.f32.gmra.mxu1 %v8657_v6  ;;  %v1431_v63 = vpop.f32.mrf.mxu0  ;;  %v1790_v12 = vpop.f32.mrf.mxu1 }
 0x20e   : > { %2145 = vmatprep.mubr.f32.mxu0 %v8422_v39  ;;  %2504 = vmatprep.mubr.f32.mxu1 %v8745_v4  ;;  %v8892_v16 = vadd.f32 %v1790_v12, %v1431_v63  ;;  %v10807_v12 = vld [vmem:[#allocation99_spill] sm:$0xff] }
 0x20f   : > { %v1435_v52 = vpop.f32.mrf.mxu0  ;;  %v1794_v5 = vpop.f32.mrf.mxu1 }
 0x210   : > { %4799 = vadd.xlane.f32.xlu1 %v4798_v47  ;;  %4808 = vadd.xlane.f32.xlu0 %v4807_v37  ;;  %v8896_v19 = vadd.f32 %v1794_v5, %v1435_v52 }
 0x211   : > { %2146 = vmatmul.mubr.f32.gmra.mxu0 %v10800_v51  ;;  %2505 = vmatmul.mubr.f32.gmra.mxu1 %v8710_v44  ;;  %v1437_v39 = vpop.f32.mrf.mxu0  ;;  %v1796_v6 = vpop.f32.mrf.mxu1  ;;  %v10802_v44 = vld [vmem:[#allocation95_spill] sm:$0xff] }
 0x212   : > { %2510 = vmatprep.mubr.f32.mxu1 %v8758_v62  ;;  %2151 = vmatprep.mubr.f32.mxu0 %v8453_v26  ;;  %v8900_v4 = vadd.f32 %v1796_v6, %v1437_v39  ;;  %v4413_v39 = vpop.xlane.xlu1 %4412 }
 0x213   : > { %v1441_v2 = vpop.f32.mrf.mxu0  ;;  %v1800_v46 = vpop.f32.mrf.mxu1 }
 0x214   : > { %4817 = vadd.xlane.f32.xlu1 %v4816_v24  ;;  %4826 = vadd.xlane.f32.xlu0 %v4825_v1  ;;  %v8904_v50 = vadd.f32 %v1800_v46, %v1441_v2  ;;  %v10809_v46 = vld [vmem:[#allocation100_spill] sm:$0xff] }
 0x215   : > { %2152 = vmatmul.mubr.f32.gmra.mxu0 %v10801_v57  ;;  %2511 = vmatmul.mubr.f32.gmra.mxu1 %v8723_v28  ;;  %v1443_v62 = vpop.f32.mrf.mxu0  ;;  %v1802_v26 = vpop.f32.mrf.mxu1  ;;  %v10804_v28 = vld [vmem:[#allocation40_spill] sm:$0xff] }
 0x216   : > { %2157 = vmatprep.mubr.f32.mxu0 %v10802_v44  ;;  %2516 = vmatprep.mubr.f32.mxu1 %v8793_v33  ;;  %v8908_v60 = vadd.f32 %v1802_v26, %v1443_v62  ;;  %v4395_v33 = vpop.xlane.xlu0 %4394  ;;  %v5124_v26 = vlaneseq }
 0x217   : > { %v1447_v32 = vpop.f32.mrf.mxu0  ;;  %v1806_v61 = vpop.f32.mrf.mxu1  ;;  %v4828_v1 = vmax.f32 %v4395_v33, 1e-24 }
 0x218   : > { %v8912_v18 = vadd.f32 %v1806_v61, %v1447_v32  ;;  %v8950_v33 = vshrl.u32 %v5124_v26, 7 }
 0x219   : > { %2158 = vmatmul.mubr.f32.gmra.mxu0 %v10803_v58  ;;  %2517 = vmatmul.mubr.f32.gmra.mxu1 %v8761_v22  ;;  %v1449_v59 = vpop.f32.mrf.mxu0  ;;  %v1808_v23 = vpop.f32.mrf.mxu1  ;;  %v10806_v22 = vld [vmem:[#allocation72_spill] sm:$0xff]  ;;  %5739 = vrsqrt.f32 %v4828_v1 }
 0x21a   : > { %2522 = vmatprep.mubr.f32.mxu1 %v8798_v9  ;;  %2163 = vmatprep.mubr.f32.mxu0 %v10804_v28  ;;  %v8916_v47 = vadd.f32 %v1808_v23, %v1449_v59  ;;  %v4404_v52 = vpop.xlane.xlu0 %4403  ;;  %v4422_v58 = vpop.xlane.xlu1 %4421  ;;  %v5130_v1 = vsub.s32 1, %v8950_v33 }
 0x21b   : > { %v1453_v37 = vpop.f32.mrf.mxu0  ;;  %v1812_v35 = vpop.f32.mrf.mxu1 }
 0x21c   : > { %v8920_v56 = vadd.f32 %v1812_v35, %v1453_v37  ;;  %v10811_v35 = vld [vmem:[#allocation104_spill] sm:$0xff] }
 0x21d   : > { %2164 = vmatmul.mubr.f32.gmra.mxu0 %v10805_v13  ;;  %2523 = vmatmul.mubr.f32.gmra.mxu1 %v8766_v7  ;;  %v1455_v9 = vpop.f32.mrf.mxu0  ;;  %v1814_v15 = vpop.f32.mrf.mxu1  ;;  %v10808_v7 = vld [vmem:[#allocation76_spill] sm:$0xff]  ;;  %v4831_v13 = vmax.f32 %v4422_v58, 1e-24 }
 0x21e   : > { %2169 = vmatprep.mubr.f32.mxu0 %v10806_v22  ;;  %2528 = vmatprep.mubr.f32.mxu1 %v8807_v29  ;;  %v8924_v53 = vadd.f32 %v1814_v15, %v1455_v9  ;;  %v4431_v22 = vpop.xlane.xlu0 %4430 }
 0x21f   : > { %v1459_v48 = vpop.f32.mrf.mxu0  ;;  %v1818_v63 = vpop.f32.mrf.mxu1 }
 0x220   : > { %v8928_v24 = vadd.f32 %v1818_v63, %v1459_v48  ;;  %v5126_v63 = vsub.s32 0, %v8950_v33 }
 0x221   : > { %2170 = vmatmul.mubr.f32.gmra.mxu0 %v10807_v12  ;;  %2529 = vmatmul.mubr.f32.gmra.mxu1 %v8776_v43  ;;  %v1461_v5 = vpop.f32.mrf.mxu0  ;;  %v1820_v29 = vpop.f32.mrf.mxu1 }
 0x222   : > { %2534 = vmatprep.mubr.f32.mxu1 %v8841_v25  ;;  %2175 = vmatprep.mubr.f32.mxu0 %v10808_v7  ;;  %v8932_v51 = vadd.f32 %v1820_v29, %v1461_v5  ;;  %v4829_v25 = vmax.f32 %v4404_v52, 1e-24  ;;  %v5122_v7 = vld [vmem:[#allocation7] sm:$0xf]  ;;  %v6026_v5 = vld [vmem:[%s6730_s6 + $0x18] sm:$0xff]  ;;  %v6027_v29 = vld [vmem:[%s6730_s6 + $0x8] sm:$0xff] }
 0x223   : > { %v1824_v6 = vpop.f32.mrf.mxu1  ;;  %v1465_v2 = vpop.f32.mrf.mxu0 }
 0x224   : > { %v8936_v43 = vadd.f32 %v1824_v6, %v1465_v2  ;;  %5741 = vrsqrt.f32 %v4829_v25  ;;  %v4440_v6 = vpop.xlane.xlu1 %4439  ;;  %v929_v25 = vld [vmem:[#allocation5 + $0x9f0] sm:$0xff] }
 0x225   : > { %2535 = vmatmul.mubr.f32.gmra.mxu1 %v8814_v0  ;;  %2176 = vmatmul.mubr.f32.gmra.mxu0 %v10809_v46  ;;  %v1467_v57 = vpop.f32.mrf.mxu0  ;;  %v1826_v44 = vpop.f32.mrf.mxu1 }
 0x226   : > { %2181 = vmatprep.mubr.f32.mxu0 %v8624_v30  ;;  %2540 = vmatprep.mubr.f32.mxu1 %v8848_v31  ;;  %v8940_v62 = vadd.f32 %v1826_v44, %v1467_v57  ;;  %v10810_v30 = vld [vmem:[#allocation102_spill] sm:$0xff]  ;;  %v4830_v31 = vmax.f32 %v4413_v39, 1e-24  ;;  %v4832_v39 = vmax.f32 %v4431_v22, 1e-24  ;;  %v8967_v2 = vpop.eup %5739  ;;  %v8970_v57 = vrot.slane %v5122_v7, %v5126_v63  ;;  %v10814_v44 = vld [vmem:[#allocation16_spill] sm:$0xff] }
 0x227   : > { %v1830_v32 = vpop.f32.mrf.mxu1  ;;  %v1471_v0 = vpop.f32.mrf.mxu0  ;;  %v6030_v22 = vld [vmem:[%s6730_s6 + $0x48] sm:$0xff] }
 0x228   : > { %v8944_v61 = vadd.f32 %v1830_v32, %v1471_v0  ;;  %5743 = vrsqrt.f32 %v4830_v31  ;;  %v1057_v32 = vld [vmem:[#allocation5 + $0xdf0] sm:$0xff]  ;;  %v8973_v0 = vrot.slane %v5122_v7, %v5130_v1 }
 0x229   : > { %2541 = vmatmul.mubr.f32.gmra.mxu1 %v8823_v36  ;;  %2182 = vmatmul.mubr.f32.gmra.mxu0 %v8642_v17  ;;  %v1473_v28 = vpop.f32.mrf.mxu0  ;;  %v1832_v59 = vpop.f32.mrf.mxu1  ;;  %5745 = vrsqrt.f32 %v4831_v13  ;;  %v6028_v31 = vld [vmem:[%s6730_s6 + $0x10] sm:$0xff] }
 0x22a   : > { %2546 = vmatprep.mubr.f32.mxu1 %v8875_v34  ;;  %2187 = vmatprep.mubr.f32.mxu0 %v10810_v30  ;;  %v8948_v23 = vadd.f32 %v1832_v59, %v1473_v28  ;;  %v10812_v34 = vld [vmem:[#allocation59_spill] sm:$0xff]  ;;  %v4833_v59 = vmax.f32 %v4440_v6, 1e-24  ;;  %5747 = vrsqrt.f32 %v4832_v39 }
 0x22b   : > { %v1477_v37 = vpop.f32.mrf.mxu0  ;;  %v1836_v36 = vpop.f32.mrf.mxu1  ;;  %v6029_v28 = vld [vmem:[%s6730_s6] sm:$0xff] }
 0x22c   : > { %v8954_v17 = vadd.f32 %v1836_v36, %v1477_v37  ;;  %v926_v37 = vld [vmem:[#allocation5 + $0x9d8] sm:$0xff]  ;;  %5749 = vrsqrt.f32 %v4833_v59 }
 0x22d   : > { %2188 = vmatmul.mubr.f32.gmra.mxu0 %v10811_v35  ;;  %2547 = vmatmul.mubr.f32.gmra.mxu1 %v8851_v8  ;;  %v1479_v9 = vpop.f32.mrf.mxu0  ;;  %v1838_v15 = vpop.f32.mrf.mxu1 }
 0x22e   : > { %2193 = vmatprep.mubr.f32.mxu0 %v10812_v34  ;;  %2552 = vmatprep.mubr.f32.mxu1 %v8878_v3  ;;  %v8958_v48 = vadd.f32 %v1838_v15, %v1479_v9  ;;  %v10813_v3 = vld [vmem:[#allocation13_spill] sm:$0xff]  ;;  %v10815_v34 = vld [vmem:[#allocation18_spill] sm:$0xff]  ;;  %v4449_v9 = vpop.xlane.xlu0 %4448 }
 0x22f   : > { %v1907_v12 = vpop.f32.mrf.mxu0  ;;  %v2266_v8 = vpop.f32.mrf.mxu1 }
 0x230   : > { %v1908_v52 = vadd.f32 %v1907_v12, %v10813_v3 }
 0x231   : > { %2194 = vmatmul.mubr.f32.gmra.mxu0 %v8726_v41  ;;  %2553 = vmatmul.mubr.f32.gmra.mxu1 %v8856_v42  ;;  %v1909_v41 = vpop.f32.mrf.mxu0  ;;  %v2268_v46 = vpop.f32.mrf.mxu1 }
 0x232   : > { %2982 = vmatprep.mubr.f32.mxu1 %v6026_v5  ;;  %2623 = vmatprep.mubr.f32.mxu0 %v6027_v29  ;;  %v2267_v42 = vadd.f32 %v2266_v8, %v1908_v52  ;;  %v1910_v26 = vadd.f32 %v1909_v41, %v10814_v44  ;;  %v8980_v15 = vpop.eup %5741  ;;  %v6031_v8 = vld [vmem:[%s6730_s6 + $0x58] sm:$0xff]  ;;  %v925_v29 = vld [vmem:[#allocation5 + $0x9d0] sm:$0xff]  ;;  %v6032_v41 = vld [vmem:[%s6730_s6 + $0x40] sm:$0xff] }
 0x233   : > { %v2272_v30 = vpop.f32.mrf.mxu1  ;;  %v1913_v58 = vpop.f32.mrf.mxu0  ;;  %v10816_v52 = vld [vmem:[#allocation19_spill] sm:$0xff] }
 0x234   : > { %v4926_v36 = vmul.f32 %v8967_v2, %v2267_v42  ;;  %v2269_v35 = vadd.f32 %v2268_v46, %v1910_v26  ;;  %v1914_v13 = vadd.f32 %v1913_v58, %v10815_v34  ;;  %v6033_v46 = vld [vmem:[%s6730_s6 + $0x50] sm:$0xff]  ;;  %v1054_v42 = vld [vmem:[#allocation5 + $0xdd8] sm:$0xff] }
 0x235   : > { %2983 = vmatmul.mubr.f32.vlgmr.msra.gmra.mxu1 %v6028_v31  ;;  %2624 = vmatmul.mubr.f32.vlgmr.msra.gmra.mxu0 %v6029_v28  ;;  %v1915_v63 = vpop.f32.mrf.mxu0  ;;  %v2274_v12 = vpop.f32.mrf.mxu1  ;;  %v6034_v58 = vld [vmem:[%s6730_s6 + $0x98] sm:$0xff]  ;;  %v1053_v34 = vld [vmem:[#allocation5 + $0xdd0] sm:$0xff] }
 0x236   : > { %3278 = vmatpush1.msra.mxu0 %v929_v25  ;;  %2629 = vmatprep.mubr.f32.mxu0 %v6030_v22  ;;  %v5144_v7 = vadd.f32 %v8970_v57, %v4926_v36  ;;  %v4927_v1 = vmul.f32 %v8967_v2, %v2269_v35  ;;  %v2273_v3 = vadd.f32 %v2272_v30, %v1914_v13  ;;  %v4834_v25 = vmax.f32 %v4449_v9, 1e-24  ;;  %v10817_v30 = vld [vmem:[#allocation20_spill] sm:$0xff]  ;;  %v4458_v28 = vpop.xlane.xlu1 %4457  ;;  %v8997_v59 = vpop.eup %5743 }
 0x237   : > { %2988 = vmatprep.mubr.f32.mxu1 %v6031_v8  ;;  %3637 = vmatpush1.msra.mxu1 %v1057_v32  ;;  %v1916_v5 = vadd.f32 %v1915_v63, %v10816_v52  ;;  %v1919_v39 = vpop.f32.mrf.mxu0  ;;  %v2278_v6 = vpop.f32.mrf.mxu1  ;;  %v6035_v35 = vld [vmem:[%s6730_s6 + $0x88] sm:$0xff]  ;;  %v4835_v52 = vmax.f32 %v4458_v28, 1e-24 }
 0x238   : > { %3279 = vmatprep.subr.mxu0 %v926_v37  ;;  %5340 = vst [vmem:[%s8990_s20] sm:$0xff] %v5144_v7  ;;  %v5145_v44 = vadd.f32 %v8973_v0, %v4927_v1  ;;  %v4930_v26 = vmul.f32 %v8980_v15, %v2273_v3  ;;  %v1920_v31 = vadd.f32 %v1919_v39, %v10817_v30  ;;  %v10818_v63 = vld [vmem:[#allocation21_spill] sm:$0xff]  ;;  %5751 = vrsqrt.f32 %v4834_v25  ;;  %v6037_v3 = vld [vmem:[%s6730_s6 + $0x80] sm:$0xff]  ;;  %v6039_v30 = vld [vmem:[%s6730_s6 + $0xd8] sm:$0xff] }
 0x239   : > { %2630 = vmatmul.mubr.f32.gmra.mxu0 %v6032_v41  ;;  %2989 = vmatmul.mubr.f32.gmra.mxu1 %v6033_v46  ;;  %v2275_v32 = vadd.f32 %v2274_v12, %v1916_v5  ;;  %v1921_v37 = vpop.f32.mrf.mxu0  ;;  %v2280_v36 = vpop.f32.mrf.mxu1  ;;  %v6036_v7 = vld [vmem:[%s6730_s6 + $0x90] sm:$0xff]  ;;  %v922_v5 = vld [vmem:[#allocation5 + $0x9b8] sm:$0xff]  ;;  %5753 = vrsqrt.f32 %v4835_v52 }
 0x23a   : > { %2994 = vmatprep.mubr.f32.mxu1 %v6034_v58  ;;  %2635 = vmatprep.mubr.f32.mxu0 %v6035_v35  ;;  %5341 = vst [vmem:[%s8990_s20 + $0x8] sm:$0xff] %v5145_v44  ;;  %v5148_v13 = vadd.f32 %v8970_v57, %v4930_v26  ;;  %v2279_v9 = vadd.f32 %v2278_v6, %v1920_v31  ;;  %v10819_v41 = vld [vmem:[#allocation23_spill] sm:$0xff]  ;;  %v9010_v44 = vpop.eup %5745  ;;  %v921_v31 = vld [vmem:[#allocation5 + $0x9b0] sm:$0xff]  ;;  %v4476_v52 = vpop.xlane.xlu1 %4475 }
 0x23b   : > { %3280 = vmatpush1.msra.mxu0 %v925_v29  ;;  %v4931_v22 = vmul.f32 %v8980_v15, %v2275_v32  ;;  %v1922_v12 = vadd.f32 %v1921_v37, %v10818_v63  ;;  %3638 = vmatprep.subr.mxu1 %v1054_v42  ;;  %v2284_v8 = vpop.f32.mrf.mxu1  ;;  %v1925_v1 = vpop.f32.mrf.mxu0  ;;  %v6038_v32 = vld [vmem:[%s6730_s6 + $0xc8] sm:$0xff]  ;;  %v6041_v63 = vld [vmem:[%s6730_s6 + $0xd0] sm:$0xff] }
 0x23c   : > { %5344 = vst [vmem:[%s8990_s20 + $0x20] sm:$0xff] %v5148_v13  ;;  %v4934_v39 = vmul.f32 %v8997_v59, %v2279_v9  ;;  %v1926_v46 = vadd.f32 %v1925_v1, %v10819_v41  ;;  %3639 = vmatpush1.msra.mxu1 %v1053_v34  ;;  %v4467_v42 = vpop.xlane.xlu0 %4466  ;;  %3281 = vmatprep.subr.mxu0 %v922_v5  ;;  %v1050_v34 = vld [vmem:[#allocation5 + $0xdb8] sm:$0xff]  ;;  %v6040_v9 = vld [vmem:[%s6730_s6 + $0xc0] sm:$0xff] }
 0x23d   : > { %2995 = vmatmul.mubr.f32.gmra.mxu1 %v6036_v7  ;;  %2636 = vmatmul.mubr.f32.gmra.mxu0 %v6037_v3  ;;  %v5149_v29 = vadd.f32 %v8973_v0, %v4931_v22  ;;  %v2281_v6 = vadd.f32 %v2280_v36, %v1922_v12  ;;  %v1927_v25 = vpop.f32.mrf.mxu0  ;;  %v2286_v26 = vpop.f32.mrf.mxu1  ;;  %v10820_v36 = vld [vmem:[#allocation24_spill] sm:$0xff]  ;;  %v4836_v12 = vmax.f32 %v4467_v42, 1e-24  ;;  %v10821_v3 = vld [vmem:[#allocation25_spill] sm:$0xff]  ;;  %v6042_v41 = vld [vmem:[%s6730_s6 + $0x118] sm:$0xff] }
 0x23e   : > { %2641 = vmatprep.mubr.f32.mxu0 %v6038_v32  ;;  %3000 = vmatprep.mubr.f32.mxu1 %v6039_v30  ;;  %v5152_v58 = vadd.f32 %v8970_v57, %v4934_v39  ;;  %v2285_v37 = vadd.f32 %v2284_v8, %v1926_v46  ;;  %v1928_v35 = vadd.f32 %v1927_v25, %v10820_v36  ;;  %v1049_v46 = vld [vmem:[#allocation5 + $0xdb0] sm:$0xff]  ;;  %v10822_v32 = vld [vmem:[#allocation28_spill] sm:$0xff] }
 0x23f   : > { %5345 = vst [vmem:[%s8990_s20 + $0x28] sm:$0xff] %v5149_v29  ;;  %v4935_v28 = vmul.f32 %v8997_v59, %v2281_v6  ;;  %v1931_v13 = vpop.f32.mrf.mxu0  ;;  %v2290_v22 = vpop.f32.mrf.mxu1  ;;  %3282 = vmatpush1.msra.mxu0 %v921_v31  ;;  %3640 = vmatprep.subr.mxu1 %v1050_v34  ;;  %v6043_v31 = vld [vmem:[%s6730_s6 + $0x108] sm:$0xff]  ;;  %5755 = vrsqrt.f32 %v4836_v12  ;;  %v6045_v36 = vld [vmem:[%s6730_s6 + $0x100] sm:$0xff]  ;;  %v4837_v34 = vmax.f32 %v4476_v52, 1e-24  ;;  %v6047_v52 = vld [vmem:[%s6730_s6 + $0x158] sm:$0xff] }
 0x240   : > { %5348 = vst [vmem:[%s8990_s20 + $0x40] sm:$0xff] %v5152_v58  ;;  %v4938_v1 = vmul.f32 %v9010_v44, %v2285_v37  ;;  %v2287_v8 = vadd.f32 %v2286_v26, %v1928_v35  ;;  %v1932_v5 = vadd.f32 %v1931_v13, %v10821_v3  ;;  %v9024_v29 = vpop.eup %5747  ;;  %v918_v35 = vld [vmem:[#allocation5 + $0x998] sm:$0xff]  ;;  %3641 = vmatpush1.msra.mxu1 %v1049_v46  ;;  %v4485_v12 = vpop.xlane.xlu0 %4484 }
 0x241   : > { %2642 = vmatmul.mubr.f32.gmra.mxu0 %v6040_v9  ;;  %3001 = vmatmul.mubr.f32.gmra.mxu1 %v6041_v63  ;;  %v5153_v7 = vadd.f32 %v8973_v0, %v4935_v28  ;;  %v1933_v39 = vpop.f32.mrf.mxu0  ;;  %v2292_v6 = vpop.f32.mrf.mxu1  ;;  %v6044_v28 = vld [vmem:[%s6730_s6 + $0x110] sm:$0xff]  ;;  %v10824_v46 = vld [vmem:[#allocation31_spill] sm:$0xff]  ;;  %5757 = vrsqrt.f32 %v4837_v34 }
 0x242   : > { %3006 = vmatprep.mubr.f32.mxu1 %v6042_v41  ;;  %v5156_v42 = vadd.f32 %v8970_v57, %v4938_v1  ;;  %v4939_v25 = vmul.f32 %v9010_v44, %v2287_v8  ;;  %v2291_v26 = vadd.f32 %v2290_v22, %v1932_v5  ;;  %v1934_v30 = vadd.f32 %v1933_v39, %v10822_v32  ;;  %v9034_v13 = vpop.eup %5749  ;;  %v6046_v5 = vld [vmem:[%s6730_s6 + $0x148] sm:$0xff]  ;;  %v917_v39 = vld [vmem:[#allocation5 + $0x990] sm:$0xff] }
 0x243   : > { %5349 = vst [vmem:[%s8990_s20 + $0x48] sm:$0xff] %v5153_v7  ;;  %2647 = vmatprep.mubr.f32.mxu0 %v6043_v31  ;;  %v2296_v58 = vpop.f32.mrf.mxu1  ;;  %v1937_v37 = vpop.f32.mrf.mxu0  ;;  %v10823_v7 = vld [vmem:[#allocation30_spill] sm:$0xff]  ;;  %3283 = vmatprep.subr.mxu0 %v918_v35  ;;  %v6048_v31 = vld [vmem:[%s6730_s6 + $0x140] sm:$0xff] }
 0x244   : > { %5352 = vst [vmem:[%s8990_s20 + $0x60] sm:$0xff] %v5156_v42  ;;  %v5157_v22 = vadd.f32 %v8973_v0, %v4939_v25  ;;  %v4942_v9 = vmul.f32 %v9024_v29, %v2291_v26  ;;  %v2293_v63 = vadd.f32 %v2292_v6, %v1934_v30  ;;  %v1938_v1 = vadd.f32 %v1937_v37, %v10823_v7  ;;  %v1046_v26 = vld [vmem:[#allocation5 + $0xd98] sm:$0xff]  ;;  %v1045_v37 = vld [vmem:[#allocation5 + $0xd90] sm:$0xff] }
 0x245   : > { %3007 = vmatmul.mubr.f32.gmra.mxu1 %v6044_v28  ;;  %2648 = vmatmul.mubr.f32.gmra.mxu0 %v6045_v36  ;;  %v1939_v8 = vpop.f32.mrf.mxu0  ;;  %v2298_v3 = vpop.f32.mrf.mxu1  ;;  %v6049_v28 = vld [vmem:[%s6730_s6 + $0x150] sm:$0xff]  ;;  %v4838_v36 = vmax.f32 %v4485_v12, 1e-24 }
 0x246   : > { %2653 = vmatprep.mubr.f32.mxu0 %v6046_v5  ;;  %3012 = vmatprep.mubr.f32.mxu1 %v6047_v52  ;;  %5353 = vst [vmem:[%s8990_s20 + $0x68] sm:$0xff] %v5157_v22  ;;  %v5160_v41 = vadd.f32 %v8970_v57, %v4942_v9  ;;  %v4943_v42 = vmul.f32 %v9024_v29, %v2293_v63  ;;  %v9048_v22 = vpop.eup %5751  ;;  %v10826_v63 = vld [vmem:[#allocation32_spill] sm:$0xff] }
 0x247   : > { %v2297_v6 = vadd.f32 %v2296_v58, %v1938_v1  ;;  %v1940_v25 = vadd.f32 %v1939_v8, %v10824_v46  ;;  %v1943_v32 = vpop.f32.mrf.mxu0  ;;  %v2302_v30 = vpop.f32.mrf.mxu1  ;;  %10825 = vst [vmem:[#allocation81_spill] sm:$0xff] %v9048_v22  ;;  %3284 = vmatpush1.msra.mxu0 %v917_v39  ;;  %3642 = vmatprep.subr.mxu1 %v1046_v26  ;;  %v6050_v8 = vld [vmem:[%s6730_s6 + $0x198] sm:$0xff]  ;;  %v6051_v39 = vld [vmem:[%s6730_s6 + $0x188] sm:$0xff]  ;;  %5759 = vrsqrt.f32 %v4838_v36 }
 0x248   : > { %5356 = vst [vmem:[%s8990_s20 + $0x80] sm:$0xff] %v5160_v41  ;;  %v5161_v58 = vadd.f32 %v8973_v0, %v4943_v42  ;;  %v1944_v34 = vadd.f32 %v1943_v32, %v10826_v63  ;;  %v10827_v41 = vld [vmem:[#allocation33_spill] sm:$0xff]  ;;  %3643 = vmatpush1.msra.mxu1 %v1045_v37  ;;  %v1042_v63 = vld [vmem:[#allocation5 + $0xd78] sm:$0xff] }
 0x249   : > { %2654 = vmatmul.mubr.f32.gmra.mxu0 %v6048_v31  ;;  %3013 = vmatmul.mubr.f32.gmra.mxu1 %v6049_v28  ;;  %v4946_v9 = vmul.f32 %v9034_v13, %v2297_v6  ;;  %v2299_v35 = vadd.f32 %v2298_v3, %v1940_v25  ;;  %v1945_v7 = vpop.f32.mrf.mxu0  ;;  %v2304_v1 = vpop.f32.mrf.mxu1  ;;  %v914_v3 = vld [vmem:[#allocation5 + $0x978] sm:$0xff]  ;;  %v6052_v25 = vld [vmem:[%s6730_s6 + $0x190] sm:$0xff] }
 0x24a   : > { %3018 = vmatprep.mubr.f32.mxu1 %v6050_v8  ;;  %5357 = vst [vmem:[%s8990_s20 + $0x88] sm:$0xff] %v5161_v58  ;;  %v2303_v52 = vadd.f32 %v2302_v30, %v1944_v34  ;;  %v1946_v42 = vadd.f32 %v1945_v7, %v10827_v41  ;;  %v4494_v6 = vpop.xlane.xlu1 %4493  ;;  %2659 = vmatprep.mubr.f32.mxu0 %v6051_v39  ;;  %v913_v32 = vld [vmem:[#allocation5 + $0x970] sm:$0xff]  ;;  %v9061_v31 = vpop.eup %5753  ;;  %v6054_v8 = vld [vmem:[%s6730_s6 + $0x1c8] sm:$0xff]  ;;  %v6055_v39 = vld [vmem:[%s6730_s6 + $0x1d8] sm:$0xff] }
 0x24b   : > { %v5164_v12 = vadd.f32 %v8970_v57, %v4946_v9  ;;  %v4947_v5 = vmul.f32 %v9034_v13, %v2299_v35  ;;  %v2308_v46 = vpop.f32.mrf.mxu1  ;;  %v1949_v26 = vpop.f32.mrf.mxu0  ;;  %10828 = vst [vmem:[#allocation60_spill] sm:$0xff] %v9061_v31  ;;  %v10829_v58 = vld [vmem:[#allocation34_spill] sm:$0xff]  ;;  %v6053_v35 = vld [vmem:[%s6730_s6 + $0x180] sm:$0xff]  ;;  %3285 = vmatprep.subr.mxu0 %v914_v3  ;;  %v4839_v41 = vmax.f32 %v4494_v6, 1e-24  ;;  %3644 = vmatprep.subr.mxu1 %v1042_v63 }
 0x24c   : > { %v4950_v28 = vmul.f32 %v9048_v22, %v2303_v52  ;;  %v2305_v37 = vadd.f32 %v2304_v1, %v1946_v42  ;;  %v1950_v9 = vadd.f32 %v1949_v26, %v10829_v58  ;;  %v4503_v34 = vpop.xlane.xlu0 %4502  ;;  %v10830_v52 = vld [vmem:[#allocation35_spill] sm:$0xff]  ;;  %3286 = vmatpush1.msra.mxu0 %v913_v32  ;;  %v1041_v26 = vld [vmem:[#allocation5 + $0xd70] sm:$0xff]  ;;  %v9074_v6 = vpop.eup %5755 }
 0x24d   : > { %3019 = vmatmul.mubr.f32.gmra.mxu1 %v6052_v25  ;;  %5360 = vst [vmem:[%s8990_s20 + $0xa0] sm:$0xff] %v5164_v12  ;;  %v5165_v30 = vadd.f32 %v8973_v0, %v4947_v5  ;;  %2660 = vmatmul.mubr.f32.gmra.mxu0 %v6053_v35  ;;  %v1951_v36 = vpop.f32.mrf.mxu0  ;;  %v2310_v7 = vpop.f32.mrf.mxu1  ;;  %v4840_v58 = vmax.f32 %v4503_v34, 1e-24  ;;  %10831 = vst [vmem:[#allocation61_spill] sm:$0xff] %v9074_v6  ;;  %v910_v35 = vld [vmem:[#allocation5 + $0x958] sm:$0xff]  ;;  %5761 = vrsqrt.f32 %v4839_v41 }
 0x24e   : > { %2665 = vmatprep.mubr.f32.mxu0 %v6054_v8  ;;  %v5168_v12 = vadd.f32 %v8970_v57, %v4950_v28  ;;  %v4951_v5 = vmul.f32 %v9048_v22, %v2305_v37  ;;  %v2309_v1 = vadd.f32 %v2308_v46, %v1950_v9  ;;  %v1952_v42 = vadd.f32 %v1951_v36, %v10830_v52  ;;  %v10832_v37 = vld [vmem:[#allocation36_spill] sm:$0xff]  ;;  %v4512_v63 = vpop.xlane.xlu1 %4511  ;;  %v6057_v36 = vld [vmem:[%s6730_s6 + $0x1d0] sm:$0xff] }
 0x24f   : > { %5361 = vst [vmem:[%s8990_s20 + $0xa8] sm:$0xff] %v5165_v30  ;;  %3024 = vmatprep.mubr.f32.mxu1 %v6055_v39  ;;  %v1955_v3 = vpop.f32.mrf.mxu0  ;;  %v2314_v25 = vpop.f32.mrf.mxu1  ;;  %v6056_v9 = vld [vmem:[%s6730_s6 + $0x1c0] sm:$0xff]  ;;  %v6058_v52 = vld [vmem:[%s6730_s6 + $0x208] sm:$0xff]  ;;  %3645 = vmatpush1.msra.mxu1 %v1041_v26  ;;  %v909_v39 = vld [vmem:[#allocation5 + $0x950] sm:$0xff]  ;;  %5763 = vrsqrt.f32 %v4840_v58 }
 0x250   : > { %5364 = vst [vmem:[%s8990_s20 + $0xc0] sm:$0xff] %v5168_v12  ;;  %v5169_v30 = vadd.f32 %v8973_v0, %v4951_v5  ;;  %v4954_v46 = vmul.f32 %v9061_v31, %v2309_v1  ;;  %v2311_v28 = vadd.f32 %v2310_v7, %v1952_v42  ;;  %v1956_v32 = vadd.f32 %v1955_v3, %v10832_v37  ;;  %v10833_v1 = vld [vmem:[#allocation38_spill] sm:$0xff] }
 0x251   : > { %2666 = vmatmul.mubr.f32.gmra.mxu0 %v6056_v9  ;;  %3025 = vmatmul.mubr.f32.gmra.mxu1 %v6057_v36  ;;  %v1957_v34 = vpop.f32.mrf.mxu0  ;;  %v2316_v8 = vpop.f32.mrf.mxu1  ;;  %v6059_v3 = vld [vmem:[%s6730_s6 + $0x218] sm:$0xff]  ;;  %v6061_v58 = vld [vmem:[%s6730_s6 + $0x210] sm:$0xff] }
 0x252   : > { %2671 = vmatprep.mubr.f32.mxu0 %v6058_v52  ;;  %5365 = vst [vmem:[%s8990_s20 + $0xc8] sm:$0xff] %v5169_v30  ;;  %v5172_v12 = vadd.f32 %v8970_v57, %v4954_v46  ;;  %v4955_v7 = vmul.f32 %v9061_v31, %v2311_v28  ;;  %v2315_v5 = vadd.f32 %v2314_v25, %v1956_v32  ;;  %v1038_v9 = vld [vmem:[#allocation5 + $0xd58] sm:$0xff]  ;;  %v4841_v30 = vmax.f32 %v4512_v63, 1e-24  ;;  %v9088_v36 = vpop.eup %5757  ;;  %v4521_v52 = vpop.xlane.xlu0 %4520  ;;  %v1029_v31 = vld [vmem:[#allocation5 + $0xd10] sm:$0xff] }
 0x253   : > { %v1958_v42 = vadd.f32 %v1957_v34, %v10833_v1  ;;  %3030 = vmatprep.mubr.f32.mxu1 %v6059_v3  ;;  %3287 = vmatprep.subr.mxu0 %v910_v35  ;;  %v2320_v41 = vpop.f32.mrf.mxu1  ;;  %v1961_v37 = vpop.f32.mrf.mxu0  ;;  %10834 = vst [vmem:[#allocation63_spill] sm:$0xff] %v9088_v36  ;;  %v10835_v28 = vld [vmem:[#allocation39_spill] sm:$0xff]  ;;  %v1037_v35 = vld [vmem:[#allocation5 + $0xd50] sm:$0xff]  ;;  %v6062_v3 = vld [vmem:[%s6730_s6 + $0x248] sm:$0xff] }
 0x254   : > { %5368 = vst [vmem:[%s8990_s20 + $0xe0] sm:$0xff] %v5172_v12  ;;  %v5173_v25 = vadd.f32 %v8973_v0, %v4955_v7  ;;  %v4958_v26 = vmul.f32 %v9074_v6, %v2315_v5  ;;  %v1962_v32 = vadd.f32 %v1961_v37, %v10835_v28  ;;  %v6060_v34 = vld [vmem:[%s6730_s6 + $0x200] sm:$0xff]  ;;  %3288 = vmatpush1.msra.mxu0 %v909_v39  ;;  %5765 = vrsqrt.f32 %v4841_v30  ;;  %v906_v28 = vld [vmem:[#allocation5 + $0x938] sm:$0xff]  ;;  %v4530_v30 = vpop.xlane.xlu1 %4529 }
 0x255   : > { %v2317_v46 = vadd.f32 %v2316_v8, %v1958_v42  ;;  %2672 = vmatmul.mubr.f32.gmra.mxu0 %v6060_v34  ;;  %3031 = vmatmul.mubr.f32.gmra.mxu1 %v6061_v58  ;;  %v1963_v63 = vpop.f32.mrf.mxu0  ;;  %v2322_v1 = vpop.f32.mrf.mxu1  ;;  %v10836_v8 = vld [vmem:[#allocation41_spill] sm:$0xff]  ;;  %v4842_v34 = vmax.f32 %v4521_v52, 1e-24 }
 0x256   : > { %5369 = vst [vmem:[%s8990_s20 + $0xe8] sm:$0xff] %v5173_v25  ;;  %v5176_v12 = vadd.f32 %v8970_v57, %v4958_v26  ;;  %v2321_v5 = vadd.f32 %v2320_v41, %v1962_v32  ;;  %3646 = vmatprep.subr.mxu1 %v1038_v9  ;;  %v1964_v42 = vadd.f32 %v1963_v63, %v10836_v8  ;;  %v9101_v25 = vpop.eup %5759  ;;  %v10838_v32 = vld [vmem:[#allocation43_spill] sm:$0xff]  ;;  %v905_v58 = vld [vmem:[#allocation5 + $0x930] sm:$0xff] }
 0x257   : > { %v4959_v7 = vmul.f32 %v9074_v6, %v2317_v46  ;;  %3647 = vmatpush1.msra.mxu1 %v1037_v35  ;;  %2677 = vmatprep.mubr.f32.mxu0 %v6062_v3  ;;  %v1967_v37 = vpop.f32.mrf.mxu0  ;;  %v2326_v39 = vpop.f32.mrf.mxu1  ;;  %10837 = vst [vmem:[#allocation82_spill] sm:$0xff] %v9101_v25  ;;  %v6063_v46 = vld [vmem:[%s6730_s6 + $0x258] sm:$0xff]  ;;  %v6064_v63 = vld [vmem:[%s6730_s6 + $0x240] sm:$0xff]  ;;  %v6065_v8 = vld [vmem:[%s6730_s6 + $0x250] sm:$0xff]  ;;  %5767 = vrsqrt.f32 %v4842_v34 }
 0x258   : > { %5372 = vst [vmem:[%s8990_s20 + $0x100] sm:$0xff] %v5176_v12  ;;  %v4962_v9 = vmul.f32 %v9088_v36, %v2321_v5  ;;  %v2323_v26 = vadd.f32 %v2322_v1, %v1964_v42  ;;  %3036 = vmatprep.mubr.f32.mxu1 %v6063_v46  ;;  %v1968_v35 = vadd.f32 %v1967_v37, %v10838_v32  ;;  %v1034_v3 = vld [vmem:[#allocation5 + $0xd38] sm:$0xff]  ;;  %v10839_v42 = vld [vmem:[#allocation44_spill] sm:$0xff] }
 0x259   : > { %v5177_v41 = vadd.f32 %v8973_v0, %v4959_v7  ;;  %2678 = vmatmul.mubr.f32.gmra.mxu0 %v6064_v63  ;;  %3037 = vmatmul.mubr.f32.gmra.mxu1 %v6065_v8  ;;  %v1969_v52 = vpop.f32.mrf.mxu0  ;;  %v2328_v12 = vpop.f32.mrf.mxu1  ;;  %v6066_v46 = vld [vmem:[%s6730_s6 + $0x298] sm:$0xff]  ;;  %v1033_v63 = vld [vmem:[#allocation5 + $0xd30] sm:$0xff]  ;;  %v6069_v34 = vld [vmem:[%s6730_s6 + $0x280] sm:$0xff] }
 0x25a   : > { %v5180_v7 = vadd.f32 %v8970_v57, %v4962_v9  ;;  %v4963_v1 = vmul.f32 %v9088_v36, %v2323_v26  ;;  %v2327_v5 = vadd.f32 %v2326_v39, %v1968_v35  ;;  %3289 = vmatprep.subr.mxu0 %v906_v28  ;;  %v1970_v37 = vadd.f32 %v1969_v52, %v10839_v42  ;;  %v6067_v39 = vld [vmem:[%s6730_s6 + $0x288] sm:$0xff]  ;;  %v902_v28 = vld [vmem:[#allocation5 + $0x918] sm:$0xff]  ;;  %v6068_v52 = vld [vmem:[%s6730_s6 + $0x290] sm:$0xff] }
 0x25b   : > { %5373 = vst [vmem:[%s8990_s20 + $0x108] sm:$0xff] %v5177_v41  ;;  %3290 = vmatpush1.msra.mxu0 %v905_v58  ;;  %3042 = vmatprep.mubr.f32.mxu1 %v6066_v46  ;;  %v2332_v32 = vpop.f32.mrf.mxu1  ;;  %v1973_v8 = vpop.f32.mrf.mxu0  ;;  %v4843_v35 = vmax.f32 %v4530_v30, 1e-24  ;;  %v10840_v42 = vld [vmem:[#allocation46_spill] sm:$0xff] }
 0x25c   : > { %5376 = vst [vmem:[%s8990_s20 + $0x120] sm:$0xff] %v5180_v7  ;;  %v5181_v41 = vadd.f32 %v8973_v0, %v4963_v1  ;;  %v4966_v9 = vmul.f32 %v9101_v25, %v2327_v5  ;;  %v2329_v26 = vadd.f32 %v2328_v12, %v1970_v37  ;;  %3648 = vmatprep.subr.mxu1 %v1034_v3  ;;  %v4539_v58 = vpop.xlane.xlu0 %4538  ;;  %v901_v36 = vld [vmem:[#allocation5 + $0x910] sm:$0xff]  ;;  %v1030_v5 = vld [vmem:[#allocation5 + $0xd18] sm:$0xff]  ;;  %v9122_v12 = vpop.eup %5761 }
 0x25d   : > { %2683 = vmatprep.mubr.f32.mxu0 %v6067_v39  ;;  %3043 = vmatmul.mubr.f32.gmra.mxu1 %v6068_v52  ;;  %v1974_v46 = vadd.f32 %v1973_v8, %v10840_v42  ;;  %v1975_v7 = vpop.f32.mrf.mxu0  ;;  %v2334_v1 = vpop.f32.mrf.mxu1  ;;  %10841 = vst [vmem:[#allocation64_spill] sm:$0xff] %v9122_v12  ;;  %v10842_v37 = vld [vmem:[#allocation47_spill] sm:$0xff]  ;;  %v6070_v52 = vld [vmem:[%s6730_s6 + $0x2c8] sm:$0xff]  ;;  %5769 = vrsqrt.f32 %v4843_v35 }
 0x25e   : > { %2684 = vmatmul.mubr.f32.gmra.mxu0 %v6069_v34  ;;  %5377 = vst [vmem:[%s8990_s20 + $0x128] sm:$0xff] %v5181_v41  ;;  %v5184_v3 = vadd.f32 %v8970_v57, %v4966_v9  ;;  %v4967_v30 = vmul.f32 %v9101_v25, %v2329_v26  ;;  %3649 = vmatpush1.msra.mxu1 %v1033_v63  ;;  %v6071_v42 = vld [vmem:[%s6730_s6 + $0x2d8] sm:$0xff]  ;;  %v4844_v41 = vmax.f32 %v4539_v58, 1e-24  ;;  %v9130_v22 = vpop.eup %5763  ;;  %v10844_v26 = vld [vmem:[#allocation49_spill] sm:$0xff] }
 0x25f   : > { %v1976_v39 = vadd.f32 %v1975_v7, %v10842_v37  ;;  %2689 = vmatprep.mubr.f32.mxu0 %v6070_v52  ;;  %v2333_v8 = vadd.f32 %v2332_v32, %v1974_v46  ;;  %3048 = vmatprep.mubr.f32.mxu1 %v6071_v42  ;;  %v1979_v34 = vpop.f32.mrf.mxu0  ;;  %v2338_v6 = vpop.f32.mrf.mxu1  ;;  %10843 = vst [vmem:[#allocation65_spill] sm:$0xff] %v9130_v22  ;;  %v898_v32 = vld [vmem:[#allocation5 + $0x8f8] sm:$0xff]  ;;  %v6072_v46 = vld [vmem:[%s6730_s6 + $0x2c0] sm:$0xff]  ;;  %v6073_v58 = vld [vmem:[%s6730_s6 + $0x2d0] sm:$0xff] }
 0x260   : > { %3291 = vmatprep.subr.mxu0 %v902_v28  ;;  %5380 = vst [vmem:[%s8990_s20 + $0x140] sm:$0xff] %v5184_v3  ;;  %v5185_v63 = vadd.f32 %v8973_v0, %v4967_v30  ;;  %v1980_v7 = vadd.f32 %v1979_v34, %v10844_v26  ;;  %3650 = vmatprep.subr.mxu1 %v1030_v5  ;;  %v897_v52 = vld [vmem:[#allocation5 + $0x8f0] sm:$0xff]  ;;  %v10845_v30 = vld [vmem:[#allocation51_spill] sm:$0xff]  ;;  %v4548_v5 = vpop.xlane.xlu1 %4547  ;;  %5771 = vrsqrt.f32 %v4844_v41 }
 0x261   : > { %v2335_v9 = vadd.f32 %v2334_v1, %v1976_v39  ;;  %3292 = vmatpush1.msra.mxu0 %v901_v36  ;;  %v4970_v28 = vmul.f32 %v9122_v12, %v2333_v8  ;;  %3049 = vmatmul.mubr.f32.gmra.mxu1 %v6073_v58  ;;  %v1981_v37 = vpop.f32.mrf.mxu0  ;;  %v2340_v3 = vpop.f32.mrf.mxu1  ;;  %v6074_v36 = vld [vmem:[%s6730_s6 + $0x308] sm:$0xff]  ;;  %v6075_v42 = vld [vmem:[%s6730_s6 + $0x318] sm:$0xff]  ;;  %v6077_v41 = vld [vmem:[%s6730_s6 + $0x300] sm:$0xff] }
 0x262   : > { %2690 = vmatmul.mubr.f32.gmra.mxu0 %v6072_v46  ;;  %5381 = vst [vmem:[%s8990_s20 + $0x148] sm:$0xff] %v5185_v63  ;;  %v2339_v35 = vadd.f32 %v2338_v6, %v1980_v7  ;;  %v1982_v39 = vadd.f32 %v1981_v37, %v10845_v30  ;;  %3651 = vmatpush1.msra.mxu1 %v1029_v31  ;;  %v9144_v63 = vpop.eup %5765  ;;  %v10847_v7 = vld [vmem:[#allocation52_spill] sm:$0xff]  ;;  %v4557_v58 = vpop.xlane.xlu0 %4556  ;;  %v6076_v37 = vld [vmem:[%s6730_s6 + $0x310] sm:$0xff] }
 0x263   : > { %v4971_v1 = vmul.f32 %v9122_v12, %v2335_v9  ;;  %2695 = vmatprep.mubr.f32.mxu0 %v6074_v36  ;;  %v5188_v8 = vadd.f32 %v8970_v57, %v4970_v28  ;;  %3054 = vmatprep.mubr.f32.mxu1 %v6075_v42  ;;  %v2344_v34 = vpop.f32.mrf.mxu1  ;;  %v1985_v26 = vpop.f32.mrf.mxu0  ;;  %10846 = vst [vmem:[#allocation84_spill] sm:$0xff] %v9144_v63  ;;  %v1026_v28 = vld [vmem:[#allocation5 + $0xcf8] sm:$0xff]  ;;  %v4845_v36 = vmax.f32 %v4548_v5, 1e-24  ;;  %v4846_v5 = vmax.f32 %v4557_v58, 1e-24 }
 0x264   : > { %3293 = vmatprep.subr.mxu0 %v898_v32  ;;  %v4974_v31 = vmul.f32 %v9130_v22, %v2339_v35  ;;  %v2341_v9 = vadd.f32 %v2340_v3, %v1982_v39  ;;  %v1986_v46 = vadd.f32 %v1985_v26, %v10847_v7  ;;  %v10848_v39 = vld [vmem:[#allocation53_spill] sm:$0xff]  ;;  %3652 = vmatprep.subr.mxu1 %v1026_v28  ;;  %v6080_v28 = vld [vmem:[%s6730_s6 + $0x340] sm:$0xff] }
 0x265   : > { %v5189_v6 = vadd.f32 %v8973_v0, %v4971_v1  ;;  %3294 = vmatpush1.msra.mxu0 %v897_v52  ;;  %5384 = vst [vmem:[%s8990_s20 + $0x160] sm:$0xff] %v5188_v8  ;;  %3055 = vmatmul.mubr.f32.gmra.mxu1 %v6076_v37  ;;  %v1987_v32 = vpop.f32.mrf.mxu0  ;;  %v2346_v30 = vpop.f32.mrf.mxu1  ;;  %v1025_v1 = vld [vmem:[#allocation5 + $0xcf0] sm:$0xff]  ;;  %v6078_v26 = vld [vmem:[%s6730_s6 + $0x348] sm:$0xff]  ;;  %v6079_v8 = vld [vmem:[%s6730_s6 + $0x358] sm:$0xff]  ;;  %5773 = vrsqrt.f32 %v4845_v36 }
 0x266   : > { %2696 = vmatmul.mubr.f32.gmra.mxu0 %v6077_v41  ;;  %v5192_v3 = vadd.f32 %v8970_v57, %v4974_v31  ;;  %v4975_v35 = vmul.f32 %v9130_v22, %v2341_v9  ;;  %v2345_v52 = vadd.f32 %v2344_v34, %v1986_v46  ;;  %v1988_v42 = vadd.f32 %v1987_v32, %v10848_v39  ;;  %v9158_v41 = vpop.eup %5767  ;;  %v10850_v9 = vld [vmem:[#allocation54_spill] sm:$0xff]  ;;  %v4566_v39 = vpop.xlane.xlu1 %4565 }
 0x267   : > { %5385 = vst [vmem:[%s8990_s20 + $0x168] sm:$0xff] %v5189_v6  ;;  %2701 = vmatprep.mubr.f32.mxu0 %v6078_v26  ;;  %3060 = vmatprep.mubr.f32.mxu1 %v6079_v8  ;;  %v1991_v7 = vpop.f32.mrf.mxu0  ;;  %v2350_v37 = vpop.f32.mrf.mxu1  ;;  %10849 = vst [vmem:[#allocation66_spill] sm:$0xff] %v9158_v41  ;;  %v894_v32 = vld [vmem:[#allocation5 + $0x8d8] sm:$0xff]  ;;  %v6081_v58 = vld [vmem:[%s6730_s6 + $0x350] sm:$0xff]  ;;  %5775 = vrsqrt.f32 %v4846_v5  ;;  %v4847_v22 = vmax.f32 %v4566_v39, 1e-24 }
 0x268   : > { %5388 = vst [vmem:[%s8990_s20 + $0x180] sm:$0xff] %v5192_v3  ;;  %v5193_v6 = vadd.f32 %v8973_v0, %v4975_v35  ;;  %v4978_v34 = vmul.f32 %v9144_v63, %v2345_v52  ;;  %v2347_v31 = vadd.f32 %v2346_v30, %v1988_v42  ;;  %v1992_v46 = vadd.f32 %v1991_v7, %v10850_v9  ;;  %v893_v8 = vld [vmem:[#allocation5 + $0x8d0] sm:$0xff]  ;;  %v6082_v7 = vld [vmem:[%s6730_s6 + $0x388] sm:$0xff]  ;;  %v6083_v9 = vld [vmem:[%s6730_s6 + $0x398] sm:$0xff] }
 0x269   : > { %3653 = vmatpush1.msra.mxu1 %v1025_v1  ;;  %v1993_v26 = vpop.f32.mrf.mxu0  ;;  %v2352_v3 = vpop.f32.mrf.mxu1  ;;  %v10851_v1 = vld [vmem:[#allocation55_spill] sm:$0xff]  ;;  %3295 = vmatprep.subr.mxu0 %v894_v32  ;;  %v6084_v5 = vld [vmem:[%s6730_s6 + $0x390] sm:$0xff]  ;;  %5777 = vrsqrt.f32 %v4847_v22 }
 0x26a   : > { %2702 = vmatmul.mubr.f32.gmra.mxu0 %v6080_v28  ;;  %3061 = vmatmul.mubr.f32.gmra.mxu1 %v6081_v58  ;;  %5389 = vst [vmem:[%s8990_s20 + $0x188] sm:$0xff] %v5193_v6  ;;  %v5196_v35 = vadd.f32 %v8970_v57, %v4978_v34  ;;  %v4979_v30 = vmul.f32 %v9144_v63, %v2347_v31  ;;  %v1022_v58 = vld [vmem:[#allocation5 + $0xcd8] sm:$0xff]  ;;  %v10852_v31 = vld [vmem:[#allocation56_spill] sm:$0xff]  ;;  %v6089_v22 = vld [vmem:[%s6730_s6 + $0x3d0] sm:$0xff] }
 0x26b   : > { %v2351_v52 = vadd.f32 %v2350_v37, %v1992_v46  ;;  %v1994_v42 = vadd.f32 %v1993_v26, %v10851_v1  ;;  %2707 = vmatprep.mubr.f32.mxu0 %v6082_v7  ;;  %3066 = vmatprep.mubr.f32.mxu1 %v6083_v9  ;;  %v2356_v36 = vpop.f32.mrf.mxu1  ;;  %v1997_v28 = vpop.f32.mrf.mxu0  ;;  %v6085_v32 = vld [vmem:[%s6730_s6 + $0x380] sm:$0xff]  ;;  %v6086_v9 = vld [vmem:[%s6730_s6 + $0x3c8] sm:$0xff] }
 0x26c   : > { %5392 = vst [vmem:[%s8990_s20 + $0x1a0] sm:$0xff] %v5196_v35  ;;  %v5197_v6 = vadd.f32 %v8973_v0, %v4979_v30  ;;  %v1998_v46 = vadd.f32 %v1997_v28, %v10852_v31  ;;  %3296 = vmatpush1.msra.mxu0 %v893_v8  ;;  %v4575_v26 = vpop.xlane.xlu0 %4574  ;;  %v9176_v1 = vpop.eup %5769  ;;  %v1021_v35 = vld [vmem:[#allocation5 + $0xcd0] sm:$0xff]  ;;  %3654 = vmatprep.subr.mxu1 %v1022_v58  ;;  %v6087_v28 = vld [vmem:[%s6730_s6 + $0x3d8] sm:$0xff] }
 0x26d   : > { %v4982_v37 = vmul.f32 %v9158_v41, %v2351_v52  ;;  %v2353_v34 = vadd.f32 %v2352_v3, %v1994_v42  ;;  %10853 = vst [vmem:[#allocation67_spill] sm:$0xff] %v9176_v1  ;;  %v1999_v39 = vpop.f32.mrf.mxu0  ;;  %v2358_v7 = vpop.f32.mrf.mxu1  ;;  %v10854_v8 = vld [vmem:[#allocation57_spill] sm:$0xff]  ;;  %3655 = vmatpush1.msra.mxu1 %v1021_v35 }
 0x26e   : > { %3067 = vmatmul.mubr.f32.gmra.mxu1 %v6084_v5  ;;  %2708 = vmatmul.mubr.f32.gmra.mxu0 %v6085_v32  ;;  %5393 = vst [vmem:[%s8990_s20 + $0x1a8] sm:$0xff] %v5197_v6  ;;  %v2357_v52 = vadd.f32 %v2356_v36, %v1998_v46  ;;  %v2000_v42 = vadd.f32 %v1999_v39, %v10854_v8  ;;  %v890_v32 = vld [vmem:[#allocation5 + $0x8b8] sm:$0xff]  ;;  %v4848_v6 = vmax.f32 %v4575_v26, 1e-24  ;;  %v9186_v63 = vpop.eup %5771  ;;  %v4584_v39 = vpop.xlane.xlu1 %4583  ;;  %v6088_v8 = vld [vmem:[%s6730_s6 + $0x3c0] sm:$0xff] }
 0x26f   : > { %v5200_v30 = vadd.f32 %v8970_v57, %v4982_v37  ;;  %v4983_v3 = vmul.f32 %v9158_v41, %v2353_v34  ;;  %2713 = vmatprep.mubr.f32.mxu0 %v6086_v9  ;;  %3072 = vmatprep.mubr.f32.mxu1 %v6087_v28  ;;  %v2003_v31 = vpop.f32.mrf.mxu0  ;;  %v2362_v5 = vpop.f32.mrf.mxu1  ;;  %10855 = vst [vmem:[#allocation86_spill] sm:$0xff] %v9186_v63  ;;  %v10856_v34 = vld [vmem:[#allocation12_spill] sm:$0xff]  ;;  %v889_v28 = vld [vmem:[#allocation5 + $0x8b0] sm:$0xff] }
 0x270   : > { %v4986_v37 = vmul.f32 %v9176_v1, %v2357_v52  ;;  %v2359_v58 = vadd.f32 %v2358_v7, %v2000_v42  ;;  %v2004_v46 = vadd.f32 %v2003_v31, %v10856_v34  ;;  %v10857_v52 = vld [vmem:[#allocation62_spill] sm:$0xff]  ;;  %3297 = vmatprep.subr.mxu0 %v890_v32  ;;  %v6090_v31 = vld [vmem:[%s6730_s6 + $0x408] sm:$0xff]  ;;  %5779 = vrsqrt.f32 %v4848_v6  ;;  %v6093_v6 = vld [vmem:[%s6730_s6 + $0x400] sm:$0xff] }
 0x271   : > { %5396 = vst [vmem:[%s8990_s20 + $0x1c0] sm:$0xff] %v5200_v30  ;;  %v5201_v36 = vadd.f32 %v8973_v0, %v4983_v3  ;;  %v2005_v26 = vpop.f32.mrf.mxu0  ;;  %v2364_v9 = vpop.f32.mrf.mxu1  ;;  %v1018_v30 = vld [vmem:[#allocation5 + $0xcb8] sm:$0xff]  ;;  %v1017_v41 = vld [vmem:[#allocation5 + $0xcb0] sm:$0xff]  ;;  %3298 = vmatpush1.msra.mxu0 %v889_v28 }
 0x272   : > { %2714 = vmatmul.mubr.f32.gmra.mxu0 %v6088_v8  ;;  %3073 = vmatmul.mubr.f32.gmra.mxu1 %v6089_v22  ;;  %v5204_v3 = vadd.f32 %v8970_v57, %v4986_v37  ;;  %v4987_v7 = vmul.f32 %v9176_v1, %v2359_v58  ;;  %v2363_v35 = vadd.f32 %v2362_v5, %v2004_v46  ;;  %v6091_v34 = vld [vmem:[%s6730_s6 + $0x418] sm:$0xff]  ;;  %v4849_v5 = vmax.f32 %v4584_v39, 1e-24  ;;  %v4593_v46 = vpop.xlane.xlu0 %4592 }
 0x273   : > { %5397 = vst [vmem:[%s8990_s20 + $0x1c8] sm:$0xff] %v5201_v36  ;;  %v2006_v42 = vadd.f32 %v2005_v26, %v10857_v52  ;;  %2719 = vmatprep.mubr.f32.mxu0 %v6090_v31  ;;  %3078 = vmatprep.mubr.f32.mxu1 %v6091_v34  ;;  %v2368_v8 = vpop.f32.mrf.mxu1  ;;  %v2009_v22 = vpop.f32.mrf.mxu0  ;;  %v886_v32 = vld [vmem:[#allocation5 + $0x898] sm:$0xff]  ;;  %v6092_v26 = vld [vmem:[%s6730_s6 + $0x410] sm:$0xff]  ;;  %v10858_v52 = vld [vmem:[#allocation68_spill] sm:$0xff]  ;;  %v4850_v12 = vmax.f32 %v4593_v46, 1e-24 }
 0x274   : > { %5400 = vst [vmem:[%s8990_s20 + $0x1e0] sm:$0xff] %v5204_v3  ;;  %v5205_v36 = vadd.f32 %v8973_v0, %v4987_v7  ;;  %v4990_v37 = vmul.f32 %v9186_v63, %v2363_v35  ;;  %3656 = vmatprep.subr.mxu1 %v1018_v30  ;;  %v2010_v31 = vadd.f32 %v2009_v22, %v10858_v52  ;;  %v885_v7 = vld [vmem:[#allocation5 + $0x890] sm:$0xff]  ;;  %v1014_v1 = vld [vmem:[#allocation5 + $0xc98] sm:$0xff]  ;;  %v9206_v35 = vpop.eup %5773  ;;  %5781 = vrsqrt.f32 %v4849_v5 }
 0x275   : > { %v2365_v58 = vadd.f32 %v2364_v9, %v2006_v42  ;;  %v2011_v3 = vpop.f32.mrf.mxu0  ;;  %v2370_v34 = vpop.f32.mrf.mxu1  ;;  %10859 = vst [vmem:[#allocation91_spill] sm:$0xff] %v9206_v35  ;;  %3657 = vmatpush1.msra.mxu1 %v1017_v41  ;;  %v10860_v28 = vld [vmem:[#allocation14_spill] sm:$0xff]  ;;  %v6094_v42 = vld [vmem:[%s6730_s6 + $0x448] sm:$0xff]  ;;  %3299 = vmatprep.subr.mxu0 %v886_v32  ;;  %v6096_v32 = vld [vmem:[%s6730_s6 + $0x440] sm:$0xff]  ;;  %5783 = vrsqrt.f32 %v4850_v12 }
 0x276   : > { %3079 = vmatmul.mubr.f32.gmra.mxu1 %v6092_v26  ;;  %2720 = vmatmul.mubr.f32.gmra.mxu0 %v6093_v6  ;;  %5401 = vst [vmem:[%s8990_s20 + $0x1e8] sm:$0xff] %v5205_v36  ;;  %v5208_v39 = vadd.f32 %v8970_v57, %v4990_v37  ;;  %v2012_v30 = vadd.f32 %v2011_v3, %v10860_v28  ;;  %v6095_v26 = vld [vmem:[%s6730_s6 + $0x458] sm:$0xff]  ;;  %v9214_v25 = vpop.eup %5775  ;;  %v10862_v37 = vld [vmem:[#allocation69_spill] sm:$0xff]  ;;  %v6101_v12 = vld [vmem:[%s6730_s6 + $0x480] sm:$0xff] }
 0x277   : > { %v4991_v9 = vmul.f32 %v9186_v63, %v2365_v58  ;;  %2725 = vmatprep.mubr.f32.mxu0 %v6094_v42  ;;  %v2369_v22 = vadd.f32 %v2368_v8, %v2010_v31  ;;  %3084 = vmatprep.mubr.f32.mxu1 %v6095_v26  ;;  %v2015_v52 = vpop.f32.mrf.mxu0  ;;  %v2374_v6 = vpop.f32.mrf.mxu1  ;;  %10861 = vst [vmem:[#allocation93_spill] sm:$0xff] %v9214_v25  ;;  %v1013_v8 = vld [vmem:[#allocation5 + $0xc90] sm:$0xff]  ;;  %v882_v31 = vld [vmem:[#allocation5 + $0x878] sm:$0xff]  ;;  %v6098_v42 = vld [vmem:[%s6730_s6 + $0x488] sm:$0xff] }
 0x278   : > { %5404 = vst [vmem:[%s8990_s20 + $0x200] sm:$0xff] %v5208_v39  ;;  %v2371_v41 = vadd.f32 %v2370_v34, %v2012_v30  ;;  %v2016_v58 = vadd.f32 %v2015_v52, %v10862_v37  ;;  %3300 = vmatpush1.msra.mxu0 %v885_v7  ;;  %3658 = vmatprep.subr.mxu1 %v1014_v1  ;;  %v6097_v46 = vld [vmem:[%s6730_s6 + $0x450] sm:$0xff]  ;;  %v6099_v1 = vld [vmem:[%s6730_s6 + $0x498] sm:$0xff]  ;;  %v4602_v26 = vpop.xlane.xlu1 %4601 }
 0x279   : > { %v5209_v36 = vadd.f32 %v8973_v0, %v4991_v9  ;;  %v4994_v3 = vmul.f32 %v9206_v35, %v2369_v22  ;;  %v2017_v39 = vpop.f32.mrf.mxu0  ;;  %v2376_v28 = vpop.f32.mrf.mxu1  ;;  %v881_v9 = vld [vmem:[#allocation5 + $0x870] sm:$0xff]  ;;  %3659 = vmatpush1.msra.mxu1 %v1013_v8  ;;  %3301 = vmatprep.subr.mxu0 %v882_v31 }
 0x27a   : > { %2726 = vmatmul.mubr.f32.gmra.mxu0 %v6096_v32  ;;  %3085 = vmatmul.mubr.f32.gmra.mxu1 %v6097_v46  ;;  %v4995_v5 = vmul.f32 %v9206_v35, %v2371_v41  ;;  %v2375_v34 = vadd.f32 %v2374_v6, %v2016_v58  ;;  %v10863_v30 = vld [vmem:[#allocation70_spill] sm:$0xff]  ;;  %v10865_v32 = vld [vmem:[#allocation15_spill] sm:$0xff] }
 0x27b   : > { %5405 = vst [vmem:[%s8990_s20 + $0x208] sm:$0xff] %v5209_v36  ;;  %v2018_v7 = vadd.f32 %v2017_v39, %v10863_v30  ;;  %2731 = vmatprep.mubr.f32.mxu0 %v6098_v42  ;;  %3090 = vmatprep.mubr.f32.mxu1 %v6099_v1  ;;  %v5212_v22 = vadd.f32 %v8970_v57, %v4994_v3  ;;  %v2380_v52 = vpop.f32.mrf.mxu1  ;;  %v2021_v37 = vpop.f32.mrf.mxu0  ;;  %v1010_v39 = vld [vmem:[#allocation5 + $0xc78] sm:$0xff]  ;;  %v6100_v8 = vld [vmem:[%s6730_s6 + $0x490] sm:$0xff]  ;;  %v4851_v42 = vmax.f32 %v4602_v26, 1e-24 }
 0x27c   : > { %v9228_v36 = vpop.eup %5777  ;;  %v5213_v6 = vadd.f32 %v8973_v0, %v4995_v5  ;;  %v4998_v41 = vmul.f32 %v9214_v25, %v2375_v34  ;;  %v2022_v46 = vadd.f32 %v2021_v37, %v10865_v32  ;;  %3302 = vmatpush1.msra.mxu0 %v881_v9  ;;  %v4611_v3 = vpop.xlane.xlu0 %4610  ;;  %v1009_v5 = vld [vmem:[#allocation5 + $0xc70] sm:$0xff]  ;;  %v6102_v37 = vld [vmem:[%s6730_s6 + $0x4c8] sm:$0xff]  ;;  %3660 = vmatprep.subr.mxu1 %v1010_v39 }
 0x27d   : > { %10864 = vst [vmem:[#allocation95_spill] sm:$0xff] %v9228_v36  ;;  %v2377_v58 = vadd.f32 %v2376_v28, %v2018_v7  ;;  %5408 = vst [vmem:[%s8990_s20 + $0x220] sm:$0xff] %v5212_v22  ;;  %v2023_v31 = vpop.f32.mrf.mxu0  ;;  %v2382_v30 = vpop.f32.mrf.mxu1  ;;  %v10866_v7 = vld [vmem:[#allocation17_spill] sm:$0xff]  ;;  %v6103_v22 = vld [vmem:[%s6730_s6 + $0x4d8] sm:$0xff]  ;;  %v4852_v26 = vmax.f32 %v4611_v3, 1e-24  ;;  %3661 = vmatpush1.msra.mxu1 %v1009_v5  ;;  %5785 = vrsqrt.f32 %v4851_v42 }
 0x27e   : > { %3091 = vmatmul.mubr.f32.gmra.mxu1 %v6100_v8  ;;  %2732 = vmatmul.mubr.f32.gmra.mxu0 %v6101_v12  ;;  %5409 = vst [vmem:[%s8990_s20 + $0x228] sm:$0xff] %v5213_v6  ;;  %v5216_v28 = vadd.f32 %v8970_v57, %v4998_v41  ;;  %v2381_v9 = vadd.f32 %v2380_v52, %v2022_v46  ;;  %v9242_v12 = vpop.eup %5779  ;;  %v6105_v39 = vld [vmem:[%s6730_s6 + $0x4d0] sm:$0xff]  ;;  %v10869_v5 = vld [vmem:[#allocation75_spill] sm:$0xff] }
 0x27f   : > { %v4999_v34 = vmul.f32 %v9214_v25, %v2377_v58  ;;  %v2024_v1 = vadd.f32 %v2023_v31, %v10866_v7  ;;  %2737 = vmatprep.mubr.f32.mxu0 %v6102_v37  ;;  %3096 = vmatprep.mubr.f32.mxu1 %v6103_v22  ;;  %v2027_v32 = vpop.f32.mrf.mxu0  ;;  %v2386_v8 = vpop.f32.mrf.mxu1  ;;  %10867 = vst [vmem:[#allocation97_spill] sm:$0xff] %v9242_v12  ;;  %v10868_v58 = vld [vmem:[#allocation74_spill] sm:$0xff]  ;;  %v6104_v37 = vld [vmem:[%s6730_s6 + $0x4c0] sm:$0xff]  ;;  %5787 = vrsqrt.f32 %v4852_v26 }
 0x280   : > { %5412 = vst [vmem:[%s8990_s20 + $0x240] sm:$0xff] %v5216_v28  ;;  %v5002_v52 = vmul.f32 %v9228_v36, %v2381_v9  ;;  %v2028_v46 = vadd.f32 %v2027_v32, %v10868_v58  ;;  %v878_v31 = vld [vmem:[#allocation5 + $0x858] sm:$0xff]  ;;  %v4620_v7 = vpop.xlane.xlu1 %4619  ;;  %v877_v22 = vld [vmem:[#allocation5 + $0x850] sm:$0xff]  ;;  %v6106_v32 = vld [vmem:[%s6730_s6 + $0x508] sm:$0xff] }
 0x281   : > { %v5217_v6 = vadd.f32 %v8973_v0, %v4999_v34  ;;  %v2383_v41 = vadd.f32 %v2382_v30, %v2024_v1  ;;  %v2029_v3 = vpop.f32.mrf.mxu0  ;;  %v2388_v28 = vpop.f32.mrf.mxu1  ;;  %v6107_v58 = vld [vmem:[%s6730_s6 + $0x518] sm:$0xff]  ;;  %3303 = vmatprep.subr.mxu0 %v878_v31  ;;  %v4853_v25 = vmax.f32 %v4620_v7, 1e-24  ;;  %v6108_v26 = vld [vmem:[%s6730_s6 + $0x510] sm:$0xff]  ;;  %v6109_v31 = vld [vmem:[%s6730_s6 + $0x500] sm:$0xff] }
 0x282   : > { %2738 = vmatmul.mubr.f32.gmra.mxu0 %v6104_v37  ;;  %3097 = vmatmul.mubr.f32.gmra.mxu1 %v6105_v39  ;;  %v5220_v34 = vadd.f32 %v8970_v57, %v5002_v52  ;;  %v2387_v9 = vadd.f32 %v2386_v8, %v2028_v46  ;;  %v2030_v1 = vadd.f32 %v2029_v3, %v10869_v5  ;;  %v1006_v39 = vld [vmem:[#allocation5 + $0xc58] sm:$0xff]  ;;  %v4629_v3 = vpop.xlane.xlu0 %4628  ;;  %v9260_v5 = vpop.eup %5781 }
 0x283   : > { %5413 = vst [vmem:[%s8990_s20 + $0x248] sm:$0xff] %v5217_v6  ;;  %v5003_v30 = vmul.f32 %v9228_v36, %v2383_v41  ;;  %2743 = vmatprep.mubr.f32.mxu0 %v6106_v32  ;;  %3102 = vmatprep.mubr.f32.mxu1 %v6107_v58  ;;  %v2392_v42 = vpop.f32.mrf.mxu1  ;;  %v2033_v37 = vpop.f32.mrf.mxu0  ;;  %v10870_v41 = vld [vmem:[#allocation77_spill] sm:$0xff]  ;;  %10871 = vst [vmem:[#allocation40_spill] sm:$0xff] %v9260_v5  ;;  %5789 = vrsqrt.f32 %v4853_v25 }
 0x284   : > { %5416 = vst [vmem:[%s8990_s20 + $0x260] sm:$0xff] %v5220_v34  ;;  %v5006_v8 = vmul.f32 %v9242_v12, %v2387_v9  ;;  %v2389_v52 = vadd.f32 %v2388_v28, %v2030_v1  ;;  %v2034_v46 = vadd.f32 %v2033_v37, %v10870_v41  ;;  %3304 = vmatpush1.msra.mxu0 %v877_v22  ;;  %v1005_v34 = vld [vmem:[#allocation5 + $0xc50] sm:$0xff]  ;;  %v6110_v58 = vld [vmem:[%s6730_s6 + $0x548] sm:$0xff]  ;;  %v6111_v37 = vld [vmem:[%s6730_s6 + $0x558] sm:$0xff]  ;;  %v9270_v36 = vpop.eup %5783 }
 0x285   : > { %v5221_v6 = vadd.f32 %v8973_v0, %v5003_v30  ;;  %v2035_v7 = vpop.f32.mrf.mxu0  ;;  %v2394_v32 = vpop.f32.mrf.mxu1  ;;  %v10872_v22 = vld [vmem:[#allocation22_spill] sm:$0xff]  ;;  %3662 = vmatprep.subr.mxu1 %v1006_v39  ;;  %10873 = vst [vmem:[#allocation42_spill] sm:$0xff] %v9270_v36 }
 0x286   : > { %3103 = vmatmul.mubr.f32.gmra.mxu1 %v6108_v26  ;;  %2744 = vmatmul.mubr.f32.gmra.mxu0 %v6109_v31  ;;  %v5224_v30 = vadd.f32 %v8970_v57, %v5006_v8  ;;  %v5007_v28 = vmul.f32 %v9242_v12, %v2389_v52  ;;  %v2393_v9 = vadd.f32 %v2392_v42, %v2034_v46  ;;  %v874_v31 = vld [vmem:[#allocation5 + $0x838] sm:$0xff]  ;;  %v6113_v25 = vld [vmem:[%s6730_s6 + $0x550] sm:$0xff] }
 0x287   : > { %5417 = vst [vmem:[%s8990_s20 + $0x268] sm:$0xff] %v5221_v6  ;;  %v2036_v1 = vadd.f32 %v2035_v7, %v10872_v22  ;;  %2749 = vmatprep.mubr.f32.mxu0 %v6110_v58  ;;  %3108 = vmatprep.mubr.f32.mxu1 %v6111_v37  ;;  %v2039_v41 = vpop.f32.mrf.mxu0  ;;  %v2398_v26 = vpop.f32.mrf.mxu1  ;;  %v4854_v6 = vmax.f32 %v4629_v3, 1e-24  ;;  %v10874_v52 = vld [vmem:[#allocation78_spill] sm:$0xff]  ;;  %v6112_v22 = vld [vmem:[%s6730_s6 + $0x540] sm:$0xff] }
 0x288   : > { %5420 = vst [vmem:[%s8990_s20 + $0x280] sm:$0xff] %v5224_v30  ;;  %v5225_v42 = vadd.f32 %v8973_v0, %v5007_v28  ;;  %v5010_v8 = vmul.f32 %v9260_v5, %v2393_v9  ;;  %3663 = vmatpush1.msra.mxu1 %v1005_v34  ;;  %v2040_v46 = vadd.f32 %v2039_v41, %v10874_v52  ;;  %v4638_v7 = vpop.xlane.xlu1 %4637  ;;  %v873_v37 = vld [vmem:[#allocation5 + $0x830] sm:$0xff]  ;;  %v1002_v30 = vld [vmem:[#allocation5 + $0xc38] sm:$0xff]  ;;  %v6114_v41 = vld [vmem:[%s6730_s6 + $0x588] sm:$0xff] }
 0x289   : > { %v2395_v39 = vadd.f32 %v2394_v32, %v2036_v1  ;;  %v2041_v3 = vpop.f32.mrf.mxu0  ;;  %v2400_v58 = vpop.f32.mrf.mxu1  ;;  %v10875_v9 = vld [vmem:[#allocation79_spill] sm:$0xff]  ;;  %3305 = vmatprep.subr.mxu0 %v874_v31  ;;  %5791 = vrsqrt.f32 %v4854_v6  ;;  %v1001_v12 = vld [vmem:[#allocation5 + $0xc30] sm:$0xff]  ;;  %3664 = vmatprep.subr.mxu1 %v1002_v30 }
 0x28a   : > { %2750 = vmatmul.mubr.f32.gmra.mxu0 %v6112_v22  ;;  %3109 = vmatmul.mubr.f32.gmra.mxu1 %v6113_v25  ;;  %5421 = vst [vmem:[%s8990_s20 + $0x288] sm:$0xff] %v5225_v42  ;;  %v5228_v28 = vadd.f32 %v8970_v57, %v5010_v8  ;;  %v2399_v34 = vadd.f32 %v2398_v26, %v2040_v46  ;;  %v6115_v52 = vld [vmem:[%s6730_s6 + $0x598] sm:$0xff]  ;;  %v4855_v26 = vmax.f32 %v4638_v7, 1e-24  ;;  %v4647_v46 = vpop.xlane.xlu0 %4646  ;;  %v6117_v6 = vld [vmem:[%s6730_s6 + $0x580] sm:$0xff] }
 0x28b   : > { %v5011_v32 = vmul.f32 %v9260_v5, %v2395_v39  ;;  %v2042_v1 = vadd.f32 %v2041_v3, %v10875_v9  ;;  %2755 = vmatprep.mubr.f32.mxu0 %v6114_v41  ;;  %3114 = vmatprep.mubr.f32.mxu1 %v6115_v52  ;;  %v2404_v22 = vpop.f32.mrf.mxu1  ;;  %v2045_v25 = vpop.f32.mrf.mxu0  ;;  %v870_v31 = vld [vmem:[#allocation5 + $0x818] sm:$0xff]  ;;  %v6116_v3 = vld [vmem:[%s6730_s6 + $0x590] sm:$0xff]  ;;  %v4856_v35 = vmax.f32 %v4647_v46, 1e-24  ;;  %v6120_v46 = vld [vmem:[%s6730_s6 + $0x5c0] sm:$0xff] }
 0x28c   : > { %5424 = vst [vmem:[%s8990_s20 + $0x2a0] sm:$0xff] %v5228_v28  ;;  %v5014_v8 = vmul.f32 %v9270_v36, %v2399_v34  ;;  %3306 = vmatpush1.msra.mxu0 %v873_v37  ;;  %v10876_v9 = vld [vmem:[#allocation26_spill] sm:$0xff]  ;;  %v9290_v34 = vpop.eup %5785  ;;  %3665 = vmatpush1.msra.mxu1 %v1001_v12  ;;  %v10878_v37 = vld [vmem:[#allocation27_spill] sm:$0xff]  ;;  %5793 = vrsqrt.f32 %v4855_v26  ;;  %v10880_v12 = vld [vmem:[#allocation29_spill] sm:$0xff] }
 0x28d   : > { %v5229_v42 = vadd.f32 %v8973_v0, %v5011_v32  ;;  %v2401_v39 = vadd.f32 %v2400_v58, %v2042_v1  ;;  %v2046_v41 = vadd.f32 %v2045_v25, %v10876_v9  ;;  %v2047_v28 = vpop.f32.mrf.mxu0  ;;  %v2406_v52 = vpop.f32.mrf.mxu1  ;;  %v869_v32 = vld [vmem:[#allocation5 + $0x810] sm:$0xff]  ;;  %v998_v5 = vld [vmem:[#allocation5 + $0xc18] sm:$0xff]  ;;  %10877 = vst [vmem:[#allocation72_spill] sm:$0xff] %v9290_v34  ;;  %v6118_v1 = vld [vmem:[%s6730_s6 + $0x5c8] sm:$0xff]  ;;  %3307 = vmatprep.subr.mxu0 %v870_v31  ;;  %5795 = vrsqrt.f32 %v4856_v35 }
 0x28e   : > { %3115 = vmatmul.mubr.f32.gmra.mxu1 %v6116_v3  ;;  %2756 = vmatmul.mubr.f32.gmra.mxu0 %v6117_v6  ;;  %v5232_v7 = vadd.f32 %v8970_v57, %v5014_v8  ;;  %v2048_v30 = vadd.f32 %v2047_v28, %v10878_v37  ;;  %v6119_v3 = vld [vmem:[%s6730_s6 + $0x5d8] sm:$0xff]  ;;  %v9298_v63 = vpop.eup %5787  ;;  %v4656_v28 = vpop.xlane.xlu1 %4655  ;;  %v6121_v37 = vld [vmem:[%s6730_s6 + $0x5d0] sm:$0xff] }
 0x28f   : > { %5425 = vst [vmem:[%s8990_s20 + $0x2a8] sm:$0xff] %v5229_v42  ;;  %v5015_v58 = vmul.f32 %v9270_v36, %v2401_v39  ;;  %2761 = vmatprep.mubr.f32.mxu0 %v6118_v1  ;;  %v2405_v25 = vadd.f32 %v2404_v22, %v2046_v41  ;;  %3120 = vmatprep.mubr.f32.mxu1 %v6119_v3  ;;  %v2051_v9 = vpop.f32.mrf.mxu0  ;;  %v2410_v6 = vpop.f32.mrf.mxu1  ;;  %10879 = vst [vmem:[#allocation99_spill] sm:$0xff] %v9298_v63  ;;  %v997_v22 = vld [vmem:[#allocation5 + $0xc10] sm:$0xff]  ;;  %v994_v41 = vld [vmem:[#allocation5 + $0xbf8] sm:$0xff] }
 0x290   : > { %5428 = vst [vmem:[%s8990_s20 + $0x2c0] sm:$0xff] %v5232_v7  ;;  %v2407_v8 = vadd.f32 %v2406_v52, %v2048_v30  ;;  %v2052_v39 = vadd.f32 %v2051_v9, %v10880_v12  ;;  %3308 = vmatpush1.msra.mxu0 %v869_v32  ;;  %3666 = vmatprep.subr.mxu1 %v998_v5  ;;  %v993_v52 = vld [vmem:[#allocation5 + $0xbf0] sm:$0xff]  ;;  %v10881_v32 = vld [vmem:[#allocation83_spill] sm:$0xff]  ;;  %v6122_v1 = vld [vmem:[%s6730_s6 + $0x608] sm:$0xff] }
 0x291   : > { %v5233_v42 = vadd.f32 %v8973_v0, %v5015_v58  ;;  %v5018_v31 = vmul.f32 %v9290_v34, %v2405_v25  ;;  %v2053_v7 = vpop.f32.mrf.mxu0  ;;  %v2412_v58 = vpop.f32.mrf.mxu1  ;;  %v6123_v3 = vld [vmem:[%s6730_s6 + $0x618] sm:$0xff]  ;;  %3667 = vmatpush1.msra.mxu1 %v997_v22  ;;  %3309 = vmatprep.subr.mxu0 %v994_v41  ;;  %v6124_v35 = vld [vmem:[%s6730_s6 + $0x610] sm:$0xff]  ;;  %v6125_v41 = vld [vmem:[%s6730_s6 + $0x600] sm:$0xff] }
 0x292   : > { %2762 = vmatmul.mubr.f32.gmra.mxu0 %v6120_v46  ;;  %3121 = vmatmul.mubr.f32.gmra.mxu1 %v6121_v37  ;;  %v5019_v26 = vmul.f32 %v9290_v34, %v2407_v8  ;;  %v2411_v30 = vadd.f32 %v2410_v6, %v2052_v39  ;;  %v2054_v5 = vadd.f32 %v2053_v7, %v10881_v32  ;;  %v9312_v46 = vpop.eup %5789  ;;  %v10883_v37 = vld [vmem:[#allocation85_spill] sm:$0xff]  ;;  %v4665_v22 = vpop.xlane.xlu0 %4664 }
 0x293   : > { %5429 = vst [vmem:[%s8990_s20 + $0x2c8] sm:$0xff] %v5233_v42  ;;  %2767 = vmatprep.mubr.f32.mxu0 %v6122_v1  ;;  %3126 = vmatprep.mubr.f32.mxu1 %v6123_v3  ;;  %v5236_v25 = vadd.f32 %v8970_v57, %v5018_v31  ;;  %v2416_v9 = vpop.f32.mrf.mxu1  ;;  %v2057_v12 = vpop.f32.mrf.mxu0  ;;  %v4857_v42 = vmax.f32 %v4656_v28, 1e-24  ;;  %10882 = vst [vmem:[#allocation76_spill] sm:$0xff] %v9312_v46  ;;  %v1122_v31 = vld [vmem:[#allocation5 + $0xff8] sm:$0xff]  ;;  %v1121_v1 = vld [vmem:[#allocation5 + $0xff0] sm:$0xff] }
 0x294   : > { %v5237_v6 = vadd.f32 %v8973_v0, %v5019_v26  ;;  %v5022_v8 = vmul.f32 %v9298_v63, %v2411_v30  ;;  %v2413_v39 = vadd.f32 %v2412_v58, %v2054_v5  ;;  %v2058_v7 = vadd.f32 %v2057_v12, %v10883_v37  ;;  %3310 = vmatpush2.msra.mxu0 %v993_v52  ;;  %v10884_v52 = vld [vmem:[#allocation87_spill] sm:$0xff]  ;;  %v6126_v3 = vld [vmem:[%s6730_s6 + $0x648] sm:$0xff]  ;;  %v1105_v34 = vld [vmem:[#allocation5 + $0xf70] sm:$0xff] }
 0x295   : > { %5432 = vst [vmem:[%s8990_s20 + $0x2e0] sm:$0xff] %v5236_v25  ;;  %v2059_v28 = vpop.f32.mrf.mxu0  ;;  %v2418_v32 = vpop.f32.mrf.mxu1  ;;  %v6127_v25 = vld [vmem:[%s6730_s6 + $0x658] sm:$0xff]  ;;  %5797 = vrsqrt.f32 %v4857_v42  ;;  %3668 = vmatprep.subr.mxu1 %v1122_v31  ;;  %v6128_v42 = vld [vmem:[%s6730_s6 + $0x640] sm:$0xff] }
 0x296   : > { %3127 = vmatmul.mubr.f32.gmra.mxu1 %v6124_v35  ;;  %2768 = vmatmul.mubr.f32.gmra.mxu0 %v6125_v41  ;;  %5433 = vst [vmem:[%s8990_s20 + $0x2e8] sm:$0xff] %v5237_v6  ;;  %v5240_v26 = vadd.f32 %v8970_v57, %v5022_v8  ;;  %v5023_v58 = vmul.f32 %v9298_v63, %v2413_v39  ;;  %v4858_v35 = vmax.f32 %v4665_v22, 1e-24  ;;  %v9326_v6 = vpop.eup %5791 }
 0x297   : > { %v2417_v30 = vadd.f32 %v2416_v9, %v2058_v7  ;;  %v2060_v5 = vadd.f32 %v2059_v28, %v10884_v52  ;;  %2773 = vmatprep.mubr.f32.mxu0 %v6126_v3  ;;  %3132 = vmatprep.mubr.f32.mxu1 %v6127_v25  ;;  %v2063_v12 = vpop.f32.mrf.mxu0  ;;  %v2422_v37 = vpop.f32.mrf.mxu1  ;;  %10885 = vst [vmem:[#allocation100_spill] sm:$0xff] %v9326_v6  ;;  %v10886_v7 = vld [vmem:[#allocation88_spill] sm:$0xff]  ;;  %v990_v28 = vld [vmem:[#allocation5 + $0xbd8] sm:$0xff]  ;;  %v6129_v52 = vld [vmem:[%s6730_s6 + $0x650] sm:$0xff] }
 0x298   : > { %5436 = vst [vmem:[%s8990_s20 + $0x300] sm:$0xff] %v5240_v26  ;;  %v5241_v8 = vadd.f32 %v8973_v0, %v5023_v58  ;;  %v2064_v41 = vadd.f32 %v2063_v12, %v10886_v7  ;;  %3669 = vmatpush2.msra.mxu1 %v1121_v1  ;;  %v989_v3 = vld [vmem:[#allocation5 + $0xbd0] sm:$0xff]  ;;  %v6130_v25 = vld [vmem:[%s6730_s6 + $0x688] sm:$0xff]  ;;  %v4674_v1 = vpop.xlane.xlu1 %4673  ;;  %v6131_v12 = vld [vmem:[%s6730_s6 + $0x698] sm:$0xff]  ;;  %5799 = vrsqrt.f32 %v4858_v35  ;;  %3311 = vmatprep.subr.mxu0 %v990_v28 }
 0x299   : > { %v5026_v9 = vmul.f32 %v9312_v46, %v2417_v30  ;;  %v2419_v39 = vadd.f32 %v2418_v32, %v2060_v5  ;;  %v2065_v31 = vpop.f32.mrf.mxu0  ;;  %v2424_v22 = vpop.f32.mrf.mxu1  ;;  %v10887_v30 = vld [vmem:[#allocation89_spill] sm:$0xff]  ;;  %3312 = vmatpush2.msra.mxu0 %v989_v3  ;;  %v6133_v35 = vld [vmem:[%s6730_s6 + $0x680] sm:$0xff] }
 0x29a   : > { %2774 = vmatmul.mubr.f32.gmra.mxu0 %v6128_v42  ;;  %3133 = vmatmul.mubr.f32.gmra.mxu1 %v6129_v52  ;;  %5437 = vst [vmem:[%s8990_s20 + $0x308] sm:$0xff] %v5241_v8  ;;  %v2423_v32 = vadd.f32 %v2422_v37, %v2064_v41  ;;  %v2066_v5 = vadd.f32 %v2065_v31, %v10887_v30  ;;  %v1118_v52 = vld [vmem:[#allocation5 + $0xfd8] sm:$0xff]  ;;  %v4683_v31 = vpop.xlane.xlu0 %4682  ;;  %v9344_v30 = vpop.eup %5793 }
 0x29b   : > { %v5244_v26 = vadd.f32 %v8970_v57, %v5026_v9  ;;  %v5027_v58 = vmul.f32 %v9312_v46, %v2419_v39  ;;  %2779 = vmatprep.mubr.f32.mxu0 %v6130_v25  ;;  %3138 = vmatprep.mubr.f32.mxu1 %v6131_v12  ;;  %v2428_v7 = vpop.f32.mrf.mxu1  ;;  %v2069_v42 = vpop.f32.mrf.mxu0  ;;  %v10888_v39 = vld [vmem:[#allocation90_spill] sm:$0xff]  ;;  %10889 = vst [vmem:[#allocation102_spill] sm:$0xff] %v9344_v30 }
 0x29c   : > { %v5030_v9 = vmul.f32 %v9326_v6, %v2423_v32  ;;  %v2425_v37 = vadd.f32 %v2424_v22, %v2066_v5  ;;  %v2070_v41 = vadd.f32 %v2069_v42, %v10888_v39  ;;  %v6132_v25 = vld [vmem:[%s6730_s6 + $0x690] sm:$0xff]  ;;  %v10890_v5 = vld [vmem:[#allocation92_spill] sm:$0xff]  ;;  %v6135_v46 = vld [vmem:[%s6730_s6 + $0x6d8] sm:$0xff]  ;;  %3670 = vmatprep.subr.mxu1 %v1118_v52  ;;  %v9354_v63 = vpop.eup %5795 }
 0x29d   : > { %5440 = vst [vmem:[%s8990_s20 + $0x320] sm:$0xff] %v5244_v26  ;;  %v5245_v8 = vadd.f32 %v8973_v0, %v5027_v58  ;;  %v2071_v28 = vpop.f32.mrf.mxu0  ;;  %v2430_v26 = vpop.f32.mrf.mxu1  ;;  %v4859_v58 = vmax.f32 %v4674_v1, 1e-24  ;;  %v1117_v12 = vld [vmem:[#allocation5 + $0xfd0] sm:$0xff]  ;;  %v6134_v39 = vld [vmem:[%s6730_s6 + $0x6c8] sm:$0xff]  ;;  %10891 = vst [vmem:[#allocation104_spill] sm:$0xff] %v9354_v63 }
 0x29e   : > { %3139 = vmatmul.mubr.f32.gmra.mxu1 %v6132_v25  ;;  %2780 = vmatmul.mubr.f32.gmra.mxu0 %v6133_v35  ;;  %v5248_v22 = vadd.f32 %v8970_v57, %v5030_v9  ;;  %v5031_v3 = vmul.f32 %v9326_v6, %v2425_v37  ;;  %v2429_v32 = vadd.f32 %v2428_v7, %v2070_v41  ;;  %v4860_v1 = vmax.f32 %v4683_v31, 1e-24  ;;  %v10892_v37 = vld [vmem:[#allocation37_spill] sm:$0xff]  ;;  %v6136_v52 = vld [vmem:[%s6730_s6 + $0x6c0] sm:$0xff] }
 0x29f   : > { %5441 = vst [vmem:[%s8990_s20 + $0x328] sm:$0xff] %v5245_v8  ;;  %v2072_v42 = vadd.f32 %v2071_v28, %v10890_v5  ;;  %2785 = vmatprep.mubr.f32.mxu0 %v6134_v39  ;;  %3144 = vmatprep.mubr.f32.mxu1 %v6135_v46  ;;  %v2075_v25 = vpop.f32.mrf.mxu0  ;;  %v2434_v35 = vpop.f32.mrf.mxu1  ;;  %v986_v28 = vld [vmem:[#allocation5 + $0xbb8] sm:$0xff]  ;;  %5801 = vrsqrt.f32 %v4859_v58  ;;  %v6137_v31 = vld [vmem:[%s6730_s6 + $0x6d0] sm:$0xff] }
 0x2a0   : > { %5444 = vst [vmem:[%s8990_s20 + $0x340] sm:$0xff] %v5248_v22  ;;  %v5249_v8 = vadd.f32 %v8973_v0, %v5031_v3  ;;  %v5034_v7 = vmul.f32 %v9344_v30, %v2429_v32  ;;  %v2076_v41 = vadd.f32 %v2075_v25, %v10892_v37  ;;  %3671 = vmatpush2.msra.mxu1 %v1117_v12  ;;  %v4692_v46 = vpop.xlane.xlu1 %4691  ;;  %v985_v39 = vld [vmem:[#allocation5 + $0xbb0] sm:$0xff]  ;;  %v6138_v25 = vld [vmem:[%s6730_s6 + $0x708] sm:$0xff]  ;;  %v6139_v37 = vld [vmem:[%s6730_s6 + $0x718] sm:$0xff]  ;;  %5803 = vrsqrt.f32 %v4860_v1 }
 0x2a1   : > { %v2431_v9 = vadd.f32 %v2430_v26, %v2072_v42  ;;  %v2077_v5 = vpop.f32.mrf.mxu0  ;;  %v2436_v22 = vpop.f32.mrf.mxu1  ;;  %v10893_v12 = vld [vmem:[#allocation94_spill] sm:$0xff]  ;;  %3313 = vmatprep.subr.mxu0 %v986_v28  ;;  %v6141_v1 = vld [vmem:[%s6730_s6 + $0x700] sm:$0xff] }
 0x2a2   : > { %2786 = vmatmul.mubr.f32.gmra.mxu0 %v6136_v52  ;;  %3145 = vmatmul.mubr.f32.gmra.mxu1 %v6137_v31  ;;  %5445 = vst [vmem:[%s8990_s20 + $0x348] sm:$0xff] %v5249_v8  ;;  %v5252_v3 = vadd.f32 %v8970_v57, %v5034_v7  ;;  %v2435_v32 = vadd.f32 %v2434_v35, %v2076_v41  ;;  %v1114_v31 = vld [vmem:[#allocation5 + $0xfb8] sm:$0xff]  ;;  %v4861_v8 = vmax.f32 %v4692_v46, 1e-24  ;;  %v9368_v6 = vpop.eup %5797  ;;  %v10895_v41 = vld [vmem:[#allocation96_spill] sm:$0xff]  ;;  %v1113_v28 = vld [vmem:[#allocation5 + $0xfb0] sm:$0xff] }
 0x2a3   : > { %v5035_v26 = vmul.f32 %v9344_v30, %v2431_v9  ;;  %v2078_v42 = vadd.f32 %v2077_v5, %v10893_v12  ;;  %2791 = vmatprep.mubr.f32.mxu0 %v6138_v25  ;;  %3150 = vmatprep.mubr.f32.mxu1 %v6139_v37  ;;  %v2440_v58 = vpop.f32.mrf.mxu1  ;;  %v2081_v52 = vpop.f32.mrf.mxu0  ;;  %10894 = vst [vmem:[#allocation59_spill] sm:$0xff] %v9368_v6  ;;  %v6140_v25 = vld [vmem:[%s6730_s6 + $0x710] sm:$0xff] }
 0x2a4   : > { %5448 = vst [vmem:[%s8990_s20 + $0x360] sm:$0xff] %v5252_v3  ;;  %v5038_v7 = vmul.f32 %v9354_v63, %v2435_v32  ;;  %v2082_v5 = vadd.f32 %v2081_v52, %v10895_v41  ;;  %3314 = vmatpush2.msra.mxu0 %v985_v39  ;;  %v4701_v12 = vpop.xlane.xlu0 %4700  ;;  %3672 = vmatprep.subr.mxu1 %v1114_v31  ;;  %5805 = vrsqrt.f32 %v4861_v8  ;;  %v4710_v8 = vpop.xlane.xlu1 %4709 }
 0x2a5   : > { %v5253_v35 = vadd.f32 %v8973_v0, %v5035_v26  ;;  %v2437_v9 = vadd.f32 %v2436_v22, %v2078_v42  ;;  %v2083_v46 = vpop.f32.mrf.mxu0  ;;  %v2442_v37 = vpop.f32.mrf.mxu1  ;;  %v10896_v22 = vld [vmem:[#allocation98_spill] sm:$0xff]  ;;  %3673 = vmatpush2.msra.mxu1 %v1113_v28  ;;  %v6142_v42 = vld [vmem:[%s6730_s6 + $0x748] sm:$0xff] }
 0x2a6   : > { %3151 = vmatmul.mubr.f32.gmra.mxu1 %v6140_v25  ;;  %2792 = vmatmul.mubr.f32.gmra.mxu0 %v6141_v1  ;;  %v5256_v3 = vadd.f32 %v8970_v57, %v5038_v7  ;;  %v2441_v32 = vadd.f32 %v2440_v58, %v2082_v5  ;;  %v2084_v39 = vadd.f32 %v2083_v46, %v10896_v22  ;;  %v982_v25 = vld [vmem:[#allocation5 + $0xb98] sm:$0xff]  ;;  %v4862_v1 = vmax.f32 %v4701_v12, 1e-24  ;;  %v981_v46 = vld [vmem:[#allocation5 + $0xb90] sm:$0xff]  ;;  %v6144_v22 = vld [vmem:[%s6730_s6 + $0x740] sm:$0xff] }
 0x2a7   : > { %5449 = vst [vmem:[%s8990_s20 + $0x368] sm:$0xff] %v5253_v35  ;;  %v5039_v26 = vmul.f32 %v9354_v63, %v2437_v9  ;;  %2797 = vmatprep.mubr.f32.mxu0 %v6142_v42  ;;  %v2087_v52 = vpop.f32.mrf.mxu0  ;;  %v2446_v41 = vpop.f32.mrf.mxu1  ;;  %v6143_v9 = vld [vmem:[%s6730_s6 + $0x758] sm:$0xff]  ;;  %v6145_v42 = vld [vmem:[%s6730_s6 + $0x750] sm:$0xff]  ;;  %3315 = vmatprep.subr.mxu0 %v982_v25  ;;  %v4863_v25 = vmax.f32 %v4710_v8, 1e-24 }
 0x2a8   : > { %v9381_v35 = vpop.eup %5799  ;;  %5452 = vst [vmem:[%s8990_s20 + $0x380] sm:$0xff] %v5256_v3  ;;  %v5042_v31 = vmul.f32 %v9368_v6, %v2441_v32  ;;  %v2443_v7 = vadd.f32 %v2442_v37, %v2084_v39  ;;  %3156 = vmatprep.mubr.f32.mxu1 %v6143_v9  ;;  %v10898_v5 = vld [vmem:[#allocation71_spill] sm:$0xff]  ;;  %v10899_v39 = vld [vmem:[#allocation45_spill] sm:$0xff]  ;;  %3316 = vmatpush2.msra.mxu0 %v981_v46  ;;  %5807 = vrsqrt.f32 %v4862_v1 }
 0x2a9   : > { %10897 = vst [vmem:[#allocation13_spill] sm:$0xff] %v9381_v35  ;;  %v5257_v58 = vadd.f32 %v8973_v0, %v5039_v26  ;;  %v2088_v28 = vadd.f32 %v2087_v52, %v10898_v5  ;;  %v2089_v12 = vpop.f32.mrf.mxu0  ;;  %v2448_v3 = vpop.f32.mrf.mxu1  ;;  %v1110_v63 = vld [vmem:[#allocation5 + $0xf98] sm:$0xff]  ;;  %v6146_v9 = vld [vmem:[%s6730_s6 + $0x788] sm:$0xff]  ;;  %v6148_v46 = vld [vmem:[%s6730_s6 + $0x790] sm:$0xff]  ;;  %5809 = vrsqrt.f32 %v4863_v25 }
 0x2aa   : > { %2798 = vmatmul.mubr.f32.gmra.mxu0 %v6144_v22  ;;  %3157 = vmatmul.mubr.f32.gmra.mxu1 %v6145_v42  ;;  %v5260_v26 = vadd.f32 %v8970_v57, %v5042_v31  ;;  %v5043_v37 = vmul.f32 %v9368_v6, %v2443_v7  ;;  %v2090_v52 = vadd.f32 %v2089_v12, %v10899_v39  ;;  %v1109_v22 = vld [vmem:[#allocation5 + $0xf90] sm:$0xff]  ;;  %v6147_v7 = vld [vmem:[%s6730_s6 + $0x798] sm:$0xff]  ;;  %v6149_v1 = vld [vmem:[%s6730_s6 + $0x780] sm:$0xff] }
 0x2ab   : > { %5453 = vst [vmem:[%s8990_s20 + $0x388] sm:$0xff] %v5257_v58  ;;  %v2447_v32 = vadd.f32 %v2446_v41, %v2088_v28  ;;  %2803 = vmatprep.mubr.f32.mxu0 %v6146_v9  ;;  %v2452_v5 = vpop.f32.mrf.mxu1  ;;  %v2093_v42 = vpop.f32.mrf.mxu0  ;;  %3162 = vmatprep.mubr.f32.mxu1 %v6147_v7  ;;  %v978_v41 = vld [vmem:[#allocation5 + $0xb78] sm:$0xff]  ;;  %v10900_v12 = vld [vmem:[#allocation73_spill] sm:$0xff] }
 0x2ac   : > { %5456 = vst [vmem:[%s8990_s20 + $0x3a0] sm:$0xff] %v5260_v26  ;;  %v5261_v58 = vadd.f32 %v8973_v0, %v5043_v37  ;;  %v2449_v30 = vadd.f32 %v2448_v3, %v2090_v52  ;;  %3674 = vmatprep.subr.mxu1 %v1110_v63  ;;  %v4719_v28 = vpop.xlane.xlu0 %4718  ;;  %v2094_v39 = vadd.f32 %v2093_v42, %v10900_v12  ;;  %v977_v9 = vld [vmem:[#allocation5 + $0xb70] sm:$0xff]  ;;  %v9402_v3 = vpop.eup %5801  ;;  %v6151_v12 = vld [vmem:[%s6730_s6 + $0x7d8] sm:$0xff] }
 0x2ad   : > { %v5046_v31 = vmul.f32 %v9381_v35, %v2447_v32  ;;  %v2095_v26 = vpop.f32.mrf.mxu0  ;;  %v2454_v37 = vpop.f32.mrf.mxu1  ;;  %v1106_v32 = vld [vmem:[#allocation5 + $0xf78] sm:$0xff]  ;;  %10901 = vst [vmem:[#allocation16_spill] sm:$0xff] %v9402_v3  ;;  %3675 = vmatpush2.msra.mxu1 %v1109_v22  ;;  %v10902_v52 = vld [vmem:[#allocation101_spill] sm:$0xff]  ;;  %3317 = vmatprep.subr.mxu0 %v978_v41 }
 0x2ae   : > { %3163 = vmatmul.mubr.f32.gmra.mxu1 %v6148_v46  ;;  %2804 = vmatmul.mubr.f32.gmra.mxu0 %v6149_v1  ;;  %5457 = vst [vmem:[%s8990_s20 + $0x3a8] sm:$0xff] %v5261_v58  ;;  %v5047_v8 = vmul.f32 %v9381_v35, %v2449_v30  ;;  %v2096_v7 = vadd.f32 %v2095_v26, %v10902_v52  ;;  %v6150_v46 = vld [vmem:[%s6730_s6 + $0x7c8] sm:$0xff]  ;;  %v4864_v58 = vmax.f32 %v4719_v28, 1e-24  ;;  %v9410_v36 = vpop.eup %5803  ;;  %v6153_v28 = vld [vmem:[%s6730_s6 + $0x7d0] sm:$0xff]  ;;  %v6312_v35 = vld [vmem:[%s6730_s6 + $0x5a0] sm:$0xff] }
 0x2af   : > { %v5264_v63 = vadd.f32 %v8970_v57, %v5046_v31  ;;  %2809 = vmatprep.mubr.f32.mxu0 %v6150_v46  ;;  %v2453_v42 = vadd.f32 %v2452_v5, %v2094_v39  ;;  %3168 = vmatprep.mubr.f32.mxu1 %v6151_v12  ;;  %v2099_v1 = vpop.f32.mrf.mxu0  ;;  %10903 = vst [vmem:[#allocation18_spill] sm:$0xff] %v9410_v36  ;;  %v10904_v31 = vld [vmem:[#allocation48_spill] sm:$0xff]  ;;  %v974_v5 = vld [vmem:[#allocation5 + $0xb58] sm:$0xff]  ;;  %v973_v46 = vld [vmem:[#allocation5 + $0xb50] sm:$0xff] }
 0x2b0   : > { %v2458_v6 = vpop.f32.mrf.mxu1  ;;  %v5265_v30 = vadd.f32 %v8973_v0, %v5047_v8  ;;  %v2455_v22 = vadd.f32 %v2454_v37, %v2096_v7  ;;  %v2100_v26 = vadd.f32 %v2099_v1, %v10904_v31  ;;  %3318 = vmatpush2.msra.mxu0 %v977_v9  ;;  %3676 = vmatprep.subr.mxu1 %v1106_v32  ;;  %v6152_v39 = vld [vmem:[%s6730_s6 + $0x7c0] sm:$0xff]  ;;  %v10905_v8 = vld [vmem:[#allocation50_spill] sm:$0xff]  ;;  %v6154_v9 = vld [vmem:[%s6730_s6 + $0x808] sm:$0xff]  ;;  %v4728_v32 = vpop.xlane.xlu1 %4727  ;;  %5811 = vrsqrt.f32 %v4864_v58 }
 0x2b1   : > { %5460 = vst [vmem:[%s8990_s20 + $0x3c0] sm:$0xff] %v5264_v63  ;;  %v5050_v41 = vmul.f32 %v9402_v3, %v2453_v42  ;;  %v2101_v52 = vpop.f32.mrf.mxu0  ;;  %3677 = vmatpush2.msra.mxu1 %v1105_v34  ;;  %v6155_v12 = vld [vmem:[%s6730_s6 + $0x818] sm:$0xff]  ;;  %3319 = vmatprep.subr.mxu0 %v974_v5  ;;  %v6157_v58 = vld [vmem:[%s6730_s6 + $0x800] sm:$0xff] }
 0x2b2   : > { %2810 = vmatmul.mubr.f32.gmra.mxu0 %v6152_v39  ;;  %3169 = vmatmul.mubr.f32.gmra.mxu1 %v6153_v28  ;;  %v2460_v63 = vpop.f32.mrf.mxu1  ;;  %5461 = vst [vmem:[%s8990_s20 + $0x3c8] sm:$0xff] %v5265_v30  ;;  %v5051_v37 = vmul.f32 %v9402_v3, %v2455_v22  ;;  %v2459_v25 = vadd.f32 %v2458_v6, %v2100_v26  ;;  %v9424_v30 = vpop.eup %5805  ;;  %v10907_v26 = vld [vmem:[#allocation103_spill] sm:$0xff] }
 0x2b3   : > { %v2102_v7 = vadd.f32 %v2101_v52, %v10905_v8  ;;  %2815 = vmatprep.mubr.f32.mxu0 %v6154_v9  ;;  %v5268_v42 = vadd.f32 %v8970_v57, %v5050_v41  ;;  %3174 = vmatprep.mubr.f32.mxu1 %v6155_v12  ;;  %10906 = vst [vmem:[#allocation19_spill] sm:$0xff] %v9424_v30  ;;  %v1102_v41 = vld [vmem:[#allocation5 + $0xf58] sm:$0xff]  ;;  %v4737_v28 = vpop.xlane.xlu0 %4736  ;;  %v6156_v52 = vld [vmem:[%s6730_s6 + $0x810] sm:$0xff]  ;;  %v4865_v9 = vmax.f32 %v4728_v32, 1e-24 }
 0x2b4   : > { %v2464_v1 = vpop.f32.mrf.mxu1  ;;  %v2105_v31 = vpop.f32.mrf.mxu0  ;;  %v5269_v6 = vadd.f32 %v8973_v0, %v5051_v37  ;;  %v5054_v34 = vmul.f32 %v9410_v36, %v2459_v25  ;;  %3320 = vmatpush2.msra.mxu0 %v973_v46  ;;  %v1101_v37 = vld [vmem:[#allocation5 + $0xf50] sm:$0xff]  ;;  %3678 = vmatprep.subr.mxu1 %v1102_v41  ;;  %v4866_v32 = vmax.f32 %v4737_v28, 1e-24  ;;  %v6160_v41 = vld [vmem:[%s6730_s6 + $0x840] sm:$0xff] }
 0x2b5   : > { %v2461_v22 = vadd.f32 %v2460_v63, %v2102_v7  ;;  %v2106_v39 = vadd.f32 %v2105_v31, %v10907_v26  ;;  %5464 = vst [vmem:[%s8990_s20 + $0x3e0] sm:$0xff] %v5268_v42  ;;  %v10908_v7 = vld [vmem:[#allocation58_spill] sm:$0xff]  ;;  %v6158_v31 = vld [vmem:[%s6730_s6 + $0x848] sm:$0xff]  ;;  %3679 = vmatpush2.msra.mxu1 %v1101_v37  ;;  %5813 = vrsqrt.f32 %v4865_v9 }
 0x2b6   : > { %3175 = vmatmul.mubr.f32.gmra.mxu1 %v6156_v52  ;;  %2816 = vmatmul.mubr.f32.gmra.mxu0 %v6157_v58  ;;  %v2107_v5 = vpop.f32.mrf.mxu0  ;;  %v2466_v8 = vpop.f32.mrf.mxu1  ;;  %5465 = vst [vmem:[%s8990_s20 + $0x3e8] sm:$0xff] %v5269_v6  ;;  %v5272_v63 = vadd.f32 %v8970_v57, %v5054_v34  ;;  %v6159_v42 = vld [vmem:[%s6730_s6 + $0x858] sm:$0xff]  ;;  %v6161_v28 = vld [vmem:[%s6730_s6 + $0x850] sm:$0xff]  ;;  %5815 = vrsqrt.f32 %v4866_v32  ;;  %v6165_v32 = vld [vmem:[%s6730_s6 + $0x880] sm:$0xff] }
 0x2b7   : > { %v5055_v25 = vmul.f32 %v9410_v36, %v2461_v22  ;;  %v2465_v46 = vadd.f32 %v2464_v1, %v2106_v39  ;;  %v2108_v12 = vadd.f32 %v2107_v5, %v10908_v7  ;;  %2821 = vmatprep.mubr.f32.mxu0 %v6158_v31  ;;  %3180 = vmatprep.mubr.f32.mxu1 %v6159_v42  ;;  %v9438_v58 = vpop.eup %5807  ;;  %v10910_v22 = vld [vmem:[#allocation80_spill] sm:$0xff]  ;;  %v970_v5 = vld [vmem:[#allocation5 + $0xb38] sm:$0xff]  ;;  %v4746_v7 = vpop.xlane.xlu1 %4745  ;;  %v969_v42 = vld [vmem:[#allocation5 + $0xb30] sm:$0xff] }
 0x2b8   : > { %10909 = vst [vmem:[#allocation20_spill] sm:$0xff] %v9438_v58  ;;  %5468 = vst [vmem:[%s8990_s20 + $0x400] sm:$0xff] %v5272_v63  ;;  %3321 = vmatprep.subr.mxu0 %v970_v5  ;;  %v9456_v5 = vpop.eup %5809  ;;  %v6308_v36 = vld [vmem:[%s6730_s6 + $0x560] sm:$0xff] }
 0x2b9   : > { %v2111_v26 = vpop.f32.mrf.mxu0  ;;  %v2470_v52 = vpop.f32.mrf.mxu1  ;;  %v5273_v6 = vadd.f32 %v8973_v0, %v5055_v25  ;;  %v5058_v1 = vmul.f32 %v9424_v30, %v2465_v46  ;;  %v2467_v34 = vadd.f32 %v2466_v8, %v2108_v12  ;;  %v6162_v12 = vld [vmem:[%s6730_s6 + $0x888] sm:$0xff]  ;;  %3322 = vmatpush2.msra.mxu0 %v969_v42  ;;  %10911 = vst [vmem:[#allocation21_spill] sm:$0xff] %v9456_v5 }
 0x2ba   : > { %v2112_v39 = vadd.f32 %v2111_v26, %v10910_v22  ;;  %2822 = vmatmul.mubr.f32.gmra.mxu0 %v6160_v41  ;;  %3181 = vmatmul.mubr.f32.gmra.mxu1 %v6161_v28  ;;  %v6163_v26 = vld [vmem:[%s6730_s6 + $0x898] sm:$0xff]  ;;  %v4867_v28 = vmax.f32 %v4746_v7, 1e-24  ;;  %v6166_v42 = vld [vmem:[%s6730_s6 + $0x8c8] sm:$0xff] }
 0x2bb   : > { %v2113_v31 = vpop.f32.mrf.mxu0  ;;  %v2472_v63 = vpop.f32.mrf.mxu1  ;;  %5469 = vst [vmem:[%s8990_s20 + $0x408] sm:$0xff] %v5273_v6  ;;  %v5276_v25 = vadd.f32 %v8970_v57, %v5058_v1  ;;  %v5059_v8 = vmul.f32 %v9424_v30, %v2467_v34  ;;  %2827 = vmatprep.mubr.f32.mxu0 %v6162_v12  ;;  %3186 = vmatprep.mubr.f32.mxu1 %v6163_v26  ;;  %v1098_v41 = vld [vmem:[#allocation5 + $0xf38] sm:$0xff]  ;;  %v1097_v34 = vld [vmem:[#allocation5 + $0xf30] sm:$0xff] }
 0x2bc   : > { %v2471_v46 = vadd.f32 %v2470_v52, %v2112_v39  ;;  %v2114_v37 = vadd.f32 %v2113_v31, %v8738_v21  ;;  %v4755_v39 = vpop.xlane.xlu0 %4754  ;;  %v6164_v31 = vld [vmem:[%s6730_s6 + $0x890] sm:$0xff]  ;;  %3680 = vmatprep.subr.mxu1 %v1098_v41  ;;  %5817 = vrsqrt.f32 %v4867_v28  ;;  %v966_v26 = vld [vmem:[#allocation5 + $0xb18] sm:$0xff]  ;;  %v4764_v28 = vpop.xlane.xlu1 %4763 }
 0x2bd   : > { %v2476_v9 = vpop.f32.mrf.mxu1  ;;  %v2117_v22 = vpop.f32.mrf.mxu0  ;;  %5472 = vst [vmem:[%s8990_s20 + $0x420] sm:$0xff] %v5276_v25  ;;  %v5277_v6 = vadd.f32 %v8973_v0, %v5059_v8  ;;  %3681 = vmatpush2.msra.mxu1 %v1097_v34  ;;  %v6168_v34 = vld [vmem:[%s6730_s6 + $0x8c0] sm:$0xff]  ;;  %3323 = vmatprep.subr.mxu0 %v966_v26 }
 0x2be   : > { %v5062_v52 = vmul.f32 %v9438_v58, %v2471_v46  ;;  %v2473_v1 = vadd.f32 %v2472_v63, %v2114_v37  ;;  %v2118_v21 = vadd.f32 %v2117_v22, %v8753_v49  ;;  %3187 = vmatmul.mubr.f32.gmra.mxu1 %v6164_v31  ;;  %2828 = vmatmul.mubr.f32.gmra.mxu0 %v6165_v32  ;;  %v4868_v22 = vmax.f32 %v4755_v39, 1e-24  ;;  %v6169_v31 = vld [vmem:[%s6730_s6 + $0x8d0] sm:$0xff] }
 0x2bf   : > { %v2119_v7 = vpop.f32.mrf.mxu0  ;;  %v2478_v12 = vpop.f32.mrf.mxu1  ;;  %5473 = vst [vmem:[%s8990_s20 + $0x428] sm:$0xff] %v5277_v6  ;;  %2833 = vmatprep.mubr.f32.mxu0 %v6166_v42  ;;  %v1093_v42 = vld [vmem:[#allocation5 + $0xf10] sm:$0xff] }
 0x2c0   : > { %v5280_v25 = vadd.f32 %v8970_v57, %v5062_v52  ;;  %v5063_v63 = vmul.f32 %v9438_v58, %v2473_v1  ;;  %v2477_v8 = vadd.f32 %v2476_v9, %v2118_v21  ;;  %v2120_v49 = vadd.f32 %v2119_v7, %v8773_v40  ;;  %v9465_v6 = vpop.eup %5811  ;;  %v6167_v40 = vld [vmem:[%s6730_s6 + $0x8d8] sm:$0xff]  ;;  %v965_v21 = vld [vmem:[#allocation5 + $0xb10] sm:$0xff]  ;;  %v4773_v26 = vpop.xlane.xlu0 %4772  ;;  %v6304_v58 = vld [vmem:[%s6730_s6 + $0x520] sm:$0xff] }
 0x2c1   : > { %v2123_v46 = vpop.f32.mrf.mxu0  ;;  %v2482_v37 = vpop.f32.mrf.mxu1  ;;  %10912 = vst [vmem:[#allocation23_spill] sm:$0xff] %v9465_v6  ;;  %3192 = vmatprep.mubr.f32.mxu1 %v6167_v40  ;;  %v1094_v7 = vld [vmem:[#allocation5 + $0xf18] sm:$0xff]  ;;  %3324 = vmatpush2.msra.mxu0 %v965_v21  ;;  %5819 = vrsqrt.f32 %v4868_v22  ;;  %v6173_v22 = vld [vmem:[%s6730_s6 + $0x900] sm:$0xff] }
 0x2c2   : > { %5476 = vst [vmem:[%s8990_s20 + $0x440] sm:$0xff] %v5280_v25  ;;  %v5281_v9 = vadd.f32 %v8973_v0, %v5063_v63  ;;  %v5066_v41 = vmul.f32 %v9456_v5, %v2477_v8  ;;  %v2479_v52 = vadd.f32 %v2478_v12, %v2120_v49  ;;  %v2124_v1 = vadd.f32 %v2123_v46, %v8788_v27  ;;  %v6170_v8 = vld [vmem:[%s6730_s6 + $0x908] sm:$0xff] }
 0x2c3   : > { %2834 = vmatmul.mubr.f32.gmra.mxu0 %v6168_v34  ;;  %3193 = vmatmul.mubr.f32.gmra.mxu1 %v6169_v31  ;;  %v2125_v39 = vpop.f32.mrf.mxu0  ;;  %v2484_v32 = vpop.f32.mrf.mxu1 }
 0x2c4   : > { %5477 = vst [vmem:[%s8990_s20 + $0x448] sm:$0xff] %v5281_v9  ;;  %v5284_v25 = vadd.f32 %v8970_v57, %v5066_v41  ;;  %v5067_v12 = vmul.f32 %v9456_v5, %v2479_v52  ;;  %v2483_v63 = vadd.f32 %v2482_v37, %v2124_v1  ;;  %v2126_v27 = vadd.f32 %v2125_v39, %v8804_v54  ;;  %v6171_v52 = vld [vmem:[%s6730_s6 + $0x918] sm:$0xff]  ;;  %v6172_v1 = vld [vmem:[%s6730_s6 + $0x910] sm:$0xff] }
 0x2c5   : > { %2839 = vmatprep.mubr.f32.mxu0 %v6170_v8  ;;  %v2488_v49 = vpop.f32.mrf.mxu1  ;;  %v2129_v46 = vpop.f32.mrf.mxu0  ;;  %3198 = vmatprep.mubr.f32.mxu1 %v6171_v52  ;;  %v962_v54 = vld [vmem:[#allocation5 + $0xaf8] sm:$0xff]  ;;  %v4869_v37 = vmax.f32 %v4764_v28, 1e-24  ;;  %v961_v39 = vld [vmem:[#allocation5 + $0xaf0] sm:$0xff] }
 0x2c6   : > { %5480 = vst [vmem:[%s8990_s20 + $0x460] sm:$0xff] %v5284_v25  ;;  %v5285_v9 = vadd.f32 %v8973_v0, %v5067_v12  ;;  %v5070_v41 = vmul.f32 %v9465_v6, %v2483_v63  ;;  %v2485_v40 = vadd.f32 %v2484_v32, %v2126_v27  ;;  %3682 = vmatprep.subr.mxu1 %v1094_v7  ;;  %v1090_v25 = vld [vmem:[#allocation5 + $0xef8] sm:$0xff]  ;;  %v9486_v32 = vpop.eup %5813  ;;  %v6174_v63 = vld [vmem:[%s6730_s6 + $0x948] sm:$0xff]  ;;  %v1089_v52 = vld [vmem:[#allocation5 + $0xef0] sm:$0xff] }
 0x2c7   : > { %3199 = vmatmul.mubr.f32.gmra.mxu1 %v6172_v1  ;;  %v2130_v21 = vadd.f32 %v2129_v46, %v8818_v38  ;;  %2840 = vmatmul.mubr.f32.gmra.mxu0 %v6173_v22  ;;  %v2131_v34 = vpop.f32.mrf.mxu0  ;;  %v2490_v31 = vpop.f32.mrf.mxu1  ;;  %10913 = vst [vmem:[#allocation24_spill] sm:$0xff] %v9486_v32  ;;  %v6175_v27 = vld [vmem:[%s6730_s6 + $0x958] sm:$0xff]  ;;  %5821 = vrsqrt.f32 %v4869_v37 }
 0x2c8   : > { %5481 = vst [vmem:[%s8990_s20 + $0x468] sm:$0xff] %v5285_v9  ;;  %v5288_v7 = vadd.f32 %v8970_v57, %v5070_v41  ;;  %v5071_v28 = vmul.f32 %v9465_v6, %v2485_v40  ;;  %3683 = vmatpush2.msra.mxu1 %v1093_v42  ;;  %v2132_v12 = vadd.f32 %v2131_v34, %v8833_v10  ;;  %v4870_v9 = vmax.f32 %v4773_v26, 1e-24  ;;  %v9494_v1 = vpop.eup %5815  ;;  %v6177_v26 = vld [vmem:[%s6730_s6 + $0x950] sm:$0xff]  ;;  %v6300_v6 = vld [vmem:[%s6730_s6 + $0x4e0] sm:$0xff] }
 0x2c9   : > { %2845 = vmatprep.mubr.f32.mxu0 %v6174_v63  ;;  %v2489_v38 = vadd.f32 %v2488_v49, %v2130_v21  ;;  %3204 = vmatprep.mubr.f32.mxu1 %v6175_v27  ;;  %v2135_v8 = vpop.f32.mrf.mxu0  ;;  %v2494_v46 = vpop.f32.mrf.mxu1  ;;  %10914 = vst [vmem:[#allocation25_spill] sm:$0xff] %v9494_v1  ;;  %v958_v49 = vld [vmem:[#allocation5 + $0xad8] sm:$0xff]  ;;  %v957_v34 = vld [vmem:[#allocation5 + $0xad0] sm:$0xff] }
 0x2ca   : > { %3325 = vmatprep.subr.mxu0 %v962_v54  ;;  %5484 = vst [vmem:[%s8990_s20 + $0x480] sm:$0xff] %v5288_v7  ;;  %v5289_v42 = vadd.f32 %v8973_v0, %v5071_v28  ;;  %v2491_v41 = vadd.f32 %v2490_v31, %v2132_v12  ;;  %v2136_v10 = vadd.f32 %v2135_v8, %v8843_v14  ;;  %v6176_v54 = vld [vmem:[%s6730_s6 + $0x940] sm:$0xff]  ;;  %v6179_v28 = vld [vmem:[%s6730_s6 + $0x998] sm:$0xff]  ;;  %5823 = vrsqrt.f32 %v4870_v9 }
 0x2cb   : > { %3326 = vmatpush2.msra.mxu0 %v961_v39  ;;  %3684 = vmatprep.subr.mxu1 %v1090_v25  ;;  %v5074_v40 = vmul.f32 %v9486_v32, %v2489_v38  ;;  %v2137_v21 = vpop.f32.mrf.mxu0  ;;  %v2496_v22 = vpop.f32.mrf.mxu1  ;;  %v6178_v39 = vld [vmem:[%s6730_s6 + $0x988] sm:$0xff]  ;;  %v6181_v9 = vld [vmem:[%s6730_s6 + $0x980] sm:$0xff] }
 0x2cc   : > { %2846 = vmatmul.mubr.f32.gmra.mxu0 %v6176_v54  ;;  %3205 = vmatmul.mubr.f32.gmra.mxu1 %v6177_v26  ;;  %5485 = vst [vmem:[%s8990_s20 + $0x488] sm:$0xff] %v5289_v42  ;;  %v5075_v31 = vmul.f32 %v9486_v32, %v2491_v41  ;;  %v2495_v37 = vadd.f32 %v2494_v46, %v2136_v10  ;;  %v4782_v25 = vpop.xlane.xlu1 %4781  ;;  %v9508_v38 = vpop.eup %5817  ;;  %v6180_v41 = vld [vmem:[%s6730_s6 + $0x990] sm:$0xff] }
 0x2cd   : > { %v2138_v14 = vadd.f32 %v2137_v21, %v8863_v20  ;;  %3685 = vmatpush2.msra.mxu1 %v1089_v52  ;;  %2851 = vmatprep.mubr.f32.mxu0 %v6178_v39  ;;  %v5292_v7 = vadd.f32 %v8970_v57, %v5074_v40  ;;  %v2500_v12 = vpop.f32.mrf.mxu1  ;;  %v2141_v63 = vpop.f32.mrf.mxu0  ;;  %10915 = vst [vmem:[#allocation28_spill] sm:$0xff] %v9508_v38  ;;  %v1086_v52 = vld [vmem:[#allocation5 + $0xed8] sm:$0xff]  ;;  %v4871_v40 = vmax.f32 %v4782_v25, 1e-24  ;;  %v1085_v54 = vld [vmem:[#allocation5 + $0xed0] sm:$0xff] }
 0x2ce   : > { %3210 = vmatprep.mubr.f32.mxu1 %v6179_v28  ;;  %3327 = vmatprep.subr.mxu0 %v958_v49  ;;  %v5293_v27 = vadd.f32 %v8973_v0, %v5075_v31  ;;  %v5078_v20 = vmul.f32 %v9494_v1, %v2495_v37  ;;  %v2142_v46 = vadd.f32 %v2141_v63, %v8870_v55  ;;  %v4791_v42 = vpop.xlane.xlu0 %4790  ;;  %v6183_v31 = vld [vmem:[%s6730_s6 + $0x9d8] sm:$0xff]  ;;  %v9522_v25 = vpop.eup %5819 }
 0x2cf   : > { %v2497_v8 = vadd.f32 %v2496_v22, %v2138_v14  ;;  %3328 = vmatpush2.msra.mxu0 %v957_v34  ;;  %5488 = vst [vmem:[%s8990_s20 + $0x4a0] sm:$0xff] %v5292_v7  ;;  %v2143_v10 = vpop.f32.mrf.mxu0  ;;  %v2502_v49 = vpop.f32.mrf.mxu1  ;;  %v6182_v34 = vld [vmem:[%s6730_s6 + $0x9c8] sm:$0xff]  ;;  %3686 = vmatprep.subr.mxu1 %v1086_v52  ;;  %v4872_v39 = vmax.f32 %v4791_v42, 1e-24  ;;  %10916 = vst [vmem:[#allocation30_spill] sm:$0xff] %v9522_v25  ;;  %v954_v63 = vld [vmem:[#allocation5 + $0xab8] sm:$0xff]  ;;  %5825 = vrsqrt.f32 %v4871_v40 }
 0x2d0   : > { %3211 = vmatmul.mubr.f32.gmra.mxu1 %v6180_v41  ;;  %2852 = vmatmul.mubr.f32.gmra.mxu0 %v6181_v9  ;;  %5489 = vst [vmem:[%s8990_s20 + $0x4a8] sm:$0xff] %v5293_v27  ;;  %v5296_v26 = vadd.f32 %v8970_v57, %v5078_v20  ;;  %v2501_v21 = vadd.f32 %v2500_v12, %v2142_v46  ;;  %v4800_v27 = vpop.xlane.xlu1 %4799  ;;  %v6184_v20 = vld [vmem:[%s6730_s6 + $0x9c0] sm:$0xff]  ;;  %v953_v42 = vld [vmem:[#allocation5 + $0xab0] sm:$0xff] }
 0x2d1   : > { %v5079_v55 = vmul.f32 %v9494_v1, %v2497_v8  ;;  %v2144_v22 = vadd.f32 %v2143_v10, %v8882_v45  ;;  %2857 = vmatprep.mubr.f32.mxu0 %v6182_v34  ;;  %3216 = vmatprep.mubr.f32.mxu1 %v6183_v31  ;;  %v2147_v37 = vpop.f32.mrf.mxu0  ;;  %v2506_v14 = vpop.f32.mrf.mxu1  ;;  %v6185_v8 = vld [vmem:[%s6730_s6 + $0x9d0] sm:$0xff]  ;;  %5827 = vrsqrt.f32 %v4872_v39  ;;  %v6296_v1 = vld [vmem:[%s6730_s6 + $0x4a0] sm:$0xff] }
 0x2d2   : > { %5492 = vst [vmem:[%s8990_s20 + $0x4c0] sm:$0xff] %v5296_v26  ;;  %v5082_v28 = vmul.f32 %v9508_v38, %v2501_v21  ;;  %v2148_v45 = vadd.f32 %v2147_v37, %v8888_v11  ;;  %3687 = vmatpush2.msra.mxu1 %v1085_v54  ;;  %v6187_v54 = vld [vmem:[%s6730_s6 + $0xa18] sm:$0xff]  ;;  %3329 = vmatprep.subr.mxu0 %v954_v63  ;;  %v4873_v21 = vmax.f32 %v4800_v27, 1e-24  ;;  %v4809_v37 = vpop.xlane.xlu0 %4808  ;;  %v6188_v39 = vld [vmem:[%s6730_s6 + $0xa10] sm:$0xff] }
 0x2d3   : > { %v5297_v7 = vadd.f32 %v8973_v0, %v5079_v55  ;;  %v2503_v12 = vadd.f32 %v2502_v49, %v2144_v22  ;;  %v2149_v46 = vpop.f32.mrf.mxu0  ;;  %v2508_v52 = vpop.f32.mrf.mxu1  ;;  %v6186_v49 = vld [vmem:[%s6730_s6 + $0xa08] sm:$0xff]  ;;  %v1082_v55 = vld [vmem:[#allocation5 + $0xeb8] sm:$0xff]  ;;  %3330 = vmatpush2.msra.mxu0 %v953_v42 }
 0x2d4   : > { %2858 = vmatmul.mubr.f32.gmra.mxu0 %v6184_v20  ;;  %3217 = vmatmul.mubr.f32.gmra.mxu1 %v6185_v8  ;;  %v5300_v41 = vadd.f32 %v8970_v57, %v5082_v28  ;;  %v2507_v11 = vadd.f32 %v2506_v14, %v2148_v45  ;;  %v2150_v10 = vadd.f32 %v2149_v46, %v8892_v16  ;;  %v9540_v14 = vpop.eup %5821  ;;  %v1081_v45 = vld [vmem:[#allocation5 + $0xeb0] sm:$0xff]  ;;  %v6190_v8 = vld [vmem:[%s6730_s6 + $0xa48] sm:$0xff]  ;;  %v6191_v46 = vld [vmem:[%s6730_s6 + $0xa58] sm:$0xff]  ;;  %5829 = vrsqrt.f32 %v4873_v21 }
 0x2d5   : > { %5493 = vst [vmem:[%s8990_s20 + $0x4c8] sm:$0xff] %v5297_v7  ;;  %v5083_v9 = vmul.f32 %v9508_v38, %v2503_v12  ;;  %2863 = vmatprep.mubr.f32.mxu0 %v6186_v49  ;;  %3222 = vmatprep.mubr.f32.mxu1 %v6187_v54  ;;  %v2512_v40 = vpop.f32.mrf.mxu1  ;;  %v2153_v26 = vpop.f32.mrf.mxu0  ;;  %10917 = vst [vmem:[#allocation31_spill] sm:$0xff] %v9540_v14  ;;  %v6189_v7 = vld [vmem:[%s6730_s6 + $0xa00] sm:$0xff] }
 0x2d6   : > { %5496 = vst [vmem:[%s8990_s20 + $0x4e0] sm:$0xff] %v5300_v41  ;;  %v5086_v34 = vmul.f32 %v9522_v25, %v2507_v11  ;;  %v2509_v31 = vadd.f32 %v2508_v52, %v2150_v10  ;;  %v2154_v16 = vadd.f32 %v2153_v26, %v8896_v19  ;;  %3688 = vmatprep.subr.mxu1 %v1082_v55  ;;  %v950_v41 = vld [vmem:[#allocation5 + $0xa98] sm:$0xff]  ;;  %v6192_v26 = vld [vmem:[%s6730_s6 + $0xa40] sm:$0xff]  ;;  %v6193_v55 = vld [vmem:[%s6730_s6 + $0xa50] sm:$0xff] }
 0x2d7   : > { %v5301_v22 = vadd.f32 %v8973_v0, %v5083_v9  ;;  %v2155_v28 = vpop.f32.mrf.mxu0  ;;  %v2514_v12 = vpop.f32.mrf.mxu1  ;;  %v4874_v9 = vmax.f32 %v4809_v37, 1e-24  ;;  %3689 = vmatpush2.msra.mxu1 %v1081_v45  ;;  %3331 = vmatprep.subr.mxu0 %v950_v41  ;;  %v6197_v41 = vld [vmem:[%s6730_s6 + $0xa80] sm:$0xff] }
 0x2d8   : > { %3223 = vmatmul.mubr.f32.gmra.mxu1 %v6188_v39  ;;  %2864 = vmatmul.mubr.f32.gmra.mxu0 %v6189_v7  ;;  %v5304_v63 = vadd.f32 %v8970_v57, %v5086_v34  ;;  %v5087_v27 = vmul.f32 %v9522_v25, %v2509_v31  ;;  %v2513_v19 = vadd.f32 %v2512_v40, %v2154_v16  ;;  %v9550_v11 = vpop.eup %5823  ;;  %v4818_v40 = vpop.xlane.xlu1 %4817  ;;  %v949_v34 = vld [vmem:[#allocation5 + $0xa90] sm:$0xff]  ;;  %v1078_v31 = vld [vmem:[#allocation5 + $0xe98] sm:$0xff]  ;;  %v6194_v7 = vld [vmem:[%s6730_s6 + $0xa88] sm:$0xff] }
 0x2d9   : > { %5497 = vst [vmem:[%s8990_s20 + $0x4e8] sm:$0xff] %v5301_v22  ;;  %v2156_v20 = vadd.f32 %v2155_v28, %v8900_v4  ;;  %2869 = vmatprep.mubr.f32.mxu0 %v6190_v8  ;;  %3228 = vmatprep.mubr.f32.mxu1 %v6191_v46  ;;  %v2159_v52 = vpop.f32.mrf.mxu0  ;;  %v2518_v42 = vpop.f32.mrf.mxu1  ;;  %10918 = vst [vmem:[#allocation32_spill] sm:$0xff] %v9550_v11  ;;  %v6195_v28 = vld [vmem:[%s6730_s6 + $0xa98] sm:$0xff]  ;;  %5831 = vrsqrt.f32 %v4874_v9  ;;  %v6292_v25 = vld [vmem:[%s6730_s6 + $0x460] sm:$0xff] }
 0x2da   : > { %5500 = vst [vmem:[%s8990_s20 + $0x500] sm:$0xff] %v5304_v63  ;;  %v5305_v10 = vadd.f32 %v8973_v0, %v5087_v27  ;;  %v5090_v4 = vmul.f32 %v9540_v14, %v2513_v19  ;;  %v2160_v54 = vadd.f32 %v2159_v52, %v8904_v50  ;;  %v1077_v63 = vld [vmem:[#allocation5 + $0xe90] sm:$0xff]  ;;  %3332 = vmatpush2.msra.mxu0 %v949_v34  ;;  %v946_v8 = vld [vmem:[#allocation5 + $0xa78] sm:$0xff]  ;;  %v4827_v46 = vpop.xlane.xlu0 %4826 }
 0x2db   : > { %v2515_v49 = vadd.f32 %v2514_v12, %v2156_v20  ;;  %v2161_v21 = vpop.f32.mrf.mxu0  ;;  %v2520_v22 = vpop.f32.mrf.mxu1  ;;  %3690 = vmatprep.subr.mxu1 %v1078_v31  ;;  %v6196_v52 = vld [vmem:[%s6730_s6 + $0xa90] sm:$0xff]  ;;  %3333 = vmatprep.subr.mxu0 %v946_v8 }
 0x2dc   : > { %2870 = vmatmul.mubr.f32.gmra.mxu0 %v6192_v26  ;;  %3229 = vmatmul.mubr.f32.gmra.mxu1 %v6193_v55  ;;  %5501 = vst [vmem:[%s8990_s20 + $0x508] sm:$0xff] %v5305_v10  ;;  %v5308_v16 = vadd.f32 %v8970_v57, %v5090_v4  ;;  %v2519_v39 = vadd.f32 %v2518_v42, %v2160_v54  ;;  %v945_v4 = vld [vmem:[#allocation5 + $0xa70] sm:$0xff]  ;;  %v9570_v54 = vpop.eup %5825 }
 0x2dd   : > { %v5091_v37 = vmul.f32 %v9540_v14, %v2515_v49  ;;  %v2162_v50 = vadd.f32 %v2161_v21, %v8908_v60  ;;  %2875 = vmatprep.mubr.f32.mxu0 %v6194_v7  ;;  %3234 = vmatprep.mubr.f32.mxu1 %v6195_v28  ;;  %v2524_v12 = vpop.f32.mrf.mxu1  ;;  %v2165_v45 = vpop.f32.mrf.mxu0  ;;  %v4875_v60 = vmax.f32 %v4818_v40, 1e-24  ;;  %v1074_v49 = vld [vmem:[#allocation5 + $0xe78] sm:$0xff]  ;;  %10919 = vst [vmem:[#allocation33_spill] sm:$0xff] %v9570_v54  ;;  %v6198_v21 = vld [vmem:[%s6730_s6 + $0xac8] sm:$0xff]  ;;  %v1073_v7 = vld [vmem:[#allocation5 + $0xe70] sm:$0xff] }
 0x2de   : > { %5504 = vst [vmem:[%s8990_s20 + $0x520] sm:$0xff] %v5308_v16  ;;  %v5094_v19 = vmul.f32 %v9550_v11, %v2519_v39  ;;  %v2166_v42 = vadd.f32 %v2165_v45, %v8912_v18  ;;  %3691 = vmatpush2.msra.mxu1 %v1077_v63  ;;  %v4876_v16 = vmax.f32 %v4827_v46, 1e-24  ;;  %3334 = vmatpush2.msra.mxu0 %v945_v4  ;;  %v942_v28 = vld [vmem:[#allocation5 + $0xa58] sm:$0xff]  ;;  %v6200_v45 = vld [vmem:[%s6730_s6 + $0xac0] sm:$0xff]  ;;  %v6201_v63 = vld [vmem:[%s6730_s6 + $0xad0] sm:$0xff] }
 0x2df   : > { %v5309_v27 = vadd.f32 %v8973_v0, %v5091_v37  ;;  %v2521_v20 = vadd.f32 %v2520_v22, %v2162_v50  ;;  %v2167_v9 = vpop.f32.mrf.mxu0  ;;  %v2526_v10 = vpop.f32.mrf.mxu1  ;;  %v6199_v22 = vld [vmem:[%s6730_s6 + $0xad8] sm:$0xff]  ;;  %5833 = vrsqrt.f32 %v4875_v60  ;;  %3692 = vmatprep.subr.mxu1 %v1074_v49  ;;  %v6202_v46 = vld [vmem:[%s6730_s6 + $0xb08] sm:$0xff]  ;;  %3335 = vmatprep.subr.mxu0 %v942_v28 }
 0x2e0   : > { %3235 = vmatmul.mubr.f32.gmra.mxu1 %v6196_v52  ;;  %2876 = vmatmul.mubr.f32.gmra.mxu0 %v6197_v41  ;;  %v5312_v40 = vadd.f32 %v8970_v57, %v5094_v19  ;;  %v2168_v55 = vadd.f32 %v2167_v9, %v8916_v47  ;;  %v2525_v18 = vadd.f32 %v2524_v12, %v2166_v42  ;;  %v9578_v37 = vpop.eup %5827  ;;  %v6203_v52 = vld [vmem:[%s6730_s6 + $0xb18] sm:$0xff]  ;;  %5835 = vrsqrt.f32 %v4876_v16 }
 0x2e1   : > { %5505 = vst [vmem:[%s8990_s20 + $0x528] sm:$0xff] %v5309_v27  ;;  %v5095_v26 = vmul.f32 %v9550_v11, %v2521_v20  ;;  %2881 = vmatprep.mubr.f32.mxu0 %v6198_v21  ;;  %3240 = vmatprep.mubr.f32.mxu1 %v6199_v22  ;;  %v2171_v34 = vpop.f32.mrf.mxu0  ;;  %v2530_v31 = vpop.f32.mrf.mxu1  ;;  %10920 = vst [vmem:[#allocation34_spill] sm:$0xff] %v9578_v37  ;;  %v941_v20 = vld [vmem:[#allocation5 + $0xa50] sm:$0xff]  ;;  %v6205_v21 = vld [vmem:[%s6730_s6 + $0xb00] sm:$0xff] }
 0x2e2   : > { %5508 = vst [vmem:[%s8990_s20 + $0x540] sm:$0xff] %v5312_v40  ;;  %v2527_v50 = vadd.f32 %v2526_v10, %v2168_v55  ;;  %v2172_v47 = vadd.f32 %v2171_v34, %v8920_v56  ;;  %v5098_v12 = vmul.f32 %v9570_v54, %v2525_v18  ;;  %3693 = vmatpush2.msra.mxu1 %v1073_v7  ;;  %v9592_v10 = vpop.eup %5829  ;;  %v6204_v55 = vld [vmem:[%s6730_s6 + $0xb10] sm:$0xff]  ;;  %v6288_v11 = vld [vmem:[%s6730_s6 + $0x420] sm:$0xff] }
 0x2e3   : > { %v5313_v39 = vadd.f32 %v8973_v0, %v5095_v26  ;;  %v2173_v27 = vpop.f32.mrf.mxu0  ;;  %v2532_v19 = vpop.f32.mrf.mxu1  ;;  %10921 = vst [vmem:[#allocation35_spill] sm:$0xff] %v9592_v10  ;;  %3336 = vmatpush2.msra.mxu0 %v941_v20  ;;  %v1070_v26 = vld [vmem:[#allocation5 + $0xe58] sm:$0xff]  ;;  %v1069_v34 = vld [vmem:[#allocation5 + $0xe50] sm:$0xff]  ;;  %v6208_v20 = vld [vmem:[%s6730_s6 + $0xb40] sm:$0xff] }
 0x2e4   : > { %2882 = vmatmul.mubr.f32.gmra.mxu0 %v6200_v45  ;;  %3241 = vmatmul.mubr.f32.gmra.mxu1 %v6201_v63  ;;  %v5099_v60 = vmul.f32 %v9570_v54, %v2527_v50  ;;  %v2531_v8 = vadd.f32 %v2530_v31, %v2172_v47  ;;  %v2174_v56 = vadd.f32 %v2173_v27, %v8924_v53  ;;  %v6206_v50 = vld [vmem:[%s6730_s6 + $0xb48] sm:$0xff]  ;;  %v6207_v47 = vld [vmem:[%s6730_s6 + $0xb58] sm:$0xff] }
 0x2e5   : > { %5509 = vst [vmem:[%s8990_s20 + $0x548] sm:$0xff] %v5313_v39  ;;  %2887 = vmatprep.mubr.f32.mxu0 %v6202_v46  ;;  %3246 = vmatprep.mubr.f32.mxu1 %v6203_v52  ;;  %v5316_v42 = vadd.f32 %v8970_v57, %v5098_v12  ;;  %v2536_v41 = vpop.f32.mrf.mxu1  ;;  %v2177_v9 = vpop.f32.mrf.mxu0  ;;  %v937_v46 = vld [vmem:[#allocation5 + $0xa30] sm:$0xff] }
 0x2e6   : > { %v5317_v4 = vadd.f32 %v8973_v0, %v5099_v60  ;;  %v5102_v53 = vmul.f32 %v9578_v37, %v2531_v8  ;;  %v2533_v49 = vadd.f32 %v2532_v19, %v2174_v56  ;;  %v2178_v40 = vadd.f32 %v2177_v9, %v8928_v24  ;;  %3694 = vmatprep.subr.mxu1 %v1070_v26  ;;  %v9606_v12 = vpop.eup %5831  ;;  %v938_v19 = vld [vmem:[#allocation5 + $0xa38] sm:$0xff]  ;;  %v6209_v60 = vld [vmem:[%s6730_s6 + $0xb50] sm:$0xff] }
 0x2e7   : > { %5512 = vst [vmem:[%s8990_s20 + $0x560] sm:$0xff] %v5316_v42  ;;  %v2179_v18 = vpop.f32.mrf.mxu0  ;;  %v2538_v22 = vpop.f32.mrf.mxu1  ;;  %10922 = vst [vmem:[#allocation36_spill] sm:$0xff] %v9606_v12  ;;  %3695 = vmatpush2.msra.mxu1 %v1069_v34  ;;  %3337 = vmatprep.subr.mxu0 %v938_v19  ;;  %v6213_v34 = vld [vmem:[%s6730_s6 + $0xb90] sm:$0xff] }
 0x2e8   : > { %3247 = vmatmul.mubr.f32.gmra.mxu1 %v6204_v55  ;;  %2888 = vmatmul.mubr.f32.gmra.mxu0 %v6205_v21  ;;  %5513 = vst [vmem:[%s8990_s20 + $0x568] sm:$0xff] %v5317_v4  ;;  %v5320_v31 = vadd.f32 %v8970_v57, %v5102_v53  ;;  %v5103_v16 = vmul.f32 %v9578_v37, %v2533_v49  ;;  %v6211_v4 = vld [vmem:[%s6730_s6 + $0xb98] sm:$0xff]  ;;  %v6284_v37 = vld [vmem:[%s6730_s6 + $0x3e0] sm:$0xff] }
 0x2e9   : > { %v2537_v39 = vadd.f32 %v2536_v41, %v2178_v40  ;;  %v2180_v24 = vadd.f32 %v2179_v18, %v8932_v51  ;;  %2893 = vmatprep.mubr.f32.mxu0 %v6206_v50  ;;  %3252 = vmatprep.mubr.f32.mxu1 %v6207_v47  ;;  %v2183_v7 = vpop.f32.mrf.mxu0  ;;  %v2542_v28 = vpop.f32.mrf.mxu1  ;;  %v1066_v40 = vld [vmem:[#allocation5 + $0xe38] sm:$0xff] }
 0x2ea   : > { %5516 = vst [vmem:[%s8990_s20 + $0x580] sm:$0xff] %v5320_v31  ;;  %v5321_v45 = vadd.f32 %v8973_v0, %v5103_v16  ;;  %v2184_v51 = vadd.f32 %v2183_v7, %v8936_v43  ;;  %v6210_v43 = vld [vmem:[%s6730_s6 + $0xb88] sm:$0xff]  ;;  %3338 = vmatpush2.msra.mxu0 %v937_v46  ;;  %3696 = vmatprep.subr.mxu1 %v1066_v40 }
 0x2eb   : > { %v5106_v63 = vmul.f32 %v9592_v10, %v2537_v39  ;;  %v2539_v27 = vadd.f32 %v2538_v22, %v2180_v24  ;;  %v2185_v8 = vpop.f32.mrf.mxu0  ;;  %v2544_v56 = vpop.f32.mrf.mxu1  ;;  %v6212_v22 = vld [vmem:[%s6730_s6 + $0xb80] sm:$0xff]  ;;  %v1065_v39 = vld [vmem:[#allocation5 + $0xe30] sm:$0xff]  ;;  %v6214_v7 = vld [vmem:[%s6730_s6 + $0xbc8] sm:$0xff] }
 0x2ec   : > { %2894 = vmatmul.mubr.f32.gmra.mxu0 %v6208_v20  ;;  %3253 = vmatmul.mubr.f32.gmra.mxu1 %v6209_v60  ;;  %5517 = vst [vmem:[%s8990_s20 + $0x588] sm:$0xff] %v5321_v45  ;;  %v2543_v41 = vadd.f32 %v2542_v28, %v2184_v51  ;;  %v2186_v9 = vadd.f32 %v2185_v8, %v8940_v62  ;;  %v9624_v62 = vpop.eup %5833  ;;  %v6215_v28 = vld [vmem:[%s6730_s6 + $0xbd8] sm:$0xff]  ;;  %v6216_v8 = vld [vmem:[%s6730_s6 + $0xbc0] sm:$0xff] }
 0x2ed   : > { %v5324_v52 = vadd.f32 %v8970_v57, %v5106_v63  ;;  %v5107_v42 = vmul.f32 %v9592_v10, %v2539_v27  ;;  %2899 = vmatprep.mubr.f32.mxu0 %v6210_v43  ;;  %3258 = vmatprep.mubr.f32.mxu1 %v6211_v4  ;;  %v2189_v53 = vpop.f32.mrf.mxu0  ;;  %v2548_v49 = vpop.f32.mrf.mxu1  ;;  %10923 = vst [vmem:[#allocation38_spill] sm:$0xff] %v9624_v62  ;;  %v934_v27 = vld [vmem:[#allocation5 + $0xa18] sm:$0xff] }
 0x2ee   : > { %v5110_v55 = vmul.f32 %v9606_v12, %v2543_v41  ;;  %v2545_v21 = vadd.f32 %v2544_v56, %v2186_v9  ;;  %v2190_v18 = vadd.f32 %v2189_v53, %v8944_v61  ;;  %v9634_v51 = vpop.eup %5835  ;;  %3697 = vmatpush2.msra.mxu1 %v1065_v39  ;;  %v6217_v56 = vld [vmem:[%s6730_s6 + $0xbd0] sm:$0xff]  ;;  %3339 = vmatprep.subr.mxu0 %v934_v27  ;;  %v6219_v53 = vld [vmem:[%s6730_s6 + $0xc18] sm:$0xff]  ;;  %v6224_v27 = vld [vmem:[%s6730_s6 + $0x20] sm:$0xff] }
 0x2ef   : > { %5520 = vst [vmem:[%s8990_s20 + $0x5a0] sm:$0xff] %v5324_v52  ;;  %v5325_v26 = vadd.f32 %v8973_v0, %v5107_v42  ;;  %v2191_v31 = vpop.f32.mrf.mxu0  ;;  %v2550_v16 = vpop.f32.mrf.mxu1  ;;  %10924 = vst [vmem:[#allocation39_spill] sm:$0xff] %v9634_v51  ;;  %v933_v42 = vld [vmem:[#allocation5 + $0xa10] sm:$0xff] }
 0x2f0   : > { %2900 = vmatmul.mubr.f32.gmra.mxu0 %v6212_v22  ;;  %3259 = vmatmul.mubr.f32.gmra.mxu1 %v6213_v34  ;;  %v5328_v24 = vadd.f32 %v8970_v57, %v5110_v55  ;;  %v5111_v50 = vmul.f32 %v9606_v12, %v2545_v21  ;;  %v2549_v47 = vadd.f32 %v2548_v49, %v2190_v18  ;;  %v1061_v22 = vld [vmem:[#allocation5 + $0xe10] sm:$0xff]  ;;  %v6220_v34 = vld [vmem:[%s6730_s6 + $0xc00] sm:$0xff] }
 0x2f1   : > { %5521 = vst [vmem:[%s8990_s20 + $0x5a8] sm:$0xff] %v5325_v26  ;;  %v2192_v61 = vadd.f32 %v2191_v31, %v8948_v23  ;;  %2905 = vmatprep.mubr.f32.mxu0 %v6214_v7  ;;  %3264 = vmatprep.mubr.f32.mxu1 %v6215_v28  ;;  %v2195_v45 = vpop.f32.mrf.mxu0  ;;  %v2554_v63 = vpop.f32.mrf.mxu1  ;;  %v1062_v26 = vld [vmem:[#allocation5 + $0xe18] sm:$0xff]  ;;  %v6221_v31 = vld [vmem:[%s6730_s6 + $0xc10] sm:$0xff]  ;;  %v6280_v12 = vld [vmem:[%s6730_s6 + $0x3a0] sm:$0xff] }
 0x2f2   : > { %5524 = vst [vmem:[%s8990_s20 + $0x5c0] sm:$0xff] %v5328_v24  ;;  %v5329_v19 = vadd.f32 %v8973_v0, %v5111_v50  ;;  %v5114_v20 = vmul.f32 %v9624_v62, %v2549_v47  ;;  %v2196_v23 = vadd.f32 %v2195_v45, %v8954_v17  ;;  %v6218_v17 = vld [vmem:[%s6730_s6 + $0xc08] sm:$0xff]  ;;  %3340 = vmatpush2.msra.mxu0 %v933_v42  ;;  %v6223_v45 = vld [vmem:[%s6730_s6 + $0x38] sm:$0xff]  ;;  %v6228_v42 = vld [vmem:[%s6730_s6 + $0x60] sm:$0xff] }
 0x2f3   : > { %v2551_v60 = vadd.f32 %v2550_v16, %v2192_v61  ;;  %v2197_v46 = vpop.f32.mrf.mxu0  ;;  %v2556_v52 = vpop.f32.mrf.mxu1  ;;  %3698 = vmatprep.subr.mxu1 %v1062_v26  ;;  %v6222_v61 = vld [vmem:[%s6730_s6 + $0x28] sm:$0xff] }
 0x2f4   : > { %2906 = vmatmul.mubr.f32.gmra.mxu0 %v6216_v8  ;;  %3265 = vmatmul.mubr.f32.gmra.mxu1 %v6217_v56  ;;  %5525 = vst [vmem:[%s8990_s20 + $0x5c8] sm:$0xff] %v5329_v19  ;;  %v5332_v41 = vadd.f32 %v8970_v57, %v5114_v20  ;;  %v2555_v43 = vadd.f32 %v2554_v63, %v2196_v23  ;;  %v6225_v19 = vld [vmem:[%s6730_s6 + $0x30] sm:$0xff]  ;;  %v6226_v8 = vld [vmem:[%s6730_s6 + $0x68] sm:$0xff]  ;;  %v6227_v56 = vld [vmem:[%s6730_s6 + $0x78] sm:$0xff] }
 0x2f5   : > { %v5115_v9 = vmul.f32 %v9624_v62, %v2551_v60  ;;  %v2198_v4 = vadd.f32 %v2197_v46, %v8958_v48  ;;  %2911 = vmatprep.mubr.f32.mxu0 %v6218_v17  ;;  %3270 = vmatprep.mubr.f32.mxu1 %v6219_v53  ;;  %v2625_v49 = vpop.f32.mrf.mxu0  ;;  %v2984_v40 = vpop.f32.mrf.mxu1  ;;  %v6230_v17 = vld [vmem:[%s6730_s6 + $0xa8] sm:$0xff]  ;;  %v6231_v53 = vld [vmem:[%s6730_s6 + $0xb8] sm:$0xff] }
 0x2f6   : > { %5528 = vst [vmem:[%s8990_s20 + $0x5e0] sm:$0xff] %v5332_v41  ;;  %v5118_v21 = vmul.f32 %v9634_v51, %v2555_v43  ;;  %v9651_v48 = vadd.f32 %v2984_v40, %v2625_v49  ;;  %3699 = vmatpush2.msra.mxu1 %v1061_v22  ;;  %v6229_v41 = vld [vmem:[%s6730_s6 + $0x70] sm:$0xff] }
 0x2f7   : > { %v5333_v55 = vadd.f32 %v8973_v0, %v5115_v9  ;;  %v2557_v18 = vadd.f32 %v2556_v52, %v2198_v4  ;;  %v2627_v16 = vpop.f32.mrf.mxu0  ;;  %v2986_v39 = vpop.f32.mrf.mxu1 }
 0x2f8   : > { %2912 = vmatmul.mubr.f32.gmra.mxu0 %v6220_v34  ;;  %3271 = vmatmul.mubr.f32.gmra.mxu1 %v6221_v31  ;;  %v5336_v24 = vadd.f32 %v8970_v57, %v5118_v21  ;;  %v9658_v47 = vadd.f32 %v2986_v39, %v2627_v16  ;;  %v6233_v21 = vld [vmem:[%s6730_s6 + $0xb0] sm:$0xff]  ;;  %v6234_v31 = vld [vmem:[%s6730_s6 + $0xe8] sm:$0xff]  ;;  %v6235_v16 = vld [vmem:[%s6730_s6 + $0xf8] sm:$0xff] }
 0x2f9   : > { %5529 = vst [vmem:[%s8990_s20 + $0x5e8] sm:$0xff] %v5333_v55  ;;  %v5119_v50 = vmul.f32 %v9634_v51, %v2557_v18  ;;  %3341 = vmatprep.mubr.f32.mxu0 %v6222_v61  ;;  %v2631_v7 = vpop.f32.mrf.mxu0  ;;  %v2990_v28 = vpop.f32.mrf.mxu1  ;;  %3700 = vmatprep.mubr.f32.mxu1 %v6223_v45  ;;  %v6232_v55 = vld [vmem:[%s6730_s6 + $0xa0] sm:$0xff] }
 0x2fa   : > { %5532 = vst [vmem:[%s8990_s20 + $0x600] sm:$0xff] %v5336_v24  ;;  %v9664_v57 = vadd.f32 %v2990_v28, %v2631_v7  ;;  %v6236_v61 = vld [vmem:[%s6730_s6 + $0xe0] sm:$0xff]  ;;  %v6237_v7 = vld [vmem:[%s6730_s6 + $0xf0] sm:$0xff] }
 0x2fb   : > { %v5337_v63 = vadd.f32 %v8973_v0, %v5119_v50  ;;  %v2633_v20 = vpop.f32.mrf.mxu0  ;;  %v2992_v60 = vpop.f32.mrf.mxu1  ;;  %v6276_v51 = vld [vmem:[%s6730_s6 + $0x360] sm:$0xff] }
 0x2fc   : > { %3342 = vmatmul.mubr.f32.vlgmr.msra.gmra.mxu0 %v6224_v27  ;;  %3701 = vmatmul.mubr.f32.vlgmr.msra.gmra.mxu1 %v6225_v19  ;;  %v9669_v23 = vadd.f32 %v2992_v60, %v2633_v20  ;;  %v6238_v27 = vld [vmem:[%s6730_s6 + $0x128] sm:$0xff]  ;;  %v6239_v19 = vld [vmem:[%s6730_s6 + $0x138] sm:$0xff] }
 0x2fd   : > { %5533 = vst [vmem:[%s8990_s20 + $0x608] sm:$0xff] %v5337_v63  ;;  %3347 = vmatprep.mubr.f32.mxu0 %v6226_v8  ;;  %3706 = vmatprep.mubr.f32.mxu1 %v6227_v56  ;;  %v2637_v0 = vpop.f32.mrf.mxu0  ;;  %v2996_v46 = vpop.f32.mrf.mxu1  ;;  %v6240_v56 = vld [vmem:[%s6730_s6 + $0x120] sm:$0xff] }
 0x2fe   : > { %v9673_v52 = vadd.f32 %v2996_v46, %v2637_v0  ;;  %v6241_v0 = vld [vmem:[%s6730_s6 + $0x130] sm:$0xff] }
 0x2ff   : > { %v2639_v9 = vpop.f32.mrf.mxu0  ;;  %v2998_v43 = vpop.f32.mrf.mxu1 }
 0x300   : > { %3348 = vmatmul.mubr.f32.gmra.mxu0 %v6228_v42  ;;  %3707 = vmatmul.mubr.f32.gmra.mxu1 %v6229_v41  ;;  %v9677_v4 = vadd.f32 %v2998_v43, %v2639_v9  ;;  %v6242_v9 = vld [vmem:[%s6730_s6 + $0x168] sm:$0xff]  ;;  %v6243_v43 = vld [vmem:[%s6730_s6 + $0x178] sm:$0xff] }
 0x301   : > { %3353 = vmatprep.mubr.f32.mxu0 %v6230_v17  ;;  %3712 = vmatprep.mubr.f32.mxu1 %v6231_v53  ;;  %v2643_v49 = vpop.f32.mrf.mxu0  ;;  %v3002_v40 = vpop.f32.mrf.mxu1 }
 0x302   : > { %v9681_v26 = vadd.f32 %v3002_v40, %v2643_v49  ;;  %v6244_v40 = vld [vmem:[%s6730_s6 + $0x160] sm:$0xff] }
 0x303   : > { %v2645_v18 = vpop.f32.mrf.mxu0  ;;  %v3004_v22 = vpop.f32.mrf.mxu1 }
 0x304   : > { %3354 = vmatmul.mubr.f32.gmra.mxu0 %v6232_v55  ;;  %3713 = vmatmul.mubr.f32.gmra.mxu1 %v6233_v21  ;;  %v9685_v34 = vadd.f32 %v3004_v22, %v2645_v18  ;;  %v6245_v55 = vld [vmem:[%s6730_s6 + $0x170] sm:$0xff]  ;;  %v6246_v22 = vld [vmem:[%s6730_s6 + $0x1a8] sm:$0xff] }
 0x305   : > { %3359 = vmatprep.mubr.f32.mxu0 %v6234_v31  ;;  %3718 = vmatprep.mubr.f32.mxu1 %v6235_v16  ;;  %v2649_v39 = vpop.f32.mrf.mxu0  ;;  %v3008_v24 = vpop.f32.mrf.mxu1  ;;  %v6247_v31 = vld [vmem:[%s6730_s6 + $0x1b8] sm:$0xff] }
 0x306   : > { %v9689_v50 = vadd.f32 %v3008_v24, %v2649_v39 }
 0x307   : > { %v2651_v28 = vpop.f32.mrf.mxu0  ;;  %v3010_v45 = vpop.f32.mrf.mxu1 }
 0x308   : > { %3360 = vmatmul.mubr.f32.gmra.mxu0 %v6236_v61  ;;  %3719 = vmatmul.mubr.f32.gmra.mxu1 %v6237_v7  ;;  %v9693_v63 = vadd.f32 %v3010_v45, %v2651_v28  ;;  %v6248_v61 = vld [vmem:[%s6730_s6 + $0x1a0] sm:$0xff]  ;;  %v6249_v7 = vld [vmem:[%s6730_s6 + $0x1b0] sm:$0xff] }
 0x309   : > { %3365 = vmatprep.mubr.f32.mxu0 %v6238_v27  ;;  %3724 = vmatprep.mubr.f32.mxu1 %v6239_v19  ;;  %v2655_v20 = vpop.f32.mrf.mxu0  ;;  %v3014_v60 = vpop.f32.mrf.mxu1  ;;  %v6250_v27 = vld [vmem:[%s6730_s6 + $0x1e8] sm:$0xff]  ;;  %v6251_v19 = vld [vmem:[%s6730_s6 + $0x1f8] sm:$0xff] }
 0x30a   : > { %v9697_v8 = vadd.f32 %v3014_v60, %v2655_v20 }
 0x30b   : > { %v2657_v46 = vpop.f32.mrf.mxu0  ;;  %v3016_v42 = vpop.f32.mrf.mxu1 }
 0x30c   : > { %3366 = vmatmul.mubr.f32.gmra.mxu0 %v6240_v56  ;;  %3725 = vmatmul.mubr.f32.gmra.mxu1 %v6241_v0  ;;  %v9701_v41 = vadd.f32 %v3016_v42, %v2657_v46  ;;  %v6252_v46 = vld [vmem:[%s6730_s6 + $0x1e0] sm:$0xff]  ;;  %v6253_v42 = vld [vmem:[%s6730_s6 + $0x1f0] sm:$0xff] }
 0x30d   : > { %3371 = vmatprep.mubr.f32.mxu0 %v6242_v9  ;;  %3730 = vmatprep.mubr.f32.mxu1 %v6243_v43  ;;  %v3020_v17 = vpop.f32.mrf.mxu1  ;;  %v2661_v53 = vpop.f32.mrf.mxu0 }
 0x30e   : > { %v9705_v49 = vadd.f32 %v3020_v17, %v2661_v53  ;;  %v6254_v17 = vld [vmem:[%s6730_s6 + $0x228] sm:$0xff]  ;;  %v6255_v53 = vld [vmem:[%s6730_s6 + $0x238] sm:$0xff] }
 0x30f   : > { %v3022_v21 = vpop.f32.mrf.mxu1  ;;  %v2663_v18 = vpop.f32.mrf.mxu0 }
 0x310   : > { %3372 = vmatmul.mubr.f32.gmra.mxu0 %v6244_v40  ;;  %3731 = vmatmul.mubr.f32.gmra.mxu1 %v6245_v55  ;;  %v9711_v16 = vadd.f32 %v3022_v21, %v2663_v18 }
 0x311   : > { %3377 = vmatprep.mubr.f32.mxu0 %v6246_v22  ;;  %3736 = vmatprep.mubr.f32.mxu1 %v6247_v31  ;;  %v2667_v39 = vpop.f32.mrf.mxu0  ;;  %v3026_v24 = vpop.f32.mrf.mxu1  ;;  %v6256_v22 = vld [vmem:[%s6730_s6 + $0x220] sm:$0xff]  ;;  %v6257_v31 = vld [vmem:[%s6730_s6 + $0x230] sm:$0xff] }
 0x312   : > { %v9715_v28 = vadd.f32 %v3026_v24, %v2667_v39  ;;  %v6258_v24 = vld [vmem:[%s6730_s6 + $0x268] sm:$0xff] }
 0x313   : > { %v2669_v45 = vpop.f32.mrf.mxu0  ;;  %v3028_v20 = vpop.f32.mrf.mxu1 }
 0x314   : > { %3378 = vmatmul.mubr.f32.gmra.mxu0 %v6248_v61  ;;  %3737 = vmatmul.mubr.f32.gmra.mxu1 %v6249_v7  ;;  %v9719_v60 = vadd.f32 %v3028_v20, %v2669_v45  ;;  %v6259_v61 = vld [vmem:[%s6730_s6 + $0x278] sm:$0xff] }
 0x315   : > { %3383 = vmatprep.mubr.f32.mxu0 %v6250_v27  ;;  %3742 = vmatprep.mubr.f32.mxu1 %v6251_v19  ;;  %v2673_v56 = vpop.f32.mrf.mxu0  ;;  %v3032_v0 = vpop.f32.mrf.mxu1 }
 0x316   : > { %v9723_v9 = vadd.f32 %v3032_v0, %v2673_v56  ;;  %v6260_v56 = vld [vmem:[%s6730_s6 + $0x260] sm:$0xff]  ;;  %v6261_v0 = vld [vmem:[%s6730_s6 + $0x270] sm:$0xff] }
 0x317   : > { %v2675_v43 = vpop.f32.mrf.mxu0  ;;  %v3034_v40 = vpop.f32.mrf.mxu1 }
 0x318   : > { %3384 = vmatmul.mubr.f32.gmra.mxu0 %v6252_v46  ;;  %3743 = vmatmul.mubr.f32.gmra.mxu1 %v6253_v42  ;;  %v9727_v55 = vadd.f32 %v3034_v40, %v2675_v43  ;;  %v6262_v42 = vld [vmem:[%s6730_s6 + $0x2a8] sm:$0xff]  ;;  %v6263_v43 = vld [vmem:[%s6730_s6 + $0x2b8] sm:$0xff] }
 0x319   : > { %3389 = vmatprep.mubr.f32.mxu0 %v6254_v17  ;;  %3748 = vmatprep.mubr.f32.mxu1 %v6255_v53  ;;  %v2679_v21 = vpop.f32.mrf.mxu0  ;;  %v3038_v18 = vpop.f32.mrf.mxu1 }
 0x31a   : > { %v9731_v39 = vadd.f32 %v3038_v18, %v2679_v21 }
 0x31b   : > { %v2681_v7 = vpop.f32.mrf.mxu0  ;;  %v3040_v45 = vpop.f32.mrf.mxu1 }
 0x31c   : > { %3390 = vmatmul.mubr.f32.gmra.mxu0 %v6256_v22  ;;  %3749 = vmatmul.mubr.f32.gmra.mxu1 %v6257_v31  ;;  %v9735_v27 = vadd.f32 %v3040_v45, %v2681_v7  ;;  %v6264_v22 = vld [vmem:[%s6730_s6 + $0x2a0] sm:$0xff]  ;;  %v6265_v31 = vld [vmem:[%s6730_s6 + $0x2b0] sm:$0xff]  ;;  %v6267_v7 = vld [vmem:[%s6730_s6 + $0x2f8] sm:$0xff] }
 0x31d   : > { %3395 = vmatprep.mubr.f32.mxu0 %v6258_v24  ;;  %3754 = vmatprep.mubr.f32.mxu1 %v6259_v61  ;;  %v3044_v20 = vpop.f32.mrf.mxu1  ;;  %v6266_v61 = vld [vmem:[%s6730_s6 + $0x2e8] sm:$0xff] }
 0x31e   : > { %v2685_v19 = vpop.f32.mrf.mxu0 }
 0x31f   : > { %v9739_v46 = vadd.f32 %v3044_v20, %v2685_v19  ;;  %v3046_v53 = vpop.f32.mrf.mxu1 }
 0x320   : > { %3396 = vmatmul.mubr.f32.gmra.mxu0 %v6260_v56  ;;  %3755 = vmatmul.mubr.f32.gmra.mxu1 %v6261_v0  ;;  %v2687_v17 = vpop.f32.mrf.mxu0 }
 0x321   : > { %3401 = vmatprep.mubr.f32.mxu0 %v6262_v42  ;;  %3760 = vmatprep.mubr.f32.mxu1 %v6263_v43  ;;  %v9743_v40 = vadd.f32 %v3046_v53, %v2687_v17  ;;  %v3050_v18 = vpop.f32.mrf.mxu1  ;;  %v6268_v42 = vld [vmem:[%s6730_s6 + $0x2e0] sm:$0xff]  ;;  %v6269_v43 = vld [vmem:[%s6730_s6 + $0x2f0] sm:$0xff]  ;;  %v6270_v53 = vld [vmem:[%s6730_s6 + $0x328] sm:$0xff] }
 0x322   : > { %v2691_v21 = vpop.f32.mrf.mxu0 }
 0x323   : > { %v9747_v24 = vadd.f32 %v3050_v18, %v2691_v21  ;;  %v3052_v19 = vpop.f32.mrf.mxu1  ;;  %v6271_v21 = vld [vmem:[%s6730_s6 + $0x338] sm:$0xff] }
 0x324   : > { %3402 = vmatmul.mubr.f32.gmra.mxu0 %v6264_v22  ;;  %3761 = vmatmul.mubr.f32.gmra.mxu1 %v6265_v31  ;;  %v2693_v45 = vpop.f32.mrf.mxu0 }
 0x325   : > { %3407 = vmatprep.mubr.f32.mxu0 %v6266_v61  ;;  %3766 = vmatprep.mubr.f32.mxu1 %v6267_v7  ;;  %v9751_v20 = vadd.f32 %v3052_v19, %v2693_v45  ;;  %v3056_v0 = vpop.f32.mrf.mxu1  ;;  %v6272_v45 = vld [vmem:[%s6730_s6 + $0x320] sm:$0xff]  ;;  %v6273_v19 = vld [vmem:[%s6730_s6 + $0x330] sm:$0xff] }
 0x326   : > { %v2697_v56 = vpop.f32.mrf.mxu0 }
 0x327   : > { %v9755_v17 = vadd.f32 %v3056_v0, %v2697_v56  ;;  %v3058_v22 = vpop.f32.mrf.mxu1  ;;  %v6274_v0 = vld [vmem:[%s6730_s6 + $0x368] sm:$0xff] }
 0x328   : > { %3408 = vmatmul.mubr.f32.gmra.mxu0 %v6268_v42  ;;  %3767 = vmatmul.mubr.f32.gmra.mxu1 %v6269_v43  ;;  %v2699_v18 = vpop.f32.mrf.mxu0  ;;  %v6275_v42 = vld [vmem:[%s6730_s6 + $0x378] sm:$0xff] }
 0x329   : > { %3413 = vmatprep.mubr.f32.mxu0 %v6270_v53  ;;  %3772 = vmatprep.mubr.f32.mxu1 %v6271_v21  ;;  %v9759_v31 = vadd.f32 %v3058_v22, %v2699_v18 }
 0x32a   : > { %v2703_v61 = vpop.f32.mrf.mxu0  ;;  %v3062_v7 = vpop.f32.mrf.mxu1 }
 0x32b   : > { %v9763_v56 = vadd.f32 %v3062_v7, %v2703_v61  ;;  %v6278_v7 = vld [vmem:[%s6730_s6 + $0x3a8] sm:$0xff] }
 0x32c   : > { %3414 = vmatmul.mubr.f32.gmra.mxu0 %v6272_v45  ;;  %3773 = vmatmul.mubr.f32.gmra.mxu1 %v6273_v19  ;;  %v2705_v43 = vpop.f32.mrf.mxu0  ;;  %v3064_v53 = vpop.f32.mrf.mxu1  ;;  %v6277_v45 = vld [vmem:[%s6730_s6 + $0x370] sm:$0xff]  ;;  %v6279_v19 = vld [vmem:[%s6730_s6 + $0x3b8] sm:$0xff] }
 0x32d   : > { %3419 = vmatprep.mubr.f32.mxu0 %v6274_v0  ;;  %3778 = vmatprep.mubr.f32.mxu1 %v6275_v42  ;;  %v9767_v21 = vadd.f32 %v3064_v53, %v2705_v43 }
 0x32e   : > { %v2709_v18 = vpop.f32.mrf.mxu0  ;;  %v3068_v22 = vpop.f32.mrf.mxu1 }
 0x32f   : > { %v9771_v61 = vadd.f32 %v3068_v22, %v2709_v18  ;;  %v6282_v22 = vld [vmem:[%s6730_s6 + $0x3e8] sm:$0xff] }
 0x330   : > { %3420 = vmatmul.mubr.f32.gmra.mxu0 %v6276_v51  ;;  %3779 = vmatmul.mubr.f32.gmra.mxu1 %v6277_v45  ;;  %v2711_v0 = vpop.f32.mrf.mxu0  ;;  %v3070_v42 = vpop.f32.mrf.mxu1  ;;  %v6281_v51 = vld [vmem:[%s6730_s6 + $0x3b0] sm:$0xff]  ;;  %v6283_v45 = vld [vmem:[%s6730_s6 + $0x3f8] sm:$0xff] }
 0x331   : > { %3425 = vmatprep.mubr.f32.mxu0 %v6278_v7  ;;  %3784 = vmatprep.mubr.f32.mxu1 %v6279_v19  ;;  %v9775_v43 = vadd.f32 %v3070_v42, %v2711_v0 }
 0x332   : > { %v2715_v53 = vpop.f32.mrf.mxu0  ;;  %v3074_v62 = vpop.f32.mrf.mxu1 }
 0x333   : > { %v9779_v18 = vadd.f32 %v3074_v62, %v2715_v53  ;;  %v6286_v53 = vld [vmem:[%s6730_s6 + $0x428] sm:$0xff] }
 0x334   : > { %3426 = vmatmul.mubr.f32.gmra.mxu0 %v6280_v12  ;;  %3785 = vmatmul.mubr.f32.gmra.mxu1 %v6281_v51  ;;  %v2717_v7 = vpop.f32.mrf.mxu0  ;;  %v3076_v19 = vpop.f32.mrf.mxu1  ;;  %v6285_v12 = vld [vmem:[%s6730_s6 + $0x3f0] sm:$0xff]  ;;  %v6287_v51 = vld [vmem:[%s6730_s6 + $0x438] sm:$0xff] }
 0x335   : > { %3431 = vmatprep.mubr.f32.mxu0 %v6282_v22  ;;  %3790 = vmatprep.mubr.f32.mxu1 %v6283_v45  ;;  %v9783_v0 = vadd.f32 %v3076_v19, %v2717_v7 }
 0x336   : > { %v2721_v42 = vpop.f32.mrf.mxu0  ;;  %v3080_v10 = vpop.f32.mrf.mxu1 }
 0x337   : > { %v9787_v62 = vadd.f32 %v3080_v10, %v2721_v42  ;;  %v6290_v42 = vld [vmem:[%s6730_s6 + $0x468] sm:$0xff] }
 0x338   : > { %3432 = vmatmul.mubr.f32.gmra.mxu0 %v6284_v37  ;;  %3791 = vmatmul.mubr.f32.gmra.mxu1 %v6285_v12  ;;  %v2723_v22 = vpop.f32.mrf.mxu0  ;;  %v3082_v45 = vpop.f32.mrf.mxu1  ;;  %v6289_v37 = vld [vmem:[%s6730_s6 + $0x430] sm:$0xff]  ;;  %v6291_v12 = vld [vmem:[%s6730_s6 + $0x478] sm:$0xff] }
 0x339   : > { %3437 = vmatprep.mubr.f32.mxu0 %v6286_v53  ;;  %3796 = vmatprep.mubr.f32.mxu1 %v6287_v51  ;;  %v9791_v7 = vadd.f32 %v3082_v45, %v2723_v22 }
 0x33a   : > { %v2727_v19 = vpop.f32.mrf.mxu0  ;;  %v3086_v54 = vpop.f32.mrf.mxu1 }
 0x33b   : > { %v9795_v10 = vadd.f32 %v3086_v54, %v2727_v19  ;;  %v6294_v19 = vld [vmem:[%s6730_s6 + $0x4a8] sm:$0xff] }
 0x33c   : > { %3438 = vmatmul.mubr.f32.gmra.mxu0 %v6288_v11  ;;  %3797 = vmatmul.mubr.f32.gmra.mxu1 %v6289_v37  ;;  %v2729_v53 = vpop.f32.mrf.mxu0  ;;  %v3088_v51 = vpop.f32.mrf.mxu1  ;;  %v6293_v11 = vld [vmem:[%s6730_s6 + $0x470] sm:$0xff]  ;;  %v6295_v37 = vld [vmem:[%s6730_s6 + $0x4b8] sm:$0xff] }
 0x33d   : > { %3443 = vmatprep.mubr.f32.mxu0 %v6290_v42  ;;  %3802 = vmatprep.mubr.f32.mxu1 %v6291_v12  ;;  %v9799_v22 = vadd.f32 %v3088_v51, %v2729_v53 }
 0x33e   : > { %v2733_v45 = vpop.f32.mrf.mxu0  ;;  %v3092_v14 = vpop.f32.mrf.mxu1 }
 0x33f   : > { %v9803_v54 = vadd.f32 %v3092_v14, %v2733_v45  ;;  %v6298_v45 = vld [vmem:[%s6730_s6 + $0x4e8] sm:$0xff] }
 0x340   : > { %3444 = vmatmul.mubr.f32.gmra.mxu0 %v6292_v25  ;;  %3803 = vmatmul.mubr.f32.gmra.mxu1 %v6293_v11  ;;  %v2735_v42 = vpop.f32.mrf.mxu0  ;;  %v3094_v12 = vpop.f32.mrf.mxu1  ;;  %v6297_v25 = vld [vmem:[%s6730_s6 + $0x4b0] sm:$0xff]  ;;  %v6299_v11 = vld [vmem:[%s6730_s6 + $0x4f8] sm:$0xff] }
 0x341   : > { %3449 = vmatprep.mubr.f32.mxu0 %v6294_v19  ;;  %3808 = vmatprep.mubr.f32.mxu1 %v6295_v37  ;;  %v9807_v53 = vadd.f32 %v3094_v12, %v2735_v42 }
 0x342   : > { %v2739_v51 = vpop.f32.mrf.mxu0  ;;  %v3098_v38 = vpop.f32.mrf.mxu1 }
 0x343   : > { %v9811_v14 = vadd.f32 %v3098_v38, %v2739_v51  ;;  %v6302_v51 = vld [vmem:[%s6730_s6 + $0x528] sm:$0xff] }
 0x344   : > { %3450 = vmatmul.mubr.f32.gmra.mxu0 %v6296_v1  ;;  %3809 = vmatmul.mubr.f32.gmra.mxu1 %v6297_v25  ;;  %v2741_v19 = vpop.f32.mrf.mxu0  ;;  %v3100_v37 = vpop.f32.mrf.mxu1  ;;  %v6301_v1 = vld [vmem:[%s6730_s6 + $0x4f0] sm:$0xff]  ;;  %v6303_v25 = vld [vmem:[%s6730_s6 + $0x538] sm:$0xff] }
 0x345   : > { %3455 = vmatprep.mubr.f32.mxu0 %v6298_v45  ;;  %3814 = vmatprep.mubr.f32.mxu1 %v6299_v11  ;;  %v9815_v42 = vadd.f32 %v3100_v37, %v2741_v19 }
 0x346   : > { %v2745_v12 = vpop.f32.mrf.mxu0  ;;  %v3104_v32 = vpop.f32.mrf.mxu1 }
 0x347   : > { %v9819_v38 = vadd.f32 %v3104_v32, %v2745_v12  ;;  %v6306_v12 = vld [vmem:[%s6730_s6 + $0x568] sm:$0xff] }
 0x348   : > { %3456 = vmatmul.mubr.f32.gmra.mxu0 %v6300_v6  ;;  %3815 = vmatmul.mubr.f32.gmra.mxu1 %v6301_v1  ;;  %v2747_v45 = vpop.f32.mrf.mxu0  ;;  %v3106_v11 = vpop.f32.mrf.mxu1  ;;  %v6305_v6 = vld [vmem:[%s6730_s6 + $0x530] sm:$0xff]  ;;  %v6307_v1 = vld [vmem:[%s6730_s6 + $0x578] sm:$0xff] }
 0x349   : > { %10925 = vst [vmem:[#allocation41_spill] sm:$0xff] %v9819_v38  ;;  %3461 = vmatprep.mubr.f32.mxu0 %v6302_v51  ;;  %3820 = vmatprep.mubr.f32.mxu1 %v6303_v25  ;;  %v9823_v19 = vadd.f32 %v3106_v11, %v2747_v45 }
 0x34a   : > { %v2751_v37 = vpop.f32.mrf.mxu0  ;;  %v3110_v5 = vpop.f32.mrf.mxu1 }
 0x34b   : > { %10926 = vst [vmem:[#allocation43_spill] sm:$0xff] %v9823_v19  ;;  %v9827_v32 = vadd.f32 %v3110_v5, %v2751_v37  ;;  %v6310_v37 = vld [vmem:[%s6730_s6 + $0x5a8] sm:$0xff] }
 0x34c   : > { %3462 = vmatmul.mubr.f32.gmra.mxu0 %v6304_v58  ;;  %3821 = vmatmul.mubr.f32.gmra.mxu1 %v6305_v6  ;;  %v2753_v51 = vpop.f32.mrf.mxu0  ;;  %v3112_v25 = vpop.f32.mrf.mxu1  ;;  %v6309_v58 = vld [vmem:[%s6730_s6 + $0x570] sm:$0xff]  ;;  %v6311_v6 = vld [vmem:[%s6730_s6 + $0x5b8] sm:$0xff] }
 0x34d   : > { %10927 = vst [vmem:[#allocation44_spill] sm:$0xff] %v9827_v32  ;;  %3467 = vmatprep.mubr.f32.mxu0 %v6306_v12  ;;  %3826 = vmatprep.mubr.f32.mxu1 %v6307_v1  ;;  %v9831_v45 = vadd.f32 %v3112_v25, %v2753_v51 }
 0x34e   : > { %v2757_v11 = vpop.f32.mrf.mxu0  ;;  %v3116_v30 = vpop.f32.mrf.mxu1 }
 0x34f   : > { %10928 = vst [vmem:[#allocation46_spill] sm:$0xff] %v9831_v45  ;;  %v9835_v5 = vadd.f32 %v3116_v30, %v2757_v11  ;;  %v6314_v11 = vld [vmem:[%s6730_s6 + $0x5e8] sm:$0xff] }
 0x350   : > { %3468 = vmatmul.mubr.f32.gmra.mxu0 %v6308_v36  ;;  %3827 = vmatmul.mubr.f32.gmra.mxu1 %v6309_v58  ;;  %v2759_v12 = vpop.f32.mrf.mxu0  ;;  %v3118_v1 = vpop.f32.mrf.mxu1  ;;  %v6313_v36 = vld [vmem:[%s6730_s6 + $0x5b0] sm:$0xff]  ;;  %v6315_v58 = vld [vmem:[%s6730_s6 + $0x5f8] sm:$0xff] }
 0x351   : > { %10929 = vst [vmem:[#allocation47_spill] sm:$0xff] %v9835_v5  ;;  %3473 = vmatprep.mubr.f32.mxu0 %v6310_v37  ;;  %3832 = vmatprep.mubr.f32.mxu1 %v6311_v6  ;;  %v9839_v51 = vadd.f32 %v3118_v1, %v2759_v12  ;;  %v6316_v5 = vld [vmem:[%s6730_s6 + $0x5e0] sm:$0xff] }
 0x352   : > { %v2763_v25 = vpop.f32.mrf.mxu0  ;;  %v3122_v3 = vpop.f32.mrf.mxu1 }
 0x353   : > { %10930 = vst [vmem:[#allocation49_spill] sm:$0xff] %v9839_v51  ;;  %v9843_v30 = vadd.f32 %v3122_v3, %v2763_v25  ;;  %v6318_v25 = vld [vmem:[%s6730_s6 + $0x628] sm:$0xff] }
 0x354   : > { %3474 = vmatmul.mubr.f32.gmra.mxu0 %v6312_v35  ;;  %3833 = vmatmul.mubr.f32.gmra.mxu1 %v6313_v36  ;;  %v2765_v37 = vpop.f32.mrf.mxu0  ;;  %v3124_v6 = vpop.f32.mrf.mxu1  ;;  %v6317_v35 = vld [vmem:[%s6730_s6 + $0x5f0] sm:$0xff]  ;;  %v6319_v36 = vld [vmem:[%s6730_s6 + $0x638] sm:$0xff] }
 0x355   : > { %10931 = vst [vmem:[#allocation51_spill] sm:$0xff] %v9843_v30  ;;  %3479 = vmatprep.mubr.f32.mxu0 %v6314_v11  ;;  %3838 = vmatprep.mubr.f32.mxu1 %v6315_v58  ;;  %v9847_v12 = vadd.f32 %v3124_v6, %v2765_v37  ;;  %v6320_v30 = vld [vmem:[%s6730_s6 + $0x620] sm:$0xff] }
 0x356   : > { %v2769_v1 = vpop.f32.mrf.mxu0  ;;  %v3128_v51 = vpop.f32.mrf.mxu1 }
 0x357   : > { %10932 = vst [vmem:[#allocation52_spill] sm:$0xff] %v9847_v12  ;;  %v9851_v3 = vadd.f32 %v3128_v51, %v2769_v1  ;;  %v6322_v1 = vld [vmem:[%s6730_s6 + $0x668] sm:$0xff] }
 0x358   : > { %3480 = vmatmul.mubr.f32.gmra.mxu0 %v6316_v5  ;;  %3839 = vmatmul.mubr.f32.gmra.mxu1 %v6317_v35  ;;  %v2771_v11 = vpop.f32.mrf.mxu0  ;;  %v3130_v58 = vpop.f32.mrf.mxu1  ;;  %v6321_v5 = vld [vmem:[%s6730_s6 + $0x630] sm:$0xff]  ;;  %v6323_v35 = vld [vmem:[%s6730_s6 + $0x678] sm:$0xff] }
 0x359   : > { %10933 = vst [vmem:[#allocation53_spill] sm:$0xff] %v9851_v3  ;;  %3485 = vmatprep.mubr.f32.mxu0 %v6318_v25  ;;  %3844 = vmatprep.mubr.f32.mxu1 %v6319_v36  ;;  %v9855_v37 = vadd.f32 %v3130_v58, %v2771_v11  ;;  %v6324_v3 = vld [vmem:[%s6730_s6 + $0x660] sm:$0xff] }
 0x35a   : > { %v2775_v6 = vpop.f32.mrf.mxu0  ;;  %v3134_v12 = vpop.f32.mrf.mxu1 }
 0x35b   : > { %10934 = vst [vmem:[#allocation54_spill] sm:$0xff] %v9855_v37  ;;  %v9859_v51 = vadd.f32 %v3134_v12, %v2775_v6  ;;  %v6326_v6 = vld [vmem:[%s6730_s6 + $0x6a8] sm:$0xff] }
 0x35c   : > { %3486 = vmatmul.mubr.f32.gmra.mxu0 %v6320_v30  ;;  %3845 = vmatmul.mubr.f32.gmra.mxu1 %v6321_v5  ;;  %v2777_v25 = vpop.f32.mrf.mxu0  ;;  %v3136_v36 = vpop.f32.mrf.mxu1  ;;  %v6325_v30 = vld [vmem:[%s6730_s6 + $0x670] sm:$0xff]  ;;  %v6327_v5 = vld [vmem:[%s6730_s6 + $0x6b8] sm:$0xff] }
 0x35d   : > { %10935 = vst [vmem:[#allocation55_spill] sm:$0xff] %v9859_v51  ;;  %3491 = vmatprep.mubr.f32.mxu0 %v6322_v1  ;;  %3850 = vmatprep.mubr.f32.mxu1 %v6323_v35  ;;  %v9863_v11 = vadd.f32 %v3136_v36, %v2777_v25  ;;  %v6328_v51 = vld [vmem:[%s6730_s6 + $0x6a0] sm:$0xff] }
 0x35e   : > { %v2781_v58 = vpop.f32.mrf.mxu0  ;;  %v3140_v37 = vpop.f32.mrf.mxu1 }
 0x35f   : > { %10936 = vst [vmem:[#allocation56_spill] sm:$0xff] %v9863_v11  ;;  %v9867_v12 = vadd.f32 %v3140_v37, %v2781_v58  ;;  %v6330_v58 = vld [vmem:[%s6730_s6 + $0x6e8] sm:$0xff] }
 0x360   : > { %3492 = vmatmul.mubr.f32.gmra.mxu0 %v6324_v3  ;;  %3851 = vmatmul.mubr.f32.gmra.mxu1 %v6325_v30  ;;  %v2783_v1 = vpop.f32.mrf.mxu0  ;;  %v3142_v35 = vpop.f32.mrf.mxu1  ;;  %v6329_v3 = vld [vmem:[%s6730_s6 + $0x6b0] sm:$0xff]  ;;  %v6331_v30 = vld [vmem:[%s6730_s6 + $0x6f8] sm:$0xff] }
 0x361   : > { %10937 = vst [vmem:[#allocation57_spill] sm:$0xff] %v9867_v12  ;;  %3497 = vmatprep.mubr.f32.mxu0 %v6326_v6  ;;  %3856 = vmatprep.mubr.f32.mxu1 %v6327_v5  ;;  %v9871_v25 = vadd.f32 %v3142_v35, %v2783_v1  ;;  %v6332_v12 = vld [vmem:[%s6730_s6 + $0x6e0] sm:$0xff] }
 0x362   : > { %v2787_v36 = vpop.f32.mrf.mxu0  ;;  %v3146_v11 = vpop.f32.mrf.mxu1 }
 0x363   : > { %10938 = vst [vmem:[#allocation12_spill] sm:$0xff] %v9871_v25  ;;  %v9875_v37 = vadd.f32 %v3146_v11, %v2787_v36  ;;  %v6334_v36 = vld [vmem:[%s6730_s6 + $0x728] sm:$0xff] }
 0x364   : > { %3498 = vmatmul.mubr.f32.gmra.mxu0 %v6328_v51  ;;  %3857 = vmatmul.mubr.f32.gmra.mxu1 %v6329_v3  ;;  %v2789_v6 = vpop.f32.mrf.mxu0  ;;  %v3148_v5 = vpop.f32.mrf.mxu1  ;;  %v6333_v51 = vld [vmem:[%s6730_s6 + $0x6f0] sm:$0xff]  ;;  %v6335_v3 = vld [vmem:[%s6730_s6 + $0x738] sm:$0xff] }
 0x365   : > { %10939 = vst [vmem:[#allocation62_spill] sm:$0xff] %v9875_v37  ;;  %3503 = vmatprep.mubr.f32.mxu0 %v6330_v58  ;;  %3862 = vmatprep.mubr.f32.mxu1 %v6331_v30  ;;  %v9879_v1 = vadd.f32 %v3148_v5, %v2789_v6  ;;  %v6336_v37 = vld [vmem:[%s6730_s6 + $0x720] sm:$0xff] }
 0x366   : > { %v2793_v35 = vpop.f32.mrf.mxu0  ;;  %v3152_v25 = vpop.f32.mrf.mxu1 }
 0x367   : > { %10940 = vst [vmem:[#allocation68_spill] sm:$0xff] %v9879_v1  ;;  %v9883_v11 = vadd.f32 %v3152_v25, %v2793_v35  ;;  %v6338_v35 = vld [vmem:[%s6730_s6 + $0x768] sm:$0xff] }
 0x368   : > { %3504 = vmatmul.mubr.f32.gmra.mxu0 %v6332_v12  ;;  %3863 = vmatmul.mubr.f32.gmra.mxu1 %v6333_v51  ;;  %v2795_v58 = vpop.f32.mrf.mxu0  ;;  %v3154_v30 = vpop.f32.mrf.mxu1  ;;  %v6337_v12 = vld [vmem:[%s6730_s6 + $0x730] sm:$0xff]  ;;  %v6339_v51 = vld [vmem:[%s6730_s6 + $0x778] sm:$0xff] }
 0x369   : > { %10941 = vst [vmem:[#allocation14_spill] sm:$0xff] %v9883_v11  ;;  %3509 = vmatprep.mubr.f32.mxu0 %v6334_v36  ;;  %3868 = vmatprep.mubr.f32.mxu1 %v6335_v3  ;;  %v9887_v6 = vadd.f32 %v3154_v30, %v2795_v58  ;;  %v6340_v11 = vld [vmem:[%s6730_s6 + $0x760] sm:$0xff] }
 0x36a   : > { %v2799_v5 = vpop.f32.mrf.mxu0  ;;  %v3158_v1 = vpop.f32.mrf.mxu1 }
 0x36b   : > { %10942 = vst [vmem:[#allocation69_spill] sm:$0xff] %v9887_v6  ;;  %v9891_v25 = vadd.f32 %v3158_v1, %v2799_v5  ;;  %v6342_v5 = vld [vmem:[%s6730_s6 + $0x7a8] sm:$0xff] }
 0x36c   : > { %3510 = vmatmul.mubr.f32.gmra.mxu0 %v6336_v37  ;;  %3869 = vmatmul.mubr.f32.gmra.mxu1 %v6337_v12  ;;  %v2801_v36 = vpop.f32.mrf.mxu0  ;;  %v3160_v3 = vpop.f32.mrf.mxu1  ;;  %v6341_v37 = vld [vmem:[%s6730_s6 + $0x770] sm:$0xff]  ;;  %v6343_v12 = vld [vmem:[%s6730_s6 + $0x7b8] sm:$0xff] }
 0x36d   : > { %10943 = vst [vmem:[#allocation70_spill] sm:$0xff] %v9891_v25  ;;  %3515 = vmatprep.mubr.f32.mxu0 %v6338_v35  ;;  %3874 = vmatprep.mubr.f32.mxu1 %v6339_v51  ;;  %v9895_v58 = vadd.f32 %v3160_v3, %v2801_v36  ;;  %v6344_v25 = vld [vmem:[%s6730_s6 + $0x7a0] sm:$0xff] }
 0x36e   : > { %v2805_v30 = vpop.f32.mrf.mxu0  ;;  %v3164_v6 = vpop.f32.mrf.mxu1 }
 0x36f   : > { %10944 = vst [vmem:[#allocation15_spill] sm:$0xff] %v9895_v58  ;;  %v9899_v1 = vadd.f32 %v3164_v6, %v2805_v30  ;;  %v6346_v30 = vld [vmem:[%s6730_s6 + $0x7e8] sm:$0xff] }
 0x370   : > { %3516 = vmatmul.mubr.f32.gmra.mxu0 %v6340_v11  ;;  %3875 = vmatmul.mubr.f32.gmra.mxu1 %v6341_v37  ;;  %v2807_v35 = vpop.f32.mrf.mxu0  ;;  %v3166_v51 = vpop.f32.mrf.mxu1  ;;  %v6345_v11 = vld [vmem:[%s6730_s6 + $0x7b0] sm:$0xff]  ;;  %v6347_v37 = vld [vmem:[%s6730_s6 + $0x7f8] sm:$0xff] }
 0x371   : > { %10945 = vst [vmem:[#allocation17_spill] sm:$0xff] %v9899_v1  ;;  %3521 = vmatprep.mubr.f32.mxu0 %v6342_v5  ;;  %3880 = vmatprep.mubr.f32.mxu1 %v6343_v12  ;;  %v9903_v36 = vadd.f32 %v3166_v51, %v2807_v35  ;;  %v6348_v1 = vld [vmem:[%s6730_s6 + $0x7e0] sm:$0xff] }
 0x372   : > { %v2811_v3 = vpop.f32.mrf.mxu0  ;;  %v3170_v58 = vpop.f32.mrf.mxu1 }
 0x373   : > { %10946 = vst [vmem:[#allocation74_spill] sm:$0xff] %v9903_v36  ;;  %v9907_v6 = vadd.f32 %v3170_v58, %v2811_v3  ;;  %v6350_v3 = vld [vmem:[%s6730_s6 + $0x828] sm:$0xff] }
 0x374   : > { %3522 = vmatmul.mubr.f32.gmra.mxu0 %v6344_v25  ;;  %3881 = vmatmul.mubr.f32.gmra.mxu1 %v6345_v11  ;;  %v2813_v5 = vpop.f32.mrf.mxu0  ;;  %v3172_v12 = vpop.f32.mrf.mxu1  ;;  %v6349_v25 = vld [vmem:[%s6730_s6 + $0x7f0] sm:$0xff]  ;;  %v6351_v11 = vld [vmem:[%s6730_s6 + $0x838] sm:$0xff] }
 0x375   : > { %10947 = vst [vmem:[#allocation75_spill] sm:$0xff] %v9907_v6  ;;  %3527 = vmatprep.mubr.f32.mxu0 %v6346_v30  ;;  %3886 = vmatprep.mubr.f32.mxu1 %v6347_v37  ;;  %v9911_v35 = vadd.f32 %v3172_v12, %v2813_v5  ;;  %v6352_v6 = vld [vmem:[%s6730_s6 + $0x820] sm:$0xff] }
 0x376   : > { %v2817_v51 = vpop.f32.mrf.mxu0  ;;  %v3176_v36 = vpop.f32.mrf.mxu1 }
 0x377   : > { %10948 = vst [vmem:[#allocation77_spill] sm:$0xff] %v9911_v35  ;;  %v9915_v58 = vadd.f32 %v3176_v36, %v2817_v51  ;;  %v6354_v51 = vld [vmem:[%s6730_s6 + $0x868] sm:$0xff] }
 0x378   : > { %3528 = vmatmul.mubr.f32.gmra.mxu0 %v6348_v1  ;;  %3887 = vmatmul.mubr.f32.gmra.mxu1 %v6349_v25  ;;  %v2819_v30 = vpop.f32.mrf.mxu0  ;;  %v3178_v37 = vpop.f32.mrf.mxu1  ;;  %v6353_v1 = vld [vmem:[%s6730_s6 + $0x830] sm:$0xff]  ;;  %v6355_v25 = vld [vmem:[%s6730_s6 + $0x878] sm:$0xff] }
 0x379   : > { %10949 = vst [vmem:[#allocation22_spill] sm:$0xff] %v9915_v58  ;;  %3533 = vmatprep.mubr.f32.mxu0 %v6350_v3  ;;  %3892 = vmatprep.mubr.f32.mxu1 %v6351_v11  ;;  %v9919_v5 = vadd.f32 %v3178_v37, %v2819_v30  ;;  %v6356_v58 = vld [vmem:[%s6730_s6 + $0x860] sm:$0xff] }
 0x37a   : > { %v2823_v12 = vpop.f32.mrf.mxu0  ;;  %v3182_v35 = vpop.f32.mrf.mxu1 }
 0x37b   : > { %10950 = vst [vmem:[#allocation78_spill] sm:$0xff] %v9919_v5  ;;  %v9923_v36 = vadd.f32 %v3182_v35, %v2823_v12  ;;  %v6358_v12 = vld [vmem:[%s6730_s6 + $0x8a8] sm:$0xff] }
 0x37c   : > { %3534 = vmatmul.mubr.f32.gmra.mxu0 %v6352_v6  ;;  %3893 = vmatmul.mubr.f32.gmra.mxu1 %v6353_v1  ;;  %v2825_v3 = vpop.f32.mrf.mxu0  ;;  %v3184_v11 = vpop.f32.mrf.mxu1  ;;  %v6357_v6 = vld [vmem:[%s6730_s6 + $0x870] sm:$0xff]  ;;  %v6359_v1 = vld [vmem:[%s6730_s6 + $0x8b8] sm:$0xff] }
 0x37d   : > { %10951 = vst [vmem:[#allocation79_spill] sm:$0xff] %v9923_v36  ;;  %3539 = vmatprep.mubr.f32.mxu0 %v6354_v51  ;;  %3898 = vmatprep.mubr.f32.mxu1 %v6355_v25  ;;  %v9927_v30 = vadd.f32 %v3184_v11, %v2825_v3  ;;  %v6360_v36 = vld [vmem:[%s6730_s6 + $0x8a0] sm:$0xff] }
 0x37e   : > { %v2829_v37 = vpop.f32.mrf.mxu0  ;;  %v3188_v5 = vpop.f32.mrf.mxu1 }
 0x37f   : > { %10952 = vst [vmem:[#allocation26_spill] sm:$0xff] %v9927_v30  ;;  %v9931_v35 = vadd.f32 %v3188_v5, %v2829_v37  ;;  %v6362_v37 = vld [vmem:[%s6730_s6 + $0x8e8] sm:$0xff] }
 0x380   : > { %3540 = vmatmul.mubr.f32.gmra.mxu0 %v6356_v58  ;;  %3899 = vmatmul.mubr.f32.gmra.mxu1 %v6357_v6  ;;  %v2831_v51 = vpop.f32.mrf.mxu0  ;;  %v3190_v25 = vpop.f32.mrf.mxu1  ;;  %v6361_v58 = vld [vmem:[%s6730_s6 + $0x8b0] sm:$0xff]  ;;  %v6363_v6 = vld [vmem:[%s6730_s6 + $0x8f8] sm:$0xff] }
 0x381   : > { %10953 = vst [vmem:[#allocation27_spill] sm:$0xff] %v9931_v35  ;;  %3545 = vmatprep.mubr.f32.mxu0 %v6358_v12  ;;  %3904 = vmatprep.mubr.f32.mxu1 %v6359_v1  ;;  %v9935_v3 = vadd.f32 %v3190_v25, %v2831_v51  ;;  %v6364_v35 = vld [vmem:[%s6730_s6 + $0x8e0] sm:$0xff] }
 0x383   : > { %10954 = vst [vmem:[#allocation29_spill] sm:$0xff] %v9935_v3  ;;  %v2835_v11 = vpop.f32.mrf.mxu0  ;;  %v3194_v30 = vpop.f32.mrf.mxu1 }
 0x384   : > { %3546 = vmatmul.mubr.f32.gmra.mxu0 %v6360_v36  ;;  %3905 = vmatmul.mubr.f32.gmra.mxu1 %v6361_v58  ;;  %v9939_v5 = vadd.f32 %v3194_v30, %v2835_v11  ;;  %v6365_v36 = vld [vmem:[%s6730_s6 + $0x8f0] sm:$0xff]  ;;  %v6366_v11 = vld [vmem:[%s6730_s6 + $0x928] sm:$0xff]  ;;  %v6367_v58 = vld [vmem:[%s6730_s6 + $0x938] sm:$0xff] }
 0x385   : > { %3551 = vmatprep.mubr.f32.mxu0 %v6362_v37  ;;  %3910 = vmatprep.mubr.f32.mxu1 %v6363_v6  ;;  %v2837_v12 = vpop.f32.mrf.mxu0  ;;  %v3196_v1 = vpop.f32.mrf.mxu1 }
 0x386   : > { %10955 = vst [vmem:[#allocation83_spill] sm:$0xff] %v9939_v5  ;;  %v9943_v51 = vadd.f32 %v3196_v1, %v2837_v12  ;;  %v6368_v5 = vld [vmem:[%s6730_s6 + $0x920] sm:$0xff] }
 0x387   : > { %v2841_v25 = vpop.f32.mrf.mxu0  ;;  %v3200_v3 = vpop.f32.mrf.mxu1 }
 0x388   : > { %10956 = vst [vmem:[#allocation85_spill] sm:$0xff] %v9943_v51  ;;  %3552 = vmatmul.mubr.f32.gmra.mxu0 %v6364_v35  ;;  %3911 = vmatmul.mubr.f32.gmra.mxu1 %v6365_v36  ;;  %v9947_v30 = vadd.f32 %v3200_v3, %v2841_v25  ;;  %v6369_v35 = vld [vmem:[%s6730_s6 + $0x930] sm:$0xff]  ;;  %v6370_v25 = vld [vmem:[%s6730_s6 + $0x968] sm:$0xff]  ;;  %v6371_v36 = vld [vmem:[%s6730_s6 + $0x978] sm:$0xff] }
 0x389   : > { %3557 = vmatprep.mubr.f32.mxu0 %v6366_v11  ;;  %3916 = vmatprep.mubr.f32.mxu1 %v6367_v58  ;;  %v2843_v37 = vpop.f32.mrf.mxu0  ;;  %v3202_v6 = vpop.f32.mrf.mxu1 }
 0x38a   : > { %10957 = vst [vmem:[#allocation87_spill] sm:$0xff] %v9947_v30  ;;  %v9951_v12 = vadd.f32 %v3202_v6, %v2843_v37  ;;  %v6372_v30 = vld [vmem:[%s6730_s6 + $0x960] sm:$0xff] }
 0x38c   : > { %10958 = vst [vmem:[#allocation88_spill] sm:$0xff] %v9951_v12  ;;  %v2847_v1 = vpop.f32.mrf.mxu0  ;;  %v3206_v51 = vpop.f32.mrf.mxu1  ;;  %3558 = vmatmul.mubr.f32.gmra.mxu0 %v6368_v5  ;;  %3917 = vmatmul.mubr.f32.gmra.mxu1 %v6369_v35  ;;  %v6373_v5 = vld [vmem:[%s6730_s6 + $0x970] sm:$0xff]  ;;  %v6375_v35 = vld [vmem:[%s6730_s6 + $0x9b8] sm:$0xff] }
 0x38d   : > { %v9955_v3 = vadd.f32 %v3206_v51, %v2847_v1  ;;  %3563 = vmatprep.mubr.f32.mxu0 %v6370_v25  ;;  %3922 = vmatprep.mubr.f32.mxu1 %v6371_v36  ;;  %v6374_v1 = vld [vmem:[%s6730_s6 + $0x9a8] sm:$0xff] }
 0x38e   : > { %v2849_v11 = vpop.f32.mrf.mxu0  ;;  %v3208_v58 = vpop.f32.mrf.mxu1 }
 0x38f   : > { %10959 = vst [vmem:[#allocation89_spill] sm:$0xff] %v9955_v3  ;;  %v9959_v37 = vadd.f32 %v3208_v58, %v2849_v11  ;;  %v6376_v3 = vld [vmem:[%s6730_s6 + $0x9a0] sm:$0xff] }
 0x390   : > { %v2853_v6 = vpop.f32.mrf.mxu0  ;;  %v3212_v12 = vpop.f32.mrf.mxu1  ;;  %3564 = vmatmul.mubr.f32.gmra.mxu0 %v6372_v30  ;;  %3923 = vmatmul.mubr.f32.gmra.mxu1 %v6373_v5  ;;  %v6377_v30 = vld [vmem:[%s6730_s6 + $0x9b0] sm:$0xff]  ;;  %v6379_v5 = vld [vmem:[%s6730_s6 + $0x9f8] sm:$0xff] }
 0x391   : > { %10960 = vst [vmem:[#allocation90_spill] sm:$0xff] %v9959_v37  ;;  %v9963_v51 = vadd.f32 %v3212_v12, %v2853_v6  ;;  %3569 = vmatprep.mubr.f32.mxu0 %v6374_v1  ;;  %3928 = vmatprep.mubr.f32.mxu1 %v6375_v35  ;;  %v6378_v6 = vld [vmem:[%s6730_s6 + $0x9e8] sm:$0xff] }
 0x392   : > { %v2855_v25 = vpop.f32.mrf.mxu0  ;;  %v3214_v36 = vpop.f32.mrf.mxu1 }
 0x393   : > { %10961 = vst [vmem:[#allocation92_spill] sm:$0xff] %v9963_v51  ;;  %v9967_v11 = vadd.f32 %v3214_v36, %v2855_v25  ;;  %v6380_v51 = vld [vmem:[%s6730_s6 + $0x9e0] sm:$0xff] }
 0x394   : > { %v2859_v58 = vpop.f32.mrf.mxu0  ;;  %v3218_v37 = vpop.f32.mrf.mxu1  ;;  %3570 = vmatmul.mubr.f32.gmra.mxu0 %v6376_v3  ;;  %3929 = vmatmul.mubr.f32.gmra.mxu1 %v6377_v30  ;;  %v6381_v3 = vld [vmem:[%s6730_s6 + $0x9f0] sm:$0xff]  ;;  %v6383_v30 = vld [vmem:[%s6730_s6 + $0xa38] sm:$0xff] }
 0x395   : > { %10962 = vst [vmem:[#allocation37_spill] sm:$0xff] %v9967_v11  ;;  %v9971_v12 = vadd.f32 %v3218_v37, %v2859_v58  ;;  %3575 = vmatprep.mubr.f32.mxu0 %v6378_v6  ;;  %3934 = vmatprep.mubr.f32.mxu1 %v6379_v5  ;;  %v6382_v58 = vld [vmem:[%s6730_s6 + $0xa28] sm:$0xff] }
 0x396   : > { %v2861_v1 = vpop.f32.mrf.mxu0  ;;  %v3220_v35 = vpop.f32.mrf.mxu1 }
 0x397   : > { %10963 = vst [vmem:[#allocation94_spill] sm:$0xff] %v9971_v12  ;;  %v9975_v25 = vadd.f32 %v3220_v35, %v2861_v1  ;;  %v6384_v12 = vld [vmem:[%s6730_s6 + $0xa20] sm:$0xff] }
 0x398   : > { %v2865_v36 = vpop.f32.mrf.mxu0  ;;  %v3224_v11 = vpop.f32.mrf.mxu1  ;;  %3576 = vmatmul.mubr.f32.gmra.mxu0 %v6380_v51  ;;  %3935 = vmatmul.mubr.f32.gmra.mxu1 %v6381_v3  ;;  %v6385_v51 = vld [vmem:[%s6730_s6 + $0xa30] sm:$0xff]  ;;  %v6387_v3 = vld [vmem:[%s6730_s6 + $0xa78] sm:$0xff] }
 0x399   : > { %10964 = vst [vmem:[#allocation96_spill] sm:$0xff] %v9975_v25  ;;  %v9979_v37 = vadd.f32 %v3224_v11, %v2865_v36  ;;  %3581 = vmatprep.mubr.f32.mxu0 %v6382_v58  ;;  %3940 = vmatprep.mubr.f32.mxu1 %v6383_v30  ;;  %v6386_v36 = vld [vmem:[%s6730_s6 + $0xa68] sm:$0xff] }
 0x39a   : > { %v2867_v6 = vpop.f32.mrf.mxu0  ;;  %v3226_v5 = vpop.f32.mrf.mxu1 }
 0x39b   : > { %10965 = vst [vmem:[#allocation98_spill] sm:$0xff] %v9979_v37  ;;  %v9983_v1 = vadd.f32 %v3226_v5, %v2867_v6  ;;  %v6388_v37 = vld [vmem:[%s6730_s6 + $0xa60] sm:$0xff] }
 0x39c   : > { %v2871_v35 = vpop.f32.mrf.mxu0  ;;  %v3230_v25 = vpop.f32.mrf.mxu1  ;;  %3582 = vmatmul.mubr.f32.gmra.mxu0 %v6384_v12  ;;  %3941 = vmatmul.mubr.f32.gmra.mxu1 %v6385_v51  ;;  %v6389_v12 = vld [vmem:[%s6730_s6 + $0xa70] sm:$0xff]  ;;  %v6391_v51 = vld [vmem:[%s6730_s6 + $0xab8] sm:$0xff] }
 0x39d   : > { %10966 = vst [vmem:[#allocation71_spill] sm:$0xff] %v9983_v1  ;;  %v9987_v11 = vadd.f32 %v3230_v25, %v2871_v35  ;;  %3587 = vmatprep.mubr.f32.mxu0 %v6386_v36  ;;  %3946 = vmatprep.mubr.f32.mxu1 %v6387_v3  ;;  %v6390_v35 = vld [vmem:[%s6730_s6 + $0xaa8] sm:$0xff] }
 0x39e   : > { %v2873_v58 = vpop.f32.mrf.mxu0  ;;  %v3232_v30 = vpop.f32.mrf.mxu1 }
 0x39f   : > { %10967 = vst [vmem:[#allocation45_spill] sm:$0xff] %v9987_v11  ;;  %v9991_v6 = vadd.f32 %v3232_v30, %v2873_v58  ;;  %v6392_v11 = vld [vmem:[%s6730_s6 + $0xaa0] sm:$0xff] }
 0x3a0   : > { %v2877_v5 = vpop.f32.mrf.mxu0  ;;  %v3236_v1 = vpop.f32.mrf.mxu1  ;;  %3588 = vmatmul.mubr.f32.gmra.mxu0 %v6388_v37  ;;  %3947 = vmatmul.mubr.f32.gmra.mxu1 %v6389_v12  ;;  %v6393_v37 = vld [vmem:[%s6730_s6 + $0xab0] sm:$0xff]  ;;  %v6395_v12 = vld [vmem:[%s6730_s6 + $0xaf8] sm:$0xff] }
 0x3a1   : > { %10968 = vst [vmem:[#allocation73_spill] sm:$0xff] %v9991_v6  ;;  %v9995_v25 = vadd.f32 %v3236_v1, %v2877_v5  ;;  %3593 = vmatprep.mubr.f32.mxu0 %v6390_v35  ;;  %3952 = vmatprep.mubr.f32.mxu1 %v6391_v51  ;;  %v6394_v5 = vld [vmem:[%s6730_s6 + $0xae8] sm:$0xff] }
 0x3a2   : > { %v2879_v36 = vpop.f32.mrf.mxu0  ;;  %v3238_v3 = vpop.f32.mrf.mxu1 }
 0x3a3   : > { %10969 = vst [vmem:[#allocation101_spill] sm:$0xff] %v9995_v25  ;;  %v9999_v58 = vadd.f32 %v3238_v3, %v2879_v36  ;;  %v6396_v25 = vld [vmem:[%s6730_s6 + $0xae0] sm:$0xff] }
 0x3a4   : > { %v2883_v30 = vpop.f32.mrf.mxu0  ;;  %v3242_v6 = vpop.f32.mrf.mxu1  ;;  %3594 = vmatmul.mubr.f32.gmra.mxu0 %v6392_v11  ;;  %3953 = vmatmul.mubr.f32.gmra.mxu1 %v6393_v37  ;;  %v6397_v11 = vld [vmem:[%s6730_s6 + $0xaf0] sm:$0xff]  ;;  %v6399_v37 = vld [vmem:[%s6730_s6 + $0xb38] sm:$0xff] }
 0x3a5   : > { %10970 = vst [vmem:[#allocation48_spill] sm:$0xff] %v9999_v58  ;;  %v10003_v1 = vadd.f32 %v3242_v6, %v2883_v30  ;;  %3599 = vmatprep.mubr.f32.mxu0 %v6394_v5  ;;  %3958 = vmatprep.mubr.f32.mxu1 %v6395_v12  ;;  %v6398_v30 = vld [vmem:[%s6730_s6 + $0xb28] sm:$0xff] }
 0x3a6   : > { %v2885_v35 = vpop.f32.mrf.mxu0  ;;  %v3244_v51 = vpop.f32.mrf.mxu1 }
 0x3a7   : > { %10971 = vst [vmem:[#allocation50_spill] sm:$0xff] %v10003_v1  ;;  %v10007_v36 = vadd.f32 %v3244_v51, %v2885_v35  ;;  %v6400_v1 = vld [vmem:[%s6730_s6 + $0xb20] sm:$0xff] }
 0x3a8   : > { %v2889_v3 = vpop.f32.mrf.mxu0  ;;  %v3248_v58 = vpop.f32.mrf.mxu1  ;;  %3600 = vmatmul.mubr.f32.gmra.mxu0 %v6396_v25  ;;  %3959 = vmatmul.mubr.f32.gmra.mxu1 %v6397_v11  ;;  %v6401_v25 = vld [vmem:[%s6730_s6 + $0xb30] sm:$0xff]  ;;  %v6403_v11 = vld [vmem:[%s6730_s6 + $0xb78] sm:$0xff] }
 0x3a9   : > { %10972 = vst [vmem:[#allocation103_spill] sm:$0xff] %v10007_v36  ;;  %v10011_v6 = vadd.f32 %v3248_v58, %v2889_v3  ;;  %3605 = vmatprep.mubr.f32.mxu0 %v6398_v30  ;;  %3964 = vmatprep.mubr.f32.mxu1 %v6399_v37  ;;  %v6402_v3 = vld [vmem:[%s6730_s6 + $0xb68] sm:$0xff] }
 0x3aa   : > { %v2891_v5 = vpop.f32.mrf.mxu0  ;;  %v3250_v12 = vpop.f32.mrf.mxu1 }
 0x3ab   : > { %10973 = vst [vmem:[#allocation58_spill] sm:$0xff] %v10011_v6  ;;  %v10015_v35 = vadd.f32 %v3250_v12, %v2891_v5  ;;  %v6404_v6 = vld [vmem:[%s6730_s6 + $0xb60] sm:$0xff] }
 0x3ac   : > { %v2895_v51 = vpop.f32.mrf.mxu0  ;;  %v3254_v36 = vpop.f32.mrf.mxu1  ;;  %3606 = vmatmul.mubr.f32.gmra.mxu0 %v6400_v1  ;;  %3965 = vmatmul.mubr.f32.gmra.mxu1 %v6401_v25  ;;  %v6405_v1 = vld [vmem:[%s6730_s6 + $0xb70] sm:$0xff]  ;;  %v6407_v25 = vld [vmem:[%s6730_s6 + $0xbb8] sm:$0xff] }
 0x3ad   : > { %10974 = vst [vmem:[#allocation80_spill] sm:$0xff] %v10015_v35  ;;  %v10019_v58 = vadd.f32 %v3254_v36, %v2895_v51  ;;  %3611 = vmatprep.mubr.f32.mxu0 %v6402_v3  ;;  %3970 = vmatprep.mubr.f32.mxu1 %v6403_v11  ;;  %v6406_v51 = vld [vmem:[%s6730_s6 + $0xba8] sm:$0xff] }
 0x3ae   : > { %v2897_v30 = vpop.f32.mrf.mxu0  ;;  %v3256_v37 = vpop.f32.mrf.mxu1 }
 0x3af   : > { %10975 = vst [vmem:[#allocation105_spill] sm:$0xff] %v10019_v58  ;;  %v10023_v5 = vadd.f32 %v3256_v37, %v2897_v30  ;;  %v6408_v58 = vld [vmem:[%s6730_s6 + $0xba0] sm:$0xff] }
 0x3b0   : > { %v2901_v12 = vpop.f32.mrf.mxu0  ;;  %v3260_v35 = vpop.f32.mrf.mxu1  ;;  %3612 = vmatmul.mubr.f32.gmra.mxu0 %v6404_v6  ;;  %3971 = vmatmul.mubr.f32.gmra.mxu1 %v6405_v1  ;;  %v6409_v6 = vld [vmem:[%s6730_s6 + $0xbb0] sm:$0xff]  ;;  %v6411_v1 = vld [vmem:[%s6730_s6 + $0xbf8] sm:$0xff] }
 0x3b1   : > { %10976 = vst [vmem:[#allocation106_spill] sm:$0xff] %v10023_v5  ;;  %v10027_v36 = vadd.f32 %v3260_v35, %v2901_v12  ;;  %3617 = vmatprep.mubr.f32.mxu0 %v6406_v51  ;;  %3976 = vmatprep.mubr.f32.mxu1 %v6407_v25  ;;  %v6410_v12 = vld [vmem:[%s6730_s6 + $0xbe8] sm:$0xff] }
 0x3b2   : > { %v2903_v3 = vpop.f32.mrf.mxu0  ;;  %v3262_v11 = vpop.f32.mrf.mxu1 }
 0x3b3   : > { %10977 = vst [vmem:[#allocation107_spill] sm:$0xff] %v10027_v36  ;;  %v10031_v30 = vadd.f32 %v3262_v11, %v2903_v3  ;;  %v6412_v36 = vld [vmem:[%s6730_s6 + $0xbe0] sm:$0xff] }
 0x3b4   : > { %v2907_v37 = vpop.f32.mrf.mxu0  ;;  %v3266_v5 = vpop.f32.mrf.mxu1  ;;  %3618 = vmatmul.mubr.f32.gmra.mxu0 %v6408_v58  ;;  %3977 = vmatmul.mubr.f32.gmra.mxu1 %v6409_v6  ;;  %v6413_v58 = vld [vmem:[%s6730_s6 + $0xbf0] sm:$0xff] }
 0x3b5   : > { %10978 = vst [vmem:[#allocation108_spill] sm:$0xff] %v10031_v30  ;;  %v10035_v35 = vadd.f32 %v3266_v5, %v2907_v37  ;;  %3623 = vmatprep.mubr.f32.mxu0 %v6410_v12  ;;  %3982 = vmatprep.mubr.f32.mxu1 %v6411_v1  ;;  %v6414_v5 = vld [vmem:[%s6730_s6 + $0xc28] sm:$0xff]  ;;  %v6415_v37 = vld [vmem:[%s6730_s6 + $0xc38] sm:$0xff] }
 0x3b6   : > { %v2909_v51 = vpop.f32.mrf.mxu0  ;;  %v3268_v25 = vpop.f32.mrf.mxu1 }
 0x3b7   : > { %10979 = vst [vmem:[#allocation109_spill] sm:$0xff] %v10035_v35  ;;  %v10039_v3 = vadd.f32 %v3268_v25, %v2909_v51  ;;  %v5134_v51 = vsub.s32 2, %v8950_v33 }
 0x3b8   : > { %v2913_v11 = vpop.f32.mrf.mxu0  ;;  %v3272_v30 = vpop.f32.mrf.mxu1  ;;  %3624 = vmatmul.mubr.f32.gmra.mxu0 %v6412_v36  ;;  %3983 = vmatmul.mubr.f32.gmra.mxu1 %v6413_v58  ;;  %v6417_v36 = vld [vmem:[%s6730_s6 + $0xc30] sm:$0xff] }
 0x3b9   : > { %10980 = vst [vmem:[#allocation110_spill] sm:$0xff] %v10039_v3  ;;  %v10043_v6 = vadd.f32 %v3272_v30, %v2913_v11  ;;  %3629 = vmatprep.mubr.f32.mxu0 %v6414_v5  ;;  %3988 = vmatprep.mubr.f32.mxu1 %v6415_v37  ;;  %v6416_v3 = vld [vmem:[%s6730_s6 + $0xc20] sm:$0xff]  ;;  %v5138_v30 = vsub.s32 3, %v8950_v33 }
 0x3ba   : > { %v2915_v12 = vpop.f32.mrf.mxu0  ;;  %v3274_v1 = vpop.f32.mrf.mxu1  ;;  %v6418_v37 = vld [vmem:[#allocation7] sm:$0xf] }
 0x3bb   : > { %10981 = vst [vmem:[#allocation111_spill] sm:$0xff] %v10043_v6  ;;  %v10047_v35 = vadd.f32 %v3274_v1, %v2915_v12  ;;  %v10054_v32 = vrot.slane %v6418_v37, %v5134_v51  ;;  %v10058_v38 = vrot.slane %v6418_v37, %v5138_v30 }
 0x3bc   : > { %v3343_v25 = vpop.f32.mrf.mxu0  ;;  %3630 = vmatmul.mubr.f32.gmra.mxu0 %v6416_v3  ;;  %v3702_v45 = vpop.f32.mrf.mxu1  ;;  %3989 = vmatmul.mubr.f32.gmra.mxu1 %v6417_v36 }
 0x3bd   : > { %10982 = vst [vmem:[#allocation112_spill] sm:$0xff] %v10047_v35  ;;  %v3344_v58 = vadd.f32 %v3343_v25, %v9651_v48 }
 0x3be   : > { %v3345_v11 = vpop.f32.mrf.mxu0  ;;  %v3704_v5 = vpop.f32.mrf.mxu1 }
 0x3bf   : > { %v3703_v6 = vadd.f32 %v3702_v45, %v3344_v58  ;;  %v3346_v12 = vadd.f32 %v3345_v11, %v9658_v47 }
 0x3c0   : > { %v3349_v1 = vpop.f32.mrf.mxu0  ;;  %v3708_v35 = vpop.f32.mrf.mxu1 }
 0x3c1   : > { %v4928_v3 = vmul.f32 %v8967_v2, %v3703_v6  ;;  %v3705_v19 = vadd.f32 %v3704_v5, %v3346_v12  ;;  %v3350_v48 = vadd.f32 %v3349_v1, %v9664_v57 }
 0x3c2   : > { %v3351_v33 = vpop.f32.mrf.mxu0  ;;  %v3710_v25 = vpop.f32.mrf.mxu1 }
 0x3c3   : > { %v5146_v45 = vadd.f32 %v10054_v32, %v4928_v3  ;;  %v4929_v51 = vmul.f32 %v8967_v2, %v3705_v19  ;;  %v3709_v36 = vadd.f32 %v3708_v35, %v3350_v48  ;;  %v3352_v58 = vadd.f32 %v3351_v33, %v9669_v23 }
 0x3c4   : > { %v3355_v47 = vpop.f32.mrf.mxu0  ;;  %v3714_v11 = vpop.f32.mrf.mxu1 }
 0x3c5   : > { %5342 = vst [vmem:[%s8990_s20 + $0x10] sm:$0xff] %v5146_v45  ;;  %v5147_v6 = vadd.f32 %v10058_v38, %v4929_v51  ;;  %v4932_v30 = vmul.f32 %v8980_v15, %v3709_v36  ;;  %v3711_v5 = vadd.f32 %v3710_v25, %v3352_v58  ;;  %v3356_v57 = vadd.f32 %v3355_v47, %v9673_v52 }
 0x3c6   : > { %v3357_v37 = vpop.f32.mrf.mxu0  ;;  %v3716_v12 = vpop.f32.mrf.mxu1 }
 0x3c7   : > { %5343 = vst [vmem:[%s8990_s20 + $0x18] sm:$0xff] %v5147_v6  ;;  %v5150_v2 = vadd.f32 %v10054_v32, %v4932_v30  ;;  %v4933_v19 = vmul.f32 %v8980_v15, %v3711_v5  ;;  %v3715_v23 = vadd.f32 %v3714_v11, %v3356_v57  ;;  %v3358_v35 = vadd.f32 %v3357_v37, %v9677_v4 }
 0x3c8   : > { %v3361_v1 = vpop.f32.mrf.mxu0  ;;  %v3720_v3 = vpop.f32.mrf.mxu1 }
 0x3c9   : > { %5346 = vst [vmem:[%s8990_s20 + $0x30] sm:$0xff] %v5150_v2  ;;  %v5151_v48 = vadd.f32 %v10058_v38, %v4933_v19  ;;  %v4936_v33 = vmul.f32 %v8997_v59, %v3715_v23  ;;  %v3717_v52 = vadd.f32 %v3716_v12, %v3358_v35  ;;  %v3362_v25 = vadd.f32 %v3361_v1, %v9681_v26 }
 0x3ca   : > { %v3363_v45 = vpop.f32.mrf.mxu0  ;;  %v3722_v51 = vpop.f32.mrf.mxu1 }
 0x3cb   : > { %5347 = vst [vmem:[%s8990_s20 + $0x38] sm:$0xff] %v5151_v48  ;;  %v5154_v15 = vadd.f32 %v10054_v32, %v4936_v33  ;;  %v4937_v36 = vmul.f32 %v8997_v59, %v3717_v52  ;;  %v3721_v4 = vadd.f32 %v3720_v3, %v3362_v25  ;;  %v3364_v58 = vadd.f32 %v3363_v45, %v9685_v34 }
 0x3cc   : > { %v3367_v47 = vpop.f32.mrf.mxu0  ;;  %v3726_v11 = vpop.f32.mrf.mxu1 }
 0x3cd   : > { %5350 = vst [vmem:[%s8990_s20 + $0x50] sm:$0xff] %v5154_v15  ;;  %v5155_v6 = vadd.f32 %v10058_v38, %v4937_v36  ;;  %v4940_v30 = vmul.f32 %v9010_v44, %v3721_v4  ;;  %v3723_v26 = vadd.f32 %v3722_v51, %v3364_v58  ;;  %v3368_v5 = vadd.f32 %v3367_v47, %v9689_v50 }
 0x3ce   : > { %v3369_v57 = vpop.f32.mrf.mxu0  ;;  %v3728_v37 = vpop.f32.mrf.mxu1 }
 0x3cf   : > { %5351 = vst [vmem:[%s8990_s20 + $0x58] sm:$0xff] %v5155_v6  ;;  %v5158_v59 = vadd.f32 %v10054_v32, %v4940_v30  ;;  %v4941_v12 = vmul.f32 %v9010_v44, %v3723_v26  ;;  %v3727_v34 = vadd.f32 %v3726_v11, %v3368_v5  ;;  %v3370_v2 = vadd.f32 %v3369_v57, %v9693_v63  ;;  %v10983_v57 = vld [vmem:[#allocation81_spill] sm:$0xff] }
 0x3d0   : > { %v3373_v19 = vpop.f32.mrf.mxu0  ;;  %v3732_v23 = vpop.f32.mrf.mxu1 }
 0x3d1   : > { %5354 = vst [vmem:[%s8990_s20 + $0x70] sm:$0xff] %v5158_v59  ;;  %v5159_v35 = vadd.f32 %v10058_v38, %v4941_v12  ;;  %v4944_v1 = vmul.f32 %v9024_v29, %v3727_v34  ;;  %v3729_v50 = vadd.f32 %v3728_v37, %v3370_v2  ;;  %v3374_v3 = vadd.f32 %v3373_v19, %v9697_v8 }
 0x3d2   : > { %v3375_v48 = vpop.f32.mrf.mxu0  ;;  %v3734_v33 = vpop.f32.mrf.mxu1 }
 0x3d3   : > { %5355 = vst [vmem:[%s8990_s20 + $0x78] sm:$0xff] %v5159_v35  ;;  %v5162_v44 = vadd.f32 %v10054_v32, %v4944_v1  ;;  %v4945_v52 = vmul.f32 %v9024_v29, %v3729_v50  ;;  %v3733_v63 = vadd.f32 %v3732_v23, %v3374_v3  ;;  %v3376_v25 = vadd.f32 %v3375_v48, %v9701_v41  ;;  %v10984_v50 = vld [vmem:[#allocation60_spill] sm:$0xff] }
 0x3d4   : > { %v3379_v45 = vpop.f32.mrf.mxu0  ;;  %v3738_v51 = vpop.f32.mrf.mxu1 }
 0x3d5   : > { %5358 = vst [vmem:[%s8990_s20 + $0x90] sm:$0xff] %v5162_v44  ;;  %v5163_v15 = vadd.f32 %v10058_v38, %v4945_v52  ;;  %v4948_v36 = vmul.f32 %v9034_v13, %v3733_v63  ;;  %v3735_v8 = vadd.f32 %v3734_v33, %v3376_v25  ;;  %v3380_v4 = vadd.f32 %v3379_v45, %v9705_v49 }
 0x3d6   : > { %v3381_v58 = vpop.f32.mrf.mxu0  ;;  %v3740_v47 = vpop.f32.mrf.mxu1 }
 0x3d7   : > { %5359 = vst [vmem:[%s8990_s20 + $0x98] sm:$0xff] %v5163_v15  ;;  %v5166_v29 = vadd.f32 %v10054_v32, %v4948_v36  ;;  %v4949_v11 = vmul.f32 %v9034_v13, %v3735_v8  ;;  %v3739_v41 = vadd.f32 %v3738_v51, %v3380_v4  ;;  %v3382_v6 = vadd.f32 %v3381_v58, %v9711_v16  ;;  %v10985_v36 = vld [vmem:[#allocation61_spill] sm:$0xff] }
 0x3d8   : > { %v3385_v30 = vpop.f32.mrf.mxu0  ;;  %v3744_v26 = vpop.f32.mrf.mxu1 }
 0x3d9   : > { %5362 = vst [vmem:[%s8990_s20 + $0xb0] sm:$0xff] %v5166_v29  ;;  %v5167_v5 = vadd.f32 %v10058_v38, %v4949_v11  ;;  %v4952_v37 = vmul.f32 %v10983_v57, %v3739_v41  ;;  %v3741_v49 = vadd.f32 %v3740_v47, %v3382_v6  ;;  %v3386_v59 = vadd.f32 %v3385_v30, %v9715_v28 }
 0x3da   : > { %v3387_v12 = vpop.f32.mrf.mxu0  ;;  %v3746_v34 = vpop.f32.mrf.mxu1 }
 0x3db   : > { %5363 = vst [vmem:[%s8990_s20 + $0xb8] sm:$0xff] %v5167_v5  ;;  %v5170_v13 = vadd.f32 %v10054_v32, %v4952_v37  ;;  %v4953_v2 = vmul.f32 %v10983_v57, %v3741_v49  ;;  %v3745_v16 = vadd.f32 %v3744_v26, %v3386_v59  ;;  %v3388_v19 = vadd.f32 %v3387_v12, %v9719_v60  ;;  %v10986_v5 = vld [vmem:[#allocation63_spill] sm:$0xff] }
 0x3dc   : > { %v3391_v23 = vpop.f32.mrf.mxu0  ;;  %v3750_v35 = vpop.f32.mrf.mxu1 }
 0x3dd   : > { %5366 = vst [vmem:[%s8990_s20 + $0xd0] sm:$0xff] %v5170_v13  ;;  %v5171_v1 = vadd.f32 %v10058_v38, %v4953_v2  ;;  %v4956_v3 = vmul.f32 %v10984_v50, %v3745_v16  ;;  %v3747_v28 = vadd.f32 %v3746_v34, %v3388_v19  ;;  %v3392_v48 = vadd.f32 %v3391_v23, %v9723_v9  ;;  %v10987_v23 = vld [vmem:[#allocation82_spill] sm:$0xff] }
 0x3de   : > { %v3393_v33 = vpop.f32.mrf.mxu0  ;;  %v3752_v44 = vpop.f32.mrf.mxu1 }
 0x3df   : > { %5367 = vst [vmem:[%s8990_s20 + $0xd8] sm:$0xff] %v5171_v1  ;;  %v5174_v52 = vadd.f32 %v10054_v32, %v4956_v3  ;;  %v4957_v63 = vmul.f32 %v10984_v50, %v3747_v28  ;;  %v3751_v60 = vadd.f32 %v3750_v35, %v3392_v48  ;;  %v3394_v25 = vadd.f32 %v3393_v33, %v9727_v55 }
 0x3e0   : > { %v3397_v45 = vpop.f32.mrf.mxu0  ;;  %v3756_v51 = vpop.f32.mrf.mxu1 }
 0x3e1   : > { %5370 = vst [vmem:[%s8990_s20 + $0xf0] sm:$0xff] %v5174_v52  ;;  %v5175_v15 = vadd.f32 %v10058_v38, %v4957_v63  ;;  %v4960_v8 = vmul.f32 %v10985_v36, %v3751_v60  ;;  %v3753_v9 = vadd.f32 %v3752_v44, %v3394_v25  ;;  %v3398_v4 = vadd.f32 %v3397_v45, %v9731_v39  ;;  %v10988_v60 = vld [vmem:[#allocation64_spill] sm:$0xff] }
 0x3e2   : > { %v3399_v58 = vpop.f32.mrf.mxu0  ;;  %v3758_v47 = vpop.f32.mrf.mxu1 }
 0x3e3   : > { %5371 = vst [vmem:[%s8990_s20 + $0xf8] sm:$0xff] %v5175_v15  ;;  %v5178_v29 = vadd.f32 %v10054_v32, %v4960_v8  ;;  %v4961_v11 = vmul.f32 %v10985_v36, %v3753_v9  ;;  %v3757_v55 = vadd.f32 %v3756_v51, %v3398_v4  ;;  %v3400_v41 = vadd.f32 %v3399_v58, %v9735_v27 }
 0x3e4   : > { %v3403_v6 = vpop.f32.mrf.mxu0  ;;  %v3762_v30 = vpop.f32.mrf.mxu1 }
 0x3e5   : > { %5374 = vst [vmem:[%s8990_s20 + $0x110] sm:$0xff] %v5178_v29  ;;  %v5179_v26 = vadd.f32 %v10058_v38, %v4961_v11  ;;  %v4964_v57 = vmul.f32 %v10986_v5, %v3757_v55  ;;  %v3759_v39 = vadd.f32 %v3758_v47, %v3400_v41  ;;  %v3404_v37 = vadd.f32 %v3403_v6, %v9739_v46  ;;  %v10989_v29 = vld [vmem:[#allocation65_spill] sm:$0xff] }
 0x3e6   : > { %v3405_v49 = vpop.f32.mrf.mxu0  ;;  %v3764_v59 = vpop.f32.mrf.mxu1 }
 0x3e7   : > { %5375 = vst [vmem:[%s8990_s20 + $0x118] sm:$0xff] %v5179_v26  ;;  %v5182_v12 = vadd.f32 %v10054_v32, %v4964_v57  ;;  %v4965_v34 = vmul.f32 %v10986_v5, %v3759_v39  ;;  %v3763_v27 = vadd.f32 %v3762_v30, %v3404_v37  ;;  %v3406_v13 = vadd.f32 %v3405_v49, %v9743_v40  ;;  %v10990_v49 = vld [vmem:[#allocation84_spill] sm:$0xff] }
 0x3e8   : > { %v3409_v2 = vpop.f32.mrf.mxu0  ;;  %v3768_v16 = vpop.f32.mrf.mxu1 }
 0x3e9   : > { %5378 = vst [vmem:[%s8990_s20 + $0x130] sm:$0xff] %v5182_v12  ;;  %v5183_v19 = vadd.f32 %v10058_v38, %v4965_v34  ;;  %v4968_v35 = vmul.f32 %v10987_v23, %v3763_v27  ;;  %v3765_v46 = vadd.f32 %v3764_v59, %v3406_v13  ;;  %v3410_v1 = vadd.f32 %v3409_v2, %v9747_v24 }
 0x3ea   : > { %v3411_v50 = vpop.f32.mrf.mxu0  ;;  %v3770_v3 = vpop.f32.mrf.mxu1 }
 0x3eb   : > { %5379 = vst [vmem:[%s8990_s20 + $0x138] sm:$0xff] %v5183_v19  ;;  %v5186_v28 = vadd.f32 %v10054_v32, %v4968_v35  ;;  %v4969_v48 = vmul.f32 %v10987_v23, %v3765_v46  ;;  %v3769_v40 = vadd.f32 %v3768_v16, %v3410_v1  ;;  %v3412_v33 = vadd.f32 %v3411_v50, %v9751_v20  ;;  %v10991_v46 = vld [vmem:[#allocation66_spill] sm:$0xff] }
 0x3ec   : > { %v3415_v44 = vpop.f32.mrf.mxu0  ;;  %v3774_v52 = vpop.f32.mrf.mxu1 }
 0x3ed   : > { %5382 = vst [vmem:[%s8990_s20 + $0x150] sm:$0xff] %v5186_v28  ;;  %v5187_v63 = vadd.f32 %v10058_v38, %v4969_v48  ;;  %v4972_v25 = vmul.f32 %v10988_v60, %v3769_v40  ;;  %v3771_v24 = vadd.f32 %v3770_v3, %v3412_v33  ;;  %v3416_v45 = vadd.f32 %v3415_v44, %v9755_v17 }
 0x3ee   : > { %v3417_v51 = vpop.f32.mrf.mxu0  ;;  %v3776_v15 = vpop.f32.mrf.mxu1 }
 0x3ef   : > { %5383 = vst [vmem:[%s8990_s20 + $0x158] sm:$0xff] %v5187_v63  ;;  %v5190_v36 = vadd.f32 %v10054_v32, %v4972_v25  ;;  %v4973_v8 = vmul.f32 %v10988_v60, %v3771_v24  ;;  %v3775_v20 = vadd.f32 %v3774_v52, %v3416_v45  ;;  %v3418_v9 = vadd.f32 %v3417_v51, %v9759_v31  ;;  %v10992_v60 = vld [vmem:[#allocation67_spill] sm:$0xff] }
 0x3f0   : > { %v3421_v4 = vpop.f32.mrf.mxu0  ;;  %v3780_v58 = vpop.f32.mrf.mxu1 }
 0x3f1   : > { %5386 = vst [vmem:[%s8990_s20 + $0x170] sm:$0xff] %v5190_v36  ;;  %v5191_v47 = vadd.f32 %v10058_v38, %v4973_v8  ;;  %v4976_v11 = vmul.f32 %v10989_v29, %v3775_v20  ;;  %v3777_v17 = vadd.f32 %v3776_v15, %v3418_v9  ;;  %v3422_v55 = vadd.f32 %v3421_v4, %v9763_v56 }
 0x3f2   : > { %v3423_v41 = vpop.f32.mrf.mxu0  ;;  %v3782_v6 = vpop.f32.mrf.mxu1 }
 0x3f3   : > { %5387 = vst [vmem:[%s8990_s20 + $0x178] sm:$0xff] %v5191_v47  ;;  %v5194_v30 = vadd.f32 %v10054_v32, %v4976_v11  ;;  %v4977_v26 = vmul.f32 %v10989_v29, %v3777_v17  ;;  %v3781_v31 = vadd.f32 %v3780_v58, %v3422_v55  ;;  %v3424_v5 = vadd.f32 %v3423_v41, %v9767_v21  ;;  %v10993_v58 = vld [vmem:[#allocation86_spill] sm:$0xff] }
 0x3f4   : > { %v3427_v57 = vpop.f32.mrf.mxu0  ;;  %v3786_v39 = vpop.f32.mrf.mxu1 }
 0x3f5   : > { %5390 = vst [vmem:[%s8990_s20 + $0x190] sm:$0xff] %v5194_v30  ;;  %v5195_v37 = vadd.f32 %v10058_v38, %v4977_v26  ;;  %v4980_v59 = vmul.f32 %v10990_v49, %v3781_v31  ;;  %v3783_v56 = vadd.f32 %v3782_v6, %v3424_v5  ;;  %v3428_v12 = vadd.f32 %v3427_v57, %v9771_v61  ;;  %v10994_v5 = vld [vmem:[#allocation91_spill] sm:$0xff] }
 0x3f6   : > { %v3429_v34 = vpop.f32.mrf.mxu0  ;;  %v3788_v27 = vpop.f32.mrf.mxu1 }
 0x3f7   : > { %5391 = vst [vmem:[%s8990_s20 + $0x198] sm:$0xff] %v5195_v37  ;;  %v5198_v13 = vadd.f32 %v10054_v32, %v4980_v59  ;;  %v4981_v2 = vmul.f32 %v10990_v49, %v3783_v56  ;;  %v3787_v21 = vadd.f32 %v3786_v39, %v3428_v12  ;;  %v3430_v16 = vadd.f32 %v3429_v34, %v9775_v43 }
 0x3f8   : > { %v3433_v19 = vpop.f32.mrf.mxu0  ;;  %v3792_v23 = vpop.f32.mrf.mxu1 }
 0x3f9   : > { %5394 = vst [vmem:[%s8990_s20 + $0x1b0] sm:$0xff] %v5198_v13  ;;  %v5199_v35 = vadd.f32 %v10058_v38, %v4981_v2  ;;  %v4984_v1 = vmul.f32 %v10991_v46, %v3787_v21  ;;  %v3789_v61 = vadd.f32 %v3788_v27, %v3430_v16  ;;  %v3434_v50 = vadd.f32 %v3433_v19, %v9779_v18  ;;  %v10995_v2 = vld [vmem:[#allocation93_spill] sm:$0xff] }
 0x3fa   : > { %v3435_v3 = vpop.f32.mrf.mxu0  ;;  %v3794_v28 = vpop.f32.mrf.mxu1 }
 0x3fb   : > { %5395 = vst [vmem:[%s8990_s20 + $0x1b8] sm:$0xff] %v5199_v35  ;;  %v5202_v48 = vadd.f32 %v10054_v32, %v4984_v1  ;;  %v4985_v40 = vmul.f32 %v10991_v46, %v3789_v61  ;;  %v3793_v43 = vadd.f32 %v3792_v23, %v3434_v50  ;;  %v3436_v33 = vadd.f32 %v3435_v3, %v9783_v0 }
 0x3fc   : > { %v3439_v44 = vpop.f32.mrf.mxu0  ;;  %v3798_v52 = vpop.f32.mrf.mxu1 }
 0x3fd   : > { %5398 = vst [vmem:[%s8990_s20 + $0x1d0] sm:$0xff] %v5202_v48  ;;  %v5203_v63 = vadd.f32 %v10058_v38, %v4985_v40  ;;  %v4988_v25 = vmul.f32 %v10992_v60, %v3793_v43  ;;  %v3795_v18 = vadd.f32 %v3794_v28, %v3436_v33  ;;  %v3440_v24 = vadd.f32 %v3439_v44, %v9787_v62  ;;  %v10996_v28 = vld [vmem:[#allocation95_spill] sm:$0xff]  ;;  %v10997_v40 = vld [vmem:[#allocation41_spill] sm:$0xff] }
 0x3fe   : > { %v3441_v45 = vpop.f32.mrf.mxu0  ;;  %v3800_v51 = vpop.f32.mrf.mxu1 }
 0x3ff   : > { %5399 = vst [vmem:[%s8990_s20 + $0x1d8] sm:$0xff] %v5203_v63  ;;  %v5206_v15 = vadd.f32 %v10054_v32, %v4988_v25  ;;  %v4989_v36 = vmul.f32 %v10992_v60, %v3795_v18  ;;  %v3799_v0 = vadd.f32 %v3798_v52, %v3440_v24  ;;  %v3442_v8 = vadd.f32 %v3441_v45, %v9791_v7  ;;  %v10998_v60 = vld [vmem:[#allocation43_spill] sm:$0xff] }
 0x400   : > { %v3445_v20 = vpop.f32.mrf.mxu0  ;;  %v3804_v9 = vpop.f32.mrf.mxu1 }
 0x401   : > { %5402 = vst [vmem:[%s8990_s20 + $0x1f0] sm:$0xff] %v5206_v15  ;;  %v5207_v4 = vadd.f32 %v10058_v38, %v4989_v36  ;;  %v4992_v47 = vmul.f32 %v10993_v58, %v3799_v0  ;;  %v3801_v62 = vadd.f32 %v3800_v51, %v3442_v8  ;;  %v3446_v29 = vadd.f32 %v3445_v20, %v9795_v10  ;;  %v10999_v51 = vld [vmem:[#allocation97_spill] sm:$0xff]  ;;  %v11000_v0 = vld [vmem:[#allocation44_spill] sm:$0xff] }
 0x402   : > { %v3447_v11 = vpop.f32.mrf.mxu0  ;;  %v3806_v17 = vpop.f32.mrf.mxu1 }
 0x403   : > { %5403 = vst [vmem:[%s8990_s20 + $0x1f8] sm:$0xff] %v5207_v4  ;;  %v5210_v55 = vadd.f32 %v10054_v32, %v4992_v47  ;;  %v4993_v41 = vmul.f32 %v10993_v58, %v3801_v62  ;;  %v3805_v7 = vadd.f32 %v3804_v9, %v3446_v29  ;;  %v3448_v6 = vadd.f32 %v3447_v11, %v9799_v22  ;;  %v11001_v62 = vld [vmem:[#allocation46_spill] sm:$0xff] }
 0x404   : > { %v3451_v30 = vpop.f32.mrf.mxu0  ;;  %v3810_v26 = vpop.f32.mrf.mxu1 }
 0x405   : > { %5406 = vst [vmem:[%s8990_s20 + $0x210] sm:$0xff] %v5210_v55  ;;  %v5211_v31 = vadd.f32 %v10058_v38, %v4993_v41  ;;  %v4996_v57 = vmul.f32 %v10994_v5, %v3805_v7  ;;  %v3807_v10 = vadd.f32 %v3806_v17, %v3448_v6  ;;  %v3452_v39 = vadd.f32 %v3451_v30, %v9803_v54  ;;  %v11002_v41 = vld [vmem:[#allocation40_spill] sm:$0xff]  ;;  %v11003_v30 = vld [vmem:[#allocation47_spill] sm:$0xff] }
 0x406   : > { %v3453_v37 = vpop.f32.mrf.mxu0  ;;  %v3812_v49 = vpop.f32.mrf.mxu1 }
 0x407   : > { %5407 = vst [vmem:[%s8990_s20 + $0x218] sm:$0xff] %v5211_v31  ;;  %v5214_v59 = vadd.f32 %v10054_v32, %v4996_v57  ;;  %v4997_v56 = vmul.f32 %v10994_v5, %v3807_v10  ;;  %v3811_v22 = vadd.f32 %v3810_v26, %v3452_v39  ;;  %v3454_v12 = vadd.f32 %v3453_v37, %v9807_v53  ;;  %v11004_v37 = vld [vmem:[#allocation49_spill] sm:$0xff] }
 0x408   : > { %v3457_v34 = vpop.f32.mrf.mxu0  ;;  %v3816_v27 = vpop.f32.mrf.mxu1 }
 0x409   : > { %5410 = vst [vmem:[%s8990_s20 + $0x230] sm:$0xff] %v5214_v59  ;;  %v5215_v13 = vadd.f32 %v10058_v38, %v4997_v56  ;;  %v5000_v21 = vmul.f32 %v10995_v2, %v3811_v22  ;;  %v3813_v54 = vadd.f32 %v3812_v49, %v3454_v12  ;;  %v3458_v16 = vadd.f32 %v3457_v34, %v9811_v14  ;;  %v11005_v12 = vld [vmem:[#allocation42_spill] sm:$0xff] }
 0x40a   : > { %v3459_v19 = vpop.f32.mrf.mxu0  ;;  %v3818_v23 = vpop.f32.mrf.mxu1 }
 0x40b   : > { %5411 = vst [vmem:[%s8990_s20 + $0x238] sm:$0xff] %v5215_v13  ;;  %v5218_v35 = vadd.f32 %v10054_v32, %v5000_v21  ;;  %v5001_v46 = vmul.f32 %v10995_v2, %v3813_v54  ;;  %v3817_v53 = vadd.f32 %v3816_v27, %v3458_v16  ;;  %v3460_v1 = vadd.f32 %v3459_v19, %v9815_v42  ;;  %v11006_v13 = vld [vmem:[#allocation51_spill] sm:$0xff] }
 0x40c   : > { %v3463_v61 = vpop.f32.mrf.mxu0  ;;  %v3822_v50 = vpop.f32.mrf.mxu1 }
 0x40d   : > { %5414 = vst [vmem:[%s8990_s20 + $0x250] sm:$0xff] %v5218_v35  ;;  %v5219_v3 = vadd.f32 %v10058_v38, %v5001_v46  ;;  %v5004_v48 = vmul.f32 %v10996_v28, %v3817_v53  ;;  %v3819_v14 = vadd.f32 %v3818_v23, %v3460_v1  ;;  %v3464_v43 = vadd.f32 %v3463_v61, %v10997_v40  ;;  %v11007_v35 = vld [vmem:[#allocation52_spill] sm:$0xff] }
 0x40e   : > { %v3465_v33 = vpop.f32.mrf.mxu0  ;;  %v3824_v44 = vpop.f32.mrf.mxu1 }
 0x40f   : > { %5415 = vst [vmem:[%s8990_s20 + $0x258] sm:$0xff] %v5219_v3  ;;  %v5222_v52 = vadd.f32 %v10054_v32, %v5004_v48  ;;  %v5005_v63 = vmul.f32 %v10996_v28, %v3819_v14  ;;  %v3823_v42 = vadd.f32 %v3822_v50, %v3464_v43  ;;  %v3466_v25 = vadd.f32 %v3465_v33, %v10998_v60  ;;  %v11008_v50 = vld [vmem:[#allocation72_spill] sm:$0xff]  ;;  %v11009_v48 = vld [vmem:[#allocation53_spill] sm:$0xff] }
 0x410   : > { %v3469_v18 = vpop.f32.mrf.mxu0  ;;  %v3828_v24 = vpop.f32.mrf.mxu1 }
 0x411   : > { %5418 = vst [vmem:[%s8990_s20 + $0x270] sm:$0xff] %v5222_v52  ;;  %v5223_v45 = vadd.f32 %v10058_v38, %v5005_v63  ;;  %v5008_v15 = vmul.f32 %v10999_v51, %v3823_v42  ;;  %v3825_v36 = vadd.f32 %v3824_v44, %v3466_v25  ;;  %v3470_v8 = vadd.f32 %v3469_v18, %v11000_v0  ;;  %v11010_v63 = vld [vmem:[#allocation54_spill] sm:$0xff] }
 0x412   : > { %v3471_v20 = vpop.f32.mrf.mxu0  ;;  %v3830_v9 = vpop.f32.mrf.mxu1 }
 0x413   : > { %5419 = vst [vmem:[%s8990_s20 + $0x278] sm:$0xff] %v5223_v45  ;;  %v5226_v4 = vadd.f32 %v10054_v32, %v5008_v15  ;;  %v5009_v58 = vmul.f32 %v10999_v51, %v3825_v36  ;;  %v3829_v47 = vadd.f32 %v3828_v24, %v3470_v8  ;;  %v3472_v29 = vadd.f32 %v3471_v20, %v11001_v62  ;;  %v11011_v24 = vld [vmem:[#allocation99_spill] sm:$0xff] }
 0x414   : > { %v3475_v11 = vpop.f32.mrf.mxu0  ;;  %v3834_v17 = vpop.f32.mrf.mxu1  ;;  %v11012_v15 = vld [vmem:[#allocation55_spill] sm:$0xff] }
 0x415   : > { %5422 = vst [vmem:[%s8990_s20 + $0x290] sm:$0xff] %v5226_v4  ;;  %v5227_v55 = vadd.f32 %v10058_v38, %v5009_v58  ;;  %v5012_v7 = vmul.f32 %v11002_v41, %v3829_v47  ;;  %v3831_v6 = vadd.f32 %v3830_v9, %v3472_v29  ;;  %v3476_v26 = vadd.f32 %v3475_v11, %v11003_v30  ;;  %v11013_v58 = vld [vmem:[#allocation56_spill] sm:$0xff] }
 0x416   : > { %v3477_v31 = vpop.f32.mrf.mxu0  ;;  %v3836_v5 = vpop.f32.mrf.mxu1 }
 0x417   : > { %5423 = vst [vmem:[%s8990_s20 + $0x298] sm:$0xff] %v5227_v55  ;;  %v5230_v57 = vadd.f32 %v10054_v32, %v5012_v7  ;;  %v5013_v10 = vmul.f32 %v11002_v41, %v3831_v6  ;;  %v3835_v39 = vadd.f32 %v3834_v17, %v3476_v26  ;;  %v3478_v49 = vadd.f32 %v3477_v31, %v11004_v37  ;;  %v11014_v17 = vld [vmem:[#allocation76_spill] sm:$0xff]  ;;  %v11015_v7 = vld [vmem:[#allocation57_spill] sm:$0xff] }
 0x418   : > { %v3481_v59 = vpop.f32.mrf.mxu0  ;;  %v3840_v56 = vpop.f32.mrf.mxu1 }
 0x419   : > { %5426 = vst [vmem:[%s8990_s20 + $0x2b0] sm:$0xff] %v5230_v57  ;;  %v5231_v22 = vadd.f32 %v10058_v38, %v5013_v10  ;;  %v5016_v34 = vmul.f32 %v11005_v12, %v3835_v39  ;;  %v3837_v27 = vadd.f32 %v3836_v5, %v3478_v49  ;;  %v3482_v2 = vadd.f32 %v3481_v59, %v11006_v13  ;;  %v11016_v10 = vld [vmem:[#allocation12_spill] sm:$0xff] }
 0x41a   : > { %v3483_v21 = vpop.f32.mrf.mxu0  ;;  %v3842_v54 = vpop.f32.mrf.mxu1 }
 0x41b   : > { %5427 = vst [vmem:[%s8990_s20 + $0x2b8] sm:$0xff] %v5231_v22  ;;  %v5234_v16 = vadd.f32 %v10054_v32, %v5016_v34  ;;  %v5017_v19 = vmul.f32 %v11005_v12, %v3837_v27  ;;  %v3841_v23 = vadd.f32 %v3840_v56, %v3482_v2  ;;  %v3484_v46 = vadd.f32 %v3483_v21, %v11007_v35  ;;  %v11017_v56 = vld [vmem:[#allocation100_spill] sm:$0xff]  ;;  %v11018_v34 = vld [vmem:[#allocation62_spill] sm:$0xff] }
 0x41c   : > { %v3487_v53 = vpop.f32.mrf.mxu0  ;;  %v3846_v1 = vpop.f32.mrf.mxu1 }
 0x41d   : > { %5430 = vst [vmem:[%s8990_s20 + $0x2d0] sm:$0xff] %v5234_v16  ;;  %v5235_v61 = vadd.f32 %v10058_v38, %v5017_v19  ;;  %v5020_v3 = vmul.f32 %v11008_v50, %v3841_v23  ;;  %v3843_v28 = vadd.f32 %v3842_v54, %v3484_v46  ;;  %v3488_v14 = vadd.f32 %v3487_v53, %v11009_v48  ;;  %v11019_v19 = vld [vmem:[#allocation68_spill] sm:$0xff] }
 0x41e   : > { %v3489_v40 = vpop.f32.mrf.mxu0  ;;  %v3848_v43 = vpop.f32.mrf.mxu1 }
 0x41f   : > { %5431 = vst [vmem:[%s8990_s20 + $0x2d8] sm:$0xff] %v5235_v61  ;;  %v5238_v33 = vadd.f32 %v10054_v32, %v5020_v3  ;;  %v5021_v44 = vmul.f32 %v11008_v50, %v3843_v28  ;;  %v3847_v52 = vadd.f32 %v3846_v1, %v3488_v14  ;;  %v3490_v42 = vadd.f32 %v3489_v40, %v11010_v63  ;;  %v11020_v1 = vld [vmem:[#allocation102_spill] sm:$0xff] }
 0x420   : > { %v3493_v60 = vpop.f32.mrf.mxu0  ;;  %v3852_v25 = vpop.f32.mrf.mxu1  ;;  %v11021_v3 = vld [vmem:[#allocation14_spill] sm:$0xff] }
 0x421   : > { %5434 = vst [vmem:[%s8990_s20 + $0x2f0] sm:$0xff] %v5238_v33  ;;  %v5239_v18 = vadd.f32 %v10058_v38, %v5021_v44  ;;  %v5024_v45 = vmul.f32 %v11011_v24, %v3847_v52  ;;  %v3849_v51 = vadd.f32 %v3848_v43, %v3490_v42  ;;  %v3494_v36 = vadd.f32 %v3493_v60, %v11012_v15  ;;  %v11022_v44 = vld [vmem:[#allocation69_spill] sm:$0xff] }
 0x422   : > { %v3495_v0 = vpop.f32.mrf.mxu0  ;;  %v3854_v8 = vpop.f32.mrf.mxu1 }
 0x423   : > { %5435 = vst [vmem:[%s8990_s20 + $0x2f8] sm:$0xff] %v5239_v18  ;;  %v5242_v20 = vadd.f32 %v10054_v32, %v5024_v45  ;;  %v5025_v9 = vmul.f32 %v11011_v24, %v3849_v51  ;;  %v3853_v4 = vadd.f32 %v3852_v25, %v3494_v36  ;;  %v3496_v47 = vadd.f32 %v3495_v0, %v11013_v58  ;;  %v11023_v25 = vld [vmem:[#allocation104_spill] sm:$0xff]  ;;  %v11024_v45 = vld [vmem:[#allocation70_spill] sm:$0xff] }
 0x424   : > { %v3499_v62 = vpop.f32.mrf.mxu0  ;;  %v3858_v29 = vpop.f32.mrf.mxu1 }
 0x425   : > { %5438 = vst [vmem:[%s8990_s20 + $0x310] sm:$0xff] %v5242_v20  ;;  %v5243_v11 = vadd.f32 %v10058_v38, %v5025_v9  ;;  %v5028_v55 = vmul.f32 %v11014_v17, %v3853_v4  ;;  %v3855_v41 = vadd.f32 %v3854_v8, %v3496_v47  ;;  %v3500_v6 = vadd.f32 %v3499_v62, %v11015_v7  ;;  %v11025_v9 = vld [vmem:[#allocation15_spill] sm:$0xff] }
 0x426   : > { %v3501_v30 = vpop.f32.mrf.mxu0  ;;  %v3860_v26 = vpop.f32.mrf.mxu1 }
 0x427   : > { %5439 = vst [vmem:[%s8990_s20 + $0x318] sm:$0xff] %v5243_v11  ;;  %v5246_v31 = vadd.f32 %v10054_v32, %v5028_v55  ;;  %v5029_v5 = vmul.f32 %v11014_v17, %v3855_v41  ;;  %v3859_v57 = vadd.f32 %v3858_v29, %v3500_v6  ;;  %v3502_v39 = vadd.f32 %v3501_v30, %v11016_v10  ;;  %v11026_v29 = vld [vmem:[#allocation59_spill] sm:$0xff]  ;;  %v11027_v55 = vld [vmem:[#allocation17_spill] sm:$0xff] }
 0x428   : > { %v3505_v37 = vpop.f32.mrf.mxu0  ;;  %v3864_v49 = vpop.f32.mrf.mxu1 }
 0x429   : > { %5442 = vst [vmem:[%s8990_s20 + $0x330] sm:$0xff] %v5246_v31  ;;  %v5247_v59 = vadd.f32 %v10058_v38, %v5029_v5  ;;  %v5032_v22 = vmul.f32 %v11017_v56, %v3859_v57  ;;  %v3861_v12 = vadd.f32 %v3860_v26, %v3502_v39  ;;  %v3506_v27 = vadd.f32 %v3505_v37, %v11018_v34  ;;  %v11028_v5 = vld [vmem:[#allocation74_spill] sm:$0xff] }
 0x42a   : > { %v3507_v13 = vpop.f32.mrf.mxu0  ;;  %v3866_v2 = vpop.f32.mrf.mxu1 }
 0x42b   : > { %5443 = vst [vmem:[%s8990_s20 + $0x338] sm:$0xff] %v5247_v59  ;;  %v5250_v21 = vadd.f32 %v10054_v32, %v5032_v22  ;;  %v5033_v54 = vmul.f32 %v11017_v56, %v3861_v12  ;;  %v3865_v16 = vadd.f32 %v3864_v49, %v3506_v27  ;;  %v3508_v23 = vadd.f32 %v3507_v13, %v11019_v19  ;;  %v11029_v49 = vld [vmem:[#allocation13_spill] sm:$0xff]  ;;  %v11030_v22 = vld [vmem:[#allocation75_spill] sm:$0xff] }
 0x42c   : > { %v3511_v35 = vpop.f32.mrf.mxu0  ;;  %v3870_v46 = vpop.f32.mrf.mxu1 }
 0x42d   : > { %5446 = vst [vmem:[%s8990_s20 + $0x350] sm:$0xff] %v5250_v21  ;;  %v5251_v53 = vadd.f32 %v10058_v38, %v5033_v54  ;;  %v5036_v61 = vmul.f32 %v11020_v1, %v3865_v16  ;;  %v3867_v50 = vadd.f32 %v3866_v2, %v3508_v23  ;;  %v3512_v28 = vadd.f32 %v3511_v35, %v11021_v3  ;;  %v11031_v54 = vld [vmem:[#allocation77_spill] sm:$0xff] }
 0x42e   : > { %v3513_v48 = vpop.f32.mrf.mxu0  ;;  %v3872_v14 = vpop.f32.mrf.mxu1 }
 0x42f   : > { %5447 = vst [vmem:[%s8990_s20 + $0x358] sm:$0xff] %v5251_v53  ;;  %v5254_v40 = vadd.f32 %v10054_v32, %v5036_v61  ;;  %v5037_v43 = vmul.f32 %v11020_v1, %v3867_v50  ;;  %v3871_v33 = vadd.f32 %v3870_v46, %v3512_v28  ;;  %v3514_v52 = vadd.f32 %v3513_v48, %v11022_v44  ;;  %v11032_v46 = vld [vmem:[#allocation16_spill] sm:$0xff]  ;;  %v11033_v61 = vld [vmem:[#allocation22_spill] sm:$0xff] }
 0x430   : > { %v3517_v63 = vpop.f32.mrf.mxu0  ;;  %v3876_v42 = vpop.f32.mrf.mxu1 }
 0x431   : > { %5450 = vst [vmem:[%s8990_s20 + $0x370] sm:$0xff] %v5254_v40  ;;  %v5255_v60 = vadd.f32 %v10058_v38, %v5037_v43  ;;  %v5040_v18 = vmul.f32 %v11023_v25, %v3871_v33  ;;  %v3873_v24 = vadd.f32 %v3872_v14, %v3514_v52  ;;  %v3518_v51 = vadd.f32 %v3517_v63, %v11024_v45  ;;  %v11034_v43 = vld [vmem:[#allocation78_spill] sm:$0xff] }
 0x432   : > { %v3519_v15 = vpop.f32.mrf.mxu0  ;;  %v3878_v36 = vpop.f32.mrf.mxu1 }
 0x433   : > { %5451 = vst [vmem:[%s8990_s20 + $0x378] sm:$0xff] %v5255_v60  ;;  %v5258_v0 = vadd.f32 %v10054_v32, %v5040_v18  ;;  %v5041_v8 = vmul.f32 %v11023_v25, %v3873_v24  ;;  %v3877_v20 = vadd.f32 %v3876_v42, %v3518_v51  ;;  %v3520_v4 = vadd.f32 %v3519_v15, %v11025_v9  ;;  %v11035_v42 = vld [vmem:[#allocation18_spill] sm:$0xff]  ;;  %v11036_v18 = vld [vmem:[#allocation79_spill] sm:$0xff] }
 0x434   : > { %v3523_v58 = vpop.f32.mrf.mxu0  ;;  %v3882_v47 = vpop.f32.mrf.mxu1 }
 0x435   : > { %5454 = vst [vmem:[%s8990_s20 + $0x390] sm:$0xff] %v5258_v0  ;;  %v5259_v62 = vadd.f32 %v10058_v38, %v5041_v8  ;;  %v5044_v11 = vmul.f32 %v11026_v29, %v3877_v20  ;;  %v3879_v17 = vadd.f32 %v3878_v36, %v3520_v4  ;;  %v3524_v41 = vadd.f32 %v3523_v58, %v11027_v55  ;;  %v11037_v8 = vld [vmem:[#allocation26_spill] sm:$0xff] }
 0x436   : > { %v3525_v7 = vpop.f32.mrf.mxu0  ;;  %v3884_v6 = vpop.f32.mrf.mxu1 }
 0x437   : > { %5455 = vst [vmem:[%s8990_s20 + $0x398] sm:$0xff] %v5259_v62  ;;  %v5262_v30 = vadd.f32 %v10054_v32, %v5044_v11  ;;  %v5045_v26 = vmul.f32 %v11026_v29, %v3879_v17  ;;  %v3883_v31 = vadd.f32 %v3882_v47, %v3524_v41  ;;  %v3526_v57 = vadd.f32 %v3525_v7, %v11028_v5  ;;  %v11038_v47 = vld [vmem:[#allocation19_spill] sm:$0xff] }
 0x438   : > { %v3529_v10 = vpop.f32.mrf.mxu0  ;;  %v3888_v39 = vpop.f32.mrf.mxu1  ;;  %v11039_v11 = vld [vmem:[#allocation27_spill] sm:$0xff] }
 0x439   : > { %5458 = vst [vmem:[%s8990_s20 + $0x3b0] sm:$0xff] %v5262_v30  ;;  %v5263_v37 = vadd.f32 %v10058_v38, %v5045_v26  ;;  %v5048_v59 = vmul.f32 %v11029_v49, %v3883_v31  ;;  %v3885_v56 = vadd.f32 %v3884_v6, %v3526_v57  ;;  %v3530_v12 = vadd.f32 %v3529_v10, %v11030_v22  ;;  %v11040_v26 = vld [vmem:[#allocation29_spill] sm:$0xff] }
 0x43a   : > { %v3531_v34 = vpop.f32.mrf.mxu0  ;;  %v3890_v27 = vpop.f32.mrf.mxu1 }
 0x43b   : > { %5459 = vst [vmem:[%s8990_s20 + $0x3b8] sm:$0xff] %v5263_v37  ;;  %v5266_v13 = vadd.f32 %v10054_v32, %v5048_v59  ;;  %v5049_v2 = vmul.f32 %v11029_v49, %v3885_v56  ;;  %v3889_v21 = vadd.f32 %v3888_v39, %v3530_v12  ;;  %v3532_v16 = vadd.f32 %v3531_v34, %v11031_v54  ;;  %v11041_v39 = vld [vmem:[#allocation20_spill] sm:$0xff]  ;;  %v11042_v59 = vld [vmem:[#allocation83_spill] sm:$0xff] }
 0x43c   : > { %v3535_v19 = vpop.f32.mrf.mxu0  ;;  %v3894_v23 = vpop.f32.mrf.mxu1 }
 0x43d   : > { %5462 = vst [vmem:[%s8990_s20 + $0x3d0] sm:$0xff] %v5266_v13  ;;  %v5267_v35 = vadd.f32 %v10058_v38, %v5049_v2  ;;  %v5052_v53 = vmul.f32 %v11032_v46, %v3889_v21  ;;  %v3891_v1 = vadd.f32 %v3890_v27, %v3532_v16  ;;  %v3536_v50 = vadd.f32 %v3535_v19, %v11033_v61  ;;  %v11043_v2 = vld [vmem:[#allocation85_spill] sm:$0xff] }
 0x43e   : > { %v3537_v3 = vpop.f32.mrf.mxu0  ;;  %v3896_v28 = vpop.f32.mrf.mxu1 }
 0x43f   : > { %5463 = vst [vmem:[%s8990_s20 + $0x3d8] sm:$0xff] %v5267_v35  ;;  %v5270_v48 = vadd.f32 %v10054_v32, %v5052_v53  ;;  %v5053_v14 = vmul.f32 %v11032_v46, %v3891_v1  ;;  %v3895_v40 = vadd.f32 %v3894_v23, %v3536_v50  ;;  %v3538_v33 = vadd.f32 %v3537_v3, %v11034_v43  ;;  %v11044_v23 = vld [vmem:[#allocation21_spill] sm:$0xff]  ;;  %v11045_v53 = vld [vmem:[#allocation87_spill] sm:$0xff] }
 0x440   : > { %v3541_v44 = vpop.f32.mrf.mxu0  ;;  %v3900_v52 = vpop.f32.mrf.mxu1 }
 0x441   : > { %5466 = vst [vmem:[%s8990_s20 + $0x3f0] sm:$0xff] %v5270_v48  ;;  %v5271_v63 = vadd.f32 %v10058_v38, %v5053_v14  ;;  %v5056_v60 = vmul.f32 %v11035_v42, %v3895_v40  ;;  %v3897_v25 = vadd.f32 %v3896_v28, %v3538_v33  ;;  %v3542_v24 = vadd.f32 %v3541_v44, %v11036_v18  ;;  %v11046_v14 = vld [vmem:[#allocation88_spill] sm:$0xff] }
 0x442   : > { %v3543_v45 = vpop.f32.mrf.mxu0  ;;  %v3902_v51 = vpop.f32.mrf.mxu1 }
 0x443   : > { %5467 = vst [vmem:[%s8990_s20 + $0x3f8] sm:$0xff] %v5271_v63  ;;  %v5274_v15 = vadd.f32 %v10054_v32, %v5056_v60  ;;  %v5057_v36 = vmul.f32 %v11035_v42, %v3897_v25  ;;  %v3901_v0 = vadd.f32 %v3900_v52, %v3542_v24  ;;  %v3544_v20 = vadd.f32 %v3543_v45, %v11037_v8  ;;  %v11047_v52 = vld [vmem:[#allocation23_spill] sm:$0xff]  ;;  %v11048_v60 = vld [vmem:[#allocation89_spill] sm:$0xff] }
 0x444   : > { %v3547_v9 = vpop.f32.mrf.mxu0  ;;  %v3906_v4 = vpop.f32.mrf.mxu1 }
 0x445   : > { %5470 = vst [vmem:[%s8990_s20 + $0x410] sm:$0xff] %v5274_v15  ;;  %v5275_v58 = vadd.f32 %v10058_v38, %v5057_v36  ;;  %v5060_v62 = vmul.f32 %v11038_v47, %v3901_v0  ;;  %v3903_v29 = vadd.f32 %v3902_v51, %v3544_v20  ;;  %v3548_v17 = vadd.f32 %v3547_v9, %v11039_v11  ;;  %v11049_v36 = vld [vmem:[#allocation90_spill] sm:$0xff] }
 0x446   : > { %v3549_v55 = vpop.f32.mrf.mxu0  ;;  %v3908_v41 = vpop.f32.mrf.mxu1 }
 0x447   : > { %5471 = vst [vmem:[%s8990_s20 + $0x418] sm:$0xff] %v5275_v58  ;;  %v5278_v7 = vadd.f32 %v10054_v32, %v5060_v62  ;;  %v5061_v6 = vmul.f32 %v11038_v47, %v3903_v29  ;;  %v3907_v30 = vadd.f32 %v3906_v4, %v3548_v17  ;;  %v3550_v31 = vadd.f32 %v3549_v55, %v11040_v26  ;;  %v11050_v4 = vld [vmem:[#allocation24_spill] sm:$0xff] }
 0x448   : > { %v3553_v5 = vpop.f32.mrf.mxu0  ;;  %v3912_v57 = vpop.f32.mrf.mxu1  ;;  %v11051_v62 = vld [vmem:[#allocation92_spill] sm:$0xff] }
 0x449   : > { %5474 = vst [vmem:[%s8990_s20 + $0x430] sm:$0xff] %v5278_v7  ;;  %v5279_v10 = vadd.f32 %v10058_v38, %v5061_v6  ;;  %v5064_v37 = vmul.f32 %v11041_v39, %v3907_v30  ;;  %v3909_v49 = vadd.f32 %v3908_v41, %v3550_v31  ;;  %v3554_v56 = vadd.f32 %v3553_v5, %v11042_v59  ;;  %v11052_v6 = vld [vmem:[#allocation37_spill] sm:$0xff] }
 0x44a   : > { %v3555_v22 = vpop.f32.mrf.mxu0  ;;  %v3914_v12 = vpop.f32.mrf.mxu1 }
 0x44b   : > { %5475 = vst [vmem:[%s8990_s20 + $0x438] sm:$0xff] %v5279_v10  ;;  %v5282_v34 = vadd.f32 %v10054_v32, %v5064_v37  ;;  %v5065_v27 = vmul.f32 %v11041_v39, %v3909_v49  ;;  %v3913_v13 = vadd.f32 %v3912_v57, %v3554_v56  ;;  %v3556_v21 = vadd.f32 %v3555_v22, %v11043_v2  ;;  %v11053_v57 = vld [vmem:[#allocation25_spill] sm:$0xff]  ;;  %v11054_v37 = vld [vmem:[#allocation94_spill] sm:$0xff] }
 0x44c   : > { %v3559_v54 = vpop.f32.mrf.mxu0  ;;  %v3918_v16 = vpop.f32.mrf.mxu1 }
 0x44d   : > { %5478 = vst [vmem:[%s8990_s20 + $0x450] sm:$0xff] %v5282_v34  ;;  %v5283_v19 = vadd.f32 %v10058_v38, %v5065_v27  ;;  %v5068_v35 = vmul.f32 %v11044_v23, %v3913_v13  ;;  %v3915_v46 = vadd.f32 %v3914_v12, %v3556_v21  ;;  %v3560_v1 = vadd.f32 %v3559_v54, %v11045_v53  ;;  %v11055_v27 = vld [vmem:[#allocation96_spill] sm:$0xff] }
 0x44e   : > { %v3561_v61 = vpop.f32.mrf.mxu0  ;;  %v3920_v50 = vpop.f32.mrf.mxu1 }
 0x44f   : > { %5479 = vst [vmem:[%s8990_s20 + $0x458] sm:$0xff] %v5283_v19  ;;  %v5286_v3 = vadd.f32 %v10054_v32, %v5068_v35  ;;  %v5069_v28 = vmul.f32 %v11044_v23, %v3915_v46  ;;  %v3919_v48 = vadd.f32 %v3918_v16, %v3560_v1  ;;  %v3562_v40 = vadd.f32 %v3561_v61, %v11046_v14  ;;  %v11056_v16 = vld [vmem:[#allocation28_spill] sm:$0xff]  ;;  %v11057_v35 = vld [vmem:[#allocation98_spill] sm:$0xff] }
 0x450   : > { %v3565_v43 = vpop.f32.mrf.mxu0  ;;  %v3924_v33 = vpop.f32.mrf.mxu1 }
 0x451   : > { %5482 = vst [vmem:[%s8990_s20 + $0x470] sm:$0xff] %v5286_v3  ;;  %v5287_v44 = vadd.f32 %v10058_v38, %v5069_v28  ;;  %v5072_v63 = vmul.f32 %v11047_v52, %v3919_v48  ;;  %v3921_v42 = vadd.f32 %v3920_v50, %v3562_v40  ;;  %v3566_v25 = vadd.f32 %v3565_v43, %v11048_v60  ;;  %v11058_v28 = vld [vmem:[#allocation71_spill] sm:$0xff] }
 0x452   : > { %v3567_v18 = vpop.f32.mrf.mxu0  ;;  %v3926_v24 = vpop.f32.mrf.mxu1 }
 0x453   : > { %5483 = vst [vmem:[%s8990_s20 + $0x478] sm:$0xff] %v5287_v44  ;;  %v5290_v45 = vadd.f32 %v10054_v32, %v5072_v63  ;;  %v5073_v51 = vmul.f32 %v11047_v52, %v3921_v42  ;;  %v3925_v15 = vadd.f32 %v3924_v33, %v3566_v25  ;;  %v3568_v0 = vadd.f32 %v3567_v18, %v11049_v36  ;;  %v11059_v33 = vld [vmem:[#allocation30_spill] sm:$0xff]  ;;  %v11060_v63 = vld [vmem:[#allocation45_spill] sm:$0xff] }
 0x454   : > { %v3571_v8 = vpop.f32.mrf.mxu0  ;;  %v3930_v20 = vpop.f32.mrf.mxu1 }
 0x455   : > { %5486 = vst [vmem:[%s8990_s20 + $0x490] sm:$0xff] %v5290_v45  ;;  %v5291_v9 = vadd.f32 %v10058_v38, %v5073_v51  ;;  %v5076_v58 = vmul.f32 %v11050_v4, %v3925_v15  ;;  %v3927_v47 = vadd.f32 %v3926_v24, %v3568_v0  ;;  %v3572_v29 = vadd.f32 %v3571_v8, %v11051_v62  ;;  %v11061_v51 = vld [vmem:[#allocation73_spill] sm:$0xff] }
 0x456   : > { %v3573_v11 = vpop.f32.mrf.mxu0  ;;  %v3932_v17 = vpop.f32.mrf.mxu1 }
 0x457   : > { %5487 = vst [vmem:[%s8990_s20 + $0x498] sm:$0xff] %v5291_v9  ;;  %v5294_v55 = vadd.f32 %v10054_v32, %v5076_v58  ;;  %v5077_v41 = vmul.f32 %v11050_v4, %v3927_v47  ;;  %v3931_v7 = vadd.f32 %v3930_v20, %v3572_v29  ;;  %v3574_v30 = vadd.f32 %v3573_v11, %v11052_v6  ;;  %v11062_v20 = vld [vmem:[#allocation31_spill] sm:$0xff]  ;;  %v11063_v58 = vld [vmem:[#allocation101_spill] sm:$0xff] }
 0x458   : > { %v3577_v26 = vpop.f32.mrf.mxu0  ;;  %v3936_v31 = vpop.f32.mrf.mxu1 }
 0x459   : > { %5490 = vst [vmem:[%s8990_s20 + $0x4b0] sm:$0xff] %v5294_v55  ;;  %v5295_v5 = vadd.f32 %v10058_v38, %v5077_v41  ;;  %v5080_v10 = vmul.f32 %v11053_v57, %v3931_v7  ;;  %v3933_v39 = vadd.f32 %v3932_v17, %v3574_v30  ;;  %v3578_v49 = vadd.f32 %v3577_v26, %v11054_v37  ;;  %v11064_v41 = vld [vmem:[#allocation48_spill] sm:$0xff] }
 0x45a   : > { %v3579_v59 = vpop.f32.mrf.mxu0  ;;  %v3938_v56 = vpop.f32.mrf.mxu1 }
 0x45b   : > { %5491 = vst [vmem:[%s8990_s20 + $0x4b8] sm:$0xff] %v5295_v5  ;;  %v5298_v22 = vadd.f32 %v10054_v32, %v5080_v10  ;;  %v5081_v12 = vmul.f32 %v11053_v57, %v3933_v39  ;;  %v3937_v34 = vadd.f32 %v3936_v31, %v3578_v49  ;;  %v3580_v13 = vadd.f32 %v3579_v59, %v11055_v27  ;;  %v11065_v31 = vld [vmem:[#allocation32_spill] sm:$0xff]  ;;  %v11066_v10 = vld [vmem:[#allocation50_spill] sm:$0xff] }
 0x45c   : > { %v3583_v2 = vpop.f32.mrf.mxu0  ;;  %v3942_v21 = vpop.f32.mrf.mxu1 }
 0x45d   : > { %5494 = vst [vmem:[%s8990_s20 + $0x4d0] sm:$0xff] %v5298_v22  ;;  %v5299_v54 = vadd.f32 %v10058_v38, %v5081_v12  ;;  %v5084_v19 = vmul.f32 %v11056_v16, %v3937_v34  ;;  %v3939_v23 = vadd.f32 %v3938_v56, %v3580_v13  ;;  %v3584_v46 = vadd.f32 %v3583_v2, %v11057_v35  ;;  %v11067_v12 = vld [vmem:[#allocation103_spill] sm:$0xff] }
 0x45e   : > { %v3585_v53 = vpop.f32.mrf.mxu0  ;;  %v3944_v1 = vpop.f32.mrf.mxu1 }
 0x45f   : > { %5495 = vst [vmem:[%s8990_s20 + $0x4d8] sm:$0xff] %v5299_v54  ;;  %v5302_v61 = vadd.f32 %v10054_v32, %v5084_v19  ;;  %v5085_v50 = vmul.f32 %v11056_v16, %v3939_v23  ;;  %v3943_v3 = vadd.f32 %v3942_v21, %v3584_v46  ;;  %v3586_v48 = vadd.f32 %v3585_v53, %v11058_v28  ;;  %v11068_v21 = vld [vmem:[#allocation33_spill] sm:$0xff]  ;;  %v11069_v19 = vld [vmem:[#allocation58_spill] sm:$0xff] }
 0x460   : > { %v3589_v14 = vpop.f32.mrf.mxu0  ;;  %v3948_v40 = vpop.f32.mrf.mxu1 }
 0x461   : > { %5498 = vst [vmem:[%s8990_s20 + $0x4f0] sm:$0xff] %v5302_v61  ;;  %v5303_v43 = vadd.f32 %v10058_v38, %v5085_v50  ;;  %v5088_v44 = vmul.f32 %v11059_v33, %v3943_v3  ;;  %v3945_v52 = vadd.f32 %v3944_v1, %v3586_v48  ;;  %v3590_v42 = vadd.f32 %v3589_v14, %v11060_v63  ;;  %v11070_v50 = vld [vmem:[#allocation80_spill] sm:$0xff] }
 0x462   : > { %v3591_v60 = vpop.f32.mrf.mxu0  ;;  %v3950_v25 = vpop.f32.mrf.mxu1 }
 0x463   : > { %5499 = vst [vmem:[%s8990_s20 + $0x4f8] sm:$0xff] %v5303_v43  ;;  %v5306_v18 = vadd.f32 %v10054_v32, %v5088_v44  ;;  %v5089_v24 = vmul.f32 %v11059_v33, %v3945_v52  ;;  %v3949_v45 = vadd.f32 %v3948_v40, %v3590_v42  ;;  %v3592_v15 = vadd.f32 %v3591_v60, %v11061_v51  ;;  %v11071_v40 = vld [vmem:[#allocation34_spill] sm:$0xff]  ;;  %v11072_v44 = vld [vmem:[#allocation105_spill] sm:$0xff] }
 0x464   : > { %v3595_v36 = vpop.f32.mrf.mxu0  ;;  %v3954_v0 = vpop.f32.mrf.mxu1 }
 0x465   : > { %5502 = vst [vmem:[%s8990_s20 + $0x510] sm:$0xff] %v5306_v18  ;;  %v5307_v8 = vadd.f32 %v10058_v38, %v5089_v24  ;;  %v5092_v9 = vmul.f32 %v11062_v20, %v3949_v45  ;;  %v3951_v4 = vadd.f32 %v3950_v25, %v3592_v15  ;;  %v3596_v47 = vadd.f32 %v3595_v36, %v11063_v58  ;;  %v11073_v24 = vld [vmem:[#allocation106_spill] sm:$0xff] }
 0x466   : > { %v3597_v62 = vpop.f32.mrf.mxu0  ;;  %v3956_v29 = vpop.f32.mrf.mxu1 }
 0x467   : > { %5503 = vst [vmem:[%s8990_s20 + $0x518] sm:$0xff] %v5307_v8  ;;  %v5310_v11 = vadd.f32 %v10054_v32, %v5092_v9  ;;  %v5093_v17 = vmul.f32 %v11062_v20, %v3951_v4  ;;  %v3955_v55 = vadd.f32 %v3954_v0, %v3596_v47  ;;  %v3598_v7 = vadd.f32 %v3597_v62, %v11064_v41  ;;  %v11074_v0 = vld [vmem:[#allocation35_spill] sm:$0xff] }
 0x468   : > { %v3601_v6 = vpop.f32.mrf.mxu0  ;;  %v3960_v30 = vpop.f32.mrf.mxu1  ;;  %v11075_v9 = vld [vmem:[#allocation107_spill] sm:$0xff] }
 0x469   : > { %5506 = vst [vmem:[%s8990_s20 + $0x530] sm:$0xff] %v5310_v11  ;;  %v5311_v26 = vadd.f32 %v10058_v38, %v5093_v17  ;;  %v5096_v5 = vmul.f32 %v11065_v31, %v3955_v55  ;;  %v3957_v57 = vadd.f32 %v3956_v29, %v3598_v7  ;;  %v3602_v39 = vadd.f32 %v3601_v6, %v11066_v10  ;;  %v11076_v17 = vld [vmem:[#allocation108_spill] sm:$0xff] }
 0x46a   : > { %v3603_v37 = vpop.f32.mrf.mxu0  ;;  %v3962_v49 = vpop.f32.mrf.mxu1 }
 0x46b   : > { %5507 = vst [vmem:[%s8990_s20 + $0x538] sm:$0xff] %v5311_v26  ;;  %v5314_v59 = vadd.f32 %v10054_v32, %v5096_v5  ;;  %v5097_v56 = vmul.f32 %v11065_v31, %v3957_v57  ;;  %v3961_v22 = vadd.f32 %v3960_v30, %v3602_v39  ;;  %v3604_v34 = vadd.f32 %v3603_v37, %v11067_v12  ;;  %v11077_v30 = vld [vmem:[#allocation36_spill] sm:$0xff]  ;;  %v11078_v5 = vld [vmem:[#allocation109_spill] sm:$0xff] }
 0x46c   : > { %v3607_v27 = vpop.f32.mrf.mxu0  ;;  %v3966_v13 = vpop.f32.mrf.mxu1 }
 0x46d   : > { %5510 = vst [vmem:[%s8990_s20 + $0x550] sm:$0xff] %v5314_v59  ;;  %v5315_v2 = vadd.f32 %v10058_v38, %v5097_v56  ;;  %v5100_v54 = vmul.f32 %v11068_v21, %v3961_v22  ;;  %v3963_v16 = vadd.f32 %v3962_v49, %v3604_v34  ;;  %v3608_v23 = vadd.f32 %v3607_v27, %v11069_v19  ;;  %v11079_v56 = vld [vmem:[#allocation110_spill] sm:$0xff] }
 0x46e   : > { %v3609_v35 = vpop.f32.mrf.mxu0  ;;  %v3968_v46 = vpop.f32.mrf.mxu1 }
 0x46f   : > { %5511 = vst [vmem:[%s8990_s20 + $0x558] sm:$0xff] %v5315_v2  ;;  %v5318_v53 = vadd.f32 %v10054_v32, %v5100_v54  ;;  %v5101_v1 = vmul.f32 %v11068_v21, %v3963_v16  ;;  %v3967_v61 = vadd.f32 %v3966_v13, %v3608_v23  ;;  %v3610_v3 = vadd.f32 %v3609_v35, %v11070_v50  ;;  %v11080_v13 = vld [vmem:[#allocation38_spill] sm:$0xff]  ;;  %v11081_v54 = vld [vmem:[#allocation111_spill] sm:$0xff] }
 0x470   : > { %v3613_v28 = vpop.f32.mrf.mxu0  ;;  %v3972_v48 = vpop.f32.mrf.mxu1 }
 0x471   : > { %5514 = vst [vmem:[%s8990_s20 + $0x570] sm:$0xff] %v5318_v53  ;;  %v5319_v14 = vadd.f32 %v10058_v38, %v5101_v1  ;;  %v5104_v43 = vmul.f32 %v11071_v40, %v3967_v61  ;;  %v3969_v33 = vadd.f32 %v3968_v46, %v3610_v3  ;;  %v3614_v52 = vadd.f32 %v3613_v28, %v11072_v44  ;;  %v11082_v53 = vld [vmem:[#allocation112_spill] sm:$0xff]  ;;  %v11083_v3 = vld [vmem:[#allocation39_spill] sm:$0xff] }
 0x472   : > { %v3615_v63 = vpop.f32.mrf.mxu0  ;;  %v3974_v42 = vpop.f32.mrf.mxu1 }
 0x473   : > { %5515 = vst [vmem:[%s8990_s20 + $0x578] sm:$0xff] %v5319_v14  ;;  %v5322_v60 = vadd.f32 %v10054_v32, %v5104_v43  ;;  %v5105_v25 = vmul.f32 %v11071_v40, %v3969_v33  ;;  %v3973_v18 = vadd.f32 %v3972_v48, %v3614_v52  ;;  %v3616_v45 = vadd.f32 %v3615_v63, %v11073_v24 }
 0x474   : > { %v3619_v51 = vpop.f32.mrf.mxu0  ;;  %v3978_v15 = vpop.f32.mrf.mxu1 }
 0x475   : > { %5518 = vst [vmem:[%s8990_s20 + $0x590] sm:$0xff] %v5322_v60  ;;  %v5323_v36 = vadd.f32 %v10058_v38, %v5105_v25  ;;  %v5108_v8 = vmul.f32 %v11074_v0, %v3973_v18  ;;  %v3975_v20 = vadd.f32 %v3974_v42, %v3616_v45  ;;  %v3620_v4 = vadd.f32 %v3619_v51, %v11075_v9 }
 0x476   : > { %v3621_v58 = vpop.f32.mrf.mxu0  ;;  %v3980_v47 = vpop.f32.mrf.mxu1 }
 0x477   : > { %5519 = vst [vmem:[%s8990_s20 + $0x598] sm:$0xff] %v5323_v36  ;;  %v5326_v62 = vadd.f32 %v10054_v32, %v5108_v8  ;;  %v5109_v29 = vmul.f32 %v11074_v0, %v3975_v20  ;;  %v3979_v11 = vadd.f32 %v3978_v15, %v3620_v4  ;;  %v3622_v55 = vadd.f32 %v3621_v58, %v11076_v17 }
 0x478   : > { %v3625_v41 = vpop.f32.mrf.mxu0  ;;  %v3984_v7 = vpop.f32.mrf.mxu1 }
 0x479   : > { %5522 = vst [vmem:[%s8990_s20 + $0x5b0] sm:$0xff] %v5326_v62  ;;  %v5327_v6 = vadd.f32 %v10058_v38, %v5109_v29  ;;  %v5112_v26 = vmul.f32 %v11077_v30, %v3979_v11  ;;  %v3981_v31 = vadd.f32 %v3980_v47, %v3622_v55  ;;  %v3626_v57 = vadd.f32 %v3625_v41, %v11078_v5 }
 0x47a   : > { %v3627_v10 = vpop.f32.mrf.mxu0  ;;  %v3986_v39 = vpop.f32.mrf.mxu1 }
 0x47b   : > { %5523 = vst [vmem:[%s8990_s20 + $0x5b8] sm:$0xff] %v5327_v6  ;;  %v5330_v37 = vadd.f32 %v10054_v32, %v5112_v26  ;;  %v5113_v49 = vmul.f32 %v11077_v30, %v3981_v31  ;;  %v3985_v59 = vadd.f32 %v3984_v7, %v3626_v57  ;;  %v3628_v22 = vadd.f32 %v3627_v10, %v11079_v56 }
 0x47c   : > { %v3631_v12 = vpop.f32.mrf.mxu0  ;;  %v3990_v34 = vpop.f32.mrf.mxu1 }
 0x47d   : > { %5526 = vst [vmem:[%s8990_s20 + $0x5d0] sm:$0xff] %v5330_v37  ;;  %v5331_v27 = vadd.f32 %v10058_v38, %v5113_v49  ;;  %v5116_v2 = vmul.f32 %v11080_v13, %v3985_v59  ;;  %v3987_v21 = vadd.f32 %v3986_v39, %v3628_v22  ;;  %v3632_v16 = vadd.f32 %v3631_v12, %v11081_v54 }
 0x47e   : > { %v3633_v19 = vpop.f32.mrf.mxu0  ;;  %v3992_v61 = vpop.f32.mrf.mxu1 }
 0x47f   : > { %5527 = vst [vmem:[%s8990_s20 + $0x5d8] sm:$0xff] %v5331_v27  ;;  %v5334_v23 = vadd.f32 %v10054_v32, %v5116_v2  ;;  %v5117_v35 = vmul.f32 %v11080_v13, %v3987_v21  ;;  %v3991_v46 = vadd.f32 %v3990_v34, %v3632_v16  ;;  %v3634_v1 = vadd.f32 %v3633_v19, %v11082_v53 }
 0x481   : > { %5530 = vst [vmem:[%s8990_s20 + $0x5f0] sm:$0xff] %v5334_v23  ;;  %v5335_v50 = vadd.f32 %v10058_v38, %v5117_v35  ;;  %v5120_v28 = vmul.f32 %v11083_v3, %v3991_v46  ;;  %v3993_v48 = vadd.f32 %v3992_v61, %v3634_v1 }
 0x483   : > { %5531 = vst [vmem:[%s8990_s20 + $0x5f8] sm:$0xff] %v5335_v50  ;;  %v5338_v14 = vadd.f32 %v10054_v32, %v5120_v28  ;;  %v5121_v40 = vmul.f32 %v11083_v3, %v3993_v48 }
 0x485   : > { %5534 = vst [vmem:[%s8990_s20 + $0x610] sm:$0xff] %v5338_v14  ;;  %v5339_v43 = vadd.f32 %v10058_v38, %v5121_v40 }
 0x487   : > { %5535 = vst [vmem:[%s8990_s20 + $0x618] sm:$0xff] %v5339_v43 }
 0x488   : > { %6512 = shalt.err (!%p6509_p9)
}
 0x489   : > { %s6513_s24 = scalar_lea.hbm %s10451_s8, 25088  ;;  %s6517_s4 = scalar_lea.hbm %s10502_s3, 50176 }
 0x48a   : > { %p6514_p13 = scmp.ne.s32.totalorder %s10451_s8, %s6513_s24  ;;  %p6518_p4 = scmp.lt.s32.totalorder %s10451_s8, %s10502_s3 }
 0x48b   : > { %p6519_p8 = scmp.lt.s32.totalorder %s6517_s4, %s6513_s24 }
 0x48c   : > { %p6515_p5 = pnand %p6514_p13, %p11084_p10 }
 0x48d   : > { %p6520_p3 = por %p6519_p8, %p6518_p4 }
 0x48e   : > { %p6516_p0 = pneg %p6515_p5 }
 0x490   : > { %p6521_p11 = pnand %p6520_p3, %p6516_p0 }
 0x492   : > { %6524 = shalt.err (!%p6521_p11)
}
 0x493   : > { %s6577_s18 = smov 512   ;;  %s6578_s20 = smov 32  }
 0x494   : > { %5676 = dma.vmem_to_hbm [thread:$0]  (%p11084_p10), %s10453_s26, 25088, %s10451_s8, %s5537_s16, %s6577_s18, %s6577_s18, %s6578_s20  }
 0x495 PF: > { %s5566_s23 = sand.u32 1, %s6555_s12   ;;  %p11085_p1 = scmp.ne.s32.totalorder %s10626_s19, 0 }
 0x496   : > { %p11086_p2 = scmp.ge.s32.totalorder %s6567_s15, 2  ;;  %s5567_s28 = scalar_lea.sflag [#allocation4], %s5566_s23 }
 0x498   : > { %p5690_p6 = pnand %p11086_p2, %p11085_p1 }
 0x49a   : > { %p5691_p12 = pneg %p5690_p6 }
 0x49c   : > { %6550 = dma.done.wait (%p5691_p12), %s5567_s28, 25088  }
 0x49d   : > { %6552 = vsyncadd (%p5691_p12), %s5567_s28, 4294942208  ;;  %p17_p7 = scmp.ge.s32.totalorder %s6671_s7, 4   ;;  %s11087_s12 = smov %s6559_s13 }
 0x49e   : > { %s11088_s13 = smov %s6563_s14  ;;  %s11089_s14 = smov %s6687_s11 }
 0x49f   : > { %s11090_s15 = smov %s6671_s7  ;;  %19 = sbr.rel (!%p17_p7) target bundleno = 6 (0x6), region = 85 }
 0x4a4   :  { %5572 = vsyncpa [#allocation3], 1 }
 0x4a5   :  { %5574 = vsyncpa [#allocation3 + $0x1], 1 }
 0x4a6   :  { %5575 = vsyncpa [#allocation6], 1 }
 0x4a7   :  { %5576 = vsyncpa [#allocation4], 1 }
 0x4a8   :  { %5578 = vsyncpa [#allocation4 + $0x1], 1 }

</bundles_post_ra>
